<compile_context>
chip_gen: v6e
topology: v6e:2x2x1
jax: 0.10.0
libtpu: 0.0.40
codegen_flags: <defaults>
</compile_context>

<pallas_src>
import functools

import numpy as np
import jax
import jax.numpy as jnp
from jax.experimental import pallas as pl
from jax.experimental.pallas import tpu as pltpu


# Module configuration from the PyTorch W_Module.
STAGE_DIMS = [(1, 4), (4, 4), (4, 4), (4, 4)]   # (c_in, c_out) per stage
STAGE_STRIDES = [1, 2, 2, 2]
LN_EPS = 1e-5


# ---------------------------------------------------------------------------
# Fused 4-stage kernel (single invocation, no grid).
# ---------------------------------------------------------------------------
def _stage_cfgs():
    """Per stage: (c_in, c_out, input dilation, stride, output dilation)."""
    cfgs, d = [], 1
    for (cin, cout), s in zip(STAGE_DIMS, STAGE_STRIDES):
        cfgs.append((cin, cout, d, s, d * s))
        d *= s
    return cfgs


def _make_fused_kernel(batch, num_points, seq_len):
    n, T = num_points, seq_len
    L = n * T                       # flattened (n, t) lane axis
    cfgs = _stage_cfgs()

    def kernel(*refs):
        # refs layout: x0, then per stage (w, b, gamma, beta), then 4 outputs.
        x0_ref = refs[0]
        stage_refs = [refs[1 + 4 * i: 1 + 4 * (i + 1)] for i in range(4)]
        out_refs = refs[1 + 4 * 4:]

        lane = jax.lax.broadcasted_iota(jnp.int32, (1, L), 1)
        t0 = lane % T               # time index within each n-block of T lanes

        # Direction probe for pltpu.roll so the shift convention can't bite us:
        # fwd == True  <=>  roll(x, s)[p] == x[p - s]  (np.roll convention).
        probe = pltpu.roll(lane, 1, 1)
        fwd = probe[:, 1:2] == 0    # (1, 1) bool

        # Current stage input: list of per-channel (batch, L) f32 slabs.
        x = [x0_ref[...].astype(jnp.float32)]

        for i, (cin, cout, d_in, stride, d_out) in enumerate(cfgs):
            w_ref, b_ref, g_ref, be_ref = stage_refs[i]

            left_ok = t0 >= d_in                    # left neighbour exists (else pad=0)
            right_ok = t0 < (T - d_in)              # right neighbour exists
            valid = (t0 % d_out) == 0               # lanes carrying real outputs

            # In-kernel im2col: neighbour taps via lane rotation (XLU, ~free).
            left, right = [], []
            for ci in range(cin):
                r_p = pltpu.roll(x[ci], d_in, 1)
                r_m = pltpu.roll(x[ci], L - d_in, 1)
                x_l = jnp.where(fwd, r_p, r_m)      # x[p - d_in]
                x_r = jnp.where(fwd, r_m, r_p)      # x[p + d_in]
                left.append(jnp.where(left_ok, x_l, 0.0))
                right.append(jnp.where(right_ok, x_r, 0.0))
            taps = [left, x, right]                 # k = 0,1,2 (conv kernel taps)

            # Both convs stacked: rows [0, cout) -> sigmoid branch,
            #                     rows [cout, 2*cout) -> tanh branch.
            # VPU contraction: scalar (SMEM) weight * (batch, L) vector MACs.
            ys = []
            for o in range(2 * cout):
                acc = jnp.zeros((batch, L), jnp.float32) + b_ref[o]
                for ci in range(cin):
                    base = (o * cin + ci) * 3
                    for k in range(3):
                        acc = acc + w_ref[base + k] * taps[k][ci]
                ys.append(acc)

            gs = [jax.nn.sigmoid(ys[o]) * jnp.tanh(ys[o + cout])
                  for o in range(cout)]

            # LayerNorm over (c_out, n, t_out) per batch element, one-pass stats.
            n_valid = float(cout * n * (T // d_out))
            s1 = jnp.zeros((batch, 1), jnp.float32)
            s2 = jnp.zeros((batch, 1), jnp.float32)
            for g in gs:
                gm = jnp.where(valid, g, 0.0)       # ignore dilation "holes"
                s1 = s1 + jnp.sum(gm, axis=1, keepdims=True)
                s2 = s2 + jnp.sum(gm * gm, axis=1, keepdims=True)
            mean = s1 / n_valid
            var = s2 / n_valid - mean * mean
            inv = jax.lax.rsqrt(var + LN_EPS)

            gamma = g_ref[...]                      # (cout, L), pre-spread, 0 at holes
            beta = be_ref[...]
            outs = []
            for o in range(cout):
                y = (gs[o] - mean) * inv * gamma[o:o + 1, :] + beta[o:o + 1, :]
                out_refs[i][o, :, :] = y.astype(out_refs[i].dtype)
                outs.append(y)
            x = outs                                # next stage input (VMEM-resident)

    return kernel, cfgs


# ---------------------------------------------------------------------------
# Wrapper: parameter packing, lane-dense layout plumbing, pallas_call.
# ---------------------------------------------------------------------------
def _prep_stage_params(stage_params, num_points, seq_len):
    """Flatten conv weights/biases and dilation-spread gamma/beta (wrapper side)."""
    n, T = num_points, seq_len
    prepped, d = [], 1
    for (w1, b1, w2, b2, gamma, beta), s in zip(stage_params, STAGE_STRIDES):
        cout, cin = w1.shape[0], w1.shape[1]
        d_out = d * s
        t_out = (T // d - 1) // s + 1               # conv output length
        assert gamma.shape == (cout, n, t_out)

        w = jnp.concatenate([w1.reshape(cout, cin, 3),
                             w2.reshape(cout, cin, 3)], axis=0).reshape(-1)
        b = jnp.concatenate([b1, b2], axis=0)

        def spread(p):  # place t_out values on the dilated T-lane grid (0 elsewhere)
            buf = jnp.zeros((cout, n, T), jnp.float32)
            buf = buf.at[:, :, ::d_out].set(p.astype(jnp.float32))
            return buf.reshape(cout, n * T)

        prepped.append((w.astype(jnp.float32), b.astype(jnp.float32),
                        spread(gamma), spread(beta)))
        d = d_out
    return prepped


def w_module_forward(x, stage_params):
    """x: (b, t, n, 1) -> (need_concat list, final out), matching W_Module.forward."""
    b, T, n, c0 = x.shape
    assert c0 == 1 and T % 8 == 0, "fused kernel assumes c_in=1 and seq_length % 8 == 0"
    L = n * T

    # (b, t, n, 1) -> (b, n, t) -> lane-dense (b, n*T)
    x0 = jnp.transpose(x[..., 0], (0, 2, 1)).reshape(b, L)

    kernel, cfgs = _make_fused_kernel(b, n, T)
    prepped = _prep_stage_params(stage_params, n, T)

    flat_inputs = [x0]
    in_specs = [pl.BlockSpec(memory_space=pltpu.MemorySpace.VMEM)]
    for (w, bb, g, be) in prepped:
        flat_inputs += [w, bb, g, be]
        in_specs += [
            pl.BlockSpec(memory_space=pltpu.MemorySpace.SMEM),   # flat conv weights
            pl.BlockSpec(memory_space=pltpu.MemorySpace.SMEM),   # flat conv biases
            pl.BlockSpec(memory_space=pltpu.MemorySpace.VMEM),   # spread gamma
            pl.BlockSpec(memory_space=pltpu.MemorySpace.VMEM),   # spread beta
        ]

    out_shapes = tuple(jax.ShapeDtypeStruct((cfg[1], b, L), jnp.float32)
                       for cfg in cfgs)
    out_specs = tuple(pl.BlockSpec(memory_space=pltpu.MemorySpace.VMEM)
                      for _ in cfgs)

    outs = pl.pallas_call(
        kernel,
        out_shape=out_shapes,
        in_specs=in_specs,
        out_specs=out_specs,
    )(*flat_inputs)

    # Wrapper-side layout plumbing: compact the dilated time axis, restore (b,c,n,t).
    need_concat = []
    for (cin, cout, d_in, s, d_out), o in zip(cfgs, outs):
        o = o.reshape(cout, b, n, T)[:, :, :, ::d_out]          # (c, b, n, t_stage)
        need_concat.append(jnp.transpose(o, (1, 0, 2, 3)))      # (b, c, n, t_stage)
    return need_concat, need_concat[-1]


# ---------------------------------------------------------------------------
# Pure-JAX (XLA) reference of the PyTorch module, for validation.
# ---------------------------------------------------------------------------
def reference_forward(x, stage_params):
    out = jnp.transpose(x, (0, 3, 2, 1))            # (b, c, n, t)
    need_concat = []
    for (w1, b1, w2, b2, gamma, beta), s in zip(stage_params, STAGE_STRIDES):
        def conv(v, w, bb):
            y = jax.lax.conv_general_dilated(
                v, w, window_strides=(1, s), padding=((0, 0), (1, 1)),
                dimension_numbers=("NCHW", "OIHW", "NCHW"))
            return y + bb.reshape(1, -1, 1, 1)
        g = jax.nn.sigmoid(conv(out, w1, b1)) * jnp.tanh(conv(out, w2, b2))
        mean = jnp.mean(g, axis=(1, 2, 3), keepdims=True)
        var = jnp.mean((g - mean) ** 2, axis=(1, 2, 3), keepdims=True)
        out = (g - mean) / jnp.sqrt(var + LN_EPS) * gamma[None] + beta[None]
        need_concat.append(out)
    return need_concat, out


# ---------------------------------------------------------------------------
# Parameter init (shapes match nn.Conv2d / nn.LayerNorm; conv-formula seq dims).
# ---------------------------------------------------------------------------
def init_w_block(key, in_dim, out_dim, num_points, seq_len):
    k1, k2, k3, k4 = jax.random.split(key, 4)
    bound = 1.0 / float(np.sqrt(in_dim * 3))
    w1 = jax.random.uniform(k1, (out_dim, in_dim, 1, 3), jnp.float32, -bound, bound)
    b1 = jax.random.uniform(k2, (out_dim,), jnp.float32, -bound, bound)
    w2 = jax.random.uniform(k3, (out_dim, in_dim, 1, 3), jnp.float32, -bound, bound)
    b2 = jax.random.uniform(k4, (out_dim,), jnp.float32, -bound, bound)
    gamma = jnp.ones((out_dim, num_points, seq_len), jnp.float32)
    beta = jnp.zeros((out_dim, num_points, seq_len), jnp.float32)
    return (w1, b1, w2, b2, gamma, beta)


def init_w_module(key, num_points, seq_length):
    params, l = [], seq_length
    for (in_d, out_d), s in zip(STAGE_DIMS, STAGE_STRIDES):
        l_out = (l - 1) // s + 1                    # conv formula (k=3, pad=1, stride=s)
        key, sub = jax.random.split(key)
        params.append(init_w_block(sub, in_d, out_d, num_points, l_out))
        l = l_out
    return params


if __name__ == "__main__":
    # Small shapes consistent with the module: batch=2, seq=16, points=8, c_in=1.
    batch, seq_length, num_points, in_ch = 2, 16, 8, 1

    key = jax.random.PRNGKey(0)
    pkey, xkey = jax.random.split(key)
    stage_params = init_w_module(pkey, num_points, seq_length)

    # PyTorch forward input convention: (b, t, n, c)
    x = jax.random.normal(xkey, (batch, seq_length, num_points, in_ch), jnp.float32)

    fwd = jax.jit(functools.partial(w_module_forward, stage_params=stage_params))
    need_concat, out = fwd(x)
    jax.block_until_ready(out)

    # Shape checks.
    assert out.shape == (batch, 4, num_points, seq_length // 8), out.shape
    assert [tuple(o.shape) for o in need_concat] == [
        (batch, 4, num_points, t) for t in (16, 8, 4, 2)]

    # Numerical check against a pure-JAX reference of the PyTorch module.
    ref_concat, _ = jax.jit(functools.partial(reference_forward,
                                              stage_params=stage_params))(x)
    for got, want in zip(need_concat, ref_concat):
        np.testing.assert_allclose(np.asarray(got), np.asarray(want),
                                   rtol=1e-3, atol=1e-3)

    print("KERNEL_OK")
</pallas_src>

<mosaic_0001>
module attributes {stable_mosaic.version = 11 : i64} {
  func.func @kernel(%arg0: memref<2x128xf32, #tpu.memory_space<vmem>>, %arg1: memref<24xf32, #tpu.memory_space<smem>>, %arg2: memref<8xf32, #tpu.memory_space<smem>>, %arg3: memref<4x128xf32, #tpu.memory_space<vmem>>, %arg4: memref<4x128xf32, #tpu.memory_space<vmem>>, %arg5: memref<96xf32, #tpu.memory_space<smem>>, %arg6: memref<8xf32, #tpu.memory_space<smem>>, %arg7: memref<4x128xf32, #tpu.memory_space<vmem>>, %arg8: memref<4x128xf32, #tpu.memory_space<vmem>>, %arg9: memref<96xf32, #tpu.memory_space<smem>>, %arg10: memref<8xf32, #tpu.memory_space<smem>>, %arg11: memref<4x128xf32, #tpu.memory_space<vmem>>, %arg12: memref<4x128xf32, #tpu.memory_space<vmem>>, %arg13: memref<96xf32, #tpu.memory_space<smem>>, %arg14: memref<8xf32, #tpu.memory_space<smem>>, %arg15: memref<4x128xf32, #tpu.memory_space<vmem>>, %arg16: memref<4x128xf32, #tpu.memory_space<vmem>>, %arg17: memref<4x2x128xf32, #tpu.memory_space<vmem>>, %arg18: memref<4x2x128xf32, #tpu.memory_space<vmem>>, %arg19: memref<4x2x128xf32, #tpu.memory_space<vmem>>, %arg20: memref<4x2x128xf32, #tpu.memory_space<vmem>>) attributes {dimension_semantics = [], scalar_prefetch = 0 : i64, scratch_operands = 0 : i64, tpu.core_type = #tpu.core_type<tc>} {
    %0 = tpu.iota {dimensions = array<i32: 1>} : vector<1x128xi32>
    %c16_i32 = arith.constant 16 : i32
    %c0_i32 = arith.constant 0 : i32
    %1 = arith.cmpi eq, %c16_i32, %c0_i32 : i32
    %c1_i32 = arith.constant 1 : i32
    %2 = arith.select %1, %c1_i32, %c16_i32 : i32
    %3 = vector.broadcast %2 : i32 to vector<1x128xi32>
    %4 = arith.remsi %0, %3 : vector<1x128xi32>
    %c0_i32_0 = arith.constant 0 : i32
    %5 = vector.broadcast %c0_i32_0 : i32 to vector<1x128xi32>
    %6 = arith.cmpi ne, %4, %5 : vector<1x128xi32>
    %c0_i32_1 = arith.constant 0 : i32
    %7 = vector.broadcast %c0_i32_1 : i32 to vector<1x128xi32>
    %8 = arith.cmpi slt, %4, %7 : vector<1x128xi32>
    %c0_i32_2 = arith.constant 0 : i32
    %9 = arith.cmpi slt, %2, %c0_i32_2 : i32
    %10 = vector.broadcast %9 : i1 to vector<1x128xi1>
    %11 = vector.broadcast %10 : vector<1x128xi1> to vector<1x128xi1>
    %12 = arith.xori %8, %11 : vector<1x128xi1>
    %13 = arith.andi %12, %6 : vector<1x128xi1>
    %14 = vector.broadcast %2 : i32 to vector<1x128xi32>
    %15 = arith.addi %4, %14 : vector<1x128xi32>
    %16 = arith.select %13, %15, %4 : vector<1x128xi1>, vector<1x128xi32>
    %c1_i32_3 = arith.constant 1 : i32
    %17 = tpu.dynamic_rotate %0 by %c1_i32_3 dim 1 : vector<1x128xi32>, i32 -> vector<1x128xi32>
    %18 = vector.extract_strided_slice %17 {offsets = [0, 1], sizes = [1, 1], strides = [1, 1]} : vector<1x128xi32> to vector<1x1xi32>
    %c0_i32_4 = arith.constant 0 : i32
    %19 = vector.broadcast %c0_i32_4 : i32 to vector<1x1xi32>
    %20 = arith.cmpi eq, %18, %19 : vector<1x1xi32>
    %c0 = arith.constant 0 : index
    %c0_5 = arith.constant 0 : index
    %21 = vector.load %arg0[%c0, %c0_5] : memref<2x128xf32, #tpu.memory_space<vmem>>, vector<2x128xf32>
    %c1_i32_6 = arith.constant 1 : i32
    %22 = vector.broadcast %c1_i32_6 : i32 to vector<1x128xi32>
    %23 = arith.cmpi sge, %16, %22 : vector<1x128xi32>
    %c15_i32 = arith.constant 15 : i32
    %24 = vector.broadcast %c15_i32 : i32 to vector<1x128xi32>
    %25 = arith.cmpi slt, %16, %24 : vector<1x128xi32>
    %c1_i32_7 = arith.constant 1 : i32
    %c0_i32_8 = arith.constant 0 : i32
    %26 = arith.cmpi eq, %c1_i32_7, %c0_i32_8 : i32
    %c1_i32_9 = arith.constant 1 : i32
    %27 = arith.select %26, %c1_i32_9, %c1_i32_7 : i32
    %28 = vector.broadcast %27 : i32 to vector<1x128xi32>
    %29 = arith.remsi %16, %28 : vector<1x128xi32>
    %c0_i32_10 = arith.constant 0 : i32
    %30 = vector.broadcast %c0_i32_10 : i32 to vector<1x128xi32>
    %31 = arith.cmpi ne, %29, %30 : vector<1x128xi32>
    %c0_i32_11 = arith.constant 0 : i32
    %32 = vector.broadcast %c0_i32_11 : i32 to vector<1x128xi32>
    %33 = arith.cmpi slt, %29, %32 : vector<1x128xi32>
    %c0_i32_12 = arith.constant 0 : i32
    %34 = arith.cmpi slt, %27, %c0_i32_12 : i32
    %35 = vector.broadcast %34 : i1 to vector<1x128xi1>
    %36 = vector.broadcast %35 : vector<1x128xi1> to vector<1x128xi1>
    %37 = arith.xori %33, %36 : vector<1x128xi1>
    %38 = arith.andi %37, %31 : vector<1x128xi1>
    %39 = vector.broadcast %27 : i32 to vector<1x128xi32>
    %40 = arith.addi %29, %39 : vector<1x128xi32>
    %41 = arith.select %38, %40, %29 : vector<1x128xi1>, vector<1x128xi32>
    %c0_i32_13 = arith.constant 0 : i32
    %42 = vector.broadcast %c0_i32_13 : i32 to vector<1x128xi32>
    %43 = arith.cmpi eq, %41, %42 : vector<1x128xi32>
    %c1_i32_14 = arith.constant 1 : i32
    %44 = tpu.dynamic_rotate %21 by %c1_i32_14 dim 1 : vector<2x128xf32>, i32 -> vector<2x128xf32>
    %c127_i32 = arith.constant 127 : i32
    %45 = tpu.dynamic_rotate %21 by %c127_i32 dim 1 : vector<2x128xf32>, i32 -> vector<2x128xf32>
    %46 = vector.shape_cast %20 : vector<1x1xi1> to vector<1x1xi1>
    %47 = vector.broadcast %46 : vector<1x1xi1> to vector<2x128xi1>
    %48 = arith.select %47, %44, %45 : vector<2x128xi1>, vector<2x128xf32>
    %49 = vector.shape_cast %20 : vector<1x1xi1> to vector<1x1xi1>
    %50 = vector.broadcast %49 : vector<1x1xi1> to vector<2x128xi1>
    %51 = arith.select %50, %45, %44 : vector<2x128xi1>, vector<2x128xf32>
    %cst = arith.constant 0.000000e+00 : f32
    %52 = vector.shape_cast %23 : vector<1x128xi1> to vector<1x128xi1>
    %53 = vector.broadcast %52 : vector<1x128xi1> to vector<2x128xi1>
    %54 = vector.broadcast %cst : f32 to vector<2x128xf32>
    %55 = arith.select %53, %48, %54 : vector<2x128xi1>, vector<2x128xf32>
    %cst_15 = arith.constant 0.000000e+00 : f32
    %56 = vector.shape_cast %25 : vector<1x128xi1> to vector<1x128xi1>
    %57 = vector.broadcast %56 : vector<1x128xi1> to vector<2x128xi1>
    %58 = vector.broadcast %cst_15 : f32 to vector<2x128xf32>
    %59 = arith.select %57, %51, %58 : vector<2x128xi1>, vector<2x128xf32>
    %cst_16 = arith.constant 0.000000e+00 : f32
    %60 = vector.broadcast %cst_16 : f32 to vector<2x128xf32>
    %c0_17 = arith.constant 0 : index
    %61 = memref.load %arg2[%c0_17] : memref<8xf32, #tpu.memory_space<smem>>
    %62 = vector.broadcast %61 : f32 to vector<2x128xf32>
    %63 = arith.addf %60, %62 : vector<2x128xf32>
    %c0_18 = arith.constant 0 : index
    %64 = memref.load %arg1[%c0_18] : memref<24xf32, #tpu.memory_space<smem>>
    %65 = vector.broadcast %64 : f32 to vector<2x128xf32>
    %66 = arith.mulf %65, %55 : vector<2x128xf32>
    %67 = arith.addf %63, %66 : vector<2x128xf32>
    %c1 = arith.constant 1 : index
    %68 = memref.load %arg1[%c1] : memref<24xf32, #tpu.memory_space<smem>>
    %69 = vector.broadcast %68 : f32 to vector<2x128xf32>
    %70 = arith.mulf %69, %21 : vector<2x128xf32>
    %71 = arith.addf %67, %70 : vector<2x128xf32>
    %c2 = arith.constant 2 : index
    %72 = memref.load %arg1[%c2] : memref<24xf32, #tpu.memory_space<smem>>
    %73 = vector.broadcast %72 : f32 to vector<2x128xf32>
    %74 = arith.mulf %73, %59 : vector<2x128xf32>
    %75 = arith.addf %71, %74 : vector<2x128xf32>
    %cst_19 = arith.constant 0.000000e+00 : f32
    %76 = vector.broadcast %cst_19 : f32 to vector<2x128xf32>
    %c1_20 = arith.constant 1 : index
    %77 = memref.load %arg2[%c1_20] : memref<8xf32, #tpu.memory_space<smem>>
    %78 = vector.broadcast %77 : f32 to vector<2x128xf32>
    %79 = arith.addf %76, %78 : vector<2x128xf32>
    %c3 = arith.constant 3 : index
    %80 = memref.load %arg1[%c3] : memref<24xf32, #tpu.memory_space<smem>>
    %81 = vector.broadcast %80 : f32 to vector<2x128xf32>
    %82 = arith.mulf %81, %55 : vector<2x128xf32>
    %83 = arith.addf %79, %82 : vector<2x128xf32>
    %c4 = arith.constant 4 : index
    %84 = memref.load %arg1[%c4] : memref<24xf32, #tpu.memory_space<smem>>
    %85 = vector.broadcast %84 : f32 to vector<2x128xf32>
    %86 = arith.mulf %85, %21 : vector<2x128xf32>
    %87 = arith.addf %83, %86 : vector<2x128xf32>
    %c5 = arith.constant 5 : index
    %88 = memref.load %arg1[%c5] : memref<24xf32, #tpu.memory_space<smem>>
    %89 = vector.broadcast %88 : f32 to vector<2x128xf32>
    %90 = arith.mulf %89, %59 : vector<2x128xf32>
    %91 = arith.addf %87, %90 : vector<2x128xf32>
    %cst_21 = arith.constant 0.000000e+00 : f32
    %92 = vector.broadcast %cst_21 : f32 to vector<2x128xf32>
    %c2_22 = arith.constant 2 : index
    %93 = memref.load %arg2[%c2_22] : memref<8xf32, #tpu.memory_space<smem>>
    %94 = vector.broadcast %93 : f32 to vector<2x128xf32>
    %95 = arith.addf %92, %94 : vector<2x128xf32>
    %c6 = arith.constant 6 : index
    %96 = memref.load %arg1[%c6] : memref<24xf32, #tpu.memory_space<smem>>
    %97 = vector.broadcast %96 : f32 to vector<2x128xf32>
    %98 = arith.mulf %97, %55 : vector<2x128xf32>
    %99 = arith.addf %95, %98 : vector<2x128xf32>
    %c7 = arith.constant 7 : index
    %100 = memref.load %arg1[%c7] : memref<24xf32, #tpu.memory_space<smem>>
    %101 = vector.broadcast %100 : f32 to vector<2x128xf32>
    %102 = arith.mulf %101, %21 : vector<2x128xf32>
    %103 = arith.addf %99, %102 : vector<2x128xf32>
    %c8 = arith.constant 8 : index
    %104 = memref.load %arg1[%c8] : memref<24xf32, #tpu.memory_space<smem>>
    %105 = vector.broadcast %104 : f32 to vector<2x128xf32>
    %106 = arith.mulf %105, %59 : vector<2x128xf32>
    %107 = arith.addf %103, %106 : vector<2x128xf32>
    %cst_23 = arith.constant 0.000000e+00 : f32
    %108 = vector.broadcast %cst_23 : f32 to vector<2x128xf32>
    %c3_24 = arith.constant 3 : index
    %109 = memref.load %arg2[%c3_24] : memref<8xf32, #tpu.memory_space<smem>>
    %110 = vector.broadcast %109 : f32 to vector<2x128xf32>
    %111 = arith.addf %108, %110 : vector<2x128xf32>
    %c9 = arith.constant 9 : index
    %112 = memref.load %arg1[%c9] : memref<24xf32, #tpu.memory_space<smem>>
    %113 = vector.broadcast %112 : f32 to vector<2x128xf32>
    %114 = arith.mulf %113, %55 : vector<2x128xf32>
    %115 = arith.addf %111, %114 : vector<2x128xf32>
    %c10 = arith.constant 10 : index
    %116 = memref.load %arg1[%c10] : memref<24xf32, #tpu.memory_space<smem>>
    %117 = vector.broadcast %116 : f32 to vector<2x128xf32>
    %118 = arith.mulf %117, %21 : vector<2x128xf32>
    %119 = arith.addf %115, %118 : vector<2x128xf32>
    %c11 = arith.constant 11 : index
    %120 = memref.load %arg1[%c11] : memref<24xf32, #tpu.memory_space<smem>>
    %121 = vector.broadcast %120 : f32 to vector<2x128xf32>
    %122 = arith.mulf %121, %59 : vector<2x128xf32>
    %123 = arith.addf %119, %122 : vector<2x128xf32>
    %cst_25 = arith.constant 0.000000e+00 : f32
    %124 = vector.broadcast %cst_25 : f32 to vector<2x128xf32>
    %c4_26 = arith.constant 4 : index
    %125 = memref.load %arg2[%c4_26] : memref<8xf32, #tpu.memory_space<smem>>
    %126 = vector.broadcast %125 : f32 to vector<2x128xf32>
    %127 = arith.addf %124, %126 : vector<2x128xf32>
    %c12 = arith.constant 12 : index
    %128 = memref.load %arg1[%c12] : memref<24xf32, #tpu.memory_space<smem>>
    %129 = vector.broadcast %128 : f32 to vector<2x128xf32>
    %130 = arith.mulf %129, %55 : vector<2x128xf32>
    %131 = arith.addf %127, %130 : vector<2x128xf32>
    %c13 = arith.constant 13 : index
    %132 = memref.load %arg1[%c13] : memref<24xf32, #tpu.memory_space<smem>>
    %133 = vector.broadcast %132 : f32 to vector<2x128xf32>
    %134 = arith.mulf %133, %21 : vector<2x128xf32>
    %135 = arith.addf %131, %134 : vector<2x128xf32>
    %c14 = arith.constant 14 : index
    %136 = memref.load %arg1[%c14] : memref<24xf32, #tpu.memory_space<smem>>
    %137 = vector.broadcast %136 : f32 to vector<2x128xf32>
    %138 = arith.mulf %137, %59 : vector<2x128xf32>
    %139 = arith.addf %135, %138 : vector<2x128xf32>
    %cst_27 = arith.constant 0.000000e+00 : f32
    %140 = vector.broadcast %cst_27 : f32 to vector<2x128xf32>
    %c5_28 = arith.constant 5 : index
    %141 = memref.load %arg2[%c5_28] : memref<8xf32, #tpu.memory_space<smem>>
    %142 = vector.broadcast %141 : f32 to vector<2x128xf32>
    %143 = arith.addf %140, %142 : vector<2x128xf32>
    %c15 = arith.constant 15 : index
    %144 = memref.load %arg1[%c15] : memref<24xf32, #tpu.memory_space<smem>>
    %145 = vector.broadcast %144 : f32 to vector<2x128xf32>
    %146 = arith.mulf %145, %55 : vector<2x128xf32>
    %147 = arith.addf %143, %146 : vector<2x128xf32>
    %c16 = arith.constant 16 : index
    %148 = memref.load %arg1[%c16] : memref<24xf32, #tpu.memory_space<smem>>
    %149 = vector.broadcast %148 : f32 to vector<2x128xf32>
    %150 = arith.mulf %149, %21 : vector<2x128xf32>
    %151 = arith.addf %147, %150 : vector<2x128xf32>
    %c17 = arith.constant 17 : index
    %152 = memref.load %arg1[%c17] : memref<24xf32, #tpu.memory_space<smem>>
    %153 = vector.broadcast %152 : f32 to vector<2x128xf32>
    %154 = arith.mulf %153, %59 : vector<2x128xf32>
    %155 = arith.addf %151, %154 : vector<2x128xf32>
    %cst_29 = arith.constant 0.000000e+00 : f32
    %156 = vector.broadcast %cst_29 : f32 to vector<2x128xf32>
    %c6_30 = arith.constant 6 : index
    %157 = memref.load %arg2[%c6_30] : memref<8xf32, #tpu.memory_space<smem>>
    %158 = vector.broadcast %157 : f32 to vector<2x128xf32>
    %159 = arith.addf %156, %158 : vector<2x128xf32>
    %c18 = arith.constant 18 : index
    %160 = memref.load %arg1[%c18] : memref<24xf32, #tpu.memory_space<smem>>
    %161 = vector.broadcast %160 : f32 to vector<2x128xf32>
    %162 = arith.mulf %161, %55 : vector<2x128xf32>
    %163 = arith.addf %159, %162 : vector<2x128xf32>
    %c19 = arith.constant 19 : index
    %164 = memref.load %arg1[%c19] : memref<24xf32, #tpu.memory_space<smem>>
    %165 = vector.broadcast %164 : f32 to vector<2x128xf32>
    %166 = arith.mulf %165, %21 : vector<2x128xf32>
    %167 = arith.addf %163, %166 : vector<2x128xf32>
    %c20 = arith.constant 20 : index
    %168 = memref.load %arg1[%c20] : memref<24xf32, #tpu.memory_space<smem>>
    %169 = vector.broadcast %168 : f32 to vector<2x128xf32>
    %170 = arith.mulf %169, %59 : vector<2x128xf32>
    %171 = arith.addf %167, %170 : vector<2x128xf32>
    %cst_31 = arith.constant 0.000000e+00 : f32
    %172 = vector.broadcast %cst_31 : f32 to vector<2x128xf32>
    %c7_32 = arith.constant 7 : index
    %173 = memref.load %arg2[%c7_32] : memref<8xf32, #tpu.memory_space<smem>>
    %174 = vector.broadcast %173 : f32 to vector<2x128xf32>
    %175 = arith.addf %172, %174 : vector<2x128xf32>
    %c21 = arith.constant 21 : index
    %176 = memref.load %arg1[%c21] : memref<24xf32, #tpu.memory_space<smem>>
    %177 = vector.broadcast %176 : f32 to vector<2x128xf32>
    %178 = arith.mulf %177, %55 : vector<2x128xf32>
    %179 = arith.addf %175, %178 : vector<2x128xf32>
    %c22 = arith.constant 22 : index
    %180 = memref.load %arg1[%c22] : memref<24xf32, #tpu.memory_space<smem>>
    %181 = vector.broadcast %180 : f32 to vector<2x128xf32>
    %182 = arith.mulf %181, %21 : vector<2x128xf32>
    %183 = arith.addf %179, %182 : vector<2x128xf32>
    %c23 = arith.constant 23 : index
    %184 = memref.load %arg1[%c23] : memref<24xf32, #tpu.memory_space<smem>>
    %185 = vector.broadcast %184 : f32 to vector<2x128xf32>
    %186 = arith.mulf %185, %59 : vector<2x128xf32>
    %187 = arith.addf %183, %186 : vector<2x128xf32>
    %188 = arith.negf %75 : vector<2x128xf32>
    %189 = math.exp %188 : vector<2x128xf32>
    %cst_33 = arith.constant 1.000000e+00 : f32
    %190 = vector.broadcast %cst_33 : f32 to vector<2x128xf32>
    %191 = arith.addf %190, %189 : vector<2x128xf32>
    %192 = arith.divf %190, %191 : vector<2x128xf32>
    %193 = math.tanh %139 : vector<2x128xf32>
    %194 = arith.mulf %192, %193 : vector<2x128xf32>
    %195 = arith.negf %91 : vector<2x128xf32>
    %196 = math.exp %195 : vector<2x128xf32>
    %cst_34 = arith.constant 1.000000e+00 : f32
    %197 = vector.broadcast %cst_34 : f32 to vector<2x128xf32>
    %198 = arith.addf %197, %196 : vector<2x128xf32>
    %199 = arith.divf %197, %198 : vector<2x128xf32>
    %200 = math.tanh %155 : vector<2x128xf32>
    %201 = arith.mulf %199, %200 : vector<2x128xf32>
    %202 = arith.negf %107 : vector<2x128xf32>
    %203 = math.exp %202 : vector<2x128xf32>
    %cst_35 = arith.constant 1.000000e+00 : f32
    %204 = vector.broadcast %cst_35 : f32 to vector<2x128xf32>
    %205 = arith.addf %204, %203 : vector<2x128xf32>
    %206 = arith.divf %204, %205 : vector<2x128xf32>
    %207 = math.tanh %171 : vector<2x128xf32>
    %208 = arith.mulf %206, %207 : vector<2x128xf32>
    %209 = arith.negf %123 : vector<2x128xf32>
    %210 = math.exp %209 : vector<2x128xf32>
    %cst_36 = arith.constant 1.000000e+00 : f32
    %211 = vector.broadcast %cst_36 : f32 to vector<2x128xf32>
    %212 = arith.addf %211, %210 : vector<2x128xf32>
    %213 = arith.divf %211, %212 : vector<2x128xf32>
    %214 = math.tanh %187 : vector<2x128xf32>
    %215 = arith.mulf %213, %214 : vector<2x128xf32>
    %cst_37 = arith.constant 0.000000e+00 : f32
    %216 = vector.broadcast %cst_37 : f32 to vector<2x1xf32>
    %cst_38 = arith.constant 0.000000e+00 : f32
    %217 = vector.broadcast %cst_38 : f32 to vector<2x1xf32>
    %cst_39 = arith.constant 0.000000e+00 : f32
    %218 = vector.shape_cast %43 : vector<1x128xi1> to vector<1x128xi1>
    %219 = vector.broadcast %218 : vector<1x128xi1> to vector<2x128xi1>
    %220 = vector.broadcast %cst_39 : f32 to vector<2x128xf32>
    %221 = arith.select %219, %194, %220 : vector<2x128xi1>, vector<2x128xf32>
    %cst_40 = arith.constant dense<0.000000e+00> : vector<2xf32>
    %222 = vector.multi_reduction <add>, %221, %cst_40 [1] : vector<2x128xf32> to vector<2xf32>
    %223 = vector.shape_cast %222 : vector<2xf32> to vector<2x1xf32>
    %224 = arith.addf %216, %223 : vector<2x1xf32>
    %225 = arith.mulf %221, %221 : vector<2x128xf32>
    %cst_41 = arith.constant dense<0.000000e+00> : vector<2xf32>
    %226 = vector.multi_reduction <add>, %225, %cst_41 [1] : vector<2x128xf32> to vector<2xf32>
    %227 = vector.shape_cast %226 : vector<2xf32> to vector<2x1xf32>
    %228 = arith.addf %217, %227 : vector<2x1xf32>
    %cst_42 = arith.constant 0.000000e+00 : f32
    %229 = vector.shape_cast %43 : vector<1x128xi1> to vector<1x128xi1>
    %230 = vector.broadcast %229 : vector<1x128xi1> to vector<2x128xi1>
    %231 = vector.broadcast %cst_42 : f32 to vector<2x128xf32>
    %232 = arith.select %230, %201, %231 : vector<2x128xi1>, vector<2x128xf32>
    %cst_43 = arith.constant dense<0.000000e+00> : vector<2xf32>
    %233 = vector.multi_reduction <add>, %232, %cst_43 [1] : vector<2x128xf32> to vector<2xf32>
    %234 = vector.shape_cast %233 : vector<2xf32> to vector<2x1xf32>
    %235 = arith.addf %224, %234 : vector<2x1xf32>
    %236 = arith.mulf %232, %232 : vector<2x128xf32>
    %cst_44 = arith.constant dense<0.000000e+00> : vector<2xf32>
    %237 = vector.multi_reduction <add>, %236, %cst_44 [1] : vector<2x128xf32> to vector<2xf32>
    %238 = vector.shape_cast %237 : vector<2xf32> to vector<2x1xf32>
    %239 = arith.addf %228, %238 : vector<2x1xf32>
    %cst_45 = arith.constant 0.000000e+00 : f32
    %240 = vector.shape_cast %43 : vector<1x128xi1> to vector<1x128xi1>
    %241 = vector.broadcast %240 : vector<1x128xi1> to vector<2x128xi1>
    %242 = vector.broadcast %cst_45 : f32 to vector<2x128xf32>
    %243 = arith.select %241, %208, %242 : vector<2x128xi1>, vector<2x128xf32>
    %cst_46 = arith.constant dense<0.000000e+00> : vector<2xf32>
    %244 = vector.multi_reduction <add>, %243, %cst_46 [1] : vector<2x128xf32> to vector<2xf32>
    %245 = vector.shape_cast %244 : vector<2xf32> to vector<2x1xf32>
    %246 = arith.addf %235, %245 : vector<2x1xf32>
    %247 = arith.mulf %243, %243 : vector<2x128xf32>
    %cst_47 = arith.constant dense<0.000000e+00> : vector<2xf32>
    %248 = vector.multi_reduction <add>, %247, %cst_47 [1] : vector<2x128xf32> to vector<2xf32>
    %249 = vector.shape_cast %248 : vector<2xf32> to vector<2x1xf32>
    %250 = arith.addf %239, %249 : vector<2x1xf32>
    %cst_48 = arith.constant 0.000000e+00 : f32
    %251 = vector.shape_cast %43 : vector<1x128xi1> to vector<1x128xi1>
    %252 = vector.broadcast %251 : vector<1x128xi1> to vector<2x128xi1>
    %253 = vector.broadcast %cst_48 : f32 to vector<2x128xf32>
    %254 = arith.select %252, %215, %253 : vector<2x128xi1>, vector<2x128xf32>
    %cst_49 = arith.constant dense<0.000000e+00> : vector<2xf32>
    %255 = vector.multi_reduction <add>, %254, %cst_49 [1] : vector<2x128xf32> to vector<2xf32>
    %256 = vector.shape_cast %255 : vector<2xf32> to vector<2x1xf32>
    %257 = arith.addf %246, %256 : vector<2x1xf32>
    %258 = arith.mulf %254, %254 : vector<2x128xf32>
    %cst_50 = arith.constant dense<0.000000e+00> : vector<2xf32>
    %259 = vector.multi_reduction <add>, %258, %cst_50 [1] : vector<2x128xf32> to vector<2xf32>
    %260 = vector.shape_cast %259 : vector<2xf32> to vector<2x1xf32>
    %261 = arith.addf %250, %260 : vector<2x1xf32>
    %cst_51 = arith.constant 5.120000e+02 : f32
    %262 = vector.broadcast %cst_51 : f32 to vector<2x1xf32>
    %263 = arith.divf %257, %262 : vector<2x1xf32>
    %cst_52 = arith.constant 5.120000e+02 : f32
    %264 = vector.broadcast %cst_52 : f32 to vector<2x1xf32>
    %265 = arith.divf %261, %264 : vector<2x1xf32>
    %266 = arith.mulf %263, %263 : vector<2x1xf32>
    %267 = arith.subf %265, %266 : vector<2x1xf32>
    %cst_53 = arith.constant 9.99999974E-6 : f32
    %268 = vector.broadcast %cst_53 : f32 to vector<2x1xf32>
    %269 = arith.addf %267, %268 : vector<2x1xf32>
    %270 = math.rsqrt %269 : vector<2x1xf32>
    %c0_54 = arith.constant 0 : index
    %c0_55 = arith.constant 0 : index
    %271 = vector.load %arg3[%c0_54, %c0_55] : memref<4x128xf32, #tpu.memory_space<vmem>>, vector<4x128xf32>
    %c0_56 = arith.constant 0 : index
    %c0_57 = arith.constant 0 : index
    %272 = vector.load %arg4[%c0_56, %c0_57] : memref<4x128xf32, #tpu.memory_space<vmem>>, vector<4x128xf32>
    %273 = vector.broadcast %263 : vector<2x1xf32> to vector<2x128xf32>
    %274 = arith.subf %194, %273 : vector<2x128xf32>
    %275 = vector.broadcast %270 : vector<2x1xf32> to vector<2x128xf32>
    %276 = arith.mulf %274, %275 : vector<2x128xf32>
    %277 = vector.extract_strided_slice %271 {offsets = [0, 0], sizes = [1, 128], strides = [1, 1]} : vector<4x128xf32> to vector<1x128xf32>
    %278 = vector.broadcast %277 : vector<1x128xf32> to vector<2x128xf32>
    %279 = arith.mulf %276, %278 : vector<2x128xf32>
    %280 = vector.extract_strided_slice %272 {offsets = [0, 0], sizes = [1, 128], strides = [1, 1]} : vector<4x128xf32> to vector<1x128xf32>
    %281 = vector.broadcast %280 : vector<1x128xf32> to vector<2x128xf32>
    %282 = arith.addf %279, %281 : vector<2x128xf32>
    %c0_58 = arith.constant 0 : index
    %c0_59 = arith.constant 0 : index
    %c0_60 = arith.constant 0 : index
    %283 = vector.load %arg17[%c0_58, %c0_59, %c0_60] : memref<4x2x128xf32, #tpu.memory_space<vmem>>, vector<1x2x128xf32>
    %284 = vector.shape_cast %283 : vector<1x2x128xf32> to vector<2x128xf32>
    %285 = vector.shape_cast %282 : vector<2x128xf32> to vector<1x2x128xf32>
    tpu.vector_store %arg17[%c0_58, %c0_59, %c0_60], %285 {strides = array<i32>} : memref<4x2x128xf32, #tpu.memory_space<vmem>>, vector<1x2x128xf32>,
    %286 = vector.broadcast %263 : vector<2x1xf32> to vector<2x128xf32>
    %287 = arith.subf %201, %286 : vector<2x128xf32>
    %288 = vector.broadcast %270 : vector<2x1xf32> to vector<2x128xf32>
    %289 = arith.mulf %287, %288 : vector<2x128xf32>
    %290 = vector.extract_strided_slice %271 {offsets = [1, 0], sizes = [1, 128], strides = [1, 1]} : vector<4x128xf32> to vector<1x128xf32>
    %291 = vector.broadcast %290 : vector<1x128xf32> to vector<2x128xf32>
    %292 = arith.mulf %289, %291 : vector<2x128xf32>
    %293 = vector.extract_strided_slice %272 {offsets = [1, 0], sizes = [1, 128], strides = [1, 1]} : vector<4x128xf32> to vector<1x128xf32>
    %294 = vector.broadcast %293 : vector<1x128xf32> to vector<2x128xf32>
    %295 = arith.addf %292, %294 : vector<2x128xf32>
    %c1_61 = arith.constant 1 : index
    %c0_62 = arith.constant 0 : index
    %c0_63 = arith.constant 0 : index
    %296 = vector.load %arg17[%c1_61, %c0_62, %c0_63] : memref<4x2x128xf32, #tpu.memory_space<vmem>>, vector<1x2x128xf32>
    %297 = vector.shape_cast %296 : vector<1x2x128xf32> to vector<2x128xf32>
    %298 = vector.shape_cast %295 : vector<2x128xf32> to vector<1x2x128xf32>
    tpu.vector_store %arg17[%c1_61, %c0_62, %c0_63], %298 {strides = array<i32>} : memref<4x2x128xf32, #tpu.memory_space<vmem>>, vector<1x2x128xf32>,
    %299 = vector.broadcast %263 : vector<2x1xf32> to vector<2x128xf32>
    %300 = arith.subf %208, %299 : vector<2x128xf32>
    %301 = vector.broadcast %270 : vector<2x1xf32> to vector<2x128xf32>
    %302 = arith.mulf %300, %301 : vector<2x128xf32>
    %303 = vector.extract_strided_slice %271 {offsets = [2, 0], sizes = [1, 128], strides = [1, 1]} : vector<4x128xf32> to vector<1x128xf32>
    %304 = vector.broadcast %303 : vector<1x128xf32> to vector<2x128xf32>
    %305 = arith.mulf %302, %304 : vector<2x128xf32>
    %306 = vector.extract_strided_slice %272 {offsets = [2, 0], sizes = [1, 128], strides = [1, 1]} : vector<4x128xf32> to vector<1x128xf32>
    %307 = vector.broadcast %306 : vector<1x128xf32> to vector<2x128xf32>
    %308 = arith.addf %305, %307 : vector<2x128xf32>
    %c2_64 = arith.constant 2 : index
    %c0_65 = arith.constant 0 : index
    %c0_66 = arith.constant 0 : index
    %309 = vector.load %arg17[%c2_64, %c0_65, %c0_66] : memref<4x2x128xf32, #tpu.memory_space<vmem>>, vector<1x2x128xf32>
    %310 = vector.shape_cast %309 : vector<1x2x128xf32> to vector<2x128xf32>
    %311 = vector.shape_cast %308 : vector<2x128xf32> to vector<1x2x128xf32>
    tpu.vector_store %arg17[%c2_64, %c0_65, %c0_66], %311 {strides = array<i32>} : memref<4x2x128xf32, #tpu.memory_space<vmem>>, vector<1x2x128xf32>,
    %312 = vector.broadcast %263 : vector<2x1xf32> to vector<2x128xf32>
    %313 = arith.subf %215, %312 : vector<2x128xf32>
    %314 = vector.broadcast %270 : vector<2x1xf32> to vector<2x128xf32>
    %315 = arith.mulf %313, %314 : vector<2x128xf32>
    %316 = vector.extract_strided_slice %271 {offsets = [3, 0], sizes = [1, 128], strides = [1, 1]} : vector<4x128xf32> to vector<1x128xf32>
    %317 = vector.broadcast %316 : vector<1x128xf32> to vector<2x128xf32>
    %318 = arith.mulf %315, %317 : vector<2x128xf32>
    %319 = vector.extract_strided_slice %272 {offsets = [3, 0], sizes = [1, 128], strides = [1, 1]} : vector<4x128xf32> to vector<1x128xf32>
    %320 = vector.broadcast %319 : vector<1x128xf32> to vector<2x128xf32>
    %321 = arith.addf %318, %320 : vector<2x128xf32>
    %c3_67 = arith.constant 3 : index
    %c0_68 = arith.constant 0 : index
    %c0_69 = arith.constant 0 : index
    %322 = vector.load %arg17[%c3_67, %c0_68, %c0_69] : memref<4x2x128xf32, #tpu.memory_space<vmem>>, vector<1x2x128xf32>
    %323 = vector.shape_cast %322 : vector<1x2x128xf32> to vector<2x128xf32>
    %324 = vector.shape_cast %321 : vector<2x128xf32> to vector<1x2x128xf32>
    tpu.vector_store %arg17[%c3_67, %c0_68, %c0_69], %324 {strides = array<i32>} : memref<4x2x128xf32, #tpu.memory_space<vmem>>, vector<1x2x128xf32>,
    %c1_i32_70 = arith.constant 1 : i32
    %325 = vector.broadcast %c1_i32_70 : i32 to vector<1x128xi32>
    %326 = arith.cmpi sge, %16, %325 : vector<1x128xi32>
    %c15_i32_71 = arith.constant 15 : i32
    %327 = vector.broadcast %c15_i32_71 : i32 to vector<1x128xi32>
    %328 = arith.cmpi slt, %16, %327 : vector<1x128xi32>
    %c2_i32 = arith.constant 2 : i32
    %c0_i32_72 = arith.constant 0 : i32
    %329 = arith.cmpi eq, %c2_i32, %c0_i32_72 : i32
    %c1_i32_73 = arith.constant 1 : i32
    %330 = arith.select %329, %c1_i32_73, %c2_i32 : i32
    %331 = vector.broadcast %330 : i32 to vector<1x128xi32>
    %332 = arith.remsi %16, %331 : vector<1x128xi32>
    %c0_i32_74 = arith.constant 0 : i32
    %333 = vector.broadcast %c0_i32_74 : i32 to vector<1x128xi32>
    %334 = arith.cmpi ne, %332, %333 : vector<1x128xi32>
    %c0_i32_75 = arith.constant 0 : i32
    %335 = vector.broadcast %c0_i32_75 : i32 to vector<1x128xi32>
    %336 = arith.cmpi slt, %332, %335 : vector<1x128xi32>
    %c0_i32_76 = arith.constant 0 : i32
    %337 = arith.cmpi slt, %330, %c0_i32_76 : i32
    %338 = vector.broadcast %337 : i1 to vector<1x128xi1>
    %339 = vector.broadcast %338 : vector<1x128xi1> to vector<1x128xi1>
    %340 = arith.xori %336, %339 : vector<1x128xi1>
    %341 = arith.andi %340, %334 : vector<1x128xi1>
    %342 = vector.broadcast %330 : i32 to vector<1x128xi32>
    %343 = arith.addi %332, %342 : vector<1x128xi32>
    %344 = arith.select %341, %343, %332 : vector<1x128xi1>, vector<1x128xi32>
    %c0_i32_77 = arith.constant 0 : i32
    %345 = vector.broadcast %c0_i32_77 : i32 to vector<1x128xi32>
    %346 = arith.cmpi eq, %344, %345 : vector<1x128xi32>
    %c1_i32_78 = arith.constant 1 : i32
    %347 = tpu.dynamic_rotate %282 by %c1_i32_78 dim 1 : vector<2x128xf32>, i32 -> vector<2x128xf32>
    %c127_i32_79 = arith.constant 127 : i32
    %348 = tpu.dynamic_rotate %282 by %c127_i32_79 dim 1 : vector<2x128xf32>, i32 -> vector<2x128xf32>
    %349 = vector.shape_cast %20 : vector<1x1xi1> to vector<1x1xi1>
    %350 = vector.broadcast %349 : vector<1x1xi1> to vector<2x128xi1>
    %351 = arith.select %350, %347, %348 : vector<2x128xi1>, vector<2x128xf32>
    %352 = vector.shape_cast %20 : vector<1x1xi1> to vector<1x1xi1>
    %353 = vector.broadcast %352 : vector<1x1xi1> to vector<2x128xi1>
    %354 = arith.select %353, %348, %347 : vector<2x128xi1>, vector<2x128xf32>
    %cst_80 = arith.constant 0.000000e+00 : f32
    %355 = vector.shape_cast %326 : vector<1x128xi1> to vector<1x128xi1>
    %356 = vector.broadcast %355 : vector<1x128xi1> to vector<2x128xi1>
    %357 = vector.broadcast %cst_80 : f32 to vector<2x128xf32>
    %358 = arith.select %356, %351, %357 : vector<2x128xi1>, vector<2x128xf32>
    %cst_81 = arith.constant 0.000000e+00 : f32
    %359 = vector.shape_cast %328 : vector<1x128xi1> to vector<1x128xi1>
    %360 = vector.broadcast %359 : vector<1x128xi1> to vector<2x128xi1>
    %361 = vector.broadcast %cst_81 : f32 to vector<2x128xf32>
    %362 = arith.select %360, %354, %361 : vector<2x128xi1>, vector<2x128xf32>
    %c1_i32_82 = arith.constant 1 : i32
    %363 = tpu.dynamic_rotate %295 by %c1_i32_82 dim 1 : vector<2x128xf32>, i32 -> vector<2x128xf32>
    %c127_i32_83 = arith.constant 127 : i32
    %364 = tpu.dynamic_rotate %295 by %c127_i32_83 dim 1 : vector<2x128xf32>, i32 -> vector<2x128xf32>
    %365 = vector.shape_cast %20 : vector<1x1xi1> to vector<1x1xi1>
    %366 = vector.broadcast %365 : vector<1x1xi1> to vector<2x128xi1>
    %367 = arith.select %366, %363, %364 : vector<2x128xi1>, vector<2x128xf32>
    %368 = vector.shape_cast %20 : vector<1x1xi1> to vector<1x1xi1>
    %369 = vector.broadcast %368 : vector<1x1xi1> to vector<2x128xi1>
    %370 = arith.select %369, %364, %363 : vector<2x128xi1>, vector<2x128xf32>
    %cst_84 = arith.constant 0.000000e+00 : f32
    %371 = vector.shape_cast %326 : vector<1x128xi1> to vector<1x128xi1>
    %372 = vector.broadcast %371 : vector<1x128xi1> to vector<2x128xi1>
    %373 = vector.broadcast %cst_84 : f32 to vector<2x128xf32>
    %374 = arith.select %372, %367, %373 : vector<2x128xi1>, vector<2x128xf32>
    %cst_85 = arith.constant 0.000000e+00 : f32
    %375 = vector.shape_cast %328 : vector<1x128xi1> to vector<1x128xi1>
    %376 = vector.broadcast %375 : vector<1x128xi1> to vector<2x128xi1>
    %377 = vector.broadcast %cst_85 : f32 to vector<2x128xf32>
    %378 = arith.select %376, %370, %377 : vector<2x128xi1>, vector<2x128xf32>
    %c1_i32_86 = arith.constant 1 : i32
    %379 = tpu.dynamic_rotate %308 by %c1_i32_86 dim 1 : vector<2x128xf32>, i32 -> vector<2x128xf32>
    %c127_i32_87 = arith.constant 127 : i32
    %380 = tpu.dynamic_rotate %308 by %c127_i32_87 dim 1 : vector<2x128xf32>, i32 -> vector<2x128xf32>
    %381 = vector.shape_cast %20 : vector<1x1xi1> to vector<1x1xi1>
    %382 = vector.broadcast %381 : vector<1x1xi1> to vector<2x128xi1>
    %383 = arith.select %382, %379, %380 : vector<2x128xi1>, vector<2x128xf32>
    %384 = vector.shape_cast %20 : vector<1x1xi1> to vector<1x1xi1>
    %385 = vector.broadcast %384 : vector<1x1xi1> to vector<2x128xi1>
    %386 = arith.select %385, %380, %379 : vector<2x128xi1>, vector<2x128xf32>
    %cst_88 = arith.constant 0.000000e+00 : f32
    %387 = vector.shape_cast %326 : vector<1x128xi1> to vector<1x128xi1>
    %388 = vector.broadcast %387 : vector<1x128xi1> to vector<2x128xi1>
    %389 = vector.broadcast %cst_88 : f32 to vector<2x128xf32>
    %390 = arith.select %388, %383, %389 : vector<2x128xi1>, vector<2x128xf32>
    %cst_89 = arith.constant 0.000000e+00 : f32
    %391 = vector.shape_cast %328 : vector<1x128xi1> to vector<1x128xi1>
    %392 = vector.broadcast %391 : vector<1x128xi1> to vector<2x128xi1>
    %393 = vector.broadcast %cst_89 : f32 to vector<2x128xf32>
    %394 = arith.select %392, %386, %393 : vector<2x128xi1>, vector<2x128xf32>
    %c1_i32_90 = arith.constant 1 : i32
    %395 = tpu.dynamic_rotate %321 by %c1_i32_90 dim 1 : vector<2x128xf32>, i32 -> vector<2x128xf32>
    %c127_i32_91 = arith.constant 127 : i32
    %396 = tpu.dynamic_rotate %321 by %c127_i32_91 dim 1 : vector<2x128xf32>, i32 -> vector<2x128xf32>
    %397 = vector.shape_cast %20 : vector<1x1xi1> to vector<1x1xi1>
    %398 = vector.broadcast %397 : vector<1x1xi1> to vector<2x128xi1>
    %399 = arith.select %398, %395, %396 : vector<2x128xi1>, vector<2x128xf32>
    %400 = vector.shape_cast %20 : vector<1x1xi1> to vector<1x1xi1>
    %401 = vector.broadcast %400 : vector<1x1xi1> to vector<2x128xi1>
    %402 = arith.select %401, %396, %395 : vector<2x128xi1>, vector<2x128xf32>
    %cst_92 = arith.constant 0.000000e+00 : f32
    %403 = vector.shape_cast %326 : vector<1x128xi1> to vector<1x128xi1>
    %404 = vector.broadcast %403 : vector<1x128xi1> to vector<2x128xi1>
    %405 = vector.broadcast %cst_92 : f32 to vector<2x128xf32>
    %406 = arith.select %404, %399, %405 : vector<2x128xi1>, vector<2x128xf32>
    %cst_93 = arith.constant 0.000000e+00 : f32
    %407 = vector.shape_cast %328 : vector<1x128xi1> to vector<1x128xi1>
    %408 = vector.broadcast %407 : vector<1x128xi1> to vector<2x128xi1>
    %409 = vector.broadcast %cst_93 : f32 to vector<2x128xf32>
    %410 = arith.select %408, %402, %409 : vector<2x128xi1>, vector<2x128xf32>
    %cst_94 = arith.constant 0.000000e+00 : f32
    %411 = vector.broadcast %cst_94 : f32 to vector<2x128xf32>
    %c0_95 = arith.constant 0 : index
    %412 = memref.load %arg6[%c0_95] : memref<8xf32, #tpu.memory_space<smem>>
    %413 = vector.broadcast %412 : f32 to vector<2x128xf32>
    %414 = arith.addf %411, %413 : vector<2x128xf32>
    %c0_96 = arith.constant 0 : index
    %415 = memref.load %arg5[%c0_96] : memref<96xf32, #tpu.memory_space<smem>>
    %416 = vector.broadcast %415 : f32 to vector<2x128xf32>
    %417 = arith.mulf %416, %358 : vector<2x128xf32>
    %418 = arith.addf %414, %417 : vector<2x128xf32>
    %c1_97 = arith.constant 1 : index
    %419 = memref.load %arg5[%c1_97] : memref<96xf32, #tpu.memory_space<smem>>
    %420 = vector.broadcast %419 : f32 to vector<2x128xf32>
    %421 = arith.mulf %420, %282 : vector<2x128xf32>
    %422 = arith.addf %418, %421 : vector<2x128xf32>
    %c2_98 = arith.constant 2 : index
    %423 = memref.load %arg5[%c2_98] : memref<96xf32, #tpu.memory_space<smem>>
    %424 = vector.broadcast %423 : f32 to vector<2x128xf32>
    %425 = arith.mulf %424, %362 : vector<2x128xf32>
    %426 = arith.addf %422, %425 : vector<2x128xf32>
    %c3_99 = arith.constant 3 : index
    %427 = memref.load %arg5[%c3_99] : memref<96xf32, #tpu.memory_space<smem>>
    %428 = vector.broadcast %427 : f32 to vector<2x128xf32>
    %429 = arith.mulf %428, %374 : vector<2x128xf32>
    %430 = arith.addf %426, %429 : vector<2x128xf32>
    %c4_100 = arith.constant 4 : index
    %431 = memref.load %arg5[%c4_100] : memref<96xf32, #tpu.memory_space<smem>>
    %432 = vector.broadcast %431 : f32 to vector<2x128xf32>
    %433 = arith.mulf %432, %295 : vector<2x128xf32>
    %434 = arith.addf %430, %433 : vector<2x128xf32>
    %c5_101 = arith.constant 5 : index
    %435 = memref.load %arg5[%c5_101] : memref<96xf32, #tpu.memory_space<smem>>
    %436 = vector.broadcast %435 : f32 to vector<2x128xf32>
    %437 = arith.mulf %436, %378 : vector<2x128xf32>
    %438 = arith.addf %434, %437 : vector<2x128xf32>
    %c6_102 = arith.constant 6 : index
    %439 = memref.load %arg5[%c6_102] : memref<96xf32, #tpu.memory_space<smem>>
    %440 = vector.broadcast %439 : f32 to vector<2x128xf32>
    %441 = arith.mulf %440, %390 : vector<2x128xf32>
    %442 = arith.addf %438, %441 : vector<2x128xf32>
    %c7_103 = arith.constant 7 : index
    %443 = memref.load %arg5[%c7_103] : memref<96xf32, #tpu.memory_space<smem>>
    %444 = vector.broadcast %443 : f32 to vector<2x128xf32>
    %445 = arith.mulf %444, %308 : vector<2x128xf32>
    %446 = arith.addf %442, %445 : vector<2x128xf32>
    %c8_104 = arith.constant 8 : index
    %447 = memref.load %arg5[%c8_104] : memref<96xf32, #tpu.memory_space<smem>>
    %448 = vector.broadcast %447 : f32 to vector<2x128xf32>
    %449 = arith.mulf %448, %394 : vector<2x128xf32>
    %450 = arith.addf %446, %449 : vector<2x128xf32>
    %c9_105 = arith.constant 9 : index
    %451 = memref.load %arg5[%c9_105] : memref<96xf32, #tpu.memory_space<smem>>
    %452 = vector.broadcast %451 : f32 to vector<2x128xf32>
    %453 = arith.mulf %452, %406 : vector<2x128xf32>
    %454 = arith.addf %450, %453 : vector<2x128xf32>
    %c10_106 = arith.constant 10 : index
    %455 = memref.load %arg5[%c10_106] : memref<96xf32, #tpu.memory_space<smem>>
    %456 = vector.broadcast %455 : f32 to vector<2x128xf32>
    %457 = arith.mulf %456, %321 : vector<2x128xf32>
    %458 = arith.addf %454, %457 : vector<2x128xf32>
    %c11_107 = arith.constant 11 : index
    %459 = memref.load %arg5[%c11_107] : memref<96xf32, #tpu.memory_space<smem>>
    %460 = vector.broadcast %459 : f32 to vector<2x128xf32>
    %461 = arith.mulf %460, %410 : vector<2x128xf32>
    %462 = arith.addf %458, %461 : vector<2x128xf32>
    %cst_108 = arith.constant 0.000000e+00 : f32
    %463 = vector.broadcast %cst_108 : f32 to vector<2x128xf32>
    %c1_109 = arith.constant 1 : index
    %464 = memref.load %arg6[%c1_109] : memref<8xf32, #tpu.memory_space<smem>>
    %465 = vector.broadcast %464 : f32 to vector<2x128xf32>
    %466 = arith.addf %463, %465 : vector<2x128xf32>
    %c12_110 = arith.constant 12 : index
    %467 = memref.load %arg5[%c12_110] : memref<96xf32, #tpu.memory_space<smem>>
    %468 = vector.broadcast %467 : f32 to vector<2x128xf32>
    %469 = arith.mulf %468, %358 : vector<2x128xf32>
    %470 = arith.addf %466, %469 : vector<2x128xf32>
    %c13_111 = arith.constant 13 : index
    %471 = memref.load %arg5[%c13_111] : memref<96xf32, #tpu.memory_space<smem>>
    %472 = vector.broadcast %471 : f32 to vector<2x128xf32>
    %473 = arith.mulf %472, %282 : vector<2x128xf32>
    %474 = arith.addf %470, %473 : vector<2x128xf32>
    %c14_112 = arith.constant 14 : index
    %475 = memref.load %arg5[%c14_112] : memref<96xf32, #tpu.memory_space<smem>>
    %476 = vector.broadcast %475 : f32 to vector<2x128xf32>
    %477 = arith.mulf %476, %362 : vector<2x128xf32>
    %478 = arith.addf %474, %477 : vector<2x128xf32>
    %c15_113 = arith.constant 15 : index
    %479 = memref.load %arg5[%c15_113] : memref<96xf32, #tpu.memory_space<smem>>
    %480 = vector.broadcast %479 : f32 to vector<2x128xf32>
    %481 = arith.mulf %480, %374 : vector<2x128xf32>
    %482 = arith.addf %478, %481 : vector<2x128xf32>
    %c16_114 = arith.constant 16 : index
    %483 = memref.load %arg5[%c16_114] : memref<96xf32, #tpu.memory_space<smem>>
    %484 = vector.broadcast %483 : f32 to vector<2x128xf32>
    %485 = arith.mulf %484, %295 : vector<2x128xf32>
    %486 = arith.addf %482, %485 : vector<2x128xf32>
    %c17_115 = arith.constant 17 : index
    %487 = memref.load %arg5[%c17_115] : memref<96xf32, #tpu.memory_space<smem>>
    %488 = vector.broadcast %487 : f32 to vector<2x128xf32>
    %489 = arith.mulf %488, %378 : vector<2x128xf32>
    %490 = arith.addf %486, %489 : vector<2x128xf32>
    %c18_116 = arith.constant 18 : index
    %491 = memref.load %arg5[%c18_116] : memref<96xf32, #tpu.memory_space<smem>>
    %492 = vector.broadcast %491 : f32 to vector<2x128xf32>
    %493 = arith.mulf %492, %390 : vector<2x128xf32>
    %494 = arith.addf %490, %493 : vector<2x128xf32>
    %c19_117 = arith.constant 19 : index
    %495 = memref.load %arg5[%c19_117] : memref<96xf32, #tpu.memory_space<smem>>
    %496 = vector.broadcast %495 : f32 to vector<2x128xf32>
    %497 = arith.mulf %496, %308 : vector<2x128xf32>
    %498 = arith.addf %494, %497 : vector<2x128xf32>
    %c20_118 = arith.constant 20 : index
    %499 = memref.load %arg5[%c20_118] : memref<96xf32, #tpu.memory_space<smem>>
    %500 = vector.broadcast %499 : f32 to vector<2x128xf32>
    %501 = arith.mulf %500, %394 : vector<2x128xf32>
    %502 = arith.addf %498, %501 : vector<2x128xf32>
    %c21_119 = arith.constant 21 : index
    %503 = memref.load %arg5[%c21_119] : memref<96xf32, #tpu.memory_space<smem>>
    %504 = vector.broadcast %503 : f32 to vector<2x128xf32>
    %505 = arith.mulf %504, %406 : vector<2x128xf32>
    %506 = arith.addf %502, %505 : vector<2x128xf32>
    %c22_120 = arith.constant 22 : index
    %507 = memref.load %arg5[%c22_120] : memref<96xf32, #tpu.memory_space<smem>>
    %508 = vector.broadcast %507 : f32 to vector<2x128xf32>
    %509 = arith.mulf %508, %321 : vector<2x128xf32>
    %510 = arith.addf %506, %509 : vector<2x128xf32>
    %c23_121 = arith.constant 23 : index
    %511 = memref.load %arg5[%c23_121] : memref<96xf32, #tpu.memory_space<smem>>
    %512 = vector.broadcast %511 : f32 to vector<2x128xf32>
    %513 = arith.mulf %512, %410 : vector<2x128xf32>
    %514 = arith.addf %510, %513 : vector<2x128xf32>
    %cst_122 = arith.constant 0.000000e+00 : f32
    %515 = vector.broadcast %cst_122 : f32 to vector<2x128xf32>
    %c2_123 = arith.constant 2 : index
    %516 = memref.load %arg6[%c2_123] : memref<8xf32, #tpu.memory_space<smem>>
    %517 = vector.broadcast %516 : f32 to vector<2x128xf32>
    %518 = arith.addf %515, %517 : vector<2x128xf32>
    %c24 = arith.constant 24 : index
    %519 = memref.load %arg5[%c24] : memref<96xf32, #tpu.memory_space<smem>>
    %520 = vector.broadcast %519 : f32 to vector<2x128xf32>
    %521 = arith.mulf %520, %358 : vector<2x128xf32>
    %522 = arith.addf %518, %521 : vector<2x128xf32>
    %c25 = arith.constant 25 : index
    %523 = memref.load %arg5[%c25] : memref<96xf32, #tpu.memory_space<smem>>
    %524 = vector.broadcast %523 : f32 to vector<2x128xf32>
    %525 = arith.mulf %524, %282 : vector<2x128xf32>
    %526 = arith.addf %522, %525 : vector<2x128xf32>
    %c26 = arith.constant 26 : index
    %527 = memref.load %arg5[%c26] : memref<96xf32, #tpu.memory_space<smem>>
    %528 = vector.broadcast %527 : f32 to vector<2x128xf32>
    %529 = arith.mulf %528, %362 : vector<2x128xf32>
    %530 = arith.addf %526, %529 : vector<2x128xf32>
    %c27 = arith.constant 27 : index
    %531 = memref.load %arg5[%c27] : memref<96xf32, #tpu.memory_space<smem>>
    %532 = vector.broadcast %531 : f32 to vector<2x128xf32>
    %533 = arith.mulf %532, %374 : vector<2x128xf32>
    %534 = arith.addf %530, %533 : vector<2x128xf32>
    %c28 = arith.constant 28 : index
    %535 = memref.load %arg5[%c28] : memref<96xf32, #tpu.memory_space<smem>>
    %536 = vector.broadcast %535 : f32 to vector<2x128xf32>
    %537 = arith.mulf %536, %295 : vector<2x128xf32>
    %538 = arith.addf %534, %537 : vector<2x128xf32>
    %c29 = arith.constant 29 : index
    %539 = memref.load %arg5[%c29] : memref<96xf32, #tpu.memory_space<smem>>
    %540 = vector.broadcast %539 : f32 to vector<2x128xf32>
    %541 = arith.mulf %540, %378 : vector<2x128xf32>
    %542 = arith.addf %538, %541 : vector<2x128xf32>
    %c30 = arith.constant 30 : index
    %543 = memref.load %arg5[%c30] : memref<96xf32, #tpu.memory_space<smem>>
    %544 = vector.broadcast %543 : f32 to vector<2x128xf32>
    %545 = arith.mulf %544, %390 : vector<2x128xf32>
    %546 = arith.addf %542, %545 : vector<2x128xf32>
    %c31 = arith.constant 31 : index
    %547 = memref.load %arg5[%c31] : memref<96xf32, #tpu.memory_space<smem>>
    %548 = vector.broadcast %547 : f32 to vector<2x128xf32>
    %549 = arith.mulf %548, %308 : vector<2x128xf32>
    %550 = arith.addf %546, %549 : vector<2x128xf32>
    %c32 = arith.constant 32 : index
    %551 = memref.load %arg5[%c32] : memref<96xf32, #tpu.memory_space<smem>>
    %552 = vector.broadcast %551 : f32 to vector<2x128xf32>
    %553 = arith.mulf %552, %394 : vector<2x128xf32>
    %554 = arith.addf %550, %553 : vector<2x128xf32>
    %c33 = arith.constant 33 : index
    %555 = memref.load %arg5[%c33] : memref<96xf32, #tpu.memory_space<smem>>
    %556 = vector.broadcast %555 : f32 to vector<2x128xf32>
    %557 = arith.mulf %556, %406 : vector<2x128xf32>
    %558 = arith.addf %554, %557 : vector<2x128xf32>
    %c34 = arith.constant 34 : index
    %559 = memref.load %arg5[%c34] : memref<96xf32, #tpu.memory_space<smem>>
    %560 = vector.broadcast %559 : f32 to vector<2x128xf32>
    %561 = arith.mulf %560, %321 : vector<2x128xf32>
    %562 = arith.addf %558, %561 : vector<2x128xf32>
    %c35 = arith.constant 35 : index
    %563 = memref.load %arg5[%c35] : memref<96xf32, #tpu.memory_space<smem>>
    %564 = vector.broadcast %563 : f32 to vector<2x128xf32>
    %565 = arith.mulf %564, %410 : vector<2x128xf32>
    %566 = arith.addf %562, %565 : vector<2x128xf32>
    %cst_124 = arith.constant 0.000000e+00 : f32
    %567 = vector.broadcast %cst_124 : f32 to vector<2x128xf32>
    %c3_125 = arith.constant 3 : index
    %568 = memref.load %arg6[%c3_125] : memref<8xf32, #tpu.memory_space<smem>>
    %569 = vector.broadcast %568 : f32 to vector<2x128xf32>
    %570 = arith.addf %567, %569 : vector<2x128xf32>
    %c36 = arith.constant 36 : index
    %571 = memref.load %arg5[%c36] : memref<96xf32, #tpu.memory_space<smem>>
    %572 = vector.broadcast %571 : f32 to vector<2x128xf32>
    %573 = arith.mulf %572, %358 : vector<2x128xf32>
    %574 = arith.addf %570, %573 : vector<2x128xf32>
    %c37 = arith.constant 37 : index
    %575 = memref.load %arg5[%c37] : memref<96xf32, #tpu.memory_space<smem>>
    %576 = vector.broadcast %575 : f32 to vector<2x128xf32>
    %577 = arith.mulf %576, %282 : vector<2x128xf32>
    %578 = arith.addf %574, %577 : vector<2x128xf32>
    %c38 = arith.constant 38 : index
    %579 = memref.load %arg5[%c38] : memref<96xf32, #tpu.memory_space<smem>>
    %580 = vector.broadcast %579 : f32 to vector<2x128xf32>
    %581 = arith.mulf %580, %362 : vector<2x128xf32>
    %582 = arith.addf %578, %581 : vector<2x128xf32>
    %c39 = arith.constant 39 : index
    %583 = memref.load %arg5[%c39] : memref<96xf32, #tpu.memory_space<smem>>
    %584 = vector.broadcast %583 : f32 to vector<2x128xf32>
    %585 = arith.mulf %584, %374 : vector<2x128xf32>
    %586 = arith.addf %582, %585 : vector<2x128xf32>
    %c40 = arith.constant 40 : index
    %587 = memref.load %arg5[%c40] : memref<96xf32, #tpu.memory_space<smem>>
    %588 = vector.broadcast %587 : f32 to vector<2x128xf32>
    %589 = arith.mulf %588, %295 : vector<2x128xf32>
    %590 = arith.addf %586, %589 : vector<2x128xf32>
    %c41 = arith.constant 41 : index
    %591 = memref.load %arg5[%c41] : memref<96xf32, #tpu.memory_space<smem>>
    %592 = vector.broadcast %591 : f32 to vector<2x128xf32>
    %593 = arith.mulf %592, %378 : vector<2x128xf32>
    %594 = arith.addf %590, %593 : vector<2x128xf32>
    %c42 = arith.constant 42 : index
    %595 = memref.load %arg5[%c42] : memref<96xf32, #tpu.memory_space<smem>>
    %596 = vector.broadcast %595 : f32 to vector<2x128xf32>
    %597 = arith.mulf %596, %390 : vector<2x128xf32>
    %598 = arith.addf %594, %597 : vector<2x128xf32>
    %c43 = arith.constant 43 : index
    %599 = memref.load %arg5[%c43] : memref<96xf32, #tpu.memory_space<smem>>
    %600 = vector.broadcast %599 : f32 to vector<2x128xf32>
    %601 = arith.mulf %600, %308 : vector<2x128xf32>
    %602 = arith.addf %598, %601 : vector<2x128xf32>
    %c44 = arith.constant 44 : index
    %603 = memref.load %arg5[%c44] : memref<96xf32, #tpu.memory_space<smem>>
    %604 = vector.broadcast %603 : f32 to vector<2x128xf32>
    %605 = arith.mulf %604, %394 : vector<2x128xf32>
    %606 = arith.addf %602, %605 : vector<2x128xf32>
    %c45 = arith.constant 45 : index
    %607 = memref.load %arg5[%c45] : memref<96xf32, #tpu.memory_space<smem>>
    %608 = vector.broadcast %607 : f32 to vector<2x128xf32>
    %609 = arith.mulf %608, %406 : vector<2x128xf32>
    %610 = arith.addf %606, %609 : vector<2x128xf32>
    %c46 = arith.constant 46 : index
    %611 = memref.load %arg5[%c46] : memref<96xf32, #tpu.memory_space<smem>>
    %612 = vector.broadcast %611 : f32 to vector<2x128xf32>
    %613 = arith.mulf %612, %321 : vector<2x128xf32>
    %614 = arith.addf %610, %613 : vector<2x128xf32>
    %c47 = arith.constant 47 : index
    %615 = memref.load %arg5[%c47] : memref<96xf32, #tpu.memory_space<smem>>
    %616 = vector.broadcast %615 : f32 to vector<2x128xf32>
    %617 = arith.mulf %616, %410 : vector<2x128xf32>
    %618 = arith.addf %614, %617 : vector<2x128xf32>
    %cst_126 = arith.constant 0.000000e+00 : f32
    %619 = vector.broadcast %cst_126 : f32 to vector<2x128xf32>
    %c4_127 = arith.constant 4 : index
    %620 = memref.load %arg6[%c4_127] : memref<8xf32, #tpu.memory_space<smem>>
    %621 = vector.broadcast %620 : f32 to vector<2x128xf32>
    %622 = arith.addf %619, %621 : vector<2x128xf32>
    %c48 = arith.constant 48 : index
    %623 = memref.load %arg5[%c48] : memref<96xf32, #tpu.memory_space<smem>>
    %624 = vector.broadcast %623 : f32 to vector<2x128xf32>
    %625 = arith.mulf %624, %358 : vector<2x128xf32>
    %626 = arith.addf %622, %625 : vector<2x128xf32>
    %c49 = arith.constant 49 : index
    %627 = memref.load %arg5[%c49] : memref<96xf32, #tpu.memory_space<smem>>
    %628 = vector.broadcast %627 : f32 to vector<2x128xf32>
    %629 = arith.mulf %628, %282 : vector<2x128xf32>
    %630 = arith.addf %626, %629 : vector<2x128xf32>
    %c50 = arith.constant 50 : index
    %631 = memref.load %arg5[%c50] : memref<96xf32, #tpu.memory_space<smem>>
    %632 = vector.broadcast %631 : f32 to vector<2x128xf32>
    %633 = arith.mulf %632, %362 : vector<2x128xf32>
    %634 = arith.addf %630, %633 : vector<2x128xf32>
    %c51 = arith.constant 51 : index
    %635 = memref.load %arg5[%c51] : memref<96xf32, #tpu.memory_space<smem>>
    %636 = vector.broadcast %635 : f32 to vector<2x128xf32>
    %637 = arith.mulf %636, %374 : vector<2x128xf32>
    %638 = arith.addf %634, %637 : vector<2x128xf32>
    %c52 = arith.constant 52 : index
    %639 = memref.load %arg5[%c52] : memref<96xf32, #tpu.memory_space<smem>>
    %640 = vector.broadcast %639 : f32 to vector<2x128xf32>
    %641 = arith.mulf %640, %295 : vector<2x128xf32>
    %642 = arith.addf %638, %641 : vector<2x128xf32>
    %c53 = arith.constant 53 : index
    %643 = memref.load %arg5[%c53] : memref<96xf32, #tpu.memory_space<smem>>
    %644 = vector.broadcast %643 : f32 to vector<2x128xf32>
    %645 = arith.mulf %644, %378 : vector<2x128xf32>
    %646 = arith.addf %642, %645 : vector<2x128xf32>
    %c54 = arith.constant 54 : index
    %647 = memref.load %arg5[%c54] : memref<96xf32, #tpu.memory_space<smem>>
    %648 = vector.broadcast %647 : f32 to vector<2x128xf32>
    %649 = arith.mulf %648, %390 : vector<2x128xf32>
    %650 = arith.addf %646, %649 : vector<2x128xf32>
    %c55 = arith.constant 55 : index
    %651 = memref.load %arg5[%c55] : memref<96xf32, #tpu.memory_space<smem>>
    %652 = vector.broadcast %651 : f32 to vector<2x128xf32>
    %653 = arith.mulf %652, %308 : vector<2x128xf32>
    %654 = arith.addf %650, %653 : vector<2x128xf32>
    %c56 = arith.constant 56 : index
    %655 = memref.load %arg5[%c56] : memref<96xf32, #tpu.memory_space<smem>>
    %656 = vector.broadcast %655 : f32 to vector<2x128xf32>
    %657 = arith.mulf %656, %394 : vector<2x128xf32>
    %658 = arith.addf %654, %657 : vector<2x128xf32>
    %c57 = arith.constant 57 : index
    %659 = memref.load %arg5[%c57] : memref<96xf32, #tpu.memory_space<smem>>
    %660 = vector.broadcast %659 : f32 to vector<2x128xf32>
    %661 = arith.mulf %660, %406 : vector<2x128xf32>
    %662 = arith.addf %658, %661 : vector<2x128xf32>
    %c58 = arith.constant 58 : index
    %663 = memref.load %arg5[%c58] : memref<96xf32, #tpu.memory_space<smem>>
    %664 = vector.broadcast %663 : f32 to vector<2x128xf32>
    %665 = arith.mulf %664, %321 : vector<2x128xf32>
    %666 = arith.addf %662, %665 : vector<2x128xf32>
    %c59 = arith.constant 59 : index
    %667 = memref.load %arg5[%c59] : memref<96xf32, #tpu.memory_space<smem>>
    %668 = vector.broadcast %667 : f32 to vector<2x128xf32>
    %669 = arith.mulf %668, %410 : vector<2x128xf32>
    %670 = arith.addf %666, %669 : vector<2x128xf32>
    %cst_128 = arith.constant 0.000000e+00 : f32
    %671 = vector.broadcast %cst_128 : f32 to vector<2x128xf32>
    %c5_129 = arith.constant 5 : index
    %672 = memref.load %arg6[%c5_129] : memref<8xf32, #tpu.memory_space<smem>>
    %673 = vector.broadcast %672 : f32 to vector<2x128xf32>
    %674 = arith.addf %671, %673 : vector<2x128xf32>
    %c60 = arith.constant 60 : index
    %675 = memref.load %arg5[%c60] : memref<96xf32, #tpu.memory_space<smem>>
    %676 = vector.broadcast %675 : f32 to vector<2x128xf32>
    %677 = arith.mulf %676, %358 : vector<2x128xf32>
    %678 = arith.addf %674, %677 : vector<2x128xf32>
    %c61 = arith.constant 61 : index
    %679 = memref.load %arg5[%c61] : memref<96xf32, #tpu.memory_space<smem>>
    %680 = vector.broadcast %679 : f32 to vector<2x128xf32>
    %681 = arith.mulf %680, %282 : vector<2x128xf32>
    %682 = arith.addf %678, %681 : vector<2x128xf32>
    %c62 = arith.constant 62 : index
    %683 = memref.load %arg5[%c62] : memref<96xf32, #tpu.memory_space<smem>>
    %684 = vector.broadcast %683 : f32 to vector<2x128xf32>
    %685 = arith.mulf %684, %362 : vector<2x128xf32>
    %686 = arith.addf %682, %685 : vector<2x128xf32>
    %c63 = arith.constant 63 : index
    %687 = memref.load %arg5[%c63] : memref<96xf32, #tpu.memory_space<smem>>
    %688 = vector.broadcast %687 : f32 to vector<2x128xf32>
    %689 = arith.mulf %688, %374 : vector<2x128xf32>
    %690 = arith.addf %686, %689 : vector<2x128xf32>
    %c64 = arith.constant 64 : index
    %691 = memref.load %arg5[%c64] : memref<96xf32, #tpu.memory_space<smem>>
    %692 = vector.broadcast %691 : f32 to vector<2x128xf32>
    %693 = arith.mulf %692, %295 : vector<2x128xf32>
    %694 = arith.addf %690, %693 : vector<2x128xf32>
    %c65 = arith.constant 65 : index
    %695 = memref.load %arg5[%c65] : memref<96xf32, #tpu.memory_space<smem>>
    %696 = vector.broadcast %695 : f32 to vector<2x128xf32>
    %697 = arith.mulf %696, %378 : vector<2x128xf32>
    %698 = arith.addf %694, %697 : vector<2x128xf32>
    %c66 = arith.constant 66 : index
    %699 = memref.load %arg5[%c66] : memref<96xf32, #tpu.memory_space<smem>>
    %700 = vector.broadcast %699 : f32 to vector<2x128xf32>
    %701 = arith.mulf %700, %390 : vector<2x128xf32>
    %702 = arith.addf %698, %701 : vector<2x128xf32>
    %c67 = arith.constant 67 : index
    %703 = memref.load %arg5[%c67] : memref<96xf32, #tpu.memory_space<smem>>
    %704 = vector.broadcast %703 : f32 to vector<2x128xf32>
    %705 = arith.mulf %704, %308 : vector<2x128xf32>
    %706 = arith.addf %702, %705 : vector<2x128xf32>
    %c68 = arith.constant 68 : index
    %707 = memref.load %arg5[%c68] : memref<96xf32, #tpu.memory_space<smem>>
    %708 = vector.broadcast %707 : f32 to vector<2x128xf32>
    %709 = arith.mulf %708, %394 : vector<2x128xf32>
    %710 = arith.addf %706, %709 : vector<2x128xf32>
    %c69 = arith.constant 69 : index
    %711 = memref.load %arg5[%c69] : memref<96xf32, #tpu.memory_space<smem>>
    %712 = vector.broadcast %711 : f32 to vector<2x128xf32>
    %713 = arith.mulf %712, %406 : vector<2x128xf32>
    %714 = arith.addf %710, %713 : vector<2x128xf32>
    %c70 = arith.constant 70 : index
    %715 = memref.load %arg5[%c70] : memref<96xf32, #tpu.memory_space<smem>>
    %716 = vector.broadcast %715 : f32 to vector<2x128xf32>
    %717 = arith.mulf %716, %321 : vector<2x128xf32>
    %718 = arith.addf %714, %717 : vector<2x128xf32>
    %c71 = arith.constant 71 : index
    %719 = memref.load %arg5[%c71] : memref<96xf32, #tpu.memory_space<smem>>
    %720 = vector.broadcast %719 : f32 to vector<2x128xf32>
    %721 = arith.mulf %720, %410 : vector<2x128xf32>
    %722 = arith.addf %718, %721 : vector<2x128xf32>
    %cst_130 = arith.constant 0.000000e+00 : f32
    %723 = vector.broadcast %cst_130 : f32 to vector<2x128xf32>
    %c6_131 = arith.constant 6 : index
    %724 = memref.load %arg6[%c6_131] : memref<8xf32, #tpu.memory_space<smem>>
    %725 = vector.broadcast %724 : f32 to vector<2x128xf32>
    %726 = arith.addf %723, %725 : vector<2x128xf32>
    %c72 = arith.constant 72 : index
    %727 = memref.load %arg5[%c72] : memref<96xf32, #tpu.memory_space<smem>>
    %728 = vector.broadcast %727 : f32 to vector<2x128xf32>
    %729 = arith.mulf %728, %358 : vector<2x128xf32>
    %730 = arith.addf %726, %729 : vector<2x128xf32>
    %c73 = arith.constant 73 : index
    %731 = memref.load %arg5[%c73] : memref<96xf32, #tpu.memory_space<smem>>
    %732 = vector.broadcast %731 : f32 to vector<2x128xf32>
    %733 = arith.mulf %732, %282 : vector<2x128xf32>
    %734 = arith.addf %730, %733 : vector<2x128xf32>
    %c74 = arith.constant 74 : index
    %735 = memref.load %arg5[%c74] : memref<96xf32, #tpu.memory_space<smem>>
    %736 = vector.broadcast %735 : f32 to vector<2x128xf32>
    %737 = arith.mulf %736, %362 : vector<2x128xf32>
    %738 = arith.addf %734, %737 : vector<2x128xf32>
    %c75 = arith.constant 75 : index
    %739 = memref.load %arg5[%c75] : memref<96xf32, #tpu.memory_space<smem>>
    %740 = vector.broadcast %739 : f32 to vector<2x128xf32>
    %741 = arith.mulf %740, %374 : vector<2x128xf32>
    %742 = arith.addf %738, %741 : vector<2x128xf32>
    %c76 = arith.constant 76 : index
    %743 = memref.load %arg5[%c76] : memref<96xf32, #tpu.memory_space<smem>>
    %744 = vector.broadcast %743 : f32 to vector<2x128xf32>
    %745 = arith.mulf %744, %295 : vector<2x128xf32>
    %746 = arith.addf %742, %745 : vector<2x128xf32>
    %c77 = arith.constant 77 : index
    %747 = memref.load %arg5[%c77] : memref<96xf32, #tpu.memory_space<smem>>
    %748 = vector.broadcast %747 : f32 to vector<2x128xf32>
    %749 = arith.mulf %748, %378 : vector<2x128xf32>
    %750 = arith.addf %746, %749 : vector<2x128xf32>
    %c78 = arith.constant 78 : index
    %751 = memref.load %arg5[%c78] : memref<96xf32, #tpu.memory_space<smem>>
    %752 = vector.broadcast %751 : f32 to vector<2x128xf32>
    %753 = arith.mulf %752, %390 : vector<2x128xf32>
    %754 = arith.addf %750, %753 : vector<2x128xf32>
    %c79 = arith.constant 79 : index
    %755 = memref.load %arg5[%c79] : memref<96xf32, #tpu.memory_space<smem>>
    %756 = vector.broadcast %755 : f32 to vector<2x128xf32>
    %757 = arith.mulf %756, %308 : vector<2x128xf32>
    %758 = arith.addf %754, %757 : vector<2x128xf32>
    %c80 = arith.constant 80 : index
    %759 = memref.load %arg5[%c80] : memref<96xf32, #tpu.memory_space<smem>>
    %760 = vector.broadcast %759 : f32 to vector<2x128xf32>
    %761 = arith.mulf %760, %394 : vector<2x128xf32>
    %762 = arith.addf %758, %761 : vector<2x128xf32>
    %c81 = arith.constant 81 : index
    %763 = memref.load %arg5[%c81] : memref<96xf32, #tpu.memory_space<smem>>
    %764 = vector.broadcast %763 : f32 to vector<2x128xf32>
    %765 = arith.mulf %764, %406 : vector<2x128xf32>
    %766 = arith.addf %762, %765 : vector<2x128xf32>
    %c82 = arith.constant 82 : index
    %767 = memref.load %arg5[%c82] : memref<96xf32, #tpu.memory_space<smem>>
    %768 = vector.broadcast %767 : f32 to vector<2x128xf32>
    %769 = arith.mulf %768, %321 : vector<2x128xf32>
    %770 = arith.addf %766, %769 : vector<2x128xf32>
    %c83 = arith.constant 83 : index
    %771 = memref.load %arg5[%c83] : memref<96xf32, #tpu.memory_space<smem>>
    %772 = vector.broadcast %771 : f32 to vector<2x128xf32>
    %773 = arith.mulf %772, %410 : vector<2x128xf32>
    %774 = arith.addf %770, %773 : vector<2x128xf32>
    %cst_132 = arith.constant 0.000000e+00 : f32
    %775 = vector.broadcast %cst_132 : f32 to vector<2x128xf32>
    %c7_133 = arith.constant 7 : index
    %776 = memref.load %arg6[%c7_133] : memref<8xf32, #tpu.memory_space<smem>>
    %777 = vector.broadcast %776 : f32 to vector<2x128xf32>
    %778 = arith.addf %775, %777 : vector<2x128xf32>
    %c84 = arith.constant 84 : index
    %779 = memref.load %arg5[%c84] : memref<96xf32, #tpu.memory_space<smem>>
    %780 = vector.broadcast %779 : f32 to vector<2x128xf32>
    %781 = arith.mulf %780, %358 : vector<2x128xf32>
    %782 = arith.addf %778, %781 : vector<2x128xf32>
    %c85 = arith.constant 85 : index
    %783 = memref.load %arg5[%c85] : memref<96xf32, #tpu.memory_space<smem>>
    %784 = vector.broadcast %783 : f32 to vector<2x128xf32>
    %785 = arith.mulf %784, %282 : vector<2x128xf32>
    %786 = arith.addf %782, %785 : vector<2x128xf32>
    %c86 = arith.constant 86 : index
    %787 = memref.load %arg5[%c86] : memref<96xf32, #tpu.memory_space<smem>>
    %788 = vector.broadcast %787 : f32 to vector<2x128xf32>
    %789 = arith.mulf %788, %362 : vector<2x128xf32>
    %790 = arith.addf %786, %789 : vector<2x128xf32>
    %c87 = arith.constant 87 : index
    %791 = memref.load %arg5[%c87] : memref<96xf32, #tpu.memory_space<smem>>
    %792 = vector.broadcast %791 : f32 to vector<2x128xf32>
    %793 = arith.mulf %792, %374 : vector<2x128xf32>
    %794 = arith.addf %790, %793 : vector<2x128xf32>
    %c88 = arith.constant 88 : index
    %795 = memref.load %arg5[%c88] : memref<96xf32, #tpu.memory_space<smem>>
    %796 = vector.broadcast %795 : f32 to vector<2x128xf32>
    %797 = arith.mulf %796, %295 : vector<2x128xf32>
    %798 = arith.addf %794, %797 : vector<2x128xf32>
    %c89 = arith.constant 89 : index
    %799 = memref.load %arg5[%c89] : memref<96xf32, #tpu.memory_space<smem>>
    %800 = vector.broadcast %799 : f32 to vector<2x128xf32>
    %801 = arith.mulf %800, %378 : vector<2x128xf32>
    %802 = arith.addf %798, %801 : vector<2x128xf32>
    %c90 = arith.constant 90 : index
    %803 = memref.load %arg5[%c90] : memref<96xf32, #tpu.memory_space<smem>>
    %804 = vector.broadcast %803 : f32 to vector<2x128xf32>
    %805 = arith.mulf %804, %390 : vector<2x128xf32>
    %806 = arith.addf %802, %805 : vector<2x128xf32>
    %c91 = arith.constant 91 : index
    %807 = memref.load %arg5[%c91] : memref<96xf32, #tpu.memory_space<smem>>
    %808 = vector.broadcast %807 : f32 to vector<2x128xf32>
    %809 = arith.mulf %808, %308 : vector<2x128xf32>
    %810 = arith.addf %806, %809 : vector<2x128xf32>
    %c92 = arith.constant 92 : index
    %811 = memref.load %arg5[%c92] : memref<96xf32, #tpu.memory_space<smem>>
    %812 = vector.broadcast %811 : f32 to vector<2x128xf32>
    %813 = arith.mulf %812, %394 : vector<2x128xf32>
    %814 = arith.addf %810, %813 : vector<2x128xf32>
    %c93 = arith.constant 93 : index
    %815 = memref.load %arg5[%c93] : memref<96xf32, #tpu.memory_space<smem>>
    %816 = vector.broadcast %815 : f32 to vector<2x128xf32>
    %817 = arith.mulf %816, %406 : vector<2x128xf32>
    %818 = arith.addf %814, %817 : vector<2x128xf32>
    %c94 = arith.constant 94 : index
    %819 = memref.load %arg5[%c94] : memref<96xf32, #tpu.memory_space<smem>>
    %820 = vector.broadcast %819 : f32 to vector<2x128xf32>
    %821 = arith.mulf %820, %321 : vector<2x128xf32>
    %822 = arith.addf %818, %821 : vector<2x128xf32>
    %c95 = arith.constant 95 : index
    %823 = memref.load %arg5[%c95] : memref<96xf32, #tpu.memory_space<smem>>
    %824 = vector.broadcast %823 : f32 to vector<2x128xf32>
    %825 = arith.mulf %824, %410 : vector<2x128xf32>
    %826 = arith.addf %822, %825 : vector<2x128xf32>
    %827 = arith.negf %462 : vector<2x128xf32>
    %828 = math.exp %827 : vector<2x128xf32>
    %cst_134 = arith.constant 1.000000e+00 : f32
    %829 = vector.broadcast %cst_134 : f32 to vector<2x128xf32>
    %830 = arith.addf %829, %828 : vector<2x128xf32>
    %831 = arith.divf %829, %830 : vector<2x128xf32>
    %832 = math.tanh %670 : vector<2x128xf32>
    %833 = arith.mulf %831, %832 : vector<2x128xf32>
    %834 = arith.negf %514 : vector<2x128xf32>
    %835 = math.exp %834 : vector<2x128xf32>
    %cst_135 = arith.constant 1.000000e+00 : f32
    %836 = vector.broadcast %cst_135 : f32 to vector<2x128xf32>
    %837 = arith.addf %836, %835 : vector<2x128xf32>
    %838 = arith.divf %836, %837 : vector<2x128xf32>
    %839 = math.tanh %722 : vector<2x128xf32>
    %840 = arith.mulf %838, %839 : vector<2x128xf32>
    %841 = arith.negf %566 : vector<2x128xf32>
    %842 = math.exp %841 : vector<2x128xf32>
    %cst_136 = arith.constant 1.000000e+00 : f32
    %843 = vector.broadcast %cst_136 : f32 to vector<2x128xf32>
    %844 = arith.addf %843, %842 : vector<2x128xf32>
    %845 = arith.divf %843, %844 : vector<2x128xf32>
    %846 = math.tanh %774 : vector<2x128xf32>
    %847 = arith.mulf %845, %846 : vector<2x128xf32>
    %848 = arith.negf %618 : vector<2x128xf32>
    %849 = math.exp %848 : vector<2x128xf32>
    %cst_137 = arith.constant 1.000000e+00 : f32
    %850 = vector.broadcast %cst_137 : f32 to vector<2x128xf32>
    %851 = arith.addf %850, %849 : vector<2x128xf32>
    %852 = arith.divf %850, %851 : vector<2x128xf32>
    %853 = math.tanh %826 : vector<2x128xf32>
    %854 = arith.mulf %852, %853 : vector<2x128xf32>
    %cst_138 = arith.constant 0.000000e+00 : f32
    %855 = vector.broadcast %cst_138 : f32 to vector<2x1xf32>
    %cst_139 = arith.constant 0.000000e+00 : f32
    %856 = vector.broadcast %cst_139 : f32 to vector<2x1xf32>
    %cst_140 = arith.constant 0.000000e+00 : f32
    %857 = vector.shape_cast %346 : vector<1x128xi1> to vector<1x128xi1>
    %858 = vector.broadcast %857 : vector<1x128xi1> to vector<2x128xi1>
    %859 = vector.broadcast %cst_140 : f32 to vector<2x128xf32>
    %860 = arith.select %858, %833, %859 : vector<2x128xi1>, vector<2x128xf32>
    %cst_141 = arith.constant dense<0.000000e+00> : vector<2xf32>
    %861 = vector.multi_reduction <add>, %860, %cst_141 [1] : vector<2x128xf32> to vector<2xf32>
    %862 = vector.shape_cast %861 : vector<2xf32> to vector<2x1xf32>
    %863 = arith.addf %855, %862 : vector<2x1xf32>
    %864 = arith.mulf %860, %860 : vector<2x128xf32>
    %cst_142 = arith.constant dense<0.000000e+00> : vector<2xf32>
    %865 = vector.multi_reduction <add>, %864, %cst_142 [1] : vector<2x128xf32> to vector<2xf32>
    %866 = vector.shape_cast %865 : vector<2xf32> to vector<2x1xf32>
    %867 = arith.addf %856, %866 : vector<2x1xf32>
    %cst_143 = arith.constant 0.000000e+00 : f32
    %868 = vector.shape_cast %346 : vector<1x128xi1> to vector<1x128xi1>
    %869 = vector.broadcast %868 : vector<1x128xi1> to vector<2x128xi1>
    %870 = vector.broadcast %cst_143 : f32 to vector<2x128xf32>
    %871 = arith.select %869, %840, %870 : vector<2x128xi1>, vector<2x128xf32>
    %cst_144 = arith.constant dense<0.000000e+00> : vector<2xf32>
    %872 = vector.multi_reduction <add>, %871, %cst_144 [1] : vector<2x128xf32> to vector<2xf32>
    %873 = vector.shape_cast %872 : vector<2xf32> to vector<2x1xf32>
    %874 = arith.addf %863, %873 : vector<2x1xf32>
    %875 = arith.mulf %871, %871 : vector<2x128xf32>
    %cst_145 = arith.constant dense<0.000000e+00> : vector<2xf32>
    %876 = vector.multi_reduction <add>, %875, %cst_145 [1] : vector<2x128xf32> to vector<2xf32>
    %877 = vector.shape_cast %876 : vector<2xf32> to vector<2x1xf32>
    %878 = arith.addf %867, %877 : vector<2x1xf32>
    %cst_146 = arith.constant 0.000000e+00 : f32
    %879 = vector.shape_cast %346 : vector<1x128xi1> to vector<1x128xi1>
    %880 = vector.broadcast %879 : vector<1x128xi1> to vector<2x128xi1>
    %881 = vector.broadcast %cst_146 : f32 to vector<2x128xf32>
    %882 = arith.select %880, %847, %881 : vector<2x128xi1>, vector<2x128xf32>
    %cst_147 = arith.constant dense<0.000000e+00> : vector<2xf32>
    %883 = vector.multi_reduction <add>, %882, %cst_147 [1] : vector<2x128xf32> to vector<2xf32>
    %884 = vector.shape_cast %883 : vector<2xf32> to vector<2x1xf32>
    %885 = arith.addf %874, %884 : vector<2x1xf32>
    %886 = arith.mulf %882, %882 : vector<2x128xf32>
    %cst_148 = arith.constant dense<0.000000e+00> : vector<2xf32>
    %887 = vector.multi_reduction <add>, %886, %cst_148 [1] : vector<2x128xf32> to vector<2xf32>
    %888 = vector.shape_cast %887 : vector<2xf32> to vector<2x1xf32>
    %889 = arith.addf %878, %888 : vector<2x1xf32>
    %cst_149 = arith.constant 0.000000e+00 : f32
    %890 = vector.shape_cast %346 : vector<1x128xi1> to vector<1x128xi1>
    %891 = vector.broadcast %890 : vector<1x128xi1> to vector<2x128xi1>
    %892 = vector.broadcast %cst_149 : f32 to vector<2x128xf32>
    %893 = arith.select %891, %854, %892 : vector<2x128xi1>, vector<2x128xf32>
    %cst_150 = arith.constant dense<0.000000e+00> : vector<2xf32>
    %894 = vector.multi_reduction <add>, %893, %cst_150 [1] : vector<2x128xf32> to vector<2xf32>
    %895 = vector.shape_cast %894 : vector<2xf32> to vector<2x1xf32>
    %896 = arith.addf %885, %895 : vector<2x1xf32>
    %897 = arith.mulf %893, %893 : vector<2x128xf32>
    %cst_151 = arith.constant dense<0.000000e+00> : vector<2xf32>
    %898 = vector.multi_reduction <add>, %897, %cst_151 [1] : vector<2x128xf32> to vector<2xf32>
    %899 = vector.shape_cast %898 : vector<2xf32> to vector<2x1xf32>
    %900 = arith.addf %889, %899 : vector<2x1xf32>
    %cst_152 = arith.constant 2.560000e+02 : f32
    %901 = vector.broadcast %cst_152 : f32 to vector<2x1xf32>
    %902 = arith.divf %896, %901 : vector<2x1xf32>
    %cst_153 = arith.constant 2.560000e+02 : f32
    %903 = vector.broadcast %cst_153 : f32 to vector<2x1xf32>
    %904 = arith.divf %900, %903 : vector<2x1xf32>
    %905 = arith.mulf %902, %902 : vector<2x1xf32>
    %906 = arith.subf %904, %905 : vector<2x1xf32>
    %cst_154 = arith.constant 9.99999974E-6 : f32
    %907 = vector.broadcast %cst_154 : f32 to vector<2x1xf32>
    %908 = arith.addf %906, %907 : vector<2x1xf32>
    %909 = math.rsqrt %908 : vector<2x1xf32>
    %c0_155 = arith.constant 0 : index
    %c0_156 = arith.constant 0 : index
    %910 = vector.load %arg7[%c0_155, %c0_156] : memref<4x128xf32, #tpu.memory_space<vmem>>, vector<4x128xf32>
    %c0_157 = arith.constant 0 : index
    %c0_158 = arith.constant 0 : index
    %911 = vector.load %arg8[%c0_157, %c0_158] : memref<4x128xf32, #tpu.memory_space<vmem>>, vector<4x128xf32>
    %912 = vector.broadcast %902 : vector<2x1xf32> to vector<2x128xf32>
    %913 = arith.subf %833, %912 : vector<2x128xf32>
    %914 = vector.broadcast %909 : vector<2x1xf32> to vector<2x128xf32>
    %915 = arith.mulf %913, %914 : vector<2x128xf32>
    %916 = vector.extract_strided_slice %910 {offsets = [0, 0], sizes = [1, 128], strides = [1, 1]} : vector<4x128xf32> to vector<1x128xf32>
    %917 = vector.broadcast %916 : vector<1x128xf32> to vector<2x128xf32>
    %918 = arith.mulf %915, %917 : vector<2x128xf32>
    %919 = vector.extract_strided_slice %911 {offsets = [0, 0], sizes = [1, 128], strides = [1, 1]} : vector<4x128xf32> to vector<1x128xf32>
    %920 = vector.broadcast %919 : vector<1x128xf32> to vector<2x128xf32>
    %921 = arith.addf %918, %920 : vector<2x128xf32>
    %c0_159 = arith.constant 0 : index
    %c0_160 = arith.constant 0 : index
    %c0_161 = arith.constant 0 : index
    %922 = vector.load %arg18[%c0_159, %c0_160, %c0_161] : memref<4x2x128xf32, #tpu.memory_space<vmem>>, vector<1x2x128xf32>
    %923 = vector.shape_cast %922 : vector<1x2x128xf32> to vector<2x128xf32>
    %924 = vector.shape_cast %921 : vector<2x128xf32> to vector<1x2x128xf32>
    tpu.vector_store %arg18[%c0_159, %c0_160, %c0_161], %924 {strides = array<i32>} : memref<4x2x128xf32, #tpu.memory_space<vmem>>, vector<1x2x128xf32>,
    %925 = vector.broadcast %902 : vector<2x1xf32> to vector<2x128xf32>
    %926 = arith.subf %840, %925 : vector<2x128xf32>
    %927 = vector.broadcast %909 : vector<2x1xf32> to vector<2x128xf32>
    %928 = arith.mulf %926, %927 : vector<2x128xf32>
    %929 = vector.extract_strided_slice %910 {offsets = [1, 0], sizes = [1, 128], strides = [1, 1]} : vector<4x128xf32> to vector<1x128xf32>
    %930 = vector.broadcast %929 : vector<1x128xf32> to vector<2x128xf32>
    %931 = arith.mulf %928, %930 : vector<2x128xf32>
    %932 = vector.extract_strided_slice %911 {offsets = [1, 0], sizes = [1, 128], strides = [1, 1]} : vector<4x128xf32> to vector<1x128xf32>
    %933 = vector.broadcast %932 : vector<1x128xf32> to vector<2x128xf32>
    %934 = arith.addf %931, %933 : vector<2x128xf32>
    %c1_162 = arith.constant 1 : index
    %c0_163 = arith.constant 0 : index
    %c0_164 = arith.constant 0 : index
    %935 = vector.load %arg18[%c1_162, %c0_163, %c0_164] : memref<4x2x128xf32, #tpu.memory_space<vmem>>, vector<1x2x128xf32>
    %936 = vector.shape_cast %935 : vector<1x2x128xf32> to vector<2x128xf32>
    %937 = vector.shape_cast %934 : vector<2x128xf32> to vector<1x2x128xf32>
    tpu.vector_store %arg18[%c1_162, %c0_163, %c0_164], %937 {strides = array<i32>} : memref<4x2x128xf32, #tpu.memory_space<vmem>>, vector<1x2x128xf32>,
    %938 = vector.broadcast %902 : vector<2x1xf32> to vector<2x128xf32>
    %939 = arith.subf %847, %938 : vector<2x128xf32>
    %940 = vector.broadcast %909 : vector<2x1xf32> to vector<2x128xf32>
    %941 = arith.mulf %939, %940 : vector<2x128xf32>
    %942 = vector.extract_strided_slice %910 {offsets = [2, 0], sizes = [1, 128], strides = [1, 1]} : vector<4x128xf32> to vector<1x128xf32>
    %943 = vector.broadcast %942 : vector<1x128xf32> to vector<2x128xf32>
    %944 = arith.mulf %941, %943 : vector<2x128xf32>
    %945 = vector.extract_strided_slice %911 {offsets = [2, 0], sizes = [1, 128], strides = [1, 1]} : vector<4x128xf32> to vector<1x128xf32>
    %946 = vector.broadcast %945 : vector<1x128xf32> to vector<2x128xf32>
    %947 = arith.addf %944, %946 : vector<2x128xf32>
    %c2_165 = arith.constant 2 : index
    %c0_166 = arith.constant 0 : index
    %c0_167 = arith.constant 0 : index
    %948 = vector.load %arg18[%c2_165, %c0_166, %c0_167] : memref<4x2x128xf32, #tpu.memory_space<vmem>>, vector<1x2x128xf32>
    %949 = vector.shape_cast %948 : vector<1x2x128xf32> to vector<2x128xf32>
    %950 = vector.shape_cast %947 : vector<2x128xf32> to vector<1x2x128xf32>
    tpu.vector_store %arg18[%c2_165, %c0_166, %c0_167], %950 {strides = array<i32>} : memref<4x2x128xf32, #tpu.memory_space<vmem>>, vector<1x2x128xf32>,
    %951 = vector.broadcast %902 : vector<2x1xf32> to vector<2x128xf32>
    %952 = arith.subf %854, %951 : vector<2x128xf32>
    %953 = vector.broadcast %909 : vector<2x1xf32> to vector<2x128xf32>
    %954 = arith.mulf %952, %953 : vector<2x128xf32>
    %955 = vector.extract_strided_slice %910 {offsets = [3, 0], sizes = [1, 128], strides = [1, 1]} : vector<4x128xf32> to vector<1x128xf32>
    %956 = vector.broadcast %955 : vector<1x128xf32> to vector<2x128xf32>
    %957 = arith.mulf %954, %956 : vector<2x128xf32>
    %958 = vector.extract_strided_slice %911 {offsets = [3, 0], sizes = [1, 128], strides = [1, 1]} : vector<4x128xf32> to vector<1x128xf32>
    %959 = vector.broadcast %958 : vector<1x128xf32> to vector<2x128xf32>
    %960 = arith.addf %957, %959 : vector<2x128xf32>
    %c3_168 = arith.constant 3 : index
    %c0_169 = arith.constant 0 : index
    %c0_170 = arith.constant 0 : index
    %961 = vector.load %arg18[%c3_168, %c0_169, %c0_170] : memref<4x2x128xf32, #tpu.memory_space<vmem>>, vector<1x2x128xf32>
    %962 = vector.shape_cast %961 : vector<1x2x128xf32> to vector<2x128xf32>
    %963 = vector.shape_cast %960 : vector<2x128xf32> to vector<1x2x128xf32>
    tpu.vector_store %arg18[%c3_168, %c0_169, %c0_170], %963 {strides = array<i32>} : memref<4x2x128xf32, #tpu.memory_space<vmem>>, vector<1x2x128xf32>,
    %c2_i32_171 = arith.constant 2 : i32
    %964 = vector.broadcast %c2_i32_171 : i32 to vector<1x128xi32>
    %965 = arith.cmpi sge, %16, %964 : vector<1x128xi32>
    %c14_i32 = arith.constant 14 : i32
    %966 = vector.broadcast %c14_i32 : i32 to vector<1x128xi32>
    %967 = arith.cmpi slt, %16, %966 : vector<1x128xi32>
    %c4_i32 = arith.constant 4 : i32
    %c0_i32_172 = arith.constant 0 : i32
    %968 = arith.cmpi eq, %c4_i32, %c0_i32_172 : i32
    %c1_i32_173 = arith.constant 1 : i32
    %969 = arith.select %968, %c1_i32_173, %c4_i32 : i32
    %970 = vector.broadcast %969 : i32 to vector<1x128xi32>
    %971 = arith.remsi %16, %970 : vector<1x128xi32>
    %c0_i32_174 = arith.constant 0 : i32
    %972 = vector.broadcast %c0_i32_174 : i32 to vector<1x128xi32>
    %973 = arith.cmpi ne, %971, %972 : vector<1x128xi32>
    %c0_i32_175 = arith.constant 0 : i32
    %974 = vector.broadcast %c0_i32_175 : i32 to vector<1x128xi32>
    %975 = arith.cmpi slt, %971, %974 : vector<1x128xi32>
    %c0_i32_176 = arith.constant 0 : i32
    %976 = arith.cmpi slt, %969, %c0_i32_176 : i32
    %977 = vector.broadcast %976 : i1 to vector<1x128xi1>
    %978 = vector.broadcast %977 : vector<1x128xi1> to vector<1x128xi1>
    %979 = arith.xori %975, %978 : vector<1x128xi1>
    %980 = arith.andi %979, %973 : vector<1x128xi1>
    %981 = vector.broadcast %969 : i32 to vector<1x128xi32>
    %982 = arith.addi %971, %981 : vector<1x128xi32>
    %983 = arith.select %980, %982, %971 : vector<1x128xi1>, vector<1x128xi32>
    %c0_i32_177 = arith.constant 0 : i32
    %984 = vector.broadcast %c0_i32_177 : i32 to vector<1x128xi32>
    %985 = arith.cmpi eq, %983, %984 : vector<1x128xi32>
    %c2_i32_178 = arith.constant 2 : i32
    %986 = tpu.dynamic_rotate %921 by %c2_i32_178 dim 1 : vector<2x128xf32>, i32 -> vector<2x128xf32>
    %c126_i32 = arith.constant 126 : i32
    %987 = tpu.dynamic_rotate %921 by %c126_i32 dim 1 : vector<2x128xf32>, i32 -> vector<2x128xf32>
    %988 = vector.shape_cast %20 : vector<1x1xi1> to vector<1x1xi1>
    %989 = vector.broadcast %988 : vector<1x1xi1> to vector<2x128xi1>
    %990 = arith.select %989, %986, %987 : vector<2x128xi1>, vector<2x128xf32>
    %991 = vector.shape_cast %20 : vector<1x1xi1> to vector<1x1xi1>
    %992 = vector.broadcast %991 : vector<1x1xi1> to vector<2x128xi1>
    %993 = arith.select %992, %987, %986 : vector<2x128xi1>, vector<2x128xf32>
    %cst_179 = arith.constant 0.000000e+00 : f32
    %994 = vector.shape_cast %965 : vector<1x128xi1> to vector<1x128xi1>
    %995 = vector.broadcast %994 : vector<1x128xi1> to vector<2x128xi1>
    %996 = vector.broadcast %cst_179 : f32 to vector<2x128xf32>
    %997 = arith.select %995, %990, %996 : vector<2x128xi1>, vector<2x128xf32>
    %cst_180 = arith.constant 0.000000e+00 : f32
    %998 = vector.shape_cast %967 : vector<1x128xi1> to vector<1x128xi1>
    %999 = vector.broadcast %998 : vector<1x128xi1> to vector<2x128xi1>
    %1000 = vector.broadcast %cst_180 : f32 to vector<2x128xf32>
    %1001 = arith.select %999, %993, %1000 : vector<2x128xi1>, vector<2x128xf32>
    %c2_i32_181 = arith.constant 2 : i32
    %1002 = tpu.dynamic_rotate %934 by %c2_i32_181 dim 1 : vector<2x128xf32>, i32 -> vector<2x128xf32>
    %c126_i32_182 = arith.constant 126 : i32
    %1003 = tpu.dynamic_rotate %934 by %c126_i32_182 dim 1 : vector<2x128xf32>, i32 -> vector<2x128xf32>
    %1004 = vector.shape_cast %20 : vector<1x1xi1> to vector<1x1xi1>
    %1005 = vector.broadcast %1004 : vector<1x1xi1> to vector<2x128xi1>
    %1006 = arith.select %1005, %1002, %1003 : vector<2x128xi1>, vector<2x128xf32>
    %1007 = vector.shape_cast %20 : vector<1x1xi1> to vector<1x1xi1>
    %1008 = vector.broadcast %1007 : vector<1x1xi1> to vector<2x128xi1>
    %1009 = arith.select %1008, %1003, %1002 : vector<2x128xi1>, vector<2x128xf32>
    %cst_183 = arith.constant 0.000000e+00 : f32
    %1010 = vector.shape_cast %965 : vector<1x128xi1> to vector<1x128xi1>
    %1011 = vector.broadcast %1010 : vector<1x128xi1> to vector<2x128xi1>
    %1012 = vector.broadcast %cst_183 : f32 to vector<2x128xf32>
    %1013 = arith.select %1011, %1006, %1012 : vector<2x128xi1>, vector<2x128xf32>
    %cst_184 = arith.constant 0.000000e+00 : f32
    %1014 = vector.shape_cast %967 : vector<1x128xi1> to vector<1x128xi1>
    %1015 = vector.broadcast %1014 : vector<1x128xi1> to vector<2x128xi1>
    %1016 = vector.broadcast %cst_184 : f32 to vector<2x128xf32>
    %1017 = arith.select %1015, %1009, %1016 : vector<2x128xi1>, vector<2x128xf32>
    %c2_i32_185 = arith.constant 2 : i32
    %1018 = tpu.dynamic_rotate %947 by %c2_i32_185 dim 1 : vector<2x128xf32>, i32 -> vector<2x128xf32>
    %c126_i32_186 = arith.constant 126 : i32
    %1019 = tpu.dynamic_rotate %947 by %c126_i32_186 dim 1 : vector<2x128xf32>, i32 -> vector<2x128xf32>
    %1020 = vector.shape_cast %20 : vector<1x1xi1> to vector<1x1xi1>
    %1021 = vector.broadcast %1020 : vector<1x1xi1> to vector<2x128xi1>
    %1022 = arith.select %1021, %1018, %1019 : vector<2x128xi1>, vector<2x128xf32>
    %1023 = vector.shape_cast %20 : vector<1x1xi1> to vector<1x1xi1>
    %1024 = vector.broadcast %1023 : vector<1x1xi1> to vector<2x128xi1>
    %1025 = arith.select %1024, %1019, %1018 : vector<2x128xi1>, vector<2x128xf32>
    %cst_187 = arith.constant 0.000000e+00 : f32
    %1026 = vector.shape_cast %965 : vector<1x128xi1> to vector<1x128xi1>
    %1027 = vector.broadcast %1026 : vector<1x128xi1> to vector<2x128xi1>
    %1028 = vector.broadcast %cst_187 : f32 to vector<2x128xf32>
    %1029 = arith.select %1027, %1022, %1028 : vector<2x128xi1>, vector<2x128xf32>
    %cst_188 = arith.constant 0.000000e+00 : f32
    %1030 = vector.shape_cast %967 : vector<1x128xi1> to vector<1x128xi1>
    %1031 = vector.broadcast %1030 : vector<1x128xi1> to vector<2x128xi1>
    %1032 = vector.broadcast %cst_188 : f32 to vector<2x128xf32>
    %1033 = arith.select %1031, %1025, %1032 : vector<2x128xi1>, vector<2x128xf32>
    %c2_i32_189 = arith.constant 2 : i32
    %1034 = tpu.dynamic_rotate %960 by %c2_i32_189 dim 1 : vector<2x128xf32>, i32 -> vector<2x128xf32>
    %c126_i32_190 = arith.constant 126 : i32
    %1035 = tpu.dynamic_rotate %960 by %c126_i32_190 dim 1 : vector<2x128xf32>, i32 -> vector<2x128xf32>
    %1036 = vector.shape_cast %20 : vector<1x1xi1> to vector<1x1xi1>
    %1037 = vector.broadcast %1036 : vector<1x1xi1> to vector<2x128xi1>
    %1038 = arith.select %1037, %1034, %1035 : vector<2x128xi1>, vector<2x128xf32>
    %1039 = vector.shape_cast %20 : vector<1x1xi1> to vector<1x1xi1>
    %1040 = vector.broadcast %1039 : vector<1x1xi1> to vector<2x128xi1>
    %1041 = arith.select %1040, %1035, %1034 : vector<2x128xi1>, vector<2x128xf32>
    %cst_191 = arith.constant 0.000000e+00 : f32
    %1042 = vector.shape_cast %965 : vector<1x128xi1> to vector<1x128xi1>
    %1043 = vector.broadcast %1042 : vector<1x128xi1> to vector<2x128xi1>
    %1044 = vector.broadcast %cst_191 : f32 to vector<2x128xf32>
    %1045 = arith.select %1043, %1038, %1044 : vector<2x128xi1>, vector<2x128xf32>
    %cst_192 = arith.constant 0.000000e+00 : f32
    %1046 = vector.shape_cast %967 : vector<1x128xi1> to vector<1x128xi1>
    %1047 = vector.broadcast %1046 : vector<1x128xi1> to vector<2x128xi1>
    %1048 = vector.broadcast %cst_192 : f32 to vector<2x128xf32>
    %1049 = arith.select %1047, %1041, %1048 : vector<2x128xi1>, vector<2x128xf32>
    %cst_193 = arith.constant 0.000000e+00 : f32
    %1050 = vector.broadcast %cst_193 : f32 to vector<2x128xf32>
    %c0_194 = arith.constant 0 : index
    %1051 = memref.load %arg10[%c0_194] : memref<8xf32, #tpu.memory_space<smem>>
    %1052 = vector.broadcast %1051 : f32 to vector<2x128xf32>
    %1053 = arith.addf %1050, %1052 : vector<2x128xf32>
    %c0_195 = arith.constant 0 : index
    %1054 = memref.load %arg9[%c0_195] : memref<96xf32, #tpu.memory_space<smem>>
    %1055 = vector.broadcast %1054 : f32 to vector<2x128xf32>
    %1056 = arith.mulf %1055, %997 : vector<2x128xf32>
    %1057 = arith.addf %1053, %1056 : vector<2x128xf32>
    %c1_196 = arith.constant 1 : index
    %1058 = memref.load %arg9[%c1_196] : memref<96xf32, #tpu.memory_space<smem>>
    %1059 = vector.broadcast %1058 : f32 to vector<2x128xf32>
    %1060 = arith.mulf %1059, %921 : vector<2x128xf32>
    %1061 = arith.addf %1057, %1060 : vector<2x128xf32>
    %c2_197 = arith.constant 2 : index
    %1062 = memref.load %arg9[%c2_197] : memref<96xf32, #tpu.memory_space<smem>>
    %1063 = vector.broadcast %1062 : f32 to vector<2x128xf32>
    %1064 = arith.mulf %1063, %1001 : vector<2x128xf32>
    %1065 = arith.addf %1061, %1064 : vector<2x128xf32>
    %c3_198 = arith.constant 3 : index
    %1066 = memref.load %arg9[%c3_198] : memref<96xf32, #tpu.memory_space<smem>>
    %1067 = vector.broadcast %1066 : f32 to vector<2x128xf32>
    %1068 = arith.mulf %1067, %1013 : vector<2x128xf32>
    %1069 = arith.addf %1065, %1068 : vector<2x128xf32>
    %c4_199 = arith.constant 4 : index
    %1070 = memref.load %arg9[%c4_199] : memref<96xf32, #tpu.memory_space<smem>>
    %1071 = vector.broadcast %1070 : f32 to vector<2x128xf32>
    %1072 = arith.mulf %1071, %934 : vector<2x128xf32>
    %1073 = arith.addf %1069, %1072 : vector<2x128xf32>
    %c5_200 = arith.constant 5 : index
    %1074 = memref.load %arg9[%c5_200] : memref<96xf32, #tpu.memory_space<smem>>
    %1075 = vector.broadcast %1074 : f32 to vector<2x128xf32>
    %1076 = arith.mulf %1075, %1017 : vector<2x128xf32>
    %1077 = arith.addf %1073, %1076 : vector<2x128xf32>
    %c6_201 = arith.constant 6 : index
    %1078 = memref.load %arg9[%c6_201] : memref<96xf32, #tpu.memory_space<smem>>
    %1079 = vector.broadcast %1078 : f32 to vector<2x128xf32>
    %1080 = arith.mulf %1079, %1029 : vector<2x128xf32>
    %1081 = arith.addf %1077, %1080 : vector<2x128xf32>
    %c7_202 = arith.constant 7 : index
    %1082 = memref.load %arg9[%c7_202] : memref<96xf32, #tpu.memory_space<smem>>
    %1083 = vector.broadcast %1082 : f32 to vector<2x128xf32>
    %1084 = arith.mulf %1083, %947 : vector<2x128xf32>
    %1085 = arith.addf %1081, %1084 : vector<2x128xf32>
    %c8_203 = arith.constant 8 : index
    %1086 = memref.load %arg9[%c8_203] : memref<96xf32, #tpu.memory_space<smem>>
    %1087 = vector.broadcast %1086 : f32 to vector<2x128xf32>
    %1088 = arith.mulf %1087, %1033 : vector<2x128xf32>
    %1089 = arith.addf %1085, %1088 : vector<2x128xf32>
    %c9_204 = arith.constant 9 : index
    %1090 = memref.load %arg9[%c9_204] : memref<96xf32, #tpu.memory_space<smem>>
    %1091 = vector.broadcast %1090 : f32 to vector<2x128xf32>
    %1092 = arith.mulf %1091, %1045 : vector<2x128xf32>
    %1093 = arith.addf %1089, %1092 : vector<2x128xf32>
    %c10_205 = arith.constant 10 : index
    %1094 = memref.load %arg9[%c10_205] : memref<96xf32, #tpu.memory_space<smem>>
    %1095 = vector.broadcast %1094 : f32 to vector<2x128xf32>
    %1096 = arith.mulf %1095, %960 : vector<2x128xf32>
    %1097 = arith.addf %1093, %1096 : vector<2x128xf32>
    %c11_206 = arith.constant 11 : index
    %1098 = memref.load %arg9[%c11_206] : memref<96xf32, #tpu.memory_space<smem>>
    %1099 = vector.broadcast %1098 : f32 to vector<2x128xf32>
    %1100 = arith.mulf %1099, %1049 : vector<2x128xf32>
    %1101 = arith.addf %1097, %1100 : vector<2x128xf32>
    %cst_207 = arith.constant 0.000000e+00 : f32
    %1102 = vector.broadcast %cst_207 : f32 to vector<2x128xf32>
    %c1_208 = arith.constant 1 : index
    %1103 = memref.load %arg10[%c1_208] : memref<8xf32, #tpu.memory_space<smem>>
    %1104 = vector.broadcast %1103 : f32 to vector<2x128xf32>
    %1105 = arith.addf %1102, %1104 : vector<2x128xf32>
    %c12_209 = arith.constant 12 : index
    %1106 = memref.load %arg9[%c12_209] : memref<96xf32, #tpu.memory_space<smem>>
    %1107 = vector.broadcast %1106 : f32 to vector<2x128xf32>
    %1108 = arith.mulf %1107, %997 : vector<2x128xf32>
    %1109 = arith.addf %1105, %1108 : vector<2x128xf32>
    %c13_210 = arith.constant 13 : index
    %1110 = memref.load %arg9[%c13_210] : memref<96xf32, #tpu.memory_space<smem>>
    %1111 = vector.broadcast %1110 : f32 to vector<2x128xf32>
    %1112 = arith.mulf %1111, %921 : vector<2x128xf32>
    %1113 = arith.addf %1109, %1112 : vector<2x128xf32>
    %c14_211 = arith.constant 14 : index
    %1114 = memref.load %arg9[%c14_211] : memref<96xf32, #tpu.memory_space<smem>>
    %1115 = vector.broadcast %1114 : f32 to vector<2x128xf32>
    %1116 = arith.mulf %1115, %1001 : vector<2x128xf32>
    %1117 = arith.addf %1113, %1116 : vector<2x128xf32>
    %c15_212 = arith.constant 15 : index
    %1118 = memref.load %arg9[%c15_212] : memref<96xf32, #tpu.memory_space<smem>>
    %1119 = vector.broadcast %1118 : f32 to vector<2x128xf32>
    %1120 = arith.mulf %1119, %1013 : vector<2x128xf32>
    %1121 = arith.addf %1117, %1120 : vector<2x128xf32>
    %c16_213 = arith.constant 16 : index
    %1122 = memref.load %arg9[%c16_213] : memref<96xf32, #tpu.memory_space<smem>>
    %1123 = vector.broadcast %1122 : f32 to vector<2x128xf32>
    %1124 = arith.mulf %1123, %934 : vector<2x128xf32>
    %1125 = arith.addf %1121, %1124 : vector<2x128xf32>
    %c17_214 = arith.constant 17 : index
    %1126 = memref.load %arg9[%c17_214] : memref<96xf32, #tpu.memory_space<smem>>
    %1127 = vector.broadcast %1126 : f32 to vector<2x128xf32>
    %1128 = arith.mulf %1127, %1017 : vector<2x128xf32>
    %1129 = arith.addf %1125, %1128 : vector<2x128xf32>
    %c18_215 = arith.constant 18 : index
    %1130 = memref.load %arg9[%c18_215] : memref<96xf32, #tpu.memory_space<smem>>
    %1131 = vector.broadcast %1130 : f32 to vector<2x128xf32>
    %1132 = arith.mulf %1131, %1029 : vector<2x128xf32>
    %1133 = arith.addf %1129, %1132 : vector<2x128xf32>
    %c19_216 = arith.constant 19 : index
    %1134 = memref.load %arg9[%c19_216] : memref<96xf32, #tpu.memory_space<smem>>
    %1135 = vector.broadcast %1134 : f32 to vector<2x128xf32>
    %1136 = arith.mulf %1135, %947 : vector<2x128xf32>
    %1137 = arith.addf %1133, %1136 : vector<2x128xf32>
    %c20_217 = arith.constant 20 : index
    %1138 = memref.load %arg9[%c20_217] : memref<96xf32, #tpu.memory_space<smem>>
    %1139 = vector.broadcast %1138 : f32 to vector<2x128xf32>
    %1140 = arith.mulf %1139, %1033 : vector<2x128xf32>
    %1141 = arith.addf %1137, %1140 : vector<2x128xf32>
    %c21_218 = arith.constant 21 : index
    %1142 = memref.load %arg9[%c21_218] : memref<96xf32, #tpu.memory_space<smem>>
    %1143 = vector.broadcast %1142 : f32 to vector<2x128xf32>
    %1144 = arith.mulf %1143, %1045 : vector<2x128xf32>
    %1145 = arith.addf %1141, %1144 : vector<2x128xf32>
    %c22_219 = arith.constant 22 : index
    %1146 = memref.load %arg9[%c22_219] : memref<96xf32, #tpu.memory_space<smem>>
    %1147 = vector.broadcast %1146 : f32 to vector<2x128xf32>
    %1148 = arith.mulf %1147, %960 : vector<2x128xf32>
    %1149 = arith.addf %1145, %1148 : vector<2x128xf32>
    %c23_220 = arith.constant 23 : index
    %1150 = memref.load %arg9[%c23_220] : memref<96xf32, #tpu.memory_space<smem>>
    %1151 = vector.broadcast %1150 : f32 to vector<2x128xf32>
    %1152 = arith.mulf %1151, %1049 : vector<2x128xf32>
    %1153 = arith.addf %1149, %1152 : vector<2x128xf32>
    %cst_221 = arith.constant 0.000000e+00 : f32
    %1154 = vector.broadcast %cst_221 : f32 to vector<2x128xf32>
    %c2_222 = arith.constant 2 : index
    %1155 = memref.load %arg10[%c2_222] : memref<8xf32, #tpu.memory_space<smem>>
    %1156 = vector.broadcast %1155 : f32 to vector<2x128xf32>
    %1157 = arith.addf %1154, %1156 : vector<2x128xf32>
    %c24_223 = arith.constant 24 : index
    %1158 = memref.load %arg9[%c24_223] : memref<96xf32, #tpu.memory_space<smem>>
    %1159 = vector.broadcast %1158 : f32 to vector<2x128xf32>
    %1160 = arith.mulf %1159, %997 : vector<2x128xf32>
    %1161 = arith.addf %1157, %1160 : vector<2x128xf32>
    %c25_224 = arith.constant 25 : index
    %1162 = memref.load %arg9[%c25_224] : memref<96xf32, #tpu.memory_space<smem>>
    %1163 = vector.broadcast %1162 : f32 to vector<2x128xf32>
    %1164 = arith.mulf %1163, %921 : vector<2x128xf32>
    %1165 = arith.addf %1161, %1164 : vector<2x128xf32>
    %c26_225 = arith.constant 26 : index
    %1166 = memref.load %arg9[%c26_225] : memref<96xf32, #tpu.memory_space<smem>>
    %1167 = vector.broadcast %1166 : f32 to vector<2x128xf32>
    %1168 = arith.mulf %1167, %1001 : vector<2x128xf32>
    %1169 = arith.addf %1165, %1168 : vector<2x128xf32>
    %c27_226 = arith.constant 27 : index
    %1170 = memref.load %arg9[%c27_226] : memref<96xf32, #tpu.memory_space<smem>>
    %1171 = vector.broadcast %1170 : f32 to vector<2x128xf32>
    %1172 = arith.mulf %1171, %1013 : vector<2x128xf32>
    %1173 = arith.addf %1169, %1172 : vector<2x128xf32>
    %c28_227 = arith.constant 28 : index
    %1174 = memref.load %arg9[%c28_227] : memref<96xf32, #tpu.memory_space<smem>>
    %1175 = vector.broadcast %1174 : f32 to vector<2x128xf32>
    %1176 = arith.mulf %1175, %934 : vector<2x128xf32>
    %1177 = arith.addf %1173, %1176 : vector<2x128xf32>
    %c29_228 = arith.constant 29 : index
    %1178 = memref.load %arg9[%c29_228] : memref<96xf32, #tpu.memory_space<smem>>
    %1179 = vector.broadcast %1178 : f32 to vector<2x128xf32>
    %1180 = arith.mulf %1179, %1017 : vector<2x128xf32>
    %1181 = arith.addf %1177, %1180 : vector<2x128xf32>
    %c30_229 = arith.constant 30 : index
    %1182 = memref.load %arg9[%c30_229] : memref<96xf32, #tpu.memory_space<smem>>
    %1183 = vector.broadcast %1182 : f32 to vector<2x128xf32>
    %1184 = arith.mulf %1183, %1029 : vector<2x128xf32>
    %1185 = arith.addf %1181, %1184 : vector<2x128xf32>
    %c31_230 = arith.constant 31 : index
    %1186 = memref.load %arg9[%c31_230] : memref<96xf32, #tpu.memory_space<smem>>
    %1187 = vector.broadcast %1186 : f32 to vector<2x128xf32>
    %1188 = arith.mulf %1187, %947 : vector<2x128xf32>
    %1189 = arith.addf %1185, %1188 : vector<2x128xf32>
    %c32_231 = arith.constant 32 : index
    %1190 = memref.load %arg9[%c32_231] : memref<96xf32, #tpu.memory_space<smem>>
    %1191 = vector.broadcast %1190 : f32 to vector<2x128xf32>
    %1192 = arith.mulf %1191, %1033 : vector<2x128xf32>
    %1193 = arith.addf %1189, %1192 : vector<2x128xf32>
    %c33_232 = arith.constant 33 : index
    %1194 = memref.load %arg9[%c33_232] : memref<96xf32, #tpu.memory_space<smem>>
    %1195 = vector.broadcast %1194 : f32 to vector<2x128xf32>
    %1196 = arith.mulf %1195, %1045 : vector<2x128xf32>
    %1197 = arith.addf %1193, %1196 : vector<2x128xf32>
    %c34_233 = arith.constant 34 : index
    %1198 = memref.load %arg9[%c34_233] : memref<96xf32, #tpu.memory_space<smem>>
    %1199 = vector.broadcast %1198 : f32 to vector<2x128xf32>
    %1200 = arith.mulf %1199, %960 : vector<2x128xf32>
    %1201 = arith.addf %1197, %1200 : vector<2x128xf32>
    %c35_234 = arith.constant 35 : index
    %1202 = memref.load %arg9[%c35_234] : memref<96xf32, #tpu.memory_space<smem>>
    %1203 = vector.broadcast %1202 : f32 to vector<2x128xf32>
    %1204 = arith.mulf %1203, %1049 : vector<2x128xf32>
    %1205 = arith.addf %1201, %1204 : vector<2x128xf32>
    %cst_235 = arith.constant 0.000000e+00 : f32
    %1206 = vector.broadcast %cst_235 : f32 to vector<2x128xf32>
    %c3_236 = arith.constant 3 : index
    %1207 = memref.load %arg10[%c3_236] : memref<8xf32, #tpu.memory_space<smem>>
    %1208 = vector.broadcast %1207 : f32 to vector<2x128xf32>
    %1209 = arith.addf %1206, %1208 : vector<2x128xf32>
    %c36_237 = arith.constant 36 : index
    %1210 = memref.load %arg9[%c36_237] : memref<96xf32, #tpu.memory_space<smem>>
    %1211 = vector.broadcast %1210 : f32 to vector<2x128xf32>
    %1212 = arith.mulf %1211, %997 : vector<2x128xf32>
    %1213 = arith.addf %1209, %1212 : vector<2x128xf32>
    %c37_238 = arith.constant 37 : index
    %1214 = memref.load %arg9[%c37_238] : memref<96xf32, #tpu.memory_space<smem>>
    %1215 = vector.broadcast %1214 : f32 to vector<2x128xf32>
    %1216 = arith.mulf %1215, %921 : vector<2x128xf32>
    %1217 = arith.addf %1213, %1216 : vector<2x128xf32>
    %c38_239 = arith.constant 38 : index
    %1218 = memref.load %arg9[%c38_239] : memref<96xf32, #tpu.memory_space<smem>>
    %1219 = vector.broadcast %1218 : f32 to vector<2x128xf32>
    %1220 = arith.mulf %1219, %1001 : vector<2x128xf32>
    %1221 = arith.addf %1217, %1220 : vector<2x128xf32>
    %c39_240 = arith.constant 39 : index
    %1222 = memref.load %arg9[%c39_240] : memref<96xf32, #tpu.memory_space<smem>>
    %1223 = vector.broadcast %1222 : f32 to vector<2x128xf32>
    %1224 = arith.mulf %1223, %1013 : vector<2x128xf32>
    %1225 = arith.addf %1221, %1224 : vector<2x128xf32>
    %c40_241 = arith.constant 40 : index
    %1226 = memref.load %arg9[%c40_241] : memref<96xf32, #tpu.memory_space<smem>>
    %1227 = vector.broadcast %1226 : f32 to vector<2x128xf32>
    %1228 = arith.mulf %1227, %934 : vector<2x128xf32>
    %1229 = arith.addf %1225, %1228 : vector<2x128xf32>
    %c41_242 = arith.constant 41 : index
    %1230 = memref.load %arg9[%c41_242] : memref<96xf32, #tpu.memory_space<smem>>
    %1231 = vector.broadcast %1230 : f32 to vector<2x128xf32>
    %1232 = arith.mulf %1231, %1017 : vector<2x128xf32>
    %1233 = arith.addf %1229, %1232 : vector<2x128xf32>
    %c42_243 = arith.constant 42 : index
    %1234 = memref.load %arg9[%c42_243] : memref<96xf32, #tpu.memory_space<smem>>
    %1235 = vector.broadcast %1234 : f32 to vector<2x128xf32>
    %1236 = arith.mulf %1235, %1029 : vector<2x128xf32>
    %1237 = arith.addf %1233, %1236 : vector<2x128xf32>
    %c43_244 = arith.constant 43 : index
    %1238 = memref.load %arg9[%c43_244] : memref<96xf32, #tpu.memory_space<smem>>
    %1239 = vector.broadcast %1238 : f32 to vector<2x128xf32>
    %1240 = arith.mulf %1239, %947 : vector<2x128xf32>
    %1241 = arith.addf %1237, %1240 : vector<2x128xf32>
    %c44_245 = arith.constant 44 : index
    %1242 = memref.load %arg9[%c44_245] : memref<96xf32, #tpu.memory_space<smem>>
    %1243 = vector.broadcast %1242 : f32 to vector<2x128xf32>
    %1244 = arith.mulf %1243, %1033 : vector<2x128xf32>
    %1245 = arith.addf %1241, %1244 : vector<2x128xf32>
    %c45_246 = arith.constant 45 : index
    %1246 = memref.load %arg9[%c45_246] : memref<96xf32, #tpu.memory_space<smem>>
    %1247 = vector.broadcast %1246 : f32 to vector<2x128xf32>
    %1248 = arith.mulf %1247, %1045 : vector<2x128xf32>
    %1249 = arith.addf %1245, %1248 : vector<2x128xf32>
    %c46_247 = arith.constant 46 : index
    %1250 = memref.load %arg9[%c46_247] : memref<96xf32, #tpu.memory_space<smem>>
    %1251 = vector.broadcast %1250 : f32 to vector<2x128xf32>
    %1252 = arith.mulf %1251, %960 : vector<2x128xf32>
    %1253 = arith.addf %1249, %1252 : vector<2x128xf32>
    %c47_248 = arith.constant 47 : index
    %1254 = memref.load %arg9[%c47_248] : memref<96xf32, #tpu.memory_space<smem>>
    %1255 = vector.broadcast %1254 : f32 to vector<2x128xf32>
    %1256 = arith.mulf %1255, %1049 : vector<2x128xf32>
    %1257 = arith.addf %1253, %1256 : vector<2x128xf32>
    %cst_249 = arith.constant 0.000000e+00 : f32
    %1258 = vector.broadcast %cst_249 : f32 to vector<2x128xf32>
    %c4_250 = arith.constant 4 : index
    %1259 = memref.load %arg10[%c4_250] : memref<8xf32, #tpu.memory_space<smem>>
    %1260 = vector.broadcast %1259 : f32 to vector<2x128xf32>
    %1261 = arith.addf %1258, %1260 : vector<2x128xf32>
    %c48_251 = arith.constant 48 : index
    %1262 = memref.load %arg9[%c48_251] : memref<96xf32, #tpu.memory_space<smem>>
    %1263 = vector.broadcast %1262 : f32 to vector<2x128xf32>
    %1264 = arith.mulf %1263, %997 : vector<2x128xf32>
    %1265 = arith.addf %1261, %1264 : vector<2x128xf32>
    %c49_252 = arith.constant 49 : index
    %1266 = memref.load %arg9[%c49_252] : memref<96xf32, #tpu.memory_space<smem>>
    %1267 = vector.broadcast %1266 : f32 to vector<2x128xf32>
    %1268 = arith.mulf %1267, %921 : vector<2x128xf32>
    %1269 = arith.addf %1265, %1268 : vector<2x128xf32>
    %c50_253 = arith.constant 50 : index
    %1270 = memref.load %arg9[%c50_253] : memref<96xf32, #tpu.memory_space<smem>>
    %1271 = vector.broadcast %1270 : f32 to vector<2x128xf32>
    %1272 = arith.mulf %1271, %1001 : vector<2x128xf32>
    %1273 = arith.addf %1269, %1272 : vector<2x128xf32>
    %c51_254 = arith.constant 51 : index
    %1274 = memref.load %arg9[%c51_254] : memref<96xf32, #tpu.memory_space<smem>>
    %1275 = vector.broadcast %1274 : f32 to vector<2x128xf32>
    %1276 = arith.mulf %1275, %1013 : vector<2x128xf32>
    %1277 = arith.addf %1273, %1276 : vector<2x128xf32>
    %c52_255 = arith.constant 52 : index
    %1278 = memref.load %arg9[%c52_255] : memref<96xf32, #tpu.memory_space<smem>>
    %1279 = vector.broadcast %1278 : f32 to vector<2x128xf32>
    %1280 = arith.mulf %1279, %934 : vector<2x128xf32>
    %1281 = arith.addf %1277, %1280 : vector<2x128xf32>
    %c53_256 = arith.constant 53 : index
    %1282 = memref.load %arg9[%c53_256] : memref<96xf32, #tpu.memory_space<smem>>
    %1283 = vector.broadcast %1282 : f32 to vector<2x128xf32>
    %1284 = arith.mulf %1283, %1017 : vector<2x128xf32>
    %1285 = arith.addf %1281, %1284 : vector<2x128xf32>
    %c54_257 = arith.constant 54 : index
    %1286 = memref.load %arg9[%c54_257] : memref<96xf32, #tpu.memory_space<smem>>
    %1287 = vector.broadcast %1286 : f32 to vector<2x128xf32>
    %1288 = arith.mulf %1287, %1029 : vector<2x128xf32>
    %1289 = arith.addf %1285, %1288 : vector<2x128xf32>
    %c55_258 = arith.constant 55 : index
    %1290 = memref.load %arg9[%c55_258] : memref<96xf32, #tpu.memory_space<smem>>
    %1291 = vector.broadcast %1290 : f32 to vector<2x128xf32>
    %1292 = arith.mulf %1291, %947 : vector<2x128xf32>
    %1293 = arith.addf %1289, %1292 : vector<2x128xf32>
    %c56_259 = arith.constant 56 : index
    %1294 = memref.load %arg9[%c56_259] : memref<96xf32, #tpu.memory_space<smem>>
    %1295 = vector.broadcast %1294 : f32 to vector<2x128xf32>
    %1296 = arith.mulf %1295, %1033 : vector<2x128xf32>
    %1297 = arith.addf %1293, %1296 : vector<2x128xf32>
    %c57_260 = arith.constant 57 : index
    %1298 = memref.load %arg9[%c57_260] : memref<96xf32, #tpu.memory_space<smem>>
    %1299 = vector.broadcast %1298 : f32 to vector<2x128xf32>
    %1300 = arith.mulf %1299, %1045 : vector<2x128xf32>
    %1301 = arith.addf %1297, %1300 : vector<2x128xf32>
    %c58_261 = arith.constant 58 : index
    %1302 = memref.load %arg9[%c58_261] : memref<96xf32, #tpu.memory_space<smem>>
    %1303 = vector.broadcast %1302 : f32 to vector<2x128xf32>
    %1304 = arith.mulf %1303, %960 : vector<2x128xf32>
    %1305 = arith.addf %1301, %1304 : vector<2x128xf32>
    %c59_262 = arith.constant 59 : index
    %1306 = memref.load %arg9[%c59_262] : memref<96xf32, #tpu.memory_space<smem>>
    %1307 = vector.broadcast %1306 : f32 to vector<2x128xf32>
    %1308 = arith.mulf %1307, %1049 : vector<2x128xf32>
    %1309 = arith.addf %1305, %1308 : vector<2x128xf32>
    %cst_263 = arith.constant 0.000000e+00 : f32
    %1310 = vector.broadcast %cst_263 : f32 to vector<2x128xf32>
    %c5_264 = arith.constant 5 : index
    %1311 = memref.load %arg10[%c5_264] : memref<8xf32, #tpu.memory_space<smem>>
    %1312 = vector.broadcast %1311 : f32 to vector<2x128xf32>
    %1313 = arith.addf %1310, %1312 : vector<2x128xf32>
    %c60_265 = arith.constant 60 : index
    %1314 = memref.load %arg9[%c60_265] : memref<96xf32, #tpu.memory_space<smem>>
    %1315 = vector.broadcast %1314 : f32 to vector<2x128xf32>
    %1316 = arith.mulf %1315, %997 : vector<2x128xf32>
    %1317 = arith.addf %1313, %1316 : vector<2x128xf32>
    %c61_266 = arith.constant 61 : index
    %1318 = memref.load %arg9[%c61_266] : memref<96xf32, #tpu.memory_space<smem>>
    %1319 = vector.broadcast %1318 : f32 to vector<2x128xf32>
    %1320 = arith.mulf %1319, %921 : vector<2x128xf32>
    %1321 = arith.addf %1317, %1320 : vector<2x128xf32>
    %c62_267 = arith.constant 62 : index
    %1322 = memref.load %arg9[%c62_267] : memref<96xf32, #tpu.memory_space<smem>>
    %1323 = vector.broadcast %1322 : f32 to vector<2x128xf32>
    %1324 = arith.mulf %1323, %1001 : vector<2x128xf32>
    %1325 = arith.addf %1321, %1324 : vector<2x128xf32>
    %c63_268 = arith.constant 63 : index
    %1326 = memref.load %arg9[%c63_268] : memref<96xf32, #tpu.memory_space<smem>>
    %1327 = vector.broadcast %1326 : f32 to vector<2x128xf32>
    %1328 = arith.mulf %1327, %1013 : vector<2x128xf32>
    %1329 = arith.addf %1325, %1328 : vector<2x128xf32>
    %c64_269 = arith.constant 64 : index
    %1330 = memref.load %arg9[%c64_269] : memref<96xf32, #tpu.memory_space<smem>>
    %1331 = vector.broadcast %1330 : f32 to vector<2x128xf32>
    %1332 = arith.mulf %1331, %934 : vector<2x128xf32>
    %1333 = arith.addf %1329, %1332 : vector<2x128xf32>
    %c65_270 = arith.constant 65 : index
    %1334 = memref.load %arg9[%c65_270] : memref<96xf32, #tpu.memory_space<smem>>
    %1335 = vector.broadcast %1334 : f32 to vector<2x128xf32>
    %1336 = arith.mulf %1335, %1017 : vector<2x128xf32>
    %1337 = arith.addf %1333, %1336 : vector<2x128xf32>
    %c66_271 = arith.constant 66 : index
    %1338 = memref.load %arg9[%c66_271] : memref<96xf32, #tpu.memory_space<smem>>
    %1339 = vector.broadcast %1338 : f32 to vector<2x128xf32>
    %1340 = arith.mulf %1339, %1029 : vector<2x128xf32>
    %1341 = arith.addf %1337, %1340 : vector<2x128xf32>
    %c67_272 = arith.constant 67 : index
    %1342 = memref.load %arg9[%c67_272] : memref<96xf32, #tpu.memory_space<smem>>
    %1343 = vector.broadcast %1342 : f32 to vector<2x128xf32>
    %1344 = arith.mulf %1343, %947 : vector<2x128xf32>
    %1345 = arith.addf %1341, %1344 : vector<2x128xf32>
    %c68_273 = arith.constant 68 : index
    %1346 = memref.load %arg9[%c68_273] : memref<96xf32, #tpu.memory_space<smem>>
    %1347 = vector.broadcast %1346 : f32 to vector<2x128xf32>
    %1348 = arith.mulf %1347, %1033 : vector<2x128xf32>
    %1349 = arith.addf %1345, %1348 : vector<2x128xf32>
    %c69_274 = arith.constant 69 : index
    %1350 = memref.load %arg9[%c69_274] : memref<96xf32, #tpu.memory_space<smem>>
    %1351 = vector.broadcast %1350 : f32 to vector<2x128xf32>
    %1352 = arith.mulf %1351, %1045 : vector<2x128xf32>
    %1353 = arith.addf %1349, %1352 : vector<2x128xf32>
    %c70_275 = arith.constant 70 : index
    %1354 = memref.load %arg9[%c70_275] : memref<96xf32, #tpu.memory_space<smem>>
    %1355 = vector.broadcast %1354 : f32 to vector<2x128xf32>
    %1356 = arith.mulf %1355, %960 : vector<2x128xf32>
    %1357 = arith.addf %1353, %1356 : vector<2x128xf32>
    %c71_276 = arith.constant 71 : index
    %1358 = memref.load %arg9[%c71_276] : memref<96xf32, #tpu.memory_space<smem>>
    %1359 = vector.broadcast %1358 : f32 to vector<2x128xf32>
    %1360 = arith.mulf %1359, %1049 : vector<2x128xf32>
    %1361 = arith.addf %1357, %1360 : vector<2x128xf32>
    %cst_277 = arith.constant 0.000000e+00 : f32
    %1362 = vector.broadcast %cst_277 : f32 to vector<2x128xf32>
    %c6_278 = arith.constant 6 : index
    %1363 = memref.load %arg10[%c6_278] : memref<8xf32, #tpu.memory_space<smem>>
    %1364 = vector.broadcast %1363 : f32 to vector<2x128xf32>
    %1365 = arith.addf %1362, %1364 : vector<2x128xf32>
    %c72_279 = arith.constant 72 : index
    %1366 = memref.load %arg9[%c72_279] : memref<96xf32, #tpu.memory_space<smem>>
    %1367 = vector.broadcast %1366 : f32 to vector<2x128xf32>
    %1368 = arith.mulf %1367, %997 : vector<2x128xf32>
    %1369 = arith.addf %1365, %1368 : vector<2x128xf32>
    %c73_280 = arith.constant 73 : index
    %1370 = memref.load %arg9[%c73_280] : memref<96xf32, #tpu.memory_space<smem>>
    %1371 = vector.broadcast %1370 : f32 to vector<2x128xf32>
    %1372 = arith.mulf %1371, %921 : vector<2x128xf32>
    %1373 = arith.addf %1369, %1372 : vector<2x128xf32>
    %c74_281 = arith.constant 74 : index
    %1374 = memref.load %arg9[%c74_281] : memref<96xf32, #tpu.memory_space<smem>>
    %1375 = vector.broadcast %1374 : f32 to vector<2x128xf32>
    %1376 = arith.mulf %1375, %1001 : vector<2x128xf32>
    %1377 = arith.addf %1373, %1376 : vector<2x128xf32>
    %c75_282 = arith.constant 75 : index
    %1378 = memref.load %arg9[%c75_282] : memref<96xf32, #tpu.memory_space<smem>>
    %1379 = vector.broadcast %1378 : f32 to vector<2x128xf32>
    %1380 = arith.mulf %1379, %1013 : vector<2x128xf32>
    %1381 = arith.addf %1377, %1380 : vector<2x128xf32>
    %c76_283 = arith.constant 76 : index
    %1382 = memref.load %arg9[%c76_283] : memref<96xf32, #tpu.memory_space<smem>>
    %1383 = vector.broadcast %1382 : f32 to vector<2x128xf32>
    %1384 = arith.mulf %1383, %934 : vector<2x128xf32>
    %1385 = arith.addf %1381, %1384 : vector<2x128xf32>
    %c77_284 = arith.constant 77 : index
    %1386 = memref.load %arg9[%c77_284] : memref<96xf32, #tpu.memory_space<smem>>
    %1387 = vector.broadcast %1386 : f32 to vector<2x128xf32>
    %1388 = arith.mulf %1387, %1017 : vector<2x128xf32>
    %1389 = arith.addf %1385, %1388 : vector<2x128xf32>
    %c78_285 = arith.constant 78 : index
    %1390 = memref.load %arg9[%c78_285] : memref<96xf32, #tpu.memory_space<smem>>
    %1391 = vector.broadcast %1390 : f32 to vector<2x128xf32>
    %1392 = arith.mulf %1391, %1029 : vector<2x128xf32>
    %1393 = arith.addf %1389, %1392 : vector<2x128xf32>
    %c79_286 = arith.constant 79 : index
    %1394 = memref.load %arg9[%c79_286] : memref<96xf32, #tpu.memory_space<smem>>
    %1395 = vector.broadcast %1394 : f32 to vector<2x128xf32>
    %1396 = arith.mulf %1395, %947 : vector<2x128xf32>
    %1397 = arith.addf %1393, %1396 : vector<2x128xf32>
    %c80_287 = arith.constant 80 : index
    %1398 = memref.load %arg9[%c80_287] : memref<96xf32, #tpu.memory_space<smem>>
    %1399 = vector.broadcast %1398 : f32 to vector<2x128xf32>
    %1400 = arith.mulf %1399, %1033 : vector<2x128xf32>
    %1401 = arith.addf %1397, %1400 : vector<2x128xf32>
    %c81_288 = arith.constant 81 : index
    %1402 = memref.load %arg9[%c81_288] : memref<96xf32, #tpu.memory_space<smem>>
    %1403 = vector.broadcast %1402 : f32 to vector<2x128xf32>
    %1404 = arith.mulf %1403, %1045 : vector<2x128xf32>
    %1405 = arith.addf %1401, %1404 : vector<2x128xf32>
    %c82_289 = arith.constant 82 : index
    %1406 = memref.load %arg9[%c82_289] : memref<96xf32, #tpu.memory_space<smem>>
    %1407 = vector.broadcast %1406 : f32 to vector<2x128xf32>
    %1408 = arith.mulf %1407, %960 : vector<2x128xf32>
    %1409 = arith.addf %1405, %1408 : vector<2x128xf32>
    %c83_290 = arith.constant 83 : index
    %1410 = memref.load %arg9[%c83_290] : memref<96xf32, #tpu.memory_space<smem>>
    %1411 = vector.broadcast %1410 : f32 to vector<2x128xf32>
    %1412 = arith.mulf %1411, %1049 : vector<2x128xf32>
    %1413 = arith.addf %1409, %1412 : vector<2x128xf32>
    %cst_291 = arith.constant 0.000000e+00 : f32
    %1414 = vector.broadcast %cst_291 : f32 to vector<2x128xf32>
    %c7_292 = arith.constant 7 : index
    %1415 = memref.load %arg10[%c7_292] : memref<8xf32, #tpu.memory_space<smem>>
    %1416 = vector.broadcast %1415 : f32 to vector<2x128xf32>
    %1417 = arith.addf %1414, %1416 : vector<2x128xf32>
    %c84_293 = arith.constant 84 : index
    %1418 = memref.load %arg9[%c84_293] : memref<96xf32, #tpu.memory_space<smem>>
    %1419 = vector.broadcast %1418 : f32 to vector<2x128xf32>
    %1420 = arith.mulf %1419, %997 : vector<2x128xf32>
    %1421 = arith.addf %1417, %1420 : vector<2x128xf32>
    %c85_294 = arith.constant 85 : index
    %1422 = memref.load %arg9[%c85_294] : memref<96xf32, #tpu.memory_space<smem>>
    %1423 = vector.broadcast %1422 : f32 to vector<2x128xf32>
    %1424 = arith.mulf %1423, %921 : vector<2x128xf32>
    %1425 = arith.addf %1421, %1424 : vector<2x128xf32>
    %c86_295 = arith.constant 86 : index
    %1426 = memref.load %arg9[%c86_295] : memref<96xf32, #tpu.memory_space<smem>>
    %1427 = vector.broadcast %1426 : f32 to vector<2x128xf32>
    %1428 = arith.mulf %1427, %1001 : vector<2x128xf32>
    %1429 = arith.addf %1425, %1428 : vector<2x128xf32>
    %c87_296 = arith.constant 87 : index
    %1430 = memref.load %arg9[%c87_296] : memref<96xf32, #tpu.memory_space<smem>>
    %1431 = vector.broadcast %1430 : f32 to vector<2x128xf32>
    %1432 = arith.mulf %1431, %1013 : vector<2x128xf32>
    %1433 = arith.addf %1429, %1432 : vector<2x128xf32>
    %c88_297 = arith.constant 88 : index
    %1434 = memref.load %arg9[%c88_297] : memref<96xf32, #tpu.memory_space<smem>>
    %1435 = vector.broadcast %1434 : f32 to vector<2x128xf32>
    %1436 = arith.mulf %1435, %934 : vector<2x128xf32>
    %1437 = arith.addf %1433, %1436 : vector<2x128xf32>
    %c89_298 = arith.constant 89 : index
    %1438 = memref.load %arg9[%c89_298] : memref<96xf32, #tpu.memory_space<smem>>
    %1439 = vector.broadcast %1438 : f32 to vector<2x128xf32>
    %1440 = arith.mulf %1439, %1017 : vector<2x128xf32>
    %1441 = arith.addf %1437, %1440 : vector<2x128xf32>
    %c90_299 = arith.constant 90 : index
    %1442 = memref.load %arg9[%c90_299] : memref<96xf32, #tpu.memory_space<smem>>
    %1443 = vector.broadcast %1442 : f32 to vector<2x128xf32>
    %1444 = arith.mulf %1443, %1029 : vector<2x128xf32>
    %1445 = arith.addf %1441, %1444 : vector<2x128xf32>
    %c91_300 = arith.constant 91 : index
    %1446 = memref.load %arg9[%c91_300] : memref<96xf32, #tpu.memory_space<smem>>
    %1447 = vector.broadcast %1446 : f32 to vector<2x128xf32>
    %1448 = arith.mulf %1447, %947 : vector<2x128xf32>
    %1449 = arith.addf %1445, %1448 : vector<2x128xf32>
    %c92_301 = arith.constant 92 : index
    %1450 = memref.load %arg9[%c92_301] : memref<96xf32, #tpu.memory_space<smem>>
    %1451 = vector.broadcast %1450 : f32 to vector<2x128xf32>
    %1452 = arith.mulf %1451, %1033 : vector<2x128xf32>
    %1453 = arith.addf %1449, %1452 : vector<2x128xf32>
    %c93_302 = arith.constant 93 : index
    %1454 = memref.load %arg9[%c93_302] : memref<96xf32, #tpu.memory_space<smem>>
    %1455 = vector.broadcast %1454 : f32 to vector<2x128xf32>
    %1456 = arith.mulf %1455, %1045 : vector<2x128xf32>
    %1457 = arith.addf %1453, %1456 : vector<2x128xf32>
    %c94_303 = arith.constant 94 : index
    %1458 = memref.load %arg9[%c94_303] : memref<96xf32, #tpu.memory_space<smem>>
    %1459 = vector.broadcast %1458 : f32 to vector<2x128xf32>
    %1460 = arith.mulf %1459, %960 : vector<2x128xf32>
    %1461 = arith.addf %1457, %1460 : vector<2x128xf32>
    %c95_304 = arith.constant 95 : index
    %1462 = memref.load %arg9[%c95_304] : memref<96xf32, #tpu.memory_space<smem>>
    %1463 = vector.broadcast %1462 : f32 to vector<2x128xf32>
    %1464 = arith.mulf %1463, %1049 : vector<2x128xf32>
    %1465 = arith.addf %1461, %1464 : vector<2x128xf32>
    %1466 = arith.negf %1101 : vector<2x128xf32>
    %1467 = math.exp %1466 : vector<2x128xf32>
    %cst_305 = arith.constant 1.000000e+00 : f32
    %1468 = vector.broadcast %cst_305 : f32 to vector<2x128xf32>
    %1469 = arith.addf %1468, %1467 : vector<2x128xf32>
    %1470 = arith.divf %1468, %1469 : vector<2x128xf32>
    %1471 = math.tanh %1309 : vector<2x128xf32>
    %1472 = arith.mulf %1470, %1471 : vector<2x128xf32>
    %1473 = arith.negf %1153 : vector<2x128xf32>
    %1474 = math.exp %1473 : vector<2x128xf32>
    %cst_306 = arith.constant 1.000000e+00 : f32
    %1475 = vector.broadcast %cst_306 : f32 to vector<2x128xf32>
    %1476 = arith.addf %1475, %1474 : vector<2x128xf32>
    %1477 = arith.divf %1475, %1476 : vector<2x128xf32>
    %1478 = math.tanh %1361 : vector<2x128xf32>
    %1479 = arith.mulf %1477, %1478 : vector<2x128xf32>
    %1480 = arith.negf %1205 : vector<2x128xf32>
    %1481 = math.exp %1480 : vector<2x128xf32>
    %cst_307 = arith.constant 1.000000e+00 : f32
    %1482 = vector.broadcast %cst_307 : f32 to vector<2x128xf32>
    %1483 = arith.addf %1482, %1481 : vector<2x128xf32>
    %1484 = arith.divf %1482, %1483 : vector<2x128xf32>
    %1485 = math.tanh %1413 : vector<2x128xf32>
    %1486 = arith.mulf %1484, %1485 : vector<2x128xf32>
    %1487 = arith.negf %1257 : vector<2x128xf32>
    %1488 = math.exp %1487 : vector<2x128xf32>
    %cst_308 = arith.constant 1.000000e+00 : f32
    %1489 = vector.broadcast %cst_308 : f32 to vector<2x128xf32>
    %1490 = arith.addf %1489, %1488 : vector<2x128xf32>
    %1491 = arith.divf %1489, %1490 : vector<2x128xf32>
    %1492 = math.tanh %1465 : vector<2x128xf32>
    %1493 = arith.mulf %1491, %1492 : vector<2x128xf32>
    %cst_309 = arith.constant 0.000000e+00 : f32
    %1494 = vector.broadcast %cst_309 : f32 to vector<2x1xf32>
    %cst_310 = arith.constant 0.000000e+00 : f32
    %1495 = vector.broadcast %cst_310 : f32 to vector<2x1xf32>
    %cst_311 = arith.constant 0.000000e+00 : f32
    %1496 = vector.shape_cast %985 : vector<1x128xi1> to vector<1x128xi1>
    %1497 = vector.broadcast %1496 : vector<1x128xi1> to vector<2x128xi1>
    %1498 = vector.broadcast %cst_311 : f32 to vector<2x128xf32>
    %1499 = arith.select %1497, %1472, %1498 : vector<2x128xi1>, vector<2x128xf32>
    %cst_312 = arith.constant dense<0.000000e+00> : vector<2xf32>
    %1500 = vector.multi_reduction <add>, %1499, %cst_312 [1] : vector<2x128xf32> to vector<2xf32>
    %1501 = vector.shape_cast %1500 : vector<2xf32> to vector<2x1xf32>
    %1502 = arith.addf %1494, %1501 : vector<2x1xf32>
    %1503 = arith.mulf %1499, %1499 : vector<2x128xf32>
    %cst_313 = arith.constant dense<0.000000e+00> : vector<2xf32>
    %1504 = vector.multi_reduction <add>, %1503, %cst_313 [1] : vector<2x128xf32> to vector<2xf32>
    %1505 = vector.shape_cast %1504 : vector<2xf32> to vector<2x1xf32>
    %1506 = arith.addf %1495, %1505 : vector<2x1xf32>
    %cst_314 = arith.constant 0.000000e+00 : f32
    %1507 = vector.shape_cast %985 : vector<1x128xi1> to vector<1x128xi1>
    %1508 = vector.broadcast %1507 : vector<1x128xi1> to vector<2x128xi1>
    %1509 = vector.broadcast %cst_314 : f32 to vector<2x128xf32>
    %1510 = arith.select %1508, %1479, %1509 : vector<2x128xi1>, vector<2x128xf32>
    %cst_315 = arith.constant dense<0.000000e+00> : vector<2xf32>
    %1511 = vector.multi_reduction <add>, %1510, %cst_315 [1] : vector<2x128xf32> to vector<2xf32>
    %1512 = vector.shape_cast %1511 : vector<2xf32> to vector<2x1xf32>
    %1513 = arith.addf %1502, %1512 : vector<2x1xf32>
    %1514 = arith.mulf %1510, %1510 : vector<2x128xf32>
    %cst_316 = arith.constant dense<0.000000e+00> : vector<2xf32>
    %1515 = vector.multi_reduction <add>, %1514, %cst_316 [1] : vector<2x128xf32> to vector<2xf32>
    %1516 = vector.shape_cast %1515 : vector<2xf32> to vector<2x1xf32>
    %1517 = arith.addf %1506, %1516 : vector<2x1xf32>
    %cst_317 = arith.constant 0.000000e+00 : f32
    %1518 = vector.shape_cast %985 : vector<1x128xi1> to vector<1x128xi1>
    %1519 = vector.broadcast %1518 : vector<1x128xi1> to vector<2x128xi1>
    %1520 = vector.broadcast %cst_317 : f32 to vector<2x128xf32>
    %1521 = arith.select %1519, %1486, %1520 : vector<2x128xi1>, vector<2x128xf32>
    %cst_318 = arith.constant dense<0.000000e+00> : vector<2xf32>
    %1522 = vector.multi_reduction <add>, %1521, %cst_318 [1] : vector<2x128xf32> to vector<2xf32>
    %1523 = vector.shape_cast %1522 : vector<2xf32> to vector<2x1xf32>
    %1524 = arith.addf %1513, %1523 : vector<2x1xf32>
    %1525 = arith.mulf %1521, %1521 : vector<2x128xf32>
    %cst_319 = arith.constant dense<0.000000e+00> : vector<2xf32>
    %1526 = vector.multi_reduction <add>, %1525, %cst_319 [1] : vector<2x128xf32> to vector<2xf32>
    %1527 = vector.shape_cast %1526 : vector<2xf32> to vector<2x1xf32>
    %1528 = arith.addf %1517, %1527 : vector<2x1xf32>
    %cst_320 = arith.constant 0.000000e+00 : f32
    %1529 = vector.shape_cast %985 : vector<1x128xi1> to vector<1x128xi1>
    %1530 = vector.broadcast %1529 : vector<1x128xi1> to vector<2x128xi1>
    %1531 = vector.broadcast %cst_320 : f32 to vector<2x128xf32>
    %1532 = arith.select %1530, %1493, %1531 : vector<2x128xi1>, vector<2x128xf32>
    %cst_321 = arith.constant dense<0.000000e+00> : vector<2xf32>
    %1533 = vector.multi_reduction <add>, %1532, %cst_321 [1] : vector<2x128xf32> to vector<2xf32>
    %1534 = vector.shape_cast %1533 : vector<2xf32> to vector<2x1xf32>
    %1535 = arith.addf %1524, %1534 : vector<2x1xf32>
    %1536 = arith.mulf %1532, %1532 : vector<2x128xf32>
    %cst_322 = arith.constant dense<0.000000e+00> : vector<2xf32>
    %1537 = vector.multi_reduction <add>, %1536, %cst_322 [1] : vector<2x128xf32> to vector<2xf32>
    %1538 = vector.shape_cast %1537 : vector<2xf32> to vector<2x1xf32>
    %1539 = arith.addf %1528, %1538 : vector<2x1xf32>
    %cst_323 = arith.constant 1.280000e+02 : f32
    %1540 = vector.broadcast %cst_323 : f32 to vector<2x1xf32>
    %1541 = arith.divf %1535, %1540 : vector<2x1xf32>
    %cst_324 = arith.constant 1.280000e+02 : f32
    %1542 = vector.broadcast %cst_324 : f32 to vector<2x1xf32>
    %1543 = arith.divf %1539, %1542 : vector<2x1xf32>
    %1544 = arith.mulf %1541, %1541 : vector<2x1xf32>
    %1545 = arith.subf %1543, %1544 : vector<2x1xf32>
    %cst_325 = arith.constant 9.99999974E-6 : f32
    %1546 = vector.broadcast %cst_325 : f32 to vector<2x1xf32>
    %1547 = arith.addf %1545, %1546 : vector<2x1xf32>
    %1548 = math.rsqrt %1547 : vector<2x1xf32>
    %c0_326 = arith.constant 0 : index
    %c0_327 = arith.constant 0 : index
    %1549 = vector.load %arg11[%c0_326, %c0_327] : memref<4x128xf32, #tpu.memory_space<vmem>>, vector<4x128xf32>
    %c0_328 = arith.constant 0 : index
    %c0_329 = arith.constant 0 : index
    %1550 = vector.load %arg12[%c0_328, %c0_329] : memref<4x128xf32, #tpu.memory_space<vmem>>, vector<4x128xf32>
    %1551 = vector.broadcast %1541 : vector<2x1xf32> to vector<2x128xf32>
    %1552 = arith.subf %1472, %1551 : vector<2x128xf32>
    %1553 = vector.broadcast %1548 : vector<2x1xf32> to vector<2x128xf32>
    %1554 = arith.mulf %1552, %1553 : vector<2x128xf32>
    %1555 = vector.extract_strided_slice %1549 {offsets = [0, 0], sizes = [1, 128], strides = [1, 1]} : vector<4x128xf32> to vector<1x128xf32>
    %1556 = vector.broadcast %1555 : vector<1x128xf32> to vector<2x128xf32>
    %1557 = arith.mulf %1554, %1556 : vector<2x128xf32>
    %1558 = vector.extract_strided_slice %1550 {offsets = [0, 0], sizes = [1, 128], strides = [1, 1]} : vector<4x128xf32> to vector<1x128xf32>
    %1559 = vector.broadcast %1558 : vector<1x128xf32> to vector<2x128xf32>
    %1560 = arith.addf %1557, %1559 : vector<2x128xf32>
    %c0_330 = arith.constant 0 : index
    %c0_331 = arith.constant 0 : index
    %c0_332 = arith.constant 0 : index
    %1561 = vector.load %arg19[%c0_330, %c0_331, %c0_332] : memref<4x2x128xf32, #tpu.memory_space<vmem>>, vector<1x2x128xf32>
    %1562 = vector.shape_cast %1561 : vector<1x2x128xf32> to vector<2x128xf32>
    %1563 = vector.shape_cast %1560 : vector<2x128xf32> to vector<1x2x128xf32>
    tpu.vector_store %arg19[%c0_330, %c0_331, %c0_332], %1563 {strides = array<i32>} : memref<4x2x128xf32, #tpu.memory_space<vmem>>, vector<1x2x128xf32>,
    %1564 = vector.broadcast %1541 : vector<2x1xf32> to vector<2x128xf32>
    %1565 = arith.subf %1479, %1564 : vector<2x128xf32>
    %1566 = vector.broadcast %1548 : vector<2x1xf32> to vector<2x128xf32>
    %1567 = arith.mulf %1565, %1566 : vector<2x128xf32>
    %1568 = vector.extract_strided_slice %1549 {offsets = [1, 0], sizes = [1, 128], strides = [1, 1]} : vector<4x128xf32> to vector<1x128xf32>
    %1569 = vector.broadcast %1568 : vector<1x128xf32> to vector<2x128xf32>
    %1570 = arith.mulf %1567, %1569 : vector<2x128xf32>
    %1571 = vector.extract_strided_slice %1550 {offsets = [1, 0], sizes = [1, 128], strides = [1, 1]} : vector<4x128xf32> to vector<1x128xf32>
    %1572 = vector.broadcast %1571 : vector<1x128xf32> to vector<2x128xf32>
    %1573 = arith.addf %1570, %1572 : vector<2x128xf32>
    %c1_333 = arith.constant 1 : index
    %c0_334 = arith.constant 0 : index
    %c0_335 = arith.constant 0 : index
    %1574 = vector.load %arg19[%c1_333, %c0_334, %c0_335] : memref<4x2x128xf32, #tpu.memory_space<vmem>>, vector<1x2x128xf32>
    %1575 = vector.shape_cast %1574 : vector<1x2x128xf32> to vector<2x128xf32>
    %1576 = vector.shape_cast %1573 : vector<2x128xf32> to vector<1x2x128xf32>
    tpu.vector_store %arg19[%c1_333, %c0_334, %c0_335], %1576 {strides = array<i32>} : memref<4x2x128xf32, #tpu.memory_space<vmem>>, vector<1x2x128xf32>,
    %1577 = vector.broadcast %1541 : vector<2x1xf32> to vector<2x128xf32>
    %1578 = arith.subf %1486, %1577 : vector<2x128xf32>
    %1579 = vector.broadcast %1548 : vector<2x1xf32> to vector<2x128xf32>
    %1580 = arith.mulf %1578, %1579 : vector<2x128xf32>
    %1581 = vector.extract_strided_slice %1549 {offsets = [2, 0], sizes = [1, 128], strides = [1, 1]} : vector<4x128xf32> to vector<1x128xf32>
    %1582 = vector.broadcast %1581 : vector<1x128xf32> to vector<2x128xf32>
    %1583 = arith.mulf %1580, %1582 : vector<2x128xf32>
    %1584 = vector.extract_strided_slice %1550 {offsets = [2, 0], sizes = [1, 128], strides = [1, 1]} : vector<4x128xf32> to vector<1x128xf32>
    %1585 = vector.broadcast %1584 : vector<1x128xf32> to vector<2x128xf32>
    %1586 = arith.addf %1583, %1585 : vector<2x128xf32>
    %c2_336 = arith.constant 2 : index
    %c0_337 = arith.constant 0 : index
    %c0_338 = arith.constant 0 : index
    %1587 = vector.load %arg19[%c2_336, %c0_337, %c0_338] : memref<4x2x128xf32, #tpu.memory_space<vmem>>, vector<1x2x128xf32>
    %1588 = vector.shape_cast %1587 : vector<1x2x128xf32> to vector<2x128xf32>
    %1589 = vector.shape_cast %1586 : vector<2x128xf32> to vector<1x2x128xf32>
    tpu.vector_store %arg19[%c2_336, %c0_337, %c0_338], %1589 {strides = array<i32>} : memref<4x2x128xf32, #tpu.memory_space<vmem>>, vector<1x2x128xf32>,
    %1590 = vector.broadcast %1541 : vector<2x1xf32> to vector<2x128xf32>
    %1591 = arith.subf %1493, %1590 : vector<2x128xf32>
    %1592 = vector.broadcast %1548 : vector<2x1xf32> to vector<2x128xf32>
    %1593 = arith.mulf %1591, %1592 : vector<2x128xf32>
    %1594 = vector.extract_strided_slice %1549 {offsets = [3, 0], sizes = [1, 128], strides = [1, 1]} : vector<4x128xf32> to vector<1x128xf32>
    %1595 = vector.broadcast %1594 : vector<1x128xf32> to vector<2x128xf32>
    %1596 = arith.mulf %1593, %1595 : vector<2x128xf32>
    %1597 = vector.extract_strided_slice %1550 {offsets = [3, 0], sizes = [1, 128], strides = [1, 1]} : vector<4x128xf32> to vector<1x128xf32>
    %1598 = vector.broadcast %1597 : vector<1x128xf32> to vector<2x128xf32>
    %1599 = arith.addf %1596, %1598 : vector<2x128xf32>
    %c3_339 = arith.constant 3 : index
    %c0_340 = arith.constant 0 : index
    %c0_341 = arith.constant 0 : index
    %1600 = vector.load %arg19[%c3_339, %c0_340, %c0_341] : memref<4x2x128xf32, #tpu.memory_space<vmem>>, vector<1x2x128xf32>
    %1601 = vector.shape_cast %1600 : vector<1x2x128xf32> to vector<2x128xf32>
    %1602 = vector.shape_cast %1599 : vector<2x128xf32> to vector<1x2x128xf32>
    tpu.vector_store %arg19[%c3_339, %c0_340, %c0_341], %1602 {strides = array<i32>} : memref<4x2x128xf32, #tpu.memory_space<vmem>>, vector<1x2x128xf32>,
    %c4_i32_342 = arith.constant 4 : i32
    %1603 = vector.broadcast %c4_i32_342 : i32 to vector<1x128xi32>
    %1604 = arith.cmpi sge, %16, %1603 : vector<1x128xi32>
    %c12_i32 = arith.constant 12 : i32
    %1605 = vector.broadcast %c12_i32 : i32 to vector<1x128xi32>
    %1606 = arith.cmpi slt, %16, %1605 : vector<1x128xi32>
    %c8_i32 = arith.constant 8 : i32
    %c0_i32_343 = arith.constant 0 : i32
    %1607 = arith.cmpi eq, %c8_i32, %c0_i32_343 : i32
    %c1_i32_344 = arith.constant 1 : i32
    %1608 = arith.select %1607, %c1_i32_344, %c8_i32 : i32
    %1609 = vector.broadcast %1608 : i32 to vector<1x128xi32>
    %1610 = arith.remsi %16, %1609 : vector<1x128xi32>
    %c0_i32_345 = arith.constant 0 : i32
    %1611 = vector.broadcast %c0_i32_345 : i32 to vector<1x128xi32>
    %1612 = arith.cmpi ne, %1610, %1611 : vector<1x128xi32>
    %c0_i32_346 = arith.constant 0 : i32
    %1613 = vector.broadcast %c0_i32_346 : i32 to vector<1x128xi32>
    %1614 = arith.cmpi slt, %1610, %1613 : vector<1x128xi32>
    %c0_i32_347 = arith.constant 0 : i32
    %1615 = arith.cmpi slt, %1608, %c0_i32_347 : i32
    %1616 = vector.broadcast %1615 : i1 to vector<1x128xi1>
    %1617 = vector.broadcast %1616 : vector<1x128xi1> to vector<1x128xi1>
    %1618 = arith.xori %1614, %1617 : vector<1x128xi1>
    %1619 = arith.andi %1618, %1612 : vector<1x128xi1>
    %1620 = vector.broadcast %1608 : i32 to vector<1x128xi32>
    %1621 = arith.addi %1610, %1620 : vector<1x128xi32>
    %1622 = arith.select %1619, %1621, %1610 : vector<1x128xi1>, vector<1x128xi32>
    %c0_i32_348 = arith.constant 0 : i32
    %1623 = vector.broadcast %c0_i32_348 : i32 to vector<1x128xi32>
    %1624 = arith.cmpi eq, %1622, %1623 : vector<1x128xi32>
    %c4_i32_349 = arith.constant 4 : i32
    %1625 = tpu.dynamic_rotate %1560 by %c4_i32_349 dim 1 : vector<2x128xf32>, i32 -> vector<2x128xf32>
    %c124_i32 = arith.constant 124 : i32
    %1626 = tpu.dynamic_rotate %1560 by %c124_i32 dim 1 : vector<2x128xf32>, i32 -> vector<2x128xf32>
    %1627 = vector.shape_cast %20 : vector<1x1xi1> to vector<1x1xi1>
    %1628 = vector.broadcast %1627 : vector<1x1xi1> to vector<2x128xi1>
    %1629 = arith.select %1628, %1625, %1626 : vector<2x128xi1>, vector<2x128xf32>
    %1630 = vector.shape_cast %20 : vector<1x1xi1> to vector<1x1xi1>
    %1631 = vector.broadcast %1630 : vector<1x1xi1> to vector<2x128xi1>
    %1632 = arith.select %1631, %1626, %1625 : vector<2x128xi1>, vector<2x128xf32>
    %cst_350 = arith.constant 0.000000e+00 : f32
    %1633 = vector.shape_cast %1604 : vector<1x128xi1> to vector<1x128xi1>
    %1634 = vector.broadcast %1633 : vector<1x128xi1> to vector<2x128xi1>
    %1635 = vector.broadcast %cst_350 : f32 to vector<2x128xf32>
    %1636 = arith.select %1634, %1629, %1635 : vector<2x128xi1>, vector<2x128xf32>
    %cst_351 = arith.constant 0.000000e+00 : f32
    %1637 = vector.shape_cast %1606 : vector<1x128xi1> to vector<1x128xi1>
    %1638 = vector.broadcast %1637 : vector<1x128xi1> to vector<2x128xi1>
    %1639 = vector.broadcast %cst_351 : f32 to vector<2x128xf32>
    %1640 = arith.select %1638, %1632, %1639 : vector<2x128xi1>, vector<2x128xf32>
    %c4_i32_352 = arith.constant 4 : i32
    %1641 = tpu.dynamic_rotate %1573 by %c4_i32_352 dim 1 : vector<2x128xf32>, i32 -> vector<2x128xf32>
    %c124_i32_353 = arith.constant 124 : i32
    %1642 = tpu.dynamic_rotate %1573 by %c124_i32_353 dim 1 : vector<2x128xf32>, i32 -> vector<2x128xf32>
    %1643 = vector.shape_cast %20 : vector<1x1xi1> to vector<1x1xi1>
    %1644 = vector.broadcast %1643 : vector<1x1xi1> to vector<2x128xi1>
    %1645 = arith.select %1644, %1641, %1642 : vector<2x128xi1>, vector<2x128xf32>
    %1646 = vector.shape_cast %20 : vector<1x1xi1> to vector<1x1xi1>
    %1647 = vector.broadcast %1646 : vector<1x1xi1> to vector<2x128xi1>
    %1648 = arith.select %1647, %1642, %1641 : vector<2x128xi1>, vector<2x128xf32>
    %cst_354 = arith.constant 0.000000e+00 : f32
    %1649 = vector.shape_cast %1604 : vector<1x128xi1> to vector<1x128xi1>
    %1650 = vector.broadcast %1649 : vector<1x128xi1> to vector<2x128xi1>
    %1651 = vector.broadcast %cst_354 : f32 to vector<2x128xf32>
    %1652 = arith.select %1650, %1645, %1651 : vector<2x128xi1>, vector<2x128xf32>
    %cst_355 = arith.constant 0.000000e+00 : f32
    %1653 = vector.shape_cast %1606 : vector<1x128xi1> to vector<1x128xi1>
    %1654 = vector.broadcast %1653 : vector<1x128xi1> to vector<2x128xi1>
    %1655 = vector.broadcast %cst_355 : f32 to vector<2x128xf32>
    %1656 = arith.select %1654, %1648, %1655 : vector<2x128xi1>, vector<2x128xf32>
    %c4_i32_356 = arith.constant 4 : i32
    %1657 = tpu.dynamic_rotate %1586 by %c4_i32_356 dim 1 : vector<2x128xf32>, i32 -> vector<2x128xf32>
    %c124_i32_357 = arith.constant 124 : i32
    %1658 = tpu.dynamic_rotate %1586 by %c124_i32_357 dim 1 : vector<2x128xf32>, i32 -> vector<2x128xf32>
    %1659 = vector.shape_cast %20 : vector<1x1xi1> to vector<1x1xi1>
    %1660 = vector.broadcast %1659 : vector<1x1xi1> to vector<2x128xi1>
    %1661 = arith.select %1660, %1657, %1658 : vector<2x128xi1>, vector<2x128xf32>
    %1662 = vector.shape_cast %20 : vector<1x1xi1> to vector<1x1xi1>
    %1663 = vector.broadcast %1662 : vector<1x1xi1> to vector<2x128xi1>
    %1664 = arith.select %1663, %1658, %1657 : vector<2x128xi1>, vector<2x128xf32>
    %cst_358 = arith.constant 0.000000e+00 : f32
    %1665 = vector.shape_cast %1604 : vector<1x128xi1> to vector<1x128xi1>
    %1666 = vector.broadcast %1665 : vector<1x128xi1> to vector<2x128xi1>
    %1667 = vector.broadcast %cst_358 : f32 to vector<2x128xf32>
    %1668 = arith.select %1666, %1661, %1667 : vector<2x128xi1>, vector<2x128xf32>
    %cst_359 = arith.constant 0.000000e+00 : f32
    %1669 = vector.shape_cast %1606 : vector<1x128xi1> to vector<1x128xi1>
    %1670 = vector.broadcast %1669 : vector<1x128xi1> to vector<2x128xi1>
    %1671 = vector.broadcast %cst_359 : f32 to vector<2x128xf32>
    %1672 = arith.select %1670, %1664, %1671 : vector<2x128xi1>, vector<2x128xf32>
    %c4_i32_360 = arith.constant 4 : i32
    %1673 = tpu.dynamic_rotate %1599 by %c4_i32_360 dim 1 : vector<2x128xf32>, i32 -> vector<2x128xf32>
    %c124_i32_361 = arith.constant 124 : i32
    %1674 = tpu.dynamic_rotate %1599 by %c124_i32_361 dim 1 : vector<2x128xf32>, i32 -> vector<2x128xf32>
    %1675 = vector.shape_cast %20 : vector<1x1xi1> to vector<1x1xi1>
    %1676 = vector.broadcast %1675 : vector<1x1xi1> to vector<2x128xi1>
    %1677 = arith.select %1676, %1673, %1674 : vector<2x128xi1>, vector<2x128xf32>
    %1678 = vector.shape_cast %20 : vector<1x1xi1> to vector<1x1xi1>
    %1679 = vector.broadcast %1678 : vector<1x1xi1> to vector<2x128xi1>
    %1680 = arith.select %1679, %1674, %1673 : vector<2x128xi1>, vector<2x128xf32>
    %cst_362 = arith.constant 0.000000e+00 : f32
    %1681 = vector.shape_cast %1604 : vector<1x128xi1> to vector<1x128xi1>
    %1682 = vector.broadcast %1681 : vector<1x128xi1> to vector<2x128xi1>
    %1683 = vector.broadcast %cst_362 : f32 to vector<2x128xf32>
    %1684 = arith.select %1682, %1677, %1683 : vector<2x128xi1>, vector<2x128xf32>
    %cst_363 = arith.constant 0.000000e+00 : f32
    %1685 = vector.shape_cast %1606 : vector<1x128xi1> to vector<1x128xi1>
    %1686 = vector.broadcast %1685 : vector<1x128xi1> to vector<2x128xi1>
    %1687 = vector.broadcast %cst_363 : f32 to vector<2x128xf32>
    %1688 = arith.select %1686, %1680, %1687 : vector<2x128xi1>, vector<2x128xf32>
    %cst_364 = arith.constant 0.000000e+00 : f32
    %1689 = vector.broadcast %cst_364 : f32 to vector<2x128xf32>
    %c0_365 = arith.constant 0 : index
    %1690 = memref.load %arg14[%c0_365] : memref<8xf32, #tpu.memory_space<smem>>
    %1691 = vector.broadcast %1690 : f32 to vector<2x128xf32>
    %1692 = arith.addf %1689, %1691 : vector<2x128xf32>
    %c0_366 = arith.constant 0 : index
    %1693 = memref.load %arg13[%c0_366] : memref<96xf32, #tpu.memory_space<smem>>
    %1694 = vector.broadcast %1693 : f32 to vector<2x128xf32>
    %1695 = arith.mulf %1694, %1636 : vector<2x128xf32>
    %1696 = arith.addf %1692, %1695 : vector<2x128xf32>
    %c1_367 = arith.constant 1 : index
    %1697 = memref.load %arg13[%c1_367] : memref<96xf32, #tpu.memory_space<smem>>
    %1698 = vector.broadcast %1697 : f32 to vector<2x128xf32>
    %1699 = arith.mulf %1698, %1560 : vector<2x128xf32>
    %1700 = arith.addf %1696, %1699 : vector<2x128xf32>
    %c2_368 = arith.constant 2 : index
    %1701 = memref.load %arg13[%c2_368] : memref<96xf32, #tpu.memory_space<smem>>
    %1702 = vector.broadcast %1701 : f32 to vector<2x128xf32>
    %1703 = arith.mulf %1702, %1640 : vector<2x128xf32>
    %1704 = arith.addf %1700, %1703 : vector<2x128xf32>
    %c3_369 = arith.constant 3 : index
    %1705 = memref.load %arg13[%c3_369] : memref<96xf32, #tpu.memory_space<smem>>
    %1706 = vector.broadcast %1705 : f32 to vector<2x128xf32>
    %1707 = arith.mulf %1706, %1652 : vector<2x128xf32>
    %1708 = arith.addf %1704, %1707 : vector<2x128xf32>
    %c4_370 = arith.constant 4 : index
    %1709 = memref.load %arg13[%c4_370] : memref<96xf32, #tpu.memory_space<smem>>
    %1710 = vector.broadcast %1709 : f32 to vector<2x128xf32>
    %1711 = arith.mulf %1710, %1573 : vector<2x128xf32>
    %1712 = arith.addf %1708, %1711 : vector<2x128xf32>
    %c5_371 = arith.constant 5 : index
    %1713 = memref.load %arg13[%c5_371] : memref<96xf32, #tpu.memory_space<smem>>
    %1714 = vector.broadcast %1713 : f32 to vector<2x128xf32>
    %1715 = arith.mulf %1714, %1656 : vector<2x128xf32>
    %1716 = arith.addf %1712, %1715 : vector<2x128xf32>
    %c6_372 = arith.constant 6 : index
    %1717 = memref.load %arg13[%c6_372] : memref<96xf32, #tpu.memory_space<smem>>
    %1718 = vector.broadcast %1717 : f32 to vector<2x128xf32>
    %1719 = arith.mulf %1718, %1668 : vector<2x128xf32>
    %1720 = arith.addf %1716, %1719 : vector<2x128xf32>
    %c7_373 = arith.constant 7 : index
    %1721 = memref.load %arg13[%c7_373] : memref<96xf32, #tpu.memory_space<smem>>
    %1722 = vector.broadcast %1721 : f32 to vector<2x128xf32>
    %1723 = arith.mulf %1722, %1586 : vector<2x128xf32>
    %1724 = arith.addf %1720, %1723 : vector<2x128xf32>
    %c8_374 = arith.constant 8 : index
    %1725 = memref.load %arg13[%c8_374] : memref<96xf32, #tpu.memory_space<smem>>
    %1726 = vector.broadcast %1725 : f32 to vector<2x128xf32>
    %1727 = arith.mulf %1726, %1672 : vector<2x128xf32>
    %1728 = arith.addf %1724, %1727 : vector<2x128xf32>
    %c9_375 = arith.constant 9 : index
    %1729 = memref.load %arg13[%c9_375] : memref<96xf32, #tpu.memory_space<smem>>
    %1730 = vector.broadcast %1729 : f32 to vector<2x128xf32>
    %1731 = arith.mulf %1730, %1684 : vector<2x128xf32>
    %1732 = arith.addf %1728, %1731 : vector<2x128xf32>
    %c10_376 = arith.constant 10 : index
    %1733 = memref.load %arg13[%c10_376] : memref<96xf32, #tpu.memory_space<smem>>
    %1734 = vector.broadcast %1733 : f32 to vector<2x128xf32>
    %1735 = arith.mulf %1734, %1599 : vector<2x128xf32>
    %1736 = arith.addf %1732, %1735 : vector<2x128xf32>
    %c11_377 = arith.constant 11 : index
    %1737 = memref.load %arg13[%c11_377] : memref<96xf32, #tpu.memory_space<smem>>
    %1738 = vector.broadcast %1737 : f32 to vector<2x128xf32>
    %1739 = arith.mulf %1738, %1688 : vector<2x128xf32>
    %1740 = arith.addf %1736, %1739 : vector<2x128xf32>
    %cst_378 = arith.constant 0.000000e+00 : f32
    %1741 = vector.broadcast %cst_378 : f32 to vector<2x128xf32>
    %c1_379 = arith.constant 1 : index
    %1742 = memref.load %arg14[%c1_379] : memref<8xf32, #tpu.memory_space<smem>>
    %1743 = vector.broadcast %1742 : f32 to vector<2x128xf32>
    %1744 = arith.addf %1741, %1743 : vector<2x128xf32>
    %c12_380 = arith.constant 12 : index
    %1745 = memref.load %arg13[%c12_380] : memref<96xf32, #tpu.memory_space<smem>>
    %1746 = vector.broadcast %1745 : f32 to vector<2x128xf32>
    %1747 = arith.mulf %1746, %1636 : vector<2x128xf32>
    %1748 = arith.addf %1744, %1747 : vector<2x128xf32>
    %c13_381 = arith.constant 13 : index
    %1749 = memref.load %arg13[%c13_381] : memref<96xf32, #tpu.memory_space<smem>>
    %1750 = vector.broadcast %1749 : f32 to vector<2x128xf32>
    %1751 = arith.mulf %1750, %1560 : vector<2x128xf32>
    %1752 = arith.addf %1748, %1751 : vector<2x128xf32>
    %c14_382 = arith.constant 14 : index
    %1753 = memref.load %arg13[%c14_382] : memref<96xf32, #tpu.memory_space<smem>>
    %1754 = vector.broadcast %1753 : f32 to vector<2x128xf32>
    %1755 = arith.mulf %1754, %1640 : vector<2x128xf32>
    %1756 = arith.addf %1752, %1755 : vector<2x128xf32>
    %c15_383 = arith.constant 15 : index
    %1757 = memref.load %arg13[%c15_383] : memref<96xf32, #tpu.memory_space<smem>>
    %1758 = vector.broadcast %1757 : f32 to vector<2x128xf32>
    %1759 = arith.mulf %1758, %1652 : vector<2x128xf32>
    %1760 = arith.addf %1756, %1759 : vector<2x128xf32>
    %c16_384 = arith.constant 16 : index
    %1761 = memref.load %arg13[%c16_384] : memref<96xf32, #tpu.memory_space<smem>>
    %1762 = vector.broadcast %1761 : f32 to vector<2x128xf32>
    %1763 = arith.mulf %1762, %1573 : vector<2x128xf32>
    %1764 = arith.addf %1760, %1763 : vector<2x128xf32>
    %c17_385 = arith.constant 17 : index
    %1765 = memref.load %arg13[%c17_385] : memref<96xf32, #tpu.memory_space<smem>>
    %1766 = vector.broadcast %1765 : f32 to vector<2x128xf32>
    %1767 = arith.mulf %1766, %1656 : vector<2x128xf32>
    %1768 = arith.addf %1764, %1767 : vector<2x128xf32>
    %c18_386 = arith.constant 18 : index
    %1769 = memref.load %arg13[%c18_386] : memref<96xf32, #tpu.memory_space<smem>>
    %1770 = vector.broadcast %1769 : f32 to vector<2x128xf32>
    %1771 = arith.mulf %1770, %1668 : vector<2x128xf32>
    %1772 = arith.addf %1768, %1771 : vector<2x128xf32>
    %c19_387 = arith.constant 19 : index
    %1773 = memref.load %arg13[%c19_387] : memref<96xf32, #tpu.memory_space<smem>>
    %1774 = vector.broadcast %1773 : f32 to vector<2x128xf32>
    %1775 = arith.mulf %1774, %1586 : vector<2x128xf32>
    %1776 = arith.addf %1772, %1775 : vector<2x128xf32>
    %c20_388 = arith.constant 20 : index
    %1777 = memref.load %arg13[%c20_388] : memref<96xf32, #tpu.memory_space<smem>>
    %1778 = vector.broadcast %1777 : f32 to vector<2x128xf32>
    %1779 = arith.mulf %1778, %1672 : vector<2x128xf32>
    %1780 = arith.addf %1776, %1779 : vector<2x128xf32>
    %c21_389 = arith.constant 21 : index
    %1781 = memref.load %arg13[%c21_389] : memref<96xf32, #tpu.memory_space<smem>>
    %1782 = vector.broadcast %1781 : f32 to vector<2x128xf32>
    %1783 = arith.mulf %1782, %1684 : vector<2x128xf32>
    %1784 = arith.addf %1780, %1783 : vector<2x128xf32>
    %c22_390 = arith.constant 22 : index
    %1785 = memref.load %arg13[%c22_390] : memref<96xf32, #tpu.memory_space<smem>>
    %1786 = vector.broadcast %1785 : f32 to vector<2x128xf32>
    %1787 = arith.mulf %1786, %1599 : vector<2x128xf32>
    %1788 = arith.addf %1784, %1787 : vector<2x128xf32>
    %c23_391 = arith.constant 23 : index
    %1789 = memref.load %arg13[%c23_391] : memref<96xf32, #tpu.memory_space<smem>>
    %1790 = vector.broadcast %1789 : f32 to vector<2x128xf32>
    %1791 = arith.mulf %1790, %1688 : vector<2x128xf32>
    %1792 = arith.addf %1788, %1791 : vector<2x128xf32>
    %cst_392 = arith.constant 0.000000e+00 : f32
    %1793 = vector.broadcast %cst_392 : f32 to vector<2x128xf32>
    %c2_393 = arith.constant 2 : index
    %1794 = memref.load %arg14[%c2_393] : memref<8xf32, #tpu.memory_space<smem>>
    %1795 = vector.broadcast %1794 : f32 to vector<2x128xf32>
    %1796 = arith.addf %1793, %1795 : vector<2x128xf32>
    %c24_394 = arith.constant 24 : index
    %1797 = memref.load %arg13[%c24_394] : memref<96xf32, #tpu.memory_space<smem>>
    %1798 = vector.broadcast %1797 : f32 to vector<2x128xf32>
    %1799 = arith.mulf %1798, %1636 : vector<2x128xf32>
    %1800 = arith.addf %1796, %1799 : vector<2x128xf32>
    %c25_395 = arith.constant 25 : index
    %1801 = memref.load %arg13[%c25_395] : memref<96xf32, #tpu.memory_space<smem>>
    %1802 = vector.broadcast %1801 : f32 to vector<2x128xf32>
    %1803 = arith.mulf %1802, %1560 : vector<2x128xf32>
    %1804 = arith.addf %1800, %1803 : vector<2x128xf32>
    %c26_396 = arith.constant 26 : index
    %1805 = memref.load %arg13[%c26_396] : memref<96xf32, #tpu.memory_space<smem>>
    %1806 = vector.broadcast %1805 : f32 to vector<2x128xf32>
    %1807 = arith.mulf %1806, %1640 : vector<2x128xf32>
    %1808 = arith.addf %1804, %1807 : vector<2x128xf32>
    %c27_397 = arith.constant 27 : index
    %1809 = memref.load %arg13[%c27_397] : memref<96xf32, #tpu.memory_space<smem>>
    %1810 = vector.broadcast %1809 : f32 to vector<2x128xf32>
    %1811 = arith.mulf %1810, %1652 : vector<2x128xf32>
    %1812 = arith.addf %1808, %1811 : vector<2x128xf32>
    %c28_398 = arith.constant 28 : index
    %1813 = memref.load %arg13[%c28_398] : memref<96xf32, #tpu.memory_space<smem>>
    %1814 = vector.broadcast %1813 : f32 to vector<2x128xf32>
    %1815 = arith.mulf %1814, %1573 : vector<2x128xf32>
    %1816 = arith.addf %1812, %1815 : vector<2x128xf32>
    %c29_399 = arith.constant 29 : index
    %1817 = memref.load %arg13[%c29_399] : memref<96xf32, #tpu.memory_space<smem>>
    %1818 = vector.broadcast %1817 : f32 to vector<2x128xf32>
    %1819 = arith.mulf %1818, %1656 : vector<2x128xf32>
    %1820 = arith.addf %1816, %1819 : vector<2x128xf32>
    %c30_400 = arith.constant 30 : index
    %1821 = memref.load %arg13[%c30_400] : memref<96xf32, #tpu.memory_space<smem>>
    %1822 = vector.broadcast %1821 : f32 to vector<2x128xf32>
    %1823 = arith.mulf %1822, %1668 : vector<2x128xf32>
    %1824 = arith.addf %1820, %1823 : vector<2x128xf32>
    %c31_401 = arith.constant 31 : index
    %1825 = memref.load %arg13[%c31_401] : memref<96xf32, #tpu.memory_space<smem>>
    %1826 = vector.broadcast %1825 : f32 to vector<2x128xf32>
    %1827 = arith.mulf %1826, %1586 : vector<2x128xf32>
    %1828 = arith.addf %1824, %1827 : vector<2x128xf32>
    %c32_402 = arith.constant 32 : index
    %1829 = memref.load %arg13[%c32_402] : memref<96xf32, #tpu.memory_space<smem>>
    %1830 = vector.broadcast %1829 : f32 to vector<2x128xf32>
    %1831 = arith.mulf %1830, %1672 : vector<2x128xf32>
    %1832 = arith.addf %1828, %1831 : vector<2x128xf32>
    %c33_403 = arith.constant 33 : index
    %1833 = memref.load %arg13[%c33_403] : memref<96xf32, #tpu.memory_space<smem>>
    %1834 = vector.broadcast %1833 : f32 to vector<2x128xf32>
    %1835 = arith.mulf %1834, %1684 : vector<2x128xf32>
    %1836 = arith.addf %1832, %1835 : vector<2x128xf32>
    %c34_404 = arith.constant 34 : index
    %1837 = memref.load %arg13[%c34_404] : memref<96xf32, #tpu.memory_space<smem>>
    %1838 = vector.broadcast %1837 : f32 to vector<2x128xf32>
    %1839 = arith.mulf %1838, %1599 : vector<2x128xf32>
    %1840 = arith.addf %1836, %1839 : vector<2x128xf32>
    %c35_405 = arith.constant 35 : index
    %1841 = memref.load %arg13[%c35_405] : memref<96xf32, #tpu.memory_space<smem>>
    %1842 = vector.broadcast %1841 : f32 to vector<2x128xf32>
    %1843 = arith.mulf %1842, %1688 : vector<2x128xf32>
    %1844 = arith.addf %1840, %1843 : vector<2x128xf32>
    %cst_406 = arith.constant 0.000000e+00 : f32
    %1845 = vector.broadcast %cst_406 : f32 to vector<2x128xf32>
    %c3_407 = arith.constant 3 : index
    %1846 = memref.load %arg14[%c3_407] : memref<8xf32, #tpu.memory_space<smem>>
    %1847 = vector.broadcast %1846 : f32 to vector<2x128xf32>
    %1848 = arith.addf %1845, %1847 : vector<2x128xf32>
    %c36_408 = arith.constant 36 : index
    %1849 = memref.load %arg13[%c36_408] : memref<96xf32, #tpu.memory_space<smem>>
    %1850 = vector.broadcast %1849 : f32 to vector<2x128xf32>
    %1851 = arith.mulf %1850, %1636 : vector<2x128xf32>
    %1852 = arith.addf %1848, %1851 : vector<2x128xf32>
    %c37_409 = arith.constant 37 : index
    %1853 = memref.load %arg13[%c37_409] : memref<96xf32, #tpu.memory_space<smem>>
    %1854 = vector.broadcast %1853 : f32 to vector<2x128xf32>
    %1855 = arith.mulf %1854, %1560 : vector<2x128xf32>
    %1856 = arith.addf %1852, %1855 : vector<2x128xf32>
    %c38_410 = arith.constant 38 : index
    %1857 = memref.load %arg13[%c38_410] : memref<96xf32, #tpu.memory_space<smem>>
    %1858 = vector.broadcast %1857 : f32 to vector<2x128xf32>
    %1859 = arith.mulf %1858, %1640 : vector<2x128xf32>
    %1860 = arith.addf %1856, %1859 : vector<2x128xf32>
    %c39_411 = arith.constant 39 : index
    %1861 = memref.load %arg13[%c39_411] : memref<96xf32, #tpu.memory_space<smem>>
    %1862 = vector.broadcast %1861 : f32 to vector<2x128xf32>
    %1863 = arith.mulf %1862, %1652 : vector<2x128xf32>
    %1864 = arith.addf %1860, %1863 : vector<2x128xf32>
    %c40_412 = arith.constant 40 : index
    %1865 = memref.load %arg13[%c40_412] : memref<96xf32, #tpu.memory_space<smem>>
    %1866 = vector.broadcast %1865 : f32 to vector<2x128xf32>
    %1867 = arith.mulf %1866, %1573 : vector<2x128xf32>
    %1868 = arith.addf %1864, %1867 : vector<2x128xf32>
    %c41_413 = arith.constant 41 : index
    %1869 = memref.load %arg13[%c41_413] : memref<96xf32, #tpu.memory_space<smem>>
    %1870 = vector.broadcast %1869 : f32 to vector<2x128xf32>
    %1871 = arith.mulf %1870, %1656 : vector<2x128xf32>
    %1872 = arith.addf %1868, %1871 : vector<2x128xf32>
    %c42_414 = arith.constant 42 : index
    %1873 = memref.load %arg13[%c42_414] : memref<96xf32, #tpu.memory_space<smem>>
    %1874 = vector.broadcast %1873 : f32 to vector<2x128xf32>
    %1875 = arith.mulf %1874, %1668 : vector<2x128xf32>
    %1876 = arith.addf %1872, %1875 : vector<2x128xf32>
    %c43_415 = arith.constant 43 : index
    %1877 = memref.load %arg13[%c43_415] : memref<96xf32, #tpu.memory_space<smem>>
    %1878 = vector.broadcast %1877 : f32 to vector<2x128xf32>
    %1879 = arith.mulf %1878, %1586 : vector<2x128xf32>
    %1880 = arith.addf %1876, %1879 : vector<2x128xf32>
    %c44_416 = arith.constant 44 : index
    %1881 = memref.load %arg13[%c44_416] : memref<96xf32, #tpu.memory_space<smem>>
    %1882 = vector.broadcast %1881 : f32 to vector<2x128xf32>
    %1883 = arith.mulf %1882, %1672 : vector<2x128xf32>
    %1884 = arith.addf %1880, %1883 : vector<2x128xf32>
    %c45_417 = arith.constant 45 : index
    %1885 = memref.load %arg13[%c45_417] : memref<96xf32, #tpu.memory_space<smem>>
    %1886 = vector.broadcast %1885 : f32 to vector<2x128xf32>
    %1887 = arith.mulf %1886, %1684 : vector<2x128xf32>
    %1888 = arith.addf %1884, %1887 : vector<2x128xf32>
    %c46_418 = arith.constant 46 : index
    %1889 = memref.load %arg13[%c46_418] : memref<96xf32, #tpu.memory_space<smem>>
    %1890 = vector.broadcast %1889 : f32 to vector<2x128xf32>
    %1891 = arith.mulf %1890, %1599 : vector<2x128xf32>
    %1892 = arith.addf %1888, %1891 : vector<2x128xf32>
    %c47_419 = arith.constant 47 : index
    %1893 = memref.load %arg13[%c47_419] : memref<96xf32, #tpu.memory_space<smem>>
    %1894 = vector.broadcast %1893 : f32 to vector<2x128xf32>
    %1895 = arith.mulf %1894, %1688 : vector<2x128xf32>
    %1896 = arith.addf %1892, %1895 : vector<2x128xf32>
    %cst_420 = arith.constant 0.000000e+00 : f32
    %1897 = vector.broadcast %cst_420 : f32 to vector<2x128xf32>
    %c4_421 = arith.constant 4 : index
    %1898 = memref.load %arg14[%c4_421] : memref<8xf32, #tpu.memory_space<smem>>
    %1899 = vector.broadcast %1898 : f32 to vector<2x128xf32>
    %1900 = arith.addf %1897, %1899 : vector<2x128xf32>
    %c48_422 = arith.constant 48 : index
    %1901 = memref.load %arg13[%c48_422] : memref<96xf32, #tpu.memory_space<smem>>
    %1902 = vector.broadcast %1901 : f32 to vector<2x128xf32>
    %1903 = arith.mulf %1902, %1636 : vector<2x128xf32>
    %1904 = arith.addf %1900, %1903 : vector<2x128xf32>
    %c49_423 = arith.constant 49 : index
    %1905 = memref.load %arg13[%c49_423] : memref<96xf32, #tpu.memory_space<smem>>
    %1906 = vector.broadcast %1905 : f32 to vector<2x128xf32>
    %1907 = arith.mulf %1906, %1560 : vector<2x128xf32>
    %1908 = arith.addf %1904, %1907 : vector<2x128xf32>
    %c50_424 = arith.constant 50 : index
    %1909 = memref.load %arg13[%c50_424] : memref<96xf32, #tpu.memory_space<smem>>
    %1910 = vector.broadcast %1909 : f32 to vector<2x128xf32>
    %1911 = arith.mulf %1910, %1640 : vector<2x128xf32>
    %1912 = arith.addf %1908, %1911 : vector<2x128xf32>
    %c51_425 = arith.constant 51 : index
    %1913 = memref.load %arg13[%c51_425] : memref<96xf32, #tpu.memory_space<smem>>
    %1914 = vector.broadcast %1913 : f32 to vector<2x128xf32>
    %1915 = arith.mulf %1914, %1652 : vector<2x128xf32>
    %1916 = arith.addf %1912, %1915 : vector<2x128xf32>
    %c52_426 = arith.constant 52 : index
    %1917 = memref.load %arg13[%c52_426] : memref<96xf32, #tpu.memory_space<smem>>
    %1918 = vector.broadcast %1917 : f32 to vector<2x128xf32>
    %1919 = arith.mulf %1918, %1573 : vector<2x128xf32>
    %1920 = arith.addf %1916, %1919 : vector<2x128xf32>
    %c53_427 = arith.constant 53 : index
    %1921 = memref.load %arg13[%c53_427] : memref<96xf32, #tpu.memory_space<smem>>
    %1922 = vector.broadcast %1921 : f32 to vector<2x128xf32>
    %1923 = arith.mulf %1922, %1656 : vector<2x128xf32>
    %1924 = arith.addf %1920, %1923 : vector<2x128xf32>
    %c54_428 = arith.constant 54 : index
    %1925 = memref.load %arg13[%c54_428] : memref<96xf32, #tpu.memory_space<smem>>
    %1926 = vector.broadcast %1925 : f32 to vector<2x128xf32>
    %1927 = arith.mulf %1926, %1668 : vector<2x128xf32>
    %1928 = arith.addf %1924, %1927 : vector<2x128xf32>
    %c55_429 = arith.constant 55 : index
    %1929 = memref.load %arg13[%c55_429] : memref<96xf32, #tpu.memory_space<smem>>
    %1930 = vector.broadcast %1929 : f32 to vector<2x128xf32>
    %1931 = arith.mulf %1930, %1586 : vector<2x128xf32>
    %1932 = arith.addf %1928, %1931 : vector<2x128xf32>
    %c56_430 = arith.constant 56 : index
    %1933 = memref.load %arg13[%c56_430] : memref<96xf32, #tpu.memory_space<smem>>
    %1934 = vector.broadcast %1933 : f32 to vector<2x128xf32>
    %1935 = arith.mulf %1934, %1672 : vector<2x128xf32>
    %1936 = arith.addf %1932, %1935 : vector<2x128xf32>
    %c57_431 = arith.constant 57 : index
    %1937 = memref.load %arg13[%c57_431] : memref<96xf32, #tpu.memory_space<smem>>
    %1938 = vector.broadcast %1937 : f32 to vector<2x128xf32>
    %1939 = arith.mulf %1938, %1684 : vector<2x128xf32>
    %1940 = arith.addf %1936, %1939 : vector<2x128xf32>
    %c58_432 = arith.constant 58 : index
    %1941 = memref.load %arg13[%c58_432] : memref<96xf32, #tpu.memory_space<smem>>
    %1942 = vector.broadcast %1941 : f32 to vector<2x128xf32>
    %1943 = arith.mulf %1942, %1599 : vector<2x128xf32>
    %1944 = arith.addf %1940, %1943 : vector<2x128xf32>
    %c59_433 = arith.constant 59 : index
    %1945 = memref.load %arg13[%c59_433] : memref<96xf32, #tpu.memory_space<smem>>
    %1946 = vector.broadcast %1945 : f32 to vector<2x128xf32>
    %1947 = arith.mulf %1946, %1688 : vector<2x128xf32>
    %1948 = arith.addf %1944, %1947 : vector<2x128xf32>
    %cst_434 = arith.constant 0.000000e+00 : f32
    %1949 = vector.broadcast %cst_434 : f32 to vector<2x128xf32>
    %c5_435 = arith.constant 5 : index
    %1950 = memref.load %arg14[%c5_435] : memref<8xf32, #tpu.memory_space<smem>>
    %1951 = vector.broadcast %1950 : f32 to vector<2x128xf32>
    %1952 = arith.addf %1949, %1951 : vector<2x128xf32>
    %c60_436 = arith.constant 60 : index
    %1953 = memref.load %arg13[%c60_436] : memref<96xf32, #tpu.memory_space<smem>>
    %1954 = vector.broadcast %1953 : f32 to vector<2x128xf32>
    %1955 = arith.mulf %1954, %1636 : vector<2x128xf32>
    %1956 = arith.addf %1952, %1955 : vector<2x128xf32>
    %c61_437 = arith.constant 61 : index
    %1957 = memref.load %arg13[%c61_437] : memref<96xf32, #tpu.memory_space<smem>>
    %1958 = vector.broadcast %1957 : f32 to vector<2x128xf32>
    %1959 = arith.mulf %1958, %1560 : vector<2x128xf32>
    %1960 = arith.addf %1956, %1959 : vector<2x128xf32>
    %c62_438 = arith.constant 62 : index
    %1961 = memref.load %arg13[%c62_438] : memref<96xf32, #tpu.memory_space<smem>>
    %1962 = vector.broadcast %1961 : f32 to vector<2x128xf32>
    %1963 = arith.mulf %1962, %1640 : vector<2x128xf32>
    %1964 = arith.addf %1960, %1963 : vector<2x128xf32>
    %c63_439 = arith.constant 63 : index
    %1965 = memref.load %arg13[%c63_439] : memref<96xf32, #tpu.memory_space<smem>>
    %1966 = vector.broadcast %1965 : f32 to vector<2x128xf32>
    %1967 = arith.mulf %1966, %1652 : vector<2x128xf32>
    %1968 = arith.addf %1964, %1967 : vector<2x128xf32>
    %c64_440 = arith.constant 64 : index
    %1969 = memref.load %arg13[%c64_440] : memref<96xf32, #tpu.memory_space<smem>>
    %1970 = vector.broadcast %1969 : f32 to vector<2x128xf32>
    %1971 = arith.mulf %1970, %1573 : vector<2x128xf32>
    %1972 = arith.addf %1968, %1971 : vector<2x128xf32>
    %c65_441 = arith.constant 65 : index
    %1973 = memref.load %arg13[%c65_441] : memref<96xf32, #tpu.memory_space<smem>>
    %1974 = vector.broadcast %1973 : f32 to vector<2x128xf32>
    %1975 = arith.mulf %1974, %1656 : vector<2x128xf32>
    %1976 = arith.addf %1972, %1975 : vector<2x128xf32>
    %c66_442 = arith.constant 66 : index
    %1977 = memref.load %arg13[%c66_442] : memref<96xf32, #tpu.memory_space<smem>>
    %1978 = vector.broadcast %1977 : f32 to vector<2x128xf32>
    %1979 = arith.mulf %1978, %1668 : vector<2x128xf32>
    %1980 = arith.addf %1976, %1979 : vector<2x128xf32>
    %c67_443 = arith.constant 67 : index
    %1981 = memref.load %arg13[%c67_443] : memref<96xf32, #tpu.memory_space<smem>>
    %1982 = vector.broadcast %1981 : f32 to vector<2x128xf32>
    %1983 = arith.mulf %1982, %1586 : vector<2x128xf32>
    %1984 = arith.addf %1980, %1983 : vector<2x128xf32>
    %c68_444 = arith.constant 68 : index
    %1985 = memref.load %arg13[%c68_444] : memref<96xf32, #tpu.memory_space<smem>>
    %1986 = vector.broadcast %1985 : f32 to vector<2x128xf32>
    %1987 = arith.mulf %1986, %1672 : vector<2x128xf32>
    %1988 = arith.addf %1984, %1987 : vector<2x128xf32>
    %c69_445 = arith.constant 69 : index
    %1989 = memref.load %arg13[%c69_445] : memref<96xf32, #tpu.memory_space<smem>>
    %1990 = vector.broadcast %1989 : f32 to vector<2x128xf32>
    %1991 = arith.mulf %1990, %1684 : vector<2x128xf32>
    %1992 = arith.addf %1988, %1991 : vector<2x128xf32>
    %c70_446 = arith.constant 70 : index
    %1993 = memref.load %arg13[%c70_446] : memref<96xf32, #tpu.memory_space<smem>>
    %1994 = vector.broadcast %1993 : f32 to vector<2x128xf32>
    %1995 = arith.mulf %1994, %1599 : vector<2x128xf32>
    %1996 = arith.addf %1992, %1995 : vector<2x128xf32>
    %c71_447 = arith.constant 71 : index
    %1997 = memref.load %arg13[%c71_447] : memref<96xf32, #tpu.memory_space<smem>>
    %1998 = vector.broadcast %1997 : f32 to vector<2x128xf32>
    %1999 = arith.mulf %1998, %1688 : vector<2x128xf32>
    %2000 = arith.addf %1996, %1999 : vector<2x128xf32>
    %cst_448 = arith.constant 0.000000e+00 : f32
    %2001 = vector.broadcast %cst_448 : f32 to vector<2x128xf32>
    %c6_449 = arith.constant 6 : index
    %2002 = memref.load %arg14[%c6_449] : memref<8xf32, #tpu.memory_space<smem>>
    %2003 = vector.broadcast %2002 : f32 to vector<2x128xf32>
    %2004 = arith.addf %2001, %2003 : vector<2x128xf32>
    %c72_450 = arith.constant 72 : index
    %2005 = memref.load %arg13[%c72_450] : memref<96xf32, #tpu.memory_space<smem>>
    %2006 = vector.broadcast %2005 : f32 to vector<2x128xf32>
    %2007 = arith.mulf %2006, %1636 : vector<2x128xf32>
    %2008 = arith.addf %2004, %2007 : vector<2x128xf32>
    %c73_451 = arith.constant 73 : index
    %2009 = memref.load %arg13[%c73_451] : memref<96xf32, #tpu.memory_space<smem>>
    %2010 = vector.broadcast %2009 : f32 to vector<2x128xf32>
    %2011 = arith.mulf %2010, %1560 : vector<2x128xf32>
    %2012 = arith.addf %2008, %2011 : vector<2x128xf32>
    %c74_452 = arith.constant 74 : index
    %2013 = memref.load %arg13[%c74_452] : memref<96xf32, #tpu.memory_space<smem>>
    %2014 = vector.broadcast %2013 : f32 to vector<2x128xf32>
    %2015 = arith.mulf %2014, %1640 : vector<2x128xf32>
    %2016 = arith.addf %2012, %2015 : vector<2x128xf32>
    %c75_453 = arith.constant 75 : index
    %2017 = memref.load %arg13[%c75_453] : memref<96xf32, #tpu.memory_space<smem>>
    %2018 = vector.broadcast %2017 : f32 to vector<2x128xf32>
    %2019 = arith.mulf %2018, %1652 : vector<2x128xf32>
    %2020 = arith.addf %2016, %2019 : vector<2x128xf32>
    %c76_454 = arith.constant 76 : index
    %2021 = memref.load %arg13[%c76_454] : memref<96xf32, #tpu.memory_space<smem>>
    %2022 = vector.broadcast %2021 : f32 to vector<2x128xf32>
    %2023 = arith.mulf %2022, %1573 : vector<2x128xf32>
    %2024 = arith.addf %2020, %2023 : vector<2x128xf32>
    %c77_455 = arith.constant 77 : index
    %2025 = memref.load %arg13[%c77_455] : memref<96xf32, #tpu.memory_space<smem>>
    %2026 = vector.broadcast %2025 : f32 to vector<2x128xf32>
    %2027 = arith.mulf %2026, %1656 : vector<2x128xf32>
    %2028 = arith.addf %2024, %2027 : vector<2x128xf32>
    %c78_456 = arith.constant 78 : index
    %2029 = memref.load %arg13[%c78_456] : memref<96xf32, #tpu.memory_space<smem>>
    %2030 = vector.broadcast %2029 : f32 to vector<2x128xf32>
    %2031 = arith.mulf %2030, %1668 : vector<2x128xf32>
    %2032 = arith.addf %2028, %2031 : vector<2x128xf32>
    %c79_457 = arith.constant 79 : index
    %2033 = memref.load %arg13[%c79_457] : memref<96xf32, #tpu.memory_space<smem>>
    %2034 = vector.broadcast %2033 : f32 to vector<2x128xf32>
    %2035 = arith.mulf %2034, %1586 : vector<2x128xf32>
    %2036 = arith.addf %2032, %2035 : vector<2x128xf32>
    %c80_458 = arith.constant 80 : index
    %2037 = memref.load %arg13[%c80_458] : memref<96xf32, #tpu.memory_space<smem>>
    %2038 = vector.broadcast %2037 : f32 to vector<2x128xf32>
    %2039 = arith.mulf %2038, %1672 : vector<2x128xf32>
    %2040 = arith.addf %2036, %2039 : vector<2x128xf32>
    %c81_459 = arith.constant 81 : index
    %2041 = memref.load %arg13[%c81_459] : memref<96xf32, #tpu.memory_space<smem>>
    %2042 = vector.broadcast %2041 : f32 to vector<2x128xf32>
    %2043 = arith.mulf %2042, %1684 : vector<2x128xf32>
    %2044 = arith.addf %2040, %2043 : vector<2x128xf32>
    %c82_460 = arith.constant 82 : index
    %2045 = memref.load %arg13[%c82_460] : memref<96xf32, #tpu.memory_space<smem>>
    %2046 = vector.broadcast %2045 : f32 to vector<2x128xf32>
    %2047 = arith.mulf %2046, %1599 : vector<2x128xf32>
    %2048 = arith.addf %2044, %2047 : vector<2x128xf32>
    %c83_461 = arith.constant 83 : index
    %2049 = memref.load %arg13[%c83_461] : memref<96xf32, #tpu.memory_space<smem>>
    %2050 = vector.broadcast %2049 : f32 to vector<2x128xf32>
    %2051 = arith.mulf %2050, %1688 : vector<2x128xf32>
    %2052 = arith.addf %2048, %2051 : vector<2x128xf32>
    %cst_462 = arith.constant 0.000000e+00 : f32
    %2053 = vector.broadcast %cst_462 : f32 to vector<2x128xf32>
    %c7_463 = arith.constant 7 : index
    %2054 = memref.load %arg14[%c7_463] : memref<8xf32, #tpu.memory_space<smem>>
    %2055 = vector.broadcast %2054 : f32 to vector<2x128xf32>
    %2056 = arith.addf %2053, %2055 : vector<2x128xf32>
    %c84_464 = arith.constant 84 : index
    %2057 = memref.load %arg13[%c84_464] : memref<96xf32, #tpu.memory_space<smem>>
    %2058 = vector.broadcast %2057 : f32 to vector<2x128xf32>
    %2059 = arith.mulf %2058, %1636 : vector<2x128xf32>
    %2060 = arith.addf %2056, %2059 : vector<2x128xf32>
    %c85_465 = arith.constant 85 : index
    %2061 = memref.load %arg13[%c85_465] : memref<96xf32, #tpu.memory_space<smem>>
    %2062 = vector.broadcast %2061 : f32 to vector<2x128xf32>
    %2063 = arith.mulf %2062, %1560 : vector<2x128xf32>
    %2064 = arith.addf %2060, %2063 : vector<2x128xf32>
    %c86_466 = arith.constant 86 : index
    %2065 = memref.load %arg13[%c86_466] : memref<96xf32, #tpu.memory_space<smem>>
    %2066 = vector.broadcast %2065 : f32 to vector<2x128xf32>
    %2067 = arith.mulf %2066, %1640 : vector<2x128xf32>
    %2068 = arith.addf %2064, %2067 : vector<2x128xf32>
    %c87_467 = arith.constant 87 : index
    %2069 = memref.load %arg13[%c87_467] : memref<96xf32, #tpu.memory_space<smem>>
    %2070 = vector.broadcast %2069 : f32 to vector<2x128xf32>
    %2071 = arith.mulf %2070, %1652 : vector<2x128xf32>
    %2072 = arith.addf %2068, %2071 : vector<2x128xf32>
    %c88_468 = arith.constant 88 : index
    %2073 = memref.load %arg13[%c88_468] : memref<96xf32, #tpu.memory_space<smem>>
    %2074 = vector.broadcast %2073 : f32 to vector<2x128xf32>
    %2075 = arith.mulf %2074, %1573 : vector<2x128xf32>
    %2076 = arith.addf %2072, %2075 : vector<2x128xf32>
    %c89_469 = arith.constant 89 : index
    %2077 = memref.load %arg13[%c89_469] : memref<96xf32, #tpu.memory_space<smem>>
    %2078 = vector.broadcast %2077 : f32 to vector<2x128xf32>
    %2079 = arith.mulf %2078, %1656 : vector<2x128xf32>
    %2080 = arith.addf %2076, %2079 : vector<2x128xf32>
    %c90_470 = arith.constant 90 : index
    %2081 = memref.load %arg13[%c90_470] : memref<96xf32, #tpu.memory_space<smem>>
    %2082 = vector.broadcast %2081 : f32 to vector<2x128xf32>
    %2083 = arith.mulf %2082, %1668 : vector<2x128xf32>
    %2084 = arith.addf %2080, %2083 : vector<2x128xf32>
    %c91_471 = arith.constant 91 : index
    %2085 = memref.load %arg13[%c91_471] : memref<96xf32, #tpu.memory_space<smem>>
    %2086 = vector.broadcast %2085 : f32 to vector<2x128xf32>
    %2087 = arith.mulf %2086, %1586 : vector<2x128xf32>
    %2088 = arith.addf %2084, %2087 : vector<2x128xf32>
    %c92_472 = arith.constant 92 : index
    %2089 = memref.load %arg13[%c92_472] : memref<96xf32, #tpu.memory_space<smem>>
    %2090 = vector.broadcast %2089 : f32 to vector<2x128xf32>
    %2091 = arith.mulf %2090, %1672 : vector<2x128xf32>
    %2092 = arith.addf %2088, %2091 : vector<2x128xf32>
    %c93_473 = arith.constant 93 : index
    %2093 = memref.load %arg13[%c93_473] : memref<96xf32, #tpu.memory_space<smem>>
    %2094 = vector.broadcast %2093 : f32 to vector<2x128xf32>
    %2095 = arith.mulf %2094, %1684 : vector<2x128xf32>
    %2096 = arith.addf %2092, %2095 : vector<2x128xf32>
    %c94_474 = arith.constant 94 : index
    %2097 = memref.load %arg13[%c94_474] : memref<96xf32, #tpu.memory_space<smem>>
    %2098 = vector.broadcast %2097 : f32 to vector<2x128xf32>
    %2099 = arith.mulf %2098, %1599 : vector<2x128xf32>
    %2100 = arith.addf %2096, %2099 : vector<2x128xf32>
    %c95_475 = arith.constant 95 : index
    %2101 = memref.load %arg13[%c95_475] : memref<96xf32, #tpu.memory_space<smem>>
    %2102 = vector.broadcast %2101 : f32 to vector<2x128xf32>
    %2103 = arith.mulf %2102, %1688 : vector<2x128xf32>
    %2104 = arith.addf %2100, %2103 : vector<2x128xf32>
    %2105 = arith.negf %1740 : vector<2x128xf32>
    %2106 = math.exp %2105 : vector<2x128xf32>
    %cst_476 = arith.constant 1.000000e+00 : f32
    %2107 = vector.broadcast %cst_476 : f32 to vector<2x128xf32>
    %2108 = arith.addf %2107, %2106 : vector<2x128xf32>
    %2109 = arith.divf %2107, %2108 : vector<2x128xf32>
    %2110 = math.tanh %1948 : vector<2x128xf32>
    %2111 = arith.mulf %2109, %2110 : vector<2x128xf32>
    %2112 = arith.negf %1792 : vector<2x128xf32>
    %2113 = math.exp %2112 : vector<2x128xf32>
    %cst_477 = arith.constant 1.000000e+00 : f32
    %2114 = vector.broadcast %cst_477 : f32 to vector<2x128xf32>
    %2115 = arith.addf %2114, %2113 : vector<2x128xf32>
    %2116 = arith.divf %2114, %2115 : vector<2x128xf32>
    %2117 = math.tanh %2000 : vector<2x128xf32>
    %2118 = arith.mulf %2116, %2117 : vector<2x128xf32>
    %2119 = arith.negf %1844 : vector<2x128xf32>
    %2120 = math.exp %2119 : vector<2x128xf32>
    %cst_478 = arith.constant 1.000000e+00 : f32
    %2121 = vector.broadcast %cst_478 : f32 to vector<2x128xf32>
    %2122 = arith.addf %2121, %2120 : vector<2x128xf32>
    %2123 = arith.divf %2121, %2122 : vector<2x128xf32>
    %2124 = math.tanh %2052 : vector<2x128xf32>
    %2125 = arith.mulf %2123, %2124 : vector<2x128xf32>
    %2126 = arith.negf %1896 : vector<2x128xf32>
    %2127 = math.exp %2126 : vector<2x128xf32>
    %cst_479 = arith.constant 1.000000e+00 : f32
    %2128 = vector.broadcast %cst_479 : f32 to vector<2x128xf32>
    %2129 = arith.addf %2128, %2127 : vector<2x128xf32>
    %2130 = arith.divf %2128, %2129 : vector<2x128xf32>
    %2131 = math.tanh %2104 : vector<2x128xf32>
    %2132 = arith.mulf %2130, %2131 : vector<2x128xf32>
    %cst_480 = arith.constant 0.000000e+00 : f32
    %2133 = vector.broadcast %cst_480 : f32 to vector<2x1xf32>
    %cst_481 = arith.constant 0.000000e+00 : f32
    %2134 = vector.broadcast %cst_481 : f32 to vector<2x1xf32>
    %cst_482 = arith.constant 0.000000e+00 : f32
    %2135 = vector.shape_cast %1624 : vector<1x128xi1> to vector<1x128xi1>
    %2136 = vector.broadcast %2135 : vector<1x128xi1> to vector<2x128xi1>
    %2137 = vector.broadcast %cst_482 : f32 to vector<2x128xf32>
    %2138 = arith.select %2136, %2111, %2137 : vector<2x128xi1>, vector<2x128xf32>
    %cst_483 = arith.constant dense<0.000000e+00> : vector<2xf32>
    %2139 = vector.multi_reduction <add>, %2138, %cst_483 [1] : vector<2x128xf32> to vector<2xf32>
    %2140 = vector.shape_cast %2139 : vector<2xf32> to vector<2x1xf32>
    %2141 = arith.addf %2133, %2140 : vector<2x1xf32>
    %2142 = arith.mulf %2138, %2138 : vector<2x128xf32>
    %cst_484 = arith.constant dense<0.000000e+00> : vector<2xf32>
    %2143 = vector.multi_reduction <add>, %2142, %cst_484 [1] : vector<2x128xf32> to vector<2xf32>
    %2144 = vector.shape_cast %2143 : vector<2xf32> to vector<2x1xf32>
    %2145 = arith.addf %2134, %2144 : vector<2x1xf32>
    %cst_485 = arith.constant 0.000000e+00 : f32
    %2146 = vector.shape_cast %1624 : vector<1x128xi1> to vector<1x128xi1>
    %2147 = vector.broadcast %2146 : vector<1x128xi1> to vector<2x128xi1>
    %2148 = vector.broadcast %cst_485 : f32 to vector<2x128xf32>
    %2149 = arith.select %2147, %2118, %2148 : vector<2x128xi1>, vector<2x128xf32>
    %cst_486 = arith.constant dense<0.000000e+00> : vector<2xf32>
    %2150 = vector.multi_reduction <add>, %2149, %cst_486 [1] : vector<2x128xf32> to vector<2xf32>
    %2151 = vector.shape_cast %2150 : vector<2xf32> to vector<2x1xf32>
    %2152 = arith.addf %2141, %2151 : vector<2x1xf32>
    %2153 = arith.mulf %2149, %2149 : vector<2x128xf32>
    %cst_487 = arith.constant dense<0.000000e+00> : vector<2xf32>
    %2154 = vector.multi_reduction <add>, %2153, %cst_487 [1] : vector<2x128xf32> to vector<2xf32>
    %2155 = vector.shape_cast %2154 : vector<2xf32> to vector<2x1xf32>
    %2156 = arith.addf %2145, %2155 : vector<2x1xf32>
    %cst_488 = arith.constant 0.000000e+00 : f32
    %2157 = vector.shape_cast %1624 : vector<1x128xi1> to vector<1x128xi1>
    %2158 = vector.broadcast %2157 : vector<1x128xi1> to vector<2x128xi1>
    %2159 = vector.broadcast %cst_488 : f32 to vector<2x128xf32>
    %2160 = arith.select %2158, %2125, %2159 : vector<2x128xi1>, vector<2x128xf32>
    %cst_489 = arith.constant dense<0.000000e+00> : vector<2xf32>
    %2161 = vector.multi_reduction <add>, %2160, %cst_489 [1] : vector<2x128xf32> to vector<2xf32>
    %2162 = vector.shape_cast %2161 : vector<2xf32> to vector<2x1xf32>
    %2163 = arith.addf %2152, %2162 : vector<2x1xf32>
    %2164 = arith.mulf %2160, %2160 : vector<2x128xf32>
    %cst_490 = arith.constant dense<0.000000e+00> : vector<2xf32>
    %2165 = vector.multi_reduction <add>, %2164, %cst_490 [1] : vector<2x128xf32> to vector<2xf32>
    %2166 = vector.shape_cast %2165 : vector<2xf32> to vector<2x1xf32>
    %2167 = arith.addf %2156, %2166 : vector<2x1xf32>
    %cst_491 = arith.constant 0.000000e+00 : f32
    %2168 = vector.shape_cast %1624 : vector<1x128xi1> to vector<1x128xi1>
    %2169 = vector.broadcast %2168 : vector<1x128xi1> to vector<2x128xi1>
    %2170 = vector.broadcast %cst_491 : f32 to vector<2x128xf32>
    %2171 = arith.select %2169, %2132, %2170 : vector<2x128xi1>, vector<2x128xf32>
    %cst_492 = arith.constant dense<0.000000e+00> : vector<2xf32>
    %2172 = vector.multi_reduction <add>, %2171, %cst_492 [1] : vector<2x128xf32> to vector<2xf32>
    %2173 = vector.shape_cast %2172 : vector<2xf32> to vector<2x1xf32>
    %2174 = arith.addf %2163, %2173 : vector<2x1xf32>
    %2175 = arith.mulf %2171, %2171 : vector<2x128xf32>
    %cst_493 = arith.constant dense<0.000000e+00> : vector<2xf32>
    %2176 = vector.multi_reduction <add>, %2175, %cst_493 [1] : vector<2x128xf32> to vector<2xf32>
    %2177 = vector.shape_cast %2176 : vector<2xf32> to vector<2x1xf32>
    %2178 = arith.addf %2167, %2177 : vector<2x1xf32>
    %cst_494 = arith.constant 6.400000e+01 : f32
    %2179 = vector.broadcast %cst_494 : f32 to vector<2x1xf32>
    %2180 = arith.divf %2174, %2179 : vector<2x1xf32>
    %cst_495 = arith.constant 6.400000e+01 : f32
    %2181 = vector.broadcast %cst_495 : f32 to vector<2x1xf32>
    %2182 = arith.divf %2178, %2181 : vector<2x1xf32>
    %2183 = arith.mulf %2180, %2180 : vector<2x1xf32>
    %2184 = arith.subf %2182, %2183 : vector<2x1xf32>
    %cst_496 = arith.constant 9.99999974E-6 : f32
    %2185 = vector.broadcast %cst_496 : f32 to vector<2x1xf32>
    %2186 = arith.addf %2184, %2185 : vector<2x1xf32>
    %2187 = math.rsqrt %2186 : vector<2x1xf32>
    %c0_497 = arith.constant 0 : index
    %c0_498 = arith.constant 0 : index
    %2188 = vector.load %arg15[%c0_497, %c0_498] : memref<4x128xf32, #tpu.memory_space<vmem>>, vector<4x128xf32>
    %c0_499 = arith.constant 0 : index
    %c0_500 = arith.constant 0 : index
    %2189 = vector.load %arg16[%c0_499, %c0_500] : memref<4x128xf32, #tpu.memory_space<vmem>>, vector<4x128xf32>
    %2190 = vector.broadcast %2180 : vector<2x1xf32> to vector<2x128xf32>
    %2191 = arith.subf %2111, %2190 : vector<2x128xf32>
    %2192 = vector.broadcast %2187 : vector<2x1xf32> to vector<2x128xf32>
    %2193 = arith.mulf %2191, %2192 : vector<2x128xf32>
    %2194 = vector.extract_strided_slice %2188 {offsets = [0, 0], sizes = [1, 128], strides = [1, 1]} : vector<4x128xf32> to vector<1x128xf32>
    %2195 = vector.broadcast %2194 : vector<1x128xf32> to vector<2x128xf32>
    %2196 = arith.mulf %2193, %2195 : vector<2x128xf32>
    %2197 = vector.extract_strided_slice %2189 {offsets = [0, 0], sizes = [1, 128], strides = [1, 1]} : vector<4x128xf32> to vector<1x128xf32>
    %2198 = vector.broadcast %2197 : vector<1x128xf32> to vector<2x128xf32>
    %2199 = arith.addf %2196, %2198 : vector<2x128xf32>
    %c0_501 = arith.constant 0 : index
    %c0_502 = arith.constant 0 : index
    %c0_503 = arith.constant 0 : index
    %2200 = vector.load %arg20[%c0_501, %c0_502, %c0_503] : memref<4x2x128xf32, #tpu.memory_space<vmem>>, vector<1x2x128xf32>
    %2201 = vector.shape_cast %2200 : vector<1x2x128xf32> to vector<2x128xf32>
    %2202 = vector.shape_cast %2199 : vector<2x128xf32> to vector<1x2x128xf32>
    tpu.vector_store %arg20[%c0_501, %c0_502, %c0_503], %2202 {strides = array<i32>} : memref<4x2x128xf32, #tpu.memory_space<vmem>>, vector<1x2x128xf32>,
    %2203 = vector.broadcast %2180 : vector<2x1xf32> to vector<2x128xf32>
    %2204 = arith.subf %2118, %2203 : vector<2x128xf32>
    %2205 = vector.broadcast %2187 : vector<2x1xf32> to vector<2x128xf32>
    %2206 = arith.mulf %2204, %2205 : vector<2x128xf32>
    %2207 = vector.extract_strided_slice %2188 {offsets = [1, 0], sizes = [1, 128], strides = [1, 1]} : vector<4x128xf32> to vector<1x128xf32>
    %2208 = vector.broadcast %2207 : vector<1x128xf32> to vector<2x128xf32>
    %2209 = arith.mulf %2206, %2208 : vector<2x128xf32>
    %2210 = vector.extract_strided_slice %2189 {offsets = [1, 0], sizes = [1, 128], strides = [1, 1]} : vector<4x128xf32> to vector<1x128xf32>
    %2211 = vector.broadcast %2210 : vector<1x128xf32> to vector<2x128xf32>
    %2212 = arith.addf %2209, %2211 : vector<2x128xf32>
    %c1_504 = arith.constant 1 : index
    %c0_505 = arith.constant 0 : index
    %c0_506 = arith.constant 0 : index
    %2213 = vector.load %arg20[%c1_504, %c0_505, %c0_506] : memref<4x2x128xf32, #tpu.memory_space<vmem>>, vector<1x2x128xf32>
    %2214 = vector.shape_cast %2213 : vector<1x2x128xf32> to vector<2x128xf32>
    %2215 = vector.shape_cast %2212 : vector<2x128xf32> to vector<1x2x128xf32>
    tpu.vector_store %arg20[%c1_504, %c0_505, %c0_506], %2215 {strides = array<i32>} : memref<4x2x128xf32, #tpu.memory_space<vmem>>, vector<1x2x128xf32>,
    %2216 = vector.broadcast %2180 : vector<2x1xf32> to vector<2x128xf32>
    %2217 = arith.subf %2125, %2216 : vector<2x128xf32>
    %2218 = vector.broadcast %2187 : vector<2x1xf32> to vector<2x128xf32>
    %2219 = arith.mulf %2217, %2218 : vector<2x128xf32>
    %2220 = vector.extract_strided_slice %2188 {offsets = [2, 0], sizes = [1, 128], strides = [1, 1]} : vector<4x128xf32> to vector<1x128xf32>
    %2221 = vector.broadcast %2220 : vector<1x128xf32> to vector<2x128xf32>
    %2222 = arith.mulf %2219, %2221 : vector<2x128xf32>
    %2223 = vector.extract_strided_slice %2189 {offsets = [2, 0], sizes = [1, 128], strides = [1, 1]} : vector<4x128xf32> to vector<1x128xf32>
    %2224 = vector.broadcast %2223 : vector<1x128xf32> to vector<2x128xf32>
    %2225 = arith.addf %2222, %2224 : vector<2x128xf32>
    %c2_507 = arith.constant 2 : index
    %c0_508 = arith.constant 0 : index
    %c0_509 = arith.constant 0 : index
    %2226 = vector.load %arg20[%c2_507, %c0_508, %c0_509] : memref<4x2x128xf32, #tpu.memory_space<vmem>>, vector<1x2x128xf32>
    %2227 = vector.shape_cast %2226 : vector<1x2x128xf32> to vector<2x128xf32>
    %2228 = vector.shape_cast %2225 : vector<2x128xf32> to vector<1x2x128xf32>
    tpu.vector_store %arg20[%c2_507, %c0_508, %c0_509], %2228 {strides = array<i32>} : memref<4x2x128xf32, #tpu.memory_space<vmem>>, vector<1x2x128xf32>,
    %2229 = vector.broadcast %2180 : vector<2x1xf32> to vector<2x128xf32>
    %2230 = arith.subf %2132, %2229 : vector<2x128xf32>
    %2231 = vector.broadcast %2187 : vector<2x1xf32> to vector<2x128xf32>
    %2232 = arith.mulf %2230, %2231 : vector<2x128xf32>
    %2233 = vector.extract_strided_slice %2188 {offsets = [3, 0], sizes = [1, 128], strides = [1, 1]} : vector<4x128xf32> to vector<1x128xf32>
    %2234 = vector.broadcast %2233 : vector<1x128xf32> to vector<2x128xf32>
    %2235 = arith.mulf %2232, %2234 : vector<2x128xf32>
    %2236 = vector.extract_strided_slice %2189 {offsets = [3, 0], sizes = [1, 128], strides = [1, 1]} : vector<4x128xf32> to vector<1x128xf32>
    %2237 = vector.broadcast %2236 : vector<1x128xf32> to vector<2x128xf32>
    %2238 = arith.addf %2235, %2237 : vector<2x128xf32>
    %c3_510 = arith.constant 3 : index
    %c0_511 = arith.constant 0 : index
    %c0_512 = arith.constant 0 : index
    %2239 = vector.load %arg20[%c3_510, %c0_511, %c0_512] : memref<4x2x128xf32, #tpu.memory_space<vmem>>, vector<1x2x128xf32>
    %2240 = vector.shape_cast %2239 : vector<1x2x128xf32> to vector<2x128xf32>
    %2241 = vector.shape_cast %2238 : vector<2x128xf32> to vector<1x2x128xf32>
    tpu.vector_store %arg20[%c3_510, %c0_511, %c0_512], %2241 {strides = array<i32>} : memref<4x2x128xf32, #tpu.memory_space<vmem>>, vector<1x2x128xf32>,
    return
  }
}

</mosaic_0001>

<bundles_post_ra>
// kernel: w_module_forward.1
= control target key start
LH: loop header
LB: loop body
LE: loop exit
PB: predicated region body
PF: predicated region fallthrough
CT: control target
= control target key end

     0   :  { %s5263_s0 = inlined_call_operand.vmem [shape: f32[2,128], index: 0, kind: input, shape index: {}]   ;;  %s5264_s1 = inlined_call_operand.vmem [shape: f32[24], index: 1, kind: input, shape index: {}]   ;;  %s5265_s2 = inlined_call_operand.vmem [shape: f32[8], index: 2, kind: input, shape index: {}]   ;;  %s5266_s3 = inlined_call_operand.vmem [shape: f32[4,128], index: 3, kind: input, shape index: {}]   ;;  %s5267_s4 = inlined_call_operand.vmem [shape: f32[4,128], index: 4, kind: input, shape index: {}]   ;;  %s5268_s5 = inlined_call_operand.vmem [shape: f32[96], index: 5, kind: input, shape index: {}]   ;;  %s5269_s6 = inlined_call_operand.vmem [shape: f32[8], index: 6, kind: input, shape index: {}]   ;;  %s5270_s7 = inlined_call_operand.vmem [shape: f32[4,128], index: 7, kind: input, shape index: {}]   ;;  %s5271_s8 = inlined_call_operand.vmem [shape: f32[4,128], index: 8, kind: input, shape index: {}]   ;;  %s5272_s9 = inlined_call_operand.vmem [shape: f32[96], index: 9, kind: input, shape index: {}]   ;;  %s5273_s10 = inlined_call_operand.vmem [shape: f32[8], index: 10, kind: input, shape index: {}]   ;;  %s5274_s11 = inlined_call_operand.vmem [shape: f32[4,128], index: 11, kind: input, shape index: {}]   ;;  %s5275_s12 = inlined_call_operand.vmem [shape: f32[4,128], index: 12, kind: input, shape index: {}]   ;;  %s5276_s13 = inlined_call_operand.vmem [shape: f32[96], index: 13, kind: input, shape index: {}]   ;;  %s5277_s14 = inlined_call_operand.vmem [shape: f32[8], index: 14, kind: input, shape index: {}]   ;;  %s5278_s15 = inlined_call_operand.vmem [shape: f32[4,128], index: 15, kind: input, shape index: {}]   ;;  %s5279_s16 = inlined_call_operand.vmem [shape: f32[4,128], index: 16, kind: input, shape index: {}]   ;;  %s5280_s17 = inlined_call_operand.vmem [shape: f32[4,2,128], index: 17, kind: output, shape index: {0}]   ;;  %s5281_s18 = inlined_call_operand.vmem [shape: f32[4,2,128], index: 18, kind: output, shape index: {1}]   ;;  %s5282_s19 = inlined_call_operand.vmem [shape: f32[4,2,128], index: 19, kind: output, shape index: {2}]   ;;  %s5283_s20 = inlined_call_operand.vmem [shape: f32[4,2,128], index: 20, kind: output, shape index: {3}]  }
   0x1   :  { %5482 = sst [smem:[#allocation81_spill]] %s5263_s0 }
   0x2   :  { %5483 = sst [smem:[#allocation82_spill]] %s5264_s1 }
   0x3   :  { %5484 = sst [smem:[#allocation83_spill]] %s5265_s2 }
   0x4   :  { %5485 = sst [smem:[#allocation84_spill]] %s5266_s3 }
   0x5   :  { %5486 = sst [smem:[#allocation85_spill]] %s5267_s4 }
   0x6   :  { %5487 = sst [smem:[#allocation86_spill]] %s5270_s7 }
   0x7   :  { %5488 = sst [smem:[#allocation87_spill]] %s5271_s8 }
   0x8   :  { %5489 = sst [smem:[#allocation88_spill]] %s5274_s11 }
   0x9   :  { %5490 = sst [smem:[#allocation89_spill]] %s5275_s12 }
   0xa   :  { %5491 = sst [smem:[#allocation90_spill]] %s5278_s15 }
   0xb   :  { %5492 = sst [smem:[#allocation91_spill]] %s5279_s16 }
   0xc   :  { %5493 = sst [smem:[#allocation92_spill]] %s5281_s18 }
   0xd   :  { %5494 = sst [smem:[#allocation93_spill]] %s5282_s19 }
   0xe   :  { %5495 = sst [smem:[#allocation94_spill]] %s5283_s20 }
   0xf   :  { %26 = vsyncpa [#allocation3], 0 }
  0x10   :  { %27 = vsyncpa [#allocation5], 0 }
  0x11   :  { %28 = vsyncpa [#allocation8], 0 }
  0x12   :  { %29 = vsyncpa [#allocation11], 0  ;;  %s5496_s23 = sld [smem:[#allocation83_spill]] }
  0x18   :  { %s49_s24 = sshll.u32 %s5496_s23, 4  ;;  %s50_s24 = int_to_ptr.vmem [resolvable:$true] %s49_s24 }
  0x19   :  { %30 = vsyncpa [#allocation14], 0  ;;  %s73_s3 = sshll.u32 %s5269_s6, 4  ;;  %s2736_s26 = scalar_lea.vmem %s50_s24, 16  ;;  %s74_s3 = int_to_ptr.vmem [resolvable:$true] %s73_s3 }
  0x1a   :  { %p2737_p0 = scmp.ne.s32.totalorder %s50_s24, %s2736_s26  ;;  %p2741_p1 = scmp.lt.s32.totalorder %s50_s24, %s50_s24 }
  0x1b   :  { %p2742_p2 = scmp.lt.s32.totalorder %s2736_s26, %s2736_s26 }
  0x1d   :  { %p2743_p3 = por %p2742_p2, %p2741_p1 }
  0x1f   :  { %p2744_p4 = pnand %p2743_p3, %p2737_p0 }
  0x21   :  { %2747 = shalt.err (!%p2744_p4)
}
  0x22   :  { %s2842_s27 = smov [#allocation4]   ;;  %s2748_s28 = scalar_lea.vmem %s74_s3, 16 }
  0x23   :  { %52 = dma.vmem_to_smem %s50_s24, 16, %s2842_s27, [#allocation5]  }
  0x24   :  { %p2749_p5 = scmp.ne.s32.totalorder %s74_s3, %s2748_s28  ;;  %p2753_p6 = scmp.lt.s32.totalorder %s74_s3, %s74_s3 }
  0x25   :  { %p2754_p7 = scmp.lt.s32.totalorder %s2748_s28, %s2748_s28 }
  0x27   :  { %p2755_p8 = por %p2754_p7, %p2753_p6 }
  0x29   :  { %p2756_p9 = pnand %p2755_p8, %p2749_p5 }
  0x2b   :  { %2759 = shalt.err (!%p2756_p9)
}
  0x2c   :  { %s2843_s4 = smov [#allocation7]   ;;  %s97_s30 = sshll.u32 %s5273_s10, 4  ;;  %s98_s30 = int_to_ptr.vmem [resolvable:$true] %s97_s30 }
  0x2d   :  { %76 = dma.vmem_to_smem %s74_s3, 16, %s2843_s4, [#allocation8]  }
  0x2e   :  { %s5497_s1 = sld [smem:[#allocation82_spill]]  ;;  %s2760_s23 = scalar_lea.vmem %s98_s30, 16 }
  0x2f   :  { %p2761_p10 = scmp.ne.s32.totalorder %s98_s30, %s2760_s23  ;;  %p2765_p11 = scmp.lt.s32.totalorder %s98_s30, %s98_s30 }
  0x30   :  { %p2766_p12 = scmp.lt.s32.totalorder %s2760_s23, %s2760_s23 }
  0x32   :  { %p2767_p13 = por %p2766_p12, %p2765_p11 }
  0x34   :  { %s39_s22 = sshll.u32 %s5497_s1, 4  ;;  %p2768_p0 = pnand %p2767_p13, %p2761_p10  ;;  %s40_s22 = int_to_ptr.vmem [resolvable:$true] %s39_s22 }
  0x36   :  { %2771 = shalt.err (!%p2768_p0)
}
  0x37   :  { %s2844_s24 = smov [#allocation10]   ;;  %s2772_s2 = scalar_lea.vmem %s40_s22, 16 }
  0x38   :  { %100 = dma.vmem_to_smem %s98_s30, 16, %s2844_s24, [#allocation11]  }
  0x39   :  { %p2773_p1 = scmp.ne.s32.totalorder %s40_s22, %s2772_s2  ;;  %p2777_p2 = scmp.lt.s32.totalorder %s40_s22, %s40_s22 }
  0x3a   :  { %p2778_p3 = scmp.lt.s32.totalorder %s2772_s2, %s2772_s2 }
  0x3c   :  { %p2779_p4 = por %p2778_p3, %p2777_p2 }
  0x3e   :  { %p2780_p5 = pnand %p2779_p4, %p2773_p1 }
  0x40   :  { %2783 = shalt.err (!%p2780_p5)
}
  0x41   :  { %s2845_s10 = smov [#allocation2]   ;;  %s63_s26 = sshll.u32 %s5268_s5, 4  ;;  %s64_s26 = int_to_ptr.vmem [resolvable:$true] %s63_s26 }
  0x42   :  { %42 = dma.vmem_to_smem %s40_s22, 16, %s2845_s10, [#allocation3]  }
  0x43   :  { %s87_s4 = sshll.u32 %s5272_s9, 4  ;;  %s2784_s6 = scalar_lea.vmem %s64_s26, 16  ;;  %s88_s4 = int_to_ptr.vmem [resolvable:$true] %s87_s4 }
  0x44   :  { %p2785_p6 = scmp.ne.s32.totalorder %s64_s26, %s2784_s6  ;;  %p2789_p7 = scmp.lt.s32.totalorder %s64_s26, %s64_s26 }
  0x45   :  { %p2790_p8 = scmp.lt.s32.totalorder %s2784_s6, %s2784_s6 }
  0x47   :  { %p2791_p9 = por %p2790_p8, %p2789_p7 }
  0x49   :  { %p2792_p10 = pnand %p2791_p9, %p2785_p6 }
  0x4b   :  { %2795 = shalt.err (!%p2792_p10)
}
  0x4c   :  { %s2846_s29 = smov [#allocation6]   ;;  %s2796_s30 = scalar_lea.vmem %s88_s4, 16 }
  0x4d   :  { %66 = dma.vmem_to_smem %s64_s26, 16, %s2846_s29, [#allocation5]  }
  0x4e   :  { %p2797_p11 = scmp.ne.s32.totalorder %s88_s4, %s2796_s30  ;;  %p2801_p12 = scmp.lt.s32.totalorder %s88_s4, %s88_s4 }
  0x4f   :  { %p2802_p13 = scmp.lt.s32.totalorder %s2796_s30, %s2796_s30 }
  0x51   :  { %p2803_p0 = por %p2802_p13, %p2801_p12 }
  0x53   :  { %p2804_p1 = pnand %p2803_p0, %p2797_p11 }
  0x55   :  { %2807 = shalt.err (!%p2804_p1)
}
  0x56   :  { %s2847_s5 = smov [#allocation9]   ;;  %s111_s21 = sshll.u32 %s5276_s13, 4  ;;  %s112_s21 = int_to_ptr.vmem [resolvable:$true] %s111_s21 }
  0x57   :  { %90 = dma.vmem_to_smem %s88_s4, 16, %s2847_s5, [#allocation8]  }
  0x58   :  { %s121_s23 = sshll.u32 %s5277_s14, 4  ;;  %s2808_s24 = scalar_lea.vmem %s112_s21, 16  ;;  %s122_s23 = int_to_ptr.vmem [resolvable:$true] %s121_s23 }
  0x59   :  { %p2809_p2 = scmp.ne.s32.totalorder %s112_s21, %s2808_s24  ;;  %p2813_p3 = scmp.lt.s32.totalorder %s112_s21, %s112_s21 }
  0x5a   :  { %p2814_p4 = scmp.lt.s32.totalorder %s2808_s24, %s2808_s24 }
  0x5c   :  { %p2815_p5 = por %p2814_p4, %p2813_p3 }
  0x5e   :  { %p2816_p6 = pnand %p2815_p5, %p2809_p2 }
  0x60   :  { %2819 = shalt.err (!%p2816_p6)
}
  0x61   :  { %s2848_s2 = smov [#allocation12]   ;;  %s2820_s10 = scalar_lea.vmem %s122_s23, 16 }
  0x62   :  { %114 = dma.vmem_to_smem %s112_s21, 16, %s2848_s2, [#allocation11]  }
  0x63   :  { %p2821_p7 = scmp.ne.s32.totalorder %s122_s23, %s2820_s10  ;;  %p2825_p8 = scmp.lt.s32.totalorder %s122_s23, %s122_s23 }
  0x64   :  { %p2826_p9 = scmp.lt.s32.totalorder %s2820_s10, %s2820_s10 }
  0x66   :  { %p2827_p10 = por %p2826_p9, %p2825_p8 }
  0x68   :  { %p2828_p11 = pnand %p2827_p10, %p2821_p7 }
  0x6a   :  { %2831 = shalt.err (!%p2828_p11)
}
  0x6b   :  { %s2849_s13 = smov [#allocation13]  }
  0x6c   :  { %124 = dma.vmem_to_smem %s122_s23, 16, %s2849_s13, [#allocation14]  }
  0x6d   :  { %2832 = dma.done.wait [#allocation3], 16  }
  0x6e   :  { %2833 = vsyncadd [#allocation3], 4294967280 }
  0x6f   :  { %2834 = dma.done.wait [#allocation5], 32  }
  0x70   :  { %2835 = vsyncadd [#allocation5], 4294967264 }
  0x71   :  { %2836 = dma.done.wait [#allocation8], 32  }
  0x72   :  { %2837 = vsyncadd [#allocation8], 4294967264 }
  0x73   :  { %2838 = dma.done.wait [#allocation11], 32  }
  0x74   :  { %2839 = vsyncadd [#allocation11], 4294967264 }
  0x75   :  { %2840 = dma.done.wait [#allocation14], 16  }
  0x76   :  { %2841 = vsyncadd [#allocation14], 4294967280 }
  0x77   :  { %153 = sfence }
  0x78   :  { %v154_v0 = vlaneseq  ;;  %s5498_s3 = sld [smem:[#allocation81_spill]]  ;;  %s2850_s26 = smov 1   ;;  %v2852_v4 = vmov 0   ;;  %vm344_vm4 = vcmask 1041408  }
  0x79   :  { %s2851_s27 = smov 127   ;;  %s2998_s28 = sld [smem:[#allocation2]] }
  0x7a   :  { %v155_v1 = vand.u32 127, %v154_v0  ;;  %s3000_s4 = sld [smem:[#allocation2 + $0x2]] }
  0x7b   :  { %s3002_s6 = sld [smem:[#allocation4]] }
  0x7c   :  { %168 = vrot.lane.b32.xlu0 %v155_v1, %s2850_s26  ;;  %s2251_s29 = sld [smem:[#allocation2 + $0x1]]  ;;  %v3018_v8 = vand.u32 15, %v155_v1 }
  0x7d   :  { %s3004_s30 = sld [smem:[#allocation4 + $0x1]] }
  0x7e   :  { %v2990_v2 = vld [vmem:[%s5498_s3] sm:$0x3]  ;;  %s3006_s5 = sld [smem:[#allocation2 + $0x3]]  ;;  %vm172_vm1 = vcmp.ge.s32.totalorder %v3018_v8, 1  ;;  %vm173_vm2 = vcmp.lt.s32.totalorder %v3018_v8, 15  ;;  %vm1036_vm6 = vcmp.ge.s32.totalorder %v3018_v8, 2 }
  0x7f   :  { %174 = vrot.lane.b32.xlu1 %v2990_v2, %s2850_s26  ;;  %s3008_s9 = sld [smem:[#allocation2 + $0x4]]  ;;  %v196_v11 = vstv %s2998_s28  ;;  %vm1037_vm7 = vcmp.lt.s32.totalorder %v3018_v8, 14  ;;  %vm1633_vm9 = vcmp.ge.s32.totalorder %v3018_v8, 4  ;;  %vm1634_vm10 = vcmp.lt.s32.totalorder %v3018_v8, 12 }
  0x80   :  { %s3010_s0 = sld [smem:[#allocation2 + $0x5]]  ;;  %v204_v12 = vstv %s3000_s4 }
  0x81   :  { %s3012_s21 = sld [smem:[#allocation2 + $0x6]]  ;;  %v193_v10 = vstv %s3002_s6 }
  0x82   :  { %s3014_s1 = sld [smem:[#allocation2 + $0x7]]  ;;  %v200_v9 = vstv %s2251_s29 }
  0x83   :  { %176 = vrot.lane.b32.xlu1 %v2990_v2, %s2851_s27  ;;  %s3016_s22 = sld [smem:[#allocation2 + $0x9]]  ;;  %v201_v15 = vmul.f32 %v200_v9, %v2990_v2  ;;  %v208_v16 = vstv %s3004_s30 }
  0x84   :  { %s3020_s23 = sld [smem:[#allocation2 + $0xa]]  ;;  %v211_v19 = vstv %s3006_s5 }
  0x85   :  { %s3022_s24 = sld [smem:[#allocation4 + $0x2]]  ;;  %v215_v17 = vstv %s3008_s9 }
  0x86   :  { %s3024_s2 = sld [smem:[#allocation4 + $0x3]]  ;;  %v216_v26 = vmul.f32 %v215_v17, %v2990_v2  ;;  %v219_v27 = vstv %s3010_s0 }
  0x87   :  { %s3026_s10 = sld [smem:[#allocation2 + $0x8]]  ;;  %v226_v20 = vstv %s3012_s21 }
  0x88   :  { %s3028_s13 = sld [smem:[#allocation2 + $0xb]]  ;;  %v230_v21 = vstv %s3014_s1 }
  0x89   :  { %s3034_s25 = sld [smem:[#allocation2 + $0xf]]  ;;  %v241_v22 = vstv %s3016_s22  ;;  %v231_v30 = vmul.f32 %v230_v21, %v2990_v2 }
  0x8a   :  { %s3047_s3 = sld [smem:[#allocation4 + $0x4]]  ;;  %v245_v23 = vstv %s3020_s23 }
  0x8b   :  { %s3051_s28 = sld [smem:[#allocation2 + $0xc]]  ;;  %v223_v28 = vstv %s3022_s24  ;;  %v246_v34 = vmul.f32 %v245_v23, %v2990_v2 }
  0x8c   :  { %s3060_s4 = sld [smem:[#allocation4 + $0x5]]  ;;  %v238_v31 = vstv %s3024_s2 }
  0x8d   :  { %s3068_s6 = sld [smem:[#allocation2 + $0x12]]  ;;  %v234_v38 = vstv %s3026_s10 }
  0x8e   :  { %s3079_s29 = sld [smem:[#allocation2 + $0x10]]  ;;  %v249_v39 = vstv %s3028_s13 }
  0x8f   :  { %s3083_s30 = sld [smem:[#allocation2 + $0xd]]  ;;  %v271_v42 = vstv %s3034_s25 }
  0x90   :  { %s3086_s5 = sld [smem:[#allocation4 + $0x6]] }
  0x91   :  { %s3090_s9 = sld [smem:[#allocation2 + $0x15]]  ;;  %v256_v53 = vstv %s3051_s28 }
  0x92   :  { %s3095_s0 = sld [smem:[#allocation2 + $0x13]]  ;;  %v268_v58 = vstv %s3060_s4 }
  0x93   :  { %s3097_s21 = sld [smem:[#allocation2 + $0x11]] }
  0x94   :  { %s3099_s1 = sld [smem:[#allocation2 + $0xe]] }
  0x95   :  { %s3103_s22 = sld [smem:[#allocation4 + $0x7]] }
  0x96   :  { %s2279_s23 = sld [smem:[#allocation2 + $0x16]] }
  0x97   :  { %s2276_s24 = sld [smem:[#allocation2 + $0x14]] }
  0x98   :  { %s2280_s2 = sld [smem:[#allocation2 + $0x17]] }
  0x99   :  { %s5502_s28 = sld [smem:[#allocation85_spill]] }
  0x9a   :  { %v264_v17 = vstv %s3099_s1  ;;  %s3211_s1 = sld [smem:[#allocation6 + $0x1]] }
  0x9b   :  { %s3229_s10 = sld [smem:[#allocation6 + $0x55]] }
  0x9c   :  { %s3231_s13 = sld [smem:[#allocation6 + $0x4]] }
  0x9d   :  { %s3235_s25 = sld [smem:[#allocation6 + $0x1c]] }
  0x9e   :  { %s3241_s4 = sld [smem:[#allocation6 + $0x40]] }
  0x9f   :  { %s3259_s20 = sld [smem:[#allocation6 + $0x4f]] }
  0xa0   :  { %s3261_s16 = sld [smem:[#allocation6 + $0x5b]] }
  0xa1   :  { %s3263_s15 = sld [smem:[#allocation6 + $0xa]] }
  0xa2   :  { %s3265_s19 = sld [smem:[#allocation6 + $0x16]] }
  0xa3   :  { %s3267_s12 = sld [smem:[#allocation6 + $0x22]] }
  0xa4   :  { %s3269_s11 = sld [smem:[#allocation6 + $0x2e]] }
  0xa5   :  { %5505 = sst [smem:[#allocation22_spill]] %s3259_s20 }
  0xa6   :  { %5506 = sst [smem:[#allocation23_spill]] %s3261_s16 }
  0xa7   :  { %5507 = sst [smem:[#allocation24_spill]] %s3263_s15 }
  0xa8   :  { %5508 = sst [smem:[#allocation25_spill]] %s3265_s19 }
  0xa9   :  { %5509 = sst [smem:[#allocation26_spill]] %s3267_s12 }
  0xaa   :  { %5510 = sst [smem:[#allocation27_spill]] %s3269_s11 }
  0xab   :  { %s3271_s18 = sld [smem:[#allocation6 + $0x46]] }
  0xac   :  { %s3273_s8 = sld [smem:[#allocation6 + $0x3a]] }
  0xad   :  { %s3275_s7 = sld [smem:[#allocation6 + $0x52]] }
  0xae   :  { %s3281_s20 = sld [smem:[#allocation6]] }
  0xaf   :  { %s3283_s16 = sld [smem:[#allocation6 + $0x2]] }
  0xb0   :  { %s3285_s15 = sld [smem:[#allocation7 + $0x1]] }
  0xb1   :  { %5511 = sst [smem:[#allocation28_spill]] %s3271_s18 }
  0xb2   :  { %5512 = sst [smem:[#allocation29_spill]] %s3273_s8 }
  0xb3   :  { %5513 = sst [smem:[#allocation30_spill]] %s3275_s7 }
  0xb4   :  { %5516 = sst [smem:[#allocation33_spill]] %s3281_s20 }
  0xb5   :  { %5517 = sst [smem:[#allocation34_spill]] %s3283_s16 }
  0xb6   :  { %5518 = sst [smem:[#allocation35_spill]] %s3285_s15 }
  0xb7   :  { %s3287_s19 = sld [smem:[#allocation6 + $0xc]] }
  0xb8   :  { %s3289_s12 = sld [smem:[#allocation6 + $0xe]] }
  0xb9   :  { %s3291_s11 = sld [smem:[#allocation7 + $0x2]] }
  0xba   :  { %s3293_s18 = sld [smem:[#allocation6 + $0x18]] }
  0xbb   :  { %s3295_s8 = sld [smem:[#allocation6 + $0x1a]] }
  0xbc   :  { %s3297_s7 = sld [smem:[#allocation7 + $0x3]] }
  0xbd   :  { %5519 = sst [smem:[#allocation36_spill]] %s3287_s19 }
  0xbe   :  { %5520 = sst [smem:[#allocation37_spill]] %s3289_s12 }
  0xbf   :  { %5521 = sst [smem:[#allocation38_spill]] %s3291_s11 }
  0xc0   :  { %5522 = sst [smem:[#allocation39_spill]] %s3293_s18 }
  0xc1   :  { %5523 = sst [smem:[#allocation40_spill]] %s3295_s8 }
  0xc2   :  { %5524 = sst [smem:[#allocation41_spill]] %s3297_s7 }
  0xc3   :  { %s3303_s20 = sld [smem:[#allocation7 + $0x4]] }
  0xc4   :  { %s3305_s16 = sld [smem:[#allocation6 + $0x30]] }
  0xc5   :  { %s3307_s15 = sld [smem:[#allocation6 + $0x32]] }
  0xc6   :  { %s3309_s19 = sld [smem:[#allocation7 + $0x5]] }
  0xc7   :  { %s3311_s12 = sld [smem:[#allocation6 + $0x3c]] }
  0xc8   :  { %s3313_s11 = sld [smem:[#allocation6 + $0x3e]] }
  0xc9   :  { %5527 = sst [smem:[#allocation44_spill]] %s3303_s20 }
  0xca   :  { %5528 = sst [smem:[#allocation45_spill]] %s3305_s16 }
  0xcb   :  { %5529 = sst [smem:[#allocation46_spill]] %s3307_s15 }
  0xcc   :  { %5530 = sst [smem:[#allocation47_spill]] %s3309_s19 }
  0xcd   :  { %5531 = sst [smem:[#allocation48_spill]] %s3311_s12 }
  0xce   :  { %5532 = sst [smem:[#allocation49_spill]] %s3313_s11 }
  0xcf   :  { %s3315_s18 = sld [smem:[#allocation7 + $0x6]] }
  0xd0   :  { %s3317_s8 = sld [smem:[#allocation6 + $0x48]] }
  0xd1   :  { %s3319_s7 = sld [smem:[#allocation6 + $0x4a]] }
  0xd2   :  { %s3325_s20 = sld [smem:[#allocation6 + $0x56]] }
  0xd3   :  { %s3327_s16 = sld [smem:[#allocation6 + $0x3]] }
  0xd4   :  { %s3329_s15 = sld [smem:[#allocation6 + $0x5]] }
  0xd5   :  { %5533 = sst [smem:[#allocation50_spill]] %s3315_s18 }
  0xd6   :  { %5534 = sst [smem:[#allocation51_spill]] %s3317_s8 }
  0xd7   :  { %5535 = sst [smem:[#allocation52_spill]] %s3319_s7 }
  0xd8   :  { %5538 = sst [smem:[#allocation55_spill]] %s3325_s20 }
  0xd9   :  { %5539 = sst [smem:[#allocation56_spill]] %s3327_s16 }
  0xda   :  { %5540 = sst [smem:[#allocation57_spill]] %s3329_s15 }
  0xdb   :  { %s3331_s19 = sld [smem:[#allocation6 + $0xf]] }
  0xdc   :  { %s3333_s11 = sld [smem:[#allocation6 + $0x11]] }
  0xdd   :  { %s3335_s18 = sld [smem:[#allocation6 + $0x1b]] }
  0xde   :  { %s3337_s7 = sld [smem:[#allocation6 + $0x1d]] }
  0xdf   :  { %s3343_s16 = sld [smem:[#allocation6 + $0x33]] }
  0xe0   :  { %s3345_s15 = sld [smem:[#allocation6 + $0x35]] }
  0xe1   :  { %5541 = sst [smem:[#allocation58_spill]] %s3331_s19 }
  0xe2   :  { %5542 = sst [smem:[#allocation59_spill]] %s3333_s11 }
  0xe3   :  { %5543 = sst [smem:[#allocation60_spill]] %s3335_s18 }
  0xe4   :  { %5544 = sst [smem:[#allocation61_spill]] %s3337_s7 }
  0xe5   :  { %5547 = sst [smem:[#allocation64_spill]] %s3343_s16 }
  0xe6   :  { %5548 = sst [smem:[#allocation65_spill]] %s3345_s15 }
  0xe7   :  { %s3347_s19 = sld [smem:[#allocation6 + $0x3f]] }
  0xe8   :  { %s3349_s11 = sld [smem:[#allocation6 + $0x41]] }
  0xe9   :  { %s3351_s18 = sld [smem:[#allocation6 + $0x4b]] }
  0xea   :  { %s3353_s7 = sld [smem:[#allocation6 + $0x4d]] }
  0xeb   :  { %s3359_s16 = sld [smem:[#allocation6 + $0x6]] }
  0xec   :  { %s3361_s15 = sld [smem:[#allocation6 + $0x8]] }
  0xed   :  { %5549 = sst [smem:[#allocation66_spill]] %s3347_s19 }
  0xee   :  { %v169_v3 = vpop.permute.xlu0 %168  ;;  %5550 = sst [smem:[#allocation67_spill]] %s3349_s11 }
  0xef   :  { %vm170_vm0 = vcmp.eq.s32.totalorder %v169_v3, 0  ;;  %v275_v3 = vstv %s3079_s29  ;;  %s3245_s29 = sld [smem:[#allocation6 + $0x58]] }
  0xf0   :  { %v178_v5 = vsel %vm170_vm0, 1, %v2852_v4  ;;  %v253_v4 = vstv %s3047_s3  ;;  %v276_v9 = vmul.f32 %v275_v3, %v2990_v2  ;;  %s3237_s3 = sld [smem:[#allocation6 + $0x28]] }
  0xf1   :  { %179 = vrot.lane.b32.xlu0 %v178_v5, %s2851_s27  ;;  %v175_v7 = vpop.permute.xlu1 %174  ;;  %v286_v5 = vstv %s3068_s6  ;;  %s3243_s6 = sld [smem:[#allocation6 + $0x4c]] }
  0xf2   :  { %5551 = sst [smem:[#allocation68_spill]] %s3351_s18 }
  0xf3   :  { %5552 = sst [smem:[#allocation69_spill]] %s3353_s7 }
  0xf4   :  { %5555 = sst [smem:[#allocation72_spill]] %s3359_s16 }
  0xf5   :  { %v177_v13 = vpop.permute.xlu1 %176  ;;  %5556 = sst [smem:[#allocation73_spill]] %s3361_s15 }
  0xf6   :  { %s3367_s7 = sld [smem:[#allocation6 + $0x12]] }
  0xf7   :  { %s3373_s16 = sld [smem:[#allocation6 + $0x14]] }
  0xf8   :  { %s3379_s15 = sld [smem:[#allocation6 + $0x1e]] }
  0xf9   :  { %s5653_s8 = sld [smem:[#allocation51_spill]] }
  0xfa   :  { %s5666_s18 = sld [smem:[#allocation55_spill]] }
  0xfb   :  { %s5671_s19 = sld [smem:[#allocation57_spill]] }
  0xfc   :  { %5557 = sst [smem:[#allocation74_spill]] %s3367_s7 }
  0xfd   :  { %5558 = sst [smem:[#allocation75_spill]] %s3373_s16 }
  0xfe   :  { %s3385_s7 = sld [smem:[#allocation6 + $0x20]] }
  0xff   :  { %s3457_s16 = sld [smem:[#allocation6 + $0x5a]] }
 0x163   :  { %v180_v6 = vpop.permute.xlu0 %179 }
 0x164   :  { %2615 = vpush %v180_v6  ;;  %v260_v6 = vstv %s3083_s30  ;;  %s3249_s30 = sld [smem:[#allocation6 + $0x13]] }
 0x195   :  { %s2616_s14 = spop %2615 }
 0x196   :  { %v182_v14 = vstv %s2616_s14  ;;  %s5501_s14 = sld [smem:[#allocation84_spill]] }
 0x197   :  { %vm3040_vm3 = vcmp.eq.s32.totalorder %v182_v14, 1  ;;  %v301_v14 = vstv %s3090_s9  ;;  %s3253_s9 = sld [smem:[#allocation6 + $0x2b]] }
 0x198   :  { %v184_v24 = vsel %vm3040_vm3, %v175_v7, %v177_v13  ;;  %v185_v25 = vsel %vm3040_vm3, %v177_v13, %v175_v7  ;;  %v283_v13 = vstv %s3086_s5  ;;  %s3251_s5 = sld [smem:[#allocation6 + $0x1f]] }
 0x199   :  { %v3064_v29 = vsel %vm172_vm1, %v184_v24, 0.0  ;;  %v3075_v35 = vsel %vm173_vm2, %v185_v25, 0.0  ;;  %v298_v24 = vstv %s3103_s22  ;;  %s3213_s22 = sld [smem:[#allocation6 + $0xd]] }
 0x19a   :  { %v197_v32 = vmul.f32 %v196_v11, %v3064_v29  ;;  %v212_v33 = vmul.f32 %v211_v19, %v3064_v29  ;;  %v227_v36 = vmul.f32 %v226_v20, %v3064_v29  ;;  %v242_v37 = vmul.f32 %v241_v22, %v3064_v29 }
 0x19b   :  { %v205_v46 = vmul.f32 %v204_v12, %v3075_v35  ;;  %v220_v48 = vmul.f32 %v219_v27, %v3075_v35  ;;  %v235_v50 = vmul.f32 %v234_v38, %v3075_v35  ;;  %v250_v52 = vmul.f32 %v249_v39, %v3075_v35 }
 0x19c   :  { %v198_v40 = vadd.f32 %v197_v32, %v193_v10  ;;  %v213_v41 = vadd.f32 %v212_v33, %v208_v16  ;;  %v228_v43 = vadd.f32 %v227_v36, %v223_v28  ;;  %v243_v44 = vadd.f32 %v242_v37, %v238_v31 }
 0x19d   :  { %v272_v59 = vmul.f32 %v271_v42, %v3064_v29  ;;  %v257_v62 = vmul.f32 %v256_v53, %v3064_v29  ;;  %v287_v11 = vmul.f32 %v286_v5, %v3064_v29  ;;  %v261_v12 = vmul.f32 %v260_v6, %v2990_v2 }
 0x19e   :  { %v202_v45 = vadd.f32 %v201_v15, %v198_v40  ;;  %v217_v47 = vadd.f32 %v216_v26, %v213_v41  ;;  %v232_v49 = vadd.f32 %v231_v30, %v228_v43  ;;  %v247_v51 = vadd.f32 %v246_v34, %v243_v44 }
 0x19f   :  { %v273_v7 = vadd.f32 %v272_v59, %v268_v58  ;;  %v258_v10 = vadd.f32 %v257_v62, %v253_v4  ;;  %v290_v15 = vstv %s3095_s0  ;;  %v279_v16 = vstv %s3097_s21  ;;  %s3255_s0 = sld [smem:[#allocation6 + $0x37]] }
 0x1a0   :  { %v206_v54 = vadd.f32 %v205_v46, %v202_v45  ;;  %v221_v55 = vadd.f32 %v220_v48, %v217_v47  ;;  %v236_v56 = vadd.f32 %v235_v50, %v232_v49  ;;  %v251_v57 = vadd.f32 %v250_v52, %v247_v51  ;;  %s3257_s21 = sld [smem:[#allocation6 + $0x43]] }
 0x1a1   :  { %v277_v19 = vadd.f32 %v276_v9, %v273_v7  ;;  %v288_v20 = vadd.f32 %v287_v11, %v283_v13  ;;  %v302_v21 = vmul.f32 %v301_v14, %v3064_v29  ;;  %v262_v22 = vadd.f32 %v261_v12, %v258_v10 }
 0x1a2   :  { %v2281_v60 = vmul.f32 -1.442695, %v206_v54  ;;  %v2282_v61 = vmul.f32 -1.442695, %v221_v55  ;;  %v2283_v63 = vmul.f32 -1.442695, %v236_v56  ;;  %v291_v23 = vmul.f32 %v290_v15, %v2990_v2 }
 0x1a3   :  { %v2284_v1 = vmul.f32 -1.442695, %v251_v57  ;;  %v280_v25 = vmul.f32 %v279_v16, %v3075_v35  ;;  %v305_v26 = vstv %s2279_s23  ;;  %v265_v27 = vmul.f32 %v264_v17, %v3075_v35  ;;  %s3219_s23 = sld [smem:[#allocation6 + $0x25]] }
 0x1a4   :  { %2632 = vpow2.f32 %v2281_v60  ;;  %v294_v28 = vstv %s2276_s24  ;;  %v303_v31 = vadd.f32 %v302_v21, %v298_v24  ;;  %v292_v33 = vadd.f32 %v291_v23, %v288_v20  ;;  %s3221_s24 = sld [smem:[#allocation6 + $0x31]] }
 0x1a5   :  { %2634 = vpow2.f32 %v2282_v61  ;;  %v281_v30 = vadd.f32 %v280_v25, %v277_v19  ;;  %v266_v32 = vadd.f32 %v265_v27, %v262_v22  ;;  %v306_v34 = vmul.f32 %v305_v26, %v2990_v2  ;;  %5503 = sst [smem:[#allocation20_spill]] %s3255_s0 }
 0x1a6   :  { %2636 = vpow2.f32 %v2283_v63  ;;  %v295_v37 = vmul.f32 %v294_v28, %v3075_v35  ;;  %v309_v38 = vstv %s2280_s2  ;;  %s3223_s2 = sld [smem:[#allocation6 + $0x3d]] }
 0x1a7   :  { %2638 = vpow2.f32 %v2284_v1  ;;  %v307_v43 = vadd.f32 %v306_v34, %v303_v31  ;;  %v310_v46 = vmul.f32 %v309_v38, %v3075_v35  ;;  %v393_v31 = vshrl.u32 %v154_v0, 7  ;;  %5504 = sst [smem:[#allocation21_spill]] %s3257_s21 }
 0x1a8   :  { %2640 = vtanh.f32 %v281_v30  ;;  %v296_v42 = vadd.f32 %v295_v37, %v292_v33  ;;  %v388_v37 = vld [vmem:[%s5501_s14] sm:$0xf]  ;;  %s3233_s14 = sld [smem:[#allocation6 + $0x10]] }
 0x1a9   :  { %2642 = vtanh.f32 %v266_v32  ;;  %v311_v2 = vadd.f32 %v310_v46, %v307_v43  ;;  %v3150_v32 = vsub.s32 0, %v393_v31  ;;  %v3152_v33 = vsub.s32 1, %v393_v31  ;;  %s3277_s0 = sld [smem:[#allocation6 + $0x5e]] }
 0x1aa   :  { %v3154_v34 = vsub.s32 2, %v393_v31  ;;  %s3279_s21 = sld [smem:[#allocation7]] }
 0x1ab   :  { %v395_v38 = vrot.slane %v388_v37, %v3150_v32  ;;  %v408_v0 = vrot.slane %v388_v37, %v3152_v33 }
 0x1af   :  { %5514 = sst [smem:[#allocation31_spill]] %s3277_s0 }
 0x1b0   :  { %5515 = sst [smem:[#allocation32_spill]] %s3279_s21 }
 0x1b1   :  { %v2633_v36 = vpop.eup %2632  ;;  %s3299_s0 = sld [smem:[#allocation6 + $0x24]] }
 0x1b2   :  { %v2635_v29 = vpop.eup %2634  ;;  %v315_v39 = vadd.f32 1.0, %v2633_v36  ;;  %v3156_v36 = vsub.s32 3, %v393_v31  ;;  %s3301_s21 = sld [smem:[#allocation6 + $0x26]] }
 0x1b3   :  { %v2637_v40 = vpop.eup %2636  ;;  %v323_v41 = vadd.f32 1.0, %v2635_v29  ;;  %v389_v29 = vld [vmem:[%s5502_s28] sm:$0xf]  ;;  %s3239_s28 = sld [smem:[#allocation6 + $0x34]] }
 0x1b4   :  { %v2639_v44 = vpop.eup %2638  ;;  %2644 = vrcp.f32 %v315_v39  ;;  %v331_v45 = vadd.f32 1.0, %v2637_v40  ;;  %v422_v39 = vrot.slane %v388_v37, %v3154_v34  ;;  %v436_v40 = vrot.slane %v388_v37, %v3156_v36 }
 0x1b5   :  { %2646 = vrcp.f32 %v323_v41  ;;  %v339_v47 = vadd.f32 1.0, %v2639_v44  ;;  %v2641_v48 = vpop.eup %2640  ;;  %v400_v46 = vrot.slane %v389_v29, %v3150_v32 }
 0x1b6   :  { %2648 = vrcp.f32 %v331_v45  ;;  %v2643_v49 = vpop.eup %2642 }
 0x1b7   :  { %2650 = vtanh.f32 %v296_v42  ;;  %5525 = sst [smem:[#allocation42_spill]] %s3299_s0 }
 0x1b8   :  { %2652 = vrcp.f32 %v339_v47  ;;  %v413_v47 = vrot.slane %v389_v29, %v3152_v33  ;;  %5526 = sst [smem:[#allocation43_spill]] %s3301_s21 }
 0x1b9   :  { %2654 = vtanh.f32 %v311_v2  ;;  %v427_v2 = vrot.slane %v389_v29, %v3154_v34  ;;  %s3321_s0 = sld [smem:[#allocation7 + $0x7]] }
 0x1ba   :  { %s3323_s21 = sld [smem:[#allocation6 + $0x54]] }
 0x1bf   :  { %5536 = sst [smem:[#allocation53_spill]] %s3321_s0 }
 0x1c0   :  { %5537 = sst [smem:[#allocation54_spill]] %s3323_s21 }
 0x1c1   :  { %v2645_v50 = vpop.eup %2644  ;;  %s3339_s0 = sld [smem:[#allocation6 + $0x27]] }
 0x1c2   :  { %v2647_v51 = vpop.eup %2646  ;;  %v3126_v52 = vmul.f32 %v2645_v50, %v2643_v49  ;;  %s3341_s21 = sld [smem:[#allocation6 + $0x29]] }
 0x1c3   :  { %v2649_v53 = vpop.eup %2648  ;;  %v3128_v54 = vmul.f32 %v2647_v51, %v2641_v48  ;;  %v441_v48 = vrot.slane %v389_v29, %v3156_v36  ;;  %s5664_s11 = sld [smem:[#allocation53_spill]] }
 0x1c4   :  { %v2651_v55 = vpop.eup %2650  ;;  %v345_v35 = vsel %vm344_vm4, %v3126_v52, 0.0  ;;  %v349_v56 = vmul.f32 %v3126_v52, %v3126_v52 }
 0x1c5   :  { %v354_v57 = vsel %vm344_vm4, %v3128_v54, 0.0  ;;  %346 = vadd.xlane.f32.xlu0 %v345_v35  ;;  %v3136_v58 = vmul.f32 %v2651_v55, %v2649_v53  ;;  %v2653_v59 = vpop.eup %2652  ;;  %v358_v62 = vmul.f32 %v3128_v54, %v3128_v54 }
 0x1c6   :  { %355 = vadd.xlane.f32.xlu1 %v354_v57  ;;  %v2655_v60 = vpop.eup %2654  ;;  %v350_v61 = vsel %vm344_vm4, %v349_v56, 0.0 }
 0x1c7   :  { %v363_v63 = vsel %vm344_vm4, %v3136_v58, 0.0  ;;  %v343_v1 = vmul.f32 %v2655_v60, %v2653_v59  ;;  %v359_v3 = vsel %vm344_vm4, %v358_v62, 0.0  ;;  %v367_v4 = vmul.f32 %v3136_v58, %v3136_v58  ;;  %5545 = sst [smem:[#allocation62_spill]] %s3339_s0 }
 0x1c8   :  { %5546 = sst [smem:[#allocation63_spill]] %s3341_s21  ;;  %v498_v60 = vstv %s3211_s1 }
 0x1c9   :  { %351 = vadd.xlane.f32.xlu0 %v350_v61  ;;  %v372_v5 = vsel %vm344_vm4, %v343_v1, 0.0  ;;  %v368_v6 = vsel %vm344_vm4, %v367_v4, 0.0  ;;  %v376_v7 = vmul.f32 %v343_v1, %v343_v1  ;;  %s3355_s0 = sld [smem:[#allocation6 + $0x57]]  ;;  %v549_v61 = vstv %s3213_s22 }
 0x1ca   :  { %364 = vadd.xlane.f32.xlu1 %v363_v63  ;;  %s3357_s21 = sld [smem:[#allocation6 + $0x59]]  ;;  %v651_v63 = vstv %s3219_s23 }
 0x1cb   :  { %v377_v9 = vsel %vm344_vm4, %v376_v7, 0.0  ;;  %s5559_s1 = sld [smem:[#allocation20_spill]]  ;;  %v561_v7 = vstv %s3233_s14 }
 0x1cc   :  { %s5560_s22 = sld [smem:[#allocation21_spill]] }
 0x1cd   :  { %360 = vadd.xlane.f32.xlu0 %v359_v3  ;;  %v753_v3 = vstv %s3223_s2  ;;  %s5562_s23 = sld [smem:[#allocation23_spill]] }
 0x1ce   :  { %373 = vadd.xlane.f32.xlu1 %v372_v5  ;;  %v855_v5 = vstv %s3229_s10  ;;  %5563 = sst [smem:[#allocation20_spill]] %s3379_s15 }
 0x1cf   :  { %5553 = sst [smem:[#allocation70_spill]] %s3355_s0 }
 0x1d0   :  { %5554 = sst [smem:[#allocation71_spill]] %s3357_s21 }
 0x1d1   :  { %369 = vadd.xlane.f32.xlu0 %v368_v6  ;;  %v510_v6 = vstv %s3231_s13  ;;  %s5565_s2 = sld [smem:[#allocation25_spill]] }
 0x1d2   :  { %s5567_s10 = sld [smem:[#allocation27_spill]] }
 0x1d3   :  { %5568 = sst [smem:[#allocation21_spill]] %s3385_s7 }
 0x1d4   :  { %s5569_s13 = sld [smem:[#allocation28_spill]] }
 0x1d5   :  { %378 = vadd.xlane.f32.xlu0 %v377_v9  ;;  %v612_v9 = vstv %s3235_s25  ;;  %s5570_s14 = sld [smem:[#allocation29_spill]] }
 0x1d6   :  { %s3393_s15 = sld [smem:[#allocation6 + $0x2c]] }
 0x1d7   :  { %s3399_s7 = sld [smem:[#allocation6 + $0x36]] }
 0x1d8   :  { %s3405_s21 = sld [smem:[#allocation6 + $0x38]] }
 0x1d9   :  { %5592 = sst [smem:[#allocation27_spill]] %s3457_s16 }
 0x1da   :  { %s5626_s20 = sld [smem:[#allocation20_spill]] }
 0x1db   :  { %s5652_s25 = sld [smem:[#allocation44_spill]] }
 0x1dc   :  { %s5659_s16 = sld [smem:[#allocation54_spill]] }
 0x1dd   :  { %s5673_s0 = sld [smem:[#allocation61_spill]] }
 0x1de   :  { %5583 = sst [smem:[#allocation23_spill]] %s3405_s21 }
 0x1df   :  { %s5656_s21 = sld [smem:[#allocation49_spill]] }
 0x24e   :  { %v347_v10 = vpop.xlane.xlu0 %346 }
 0x24f   :  { %v356_v11 = vpop.xlane.xlu1 %355 }
 0x250   :  { %v357_v14 = vadd.f32 %v356_v11, %v347_v10  ;;  %v663_v10 = vstv %s3237_s3  ;;  %v714_v11 = vstv %s3239_s28  ;;  %s3390_s3 = sld [smem:[#allocation6 + $0x2a]] }
 0x251   :  { %s5574_s28 = sld [smem:[#allocation32_spill]] }
 0x252   :  { %v352_v12 = vpop.xlane.xlu0 %351 }
 0x253   :  { %v365_v13 = vpop.xlane.xlu1 %364 }
 0x254   :  { %v366_v16 = vadd.f32 %v365_v13, %v357_v14  ;;  %v816_v13 = vstv %s3243_s6  ;;  %v867_v14 = vstv %s3245_s29  ;;  %s5576_s6 = sld [smem:[#allocation34_spill]] }
 0x255   :  { %s5577_s29 = sld [smem:[#allocation35_spill]] }
 0x256   :  { %v361_v15 = vpop.xlane.xlu0 %360 }
 0x257   :  { %v374_v17 = vpop.xlane.xlu1 %373  ;;  %v362_v21 = vadd.f32 %v361_v15, %v352_v12  ;;  %v765_v12 = vstv %s3241_s4  ;;  %s5575_s4 = sld [smem:[#allocation33_spill]]  ;;  %v491_v29 = vstv %s5574_s28 }
 0x258   :  { %v375_v19 = vadd.f32 %v374_v17, %v366_v16  ;;  %v573_v16 = vstv %s3249_s30  ;;  %v624_v17 = vstv %s3251_s5  ;;  %s5579_s30 = sld [smem:[#allocation37_spill]] }
 0x259   :  { %s5580_s5 = sld [smem:[#allocation38_spill]] }
 0x25a   :  { %v370_v20 = vpop.xlane.xlu0 %369  ;;  %v382_v22 = vmul.f32 0.001953125, %v375_v19  ;;  %v675_v19 = vstv %s3253_s9  ;;  %s5582_s9 = sld [smem:[#allocation40_spill]] }
 0x25b   :  { %v371_v23 = vadd.f32 %v370_v20, %v362_v21  ;;  %v726_v20 = vstv %s5559_s1  ;;  %v777_v21 = vstv %s5560_s22  ;;  %s5584_s1 = sld [smem:[#allocation41_spill]] }
 0x25c   :  { %v384_v26 = vmul.f32 %v382_v22, %v382_v22  ;;  %v390_v41 = vsub.f32 %v3126_v52, %v382_v22  ;;  %v403_v42 = vsub.f32 %v3128_v54, %v382_v22  ;;  %v417_v43 = vsub.f32 %v3136_v58, %v382_v22  ;;  %s3415_s22 = sld [smem:[#allocation6 + $0x42]] }
 0x25d   :  { %v431_v44 = vsub.f32 %v343_v1, %v382_v22  ;;  %v702_v1 = vstv %s3221_s24  ;;  %s5564_s24 = sld [smem:[#allocation24_spill]] }
 0x25e   :  { %v379_v24 = vpop.xlane.xlu0 %378  ;;  %s3561_s28 = sld [smem:[#allocation6 + $0x39]] }
 0x25f   :  { %v380_v25 = vadd.f32 %v379_v24, %v371_v23  ;;  %v879_v23 = vstv %s5562_s23  ;;  %s3421_s23 = sld [smem:[#allocation6 + $0x44]] }
 0x261   :  { %v383_v27 = vmul.f32 0.001953125, %v380_v25  ;;  %v585_v25 = vstv %s5565_s2  ;;  %s3433_s2 = sld [smem:[#allocation6 + $0x4e]] }
 0x262   :  { %5585 = sst [smem:[#allocation24_spill]] %s3415_s22 }
 0x263   :  { %v385_v28 = vsub.f32 %v383_v27, %v384_v26  ;;  %v534_v24 = vstv %s5564_s24  ;;  %v687_v27 = vstv %s5567_s10  ;;  %s5588_s24 = sld [smem:[#allocation43_spill]] }
 0x264   :  { %s5658_s22 = sld [smem:[#allocation52_spill]] }
 0x265   :  { %v386_v30 = vadd.f32 1e-05, %v385_v28  ;;  %v789_v28 = vstv %s5569_s13  ;;  %5587 = sst [smem:[#allocation25_spill]] %s3421_s23 }
 0x266   :  { %s3445_s13 = sld [smem:[#allocation6 + $0x50]] }
 0x267   :  { %2656 = vrsqrt.f32 %v386_v30  ;;  %v738_v30 = vstv %s5570_s14  ;;  %s5591_s14 = sld [smem:[#allocation45_spill]] }
 0x268   :  { %s5680_s23 = sld [smem:[#allocation66_spill]] }
 0x269   :  { %s5700_s10 = sld [smem:[#allocation75_spill]] }
 0x274   :  { %v2657_v45 = vpop.eup %2656 }
 0x275   :  { %v391_v49 = vmul.f32 %v2657_v45, %v390_v41  ;;  %v404_v50 = vmul.f32 %v2657_v45, %v403_v42  ;;  %v418_v51 = vmul.f32 %v2657_v45, %v417_v43  ;;  %v432_v53 = vmul.f32 %v2657_v45, %v431_v44 }
 0x276   :  { %v553_v41 = vstv %s5579_s30  ;;  %v593_v42 = vstv %s5580_s5  ;;  %v604_v44 = vstv %s5582_s9  ;;  %s3579_s9 = sld [smem:[#allocation6 + $0x5d]] }
 0x277   :  { %v396_v55 = vmul.f32 %v395_v38, %v391_v49  ;;  %v409_v52 = vmul.f32 %v408_v0, %v404_v50  ;;  %v423_v35 = vmul.f32 %v422_v39, %v418_v51  ;;  %v437_v54 = vmul.f32 %v436_v40, %v432_v53  ;;  %s5657_s5 = sld [smem:[#allocation50_spill]] }
 0x278   :  { %v494_v38 = vstv %s5575_s4  ;;  %v502_v0 = vstv %s5576_s6  ;;  %v542_v39 = vstv %s5577_s29  ;;  %s3526_s6 = sld [smem:[#allocation6 + $0x21]] }
 0x279   :  { %v3175_v56 = vadd.f32 %v400_v46, %v396_v55  ;;  %v3177_v57 = vadd.f32 %v413_v47, %v409_v52  ;;  %v3179_v58 = vadd.f32 %v427_v2, %v423_v35  ;;  %v3181_v59 = vadd.f32 %v441_v48, %v437_v54  ;;  %s5609_s4 = sld [smem:[#allocation59_spill]] }
 0x27a   :  { %v644_v2 = vstv %s5584_s1  ;;  %v655_v35 = vstv %s5588_s24  ;;  %s3469_s1 = sld [smem:[#allocation6 + $0x5c]] }
 0x27b   :  { %402 = vst [vmem:[%s5280_s17] sm:$0x3] %v3175_v56  ;;  %2285 = vst [vmem:[%s5280_s17 + $0x2] sm:$0x3] %v3177_v57  ;;  %460 = vrot.lane.b32.xlu0 %v3175_v56, %s2851_s27  ;;  %458 = vrot.lane.b32.xlu1 %v3175_v56, %s2850_s26  ;;  %v3425_v45 = vmul.f32 %v498_v60, %v3175_v56  ;;  %v3428_v46 = vmul.f32 %v549_v61, %v3175_v56  ;;  %s3481_s24 = sld [smem:[#allocation6 + $0x9]] }
 0x27c   :  { %2286 = vst [vmem:[%s5280_s17 + $0x4] sm:$0x3] %v3179_v58  ;;  %2287 = vst [vmem:[%s5280_s17 + $0x6] sm:$0x3] %v3181_v59  ;;  %s3217_s17 = sld [smem:[#allocation6 + $0x19]]  ;;  %v3437_v48 = vmul.f32 %v651_v63, %v3175_v56  ;;  %v3440_v49 = vmul.f32 %v702_v1, %v3175_v56  ;;  %v3443_v50 = vmul.f32 %v753_v3, %v3175_v56  ;;  %v698_v3 = vstv %s5591_s14 }
 0x27d   :  { %v3452_v55 = vmul.f32 %v855_v5, %v3175_v56  ;;  %v3455_v52 = vmul.f32 %v510_v6, %v3177_v57  ;;  %v3461_v54 = vmul.f32 %v561_v7, %v3177_v57  ;;  %v3464_v60 = vmul.f32 %v612_v9, %v3177_v57  ;;  %s3505_s14 = sld [smem:[#allocation6 + $0x15]] }
 0x27e   :  { %v3467_v61 = vmul.f32 %v663_v10, %v3177_v57  ;;  %v3476_v63 = vmul.f32 %v765_v12, %v3177_v57  ;;  %v3479_v1 = vmul.f32 %v816_v13, %v3177_v57  ;;  %v3491_v6 = vmul.f32 %v573_v16, %v3179_v58  ;;  %5607 = sst [smem:[#allocation79_spill]] %s3526_s6 }
 0x27f   :  { %474 = vrot.lane.b32.xlu0 %v3179_v58, %s2850_s26  ;;  %466 = vrot.lane.b32.xlu1 %v3177_v57, %s2850_s26  ;;  %v3497_v9 = vmul.f32 %v624_v17, %v3179_v58  ;;  %v3500_v10 = vmul.f32 %v675_v19, %v3179_v58  ;;  %v3509_v12 = vmul.f32 %v777_v21, %v3179_v58  ;;  %s5613_s6 = sld [smem:[#allocation62_spill]] }
 0x280   :  { %5594 = sst [smem:[#allocation28_spill]] %s3469_s1  ;;  %v3521_v16 = vmul.f32 %v534_v24, %v3181_v59  ;;  %v3524_v17 = vmul.f32 %v585_v25, %v3181_v59  ;;  %v3540_v21 = vmul.f32 %v789_v28, %v3181_v59 }
 0x281   :  { %5596 = sst [smem:[#allocation29_spill]] %s3481_s24 }
 0x282   :  { %v600_v62 = vstv %s3217_s17  ;;  %s5561_s17 = sld [smem:[#allocation22_spill]] }
 0x283   :  { %482 = vrot.lane.b32.xlu0 %v3181_v59, %s2850_s26  ;;  %468 = vrot.lane.b32.xlu1 %v3177_v57, %s2851_s27  ;;  %s3227_s26 = sld [smem:[#allocation6 + $0x49]]  ;;  %v3431_v47 = vmul.f32 %v600_v62, %v3175_v56  ;;  %v3473_v62 = vmul.f32 %v714_v11, %v3177_v57 }
 0x284   :  { %5572 = sst [smem:[#allocation22_spill]] %s3390_s3 }
 0x285   :  { %s5581_s3 = sld [smem:[#allocation39_spill]] }
 0x286   :  { %5599 = sst [smem:[#allocation77_spill]] %s3505_s14 }
 0x287   :  { %476 = vrot.lane.b32.xlu1 %v3179_v58, %s2851_s27  ;;  %s3555_s1 = sld [smem:[#allocation6 + $0x2f]] }
 0x288   :  { %v828_v22 = vstv %s5561_s17  ;;  %s5586_s17 = sld [smem:[#allocation42_spill]] }
 0x289   :  { %v804_v4 = vstv %s3227_s26  ;;  %s5566_s26 = sld [smem:[#allocation26_spill]]  ;;  %v3512_v13 = vmul.f32 %v828_v22, %v3179_v58  ;;  %v3543_v22 = vmul.f32 %v738_v30, %v3181_v59 }
 0x28a   :  { %5590 = sst [smem:[#allocation26_spill]] %s3445_s13  ;;  %v3449_v53 = vmul.f32 %v804_v4, %v3175_v56  ;;  %v3485_v4 = vmul.f32 %v867_v14, %v3177_v57  ;;  %v3503_v57 = vmul.f32 %v726_v20, %v3179_v58  ;;  %v3515_v14 = vmul.f32 %v879_v23, %v3179_v58 }
 0x28b   :  { %484 = vrot.lane.b32.xlu1 %v3181_v59, %s2851_s27  ;;  %s3247_s27 = sld [smem:[#allocation6 + $0x7]]  ;;  %v596_v43 = vstv %s5581_s3  ;;  %v3537_v20 = vmul.f32 %v687_v27, %v3181_v59 }
 0x28c   :  { %s5620_s29 = sld [smem:[#allocation71_spill]] }
 0x28d   :  { %5623 = sst [smem:[#allocation62_spill]] %s3561_s28 }
 0x28e   :  { %v647_v51 = vstv %s5586_s17  ;;  %s3517_s17 = sld [smem:[#allocation6 + $0x17]] }
 0x28f   :  { %v636_v26 = vstv %s5566_s26  ;;  %s3493_s26 = sld [smem:[#allocation6 + $0xb]] }
 0x290   :  { %v3529_v19 = vmul.f32 %v636_v26, %v3181_v59  ;;  %s5628_s30 = sld [smem:[#allocation22_spill]] }
 0x291   :  { %v522_v15 = vstv %s3247_s27  ;;  %s5578_s27 = sld [smem:[#allocation36_spill]] }
 0x292   :  { %v3488_v5 = vmul.f32 %v522_v15, %v3179_v58  ;;  %v749_v15 = vstv %s3311_s12  ;;  %s5611_s12 = sld [smem:[#allocation60_spill]] }
 0x293   :  { %5619 = sst [smem:[#allocation60_spill]] %s3555_s1 }
 0x294   :  { %5603 = sst [smem:[#allocation78_spill]] %s3517_s17 }
 0x295   :  { %5597 = sst [smem:[#allocation76_spill]] %s3493_s26 }
 0x296   :  { %s3532_s17 = sld [smem:[#allocation6 + $0x23]] }
 0x297   :  { %v545_v40 = vstv %s5578_s27  ;;  %s5608_s27 = sld [smem:[#allocation58_spill]] }
 0x298   :  { %s3567_s1 = sld [smem:[#allocation6 + $0x45]] }
 0x299   :  { %s3573_s14 = sld [smem:[#allocation6 + $0x51]] }
 0x29a   :  { %s5654_s28 = sld [smem:[#allocation46_spill]] }
 0x29b   :  { %s5655_s3 = sld [smem:[#allocation47_spill]] }
 0x29c   :  { %5610 = sst [smem:[#allocation58_spill]] %s3532_s17 }
 0x29d   :  { %s3549_s17 = sld [smem:[#allocation6 + $0x2d]] }
 0x29e   :  { %s5682_s24 = sld [smem:[#allocation65_spill]] }
 0x29f   :  { %s5684_s26 = sld [smem:[#allocation67_spill]] }
 0x2a0   :  { %s5686_s13 = sld [smem:[#allocation68_spill]] }
 0x2a3   :  { %5617 = sst [smem:[#allocation59_spill]] %s3549_s17 }
 0x2a4   :  { %s5624_s17 = sld [smem:[#allocation74_spill]] }
 0x2ed   :  { %v461_v58 = vpop.permute.xlu0 %460  ;;  %v459_v11 = vpop.permute.xlu1 %458 }
 0x2ee   :  { %v462_v23 = vsel %vm3040_vm3, %v459_v11, %v461_v58  ;;  %v463_v30 = vsel %vm3040_vm3, %v461_v58, %v459_v11 }
 0x2ef   :  { %v464_v37 = vsel %vm172_vm1, %v462_v23, 0.0  ;;  %v465_v28 = vsel %vm173_vm2, %v463_v30, 0.0 }
 0x2f0   :  { %v495_v24 = vmul.f32 %v494_v38, %v464_v37  ;;  %v546_v11 = vmul.f32 %v545_v40, %v464_v37  ;;  %v503_v26 = vmul.f32 %v502_v0, %v465_v28  ;;  %v554_v23 = vmul.f32 %v553_v41, %v465_v28 }
 0x2f1   :  { %v597_v30 = vmul.f32 %v596_v43, %v464_v37  ;;  %v648_v27 = vmul.f32 %v647_v51, %v464_v37  ;;  %v467_v31 = vpop.permute.xlu1 %466  ;;  %v605_v40 = vmul.f32 %v604_v44, %v465_v28  ;;  %v699_v56 = vmul.f32 %v698_v3, %v464_v37 }
 0x2f2   :  { %v496_v38 = vadd.f32 %v495_v24, %v491_v29  ;;  %v547_v7 = vadd.f32 %v546_v11, %v542_v39  ;;  %v656_v43 = vmul.f32 %v655_v35, %v465_v28  ;;  %v750_v51 = vmul.f32 %v749_v15, %v464_v37 }
 0x2f3   :  { %v598_v0 = vadd.f32 %v597_v30, %v593_v42  ;;  %v649_v41 = vadd.f32 %v648_v27, %v644_v2  ;;  %v5660_v39 = vstv %s5652_s25  ;;  %v5661_v24 = vstv %s5653_s8  ;;  %s5669_s8 = sld [smem:[#allocation56_spill]] }
 0x2f4   :  { %v500_v58 = vadd.f32 %v3425_v45, %v496_v38  ;;  %v551_v29 = vadd.f32 %v3428_v46, %v547_v7  ;;  %v700_v44 = vadd.f32 %v699_v56, %v5660_v39  ;;  %v801_v11 = vmul.f32 %v5661_v24, %v464_v37  ;;  %s5675_s25 = sld [smem:[#allocation64_spill]] }
 0x2f5   :  { %v602_v3 = vadd.f32 %v3431_v47, %v598_v0  ;;  %v653_v42 = vadd.f32 %v3437_v48, %v649_v41  ;;  %v5662_v30 = vstv %s5654_s28  ;;  %v5663_v2 = vstv %s5655_s3  ;;  %v469_v27 = vpop.permute.xlu1 %468  ;;  %s5678_s28 = sld [smem:[#allocation63_spill]] }
 0x2f6   :  { %v707_v25 = vmul.f32 %v5662_v30, %v465_v28  ;;  %v751_v35 = vadd.f32 %v750_v51, %v5663_v2  ;;  %v704_v15 = vadd.f32 %v3440_v49, %v700_v44  ;;  %v5665_v45 = vstv %s5656_s21  ;;  %s5701_s3 = sld [smem:[#allocation21_spill]] }
 0x2f7   :  { %v758_v38 = vmul.f32 %v5665_v45, %v465_v28  ;;  %v5667_v46 = vstv %s5657_s5  ;;  %v5668_v56 = vstv %s5658_s22  ;;  %v504_v47 = vadd.f32 %v503_v26, %v500_v58  ;;  %s5707_s21 = sld [smem:[#allocation24_spill]] }
 0x2f8   :  { %v802_v7 = vadd.f32 %v801_v11, %v5667_v46  ;;  %v809_v39 = vmul.f32 %v5668_v56, %v465_v28  ;;  %v555_v0 = vadd.f32 %v554_v23, %v551_v29  ;;  %v755_v48 = vadd.f32 %v3443_v50, %v751_v35  ;;  %s5708_s5 = sld [smem:[#allocation23_spill]] }
 0x2f9   :  { %v5670_v41 = vstv %s5659_s16  ;;  %v606_v51 = vadd.f32 %v605_v40, %v602_v3  ;;  %v657_v30 = vadd.f32 %v656_v43, %v653_v42  ;;  %v470_v44 = vsel %vm3040_vm3, %v467_v31, %v469_v27  ;;  %s5726_s22 = sld [smem:[#allocation76_spill]] }
 0x2fa   :  { %v852_v24 = vmul.f32 %v5670_v41, %v464_v37  ;;  %v806_v49 = vadd.f32 %v3449_v53, %v802_v7  ;;  %v708_v11 = vadd.f32 %v707_v25, %v704_v15  ;;  %v5672_v2 = vstv %s5664_s11  ;;  %s5727_s16 = sld [smem:[#allocation79_spill]] }
 0x2fb   :  { %v471_v26 = vsel %vm3040_vm3, %v469_v27, %v467_v31  ;;  %v472_v37 = vsel %vm172_vm1, %v470_v44, 0.0  ;;  %v5674_v50 = vstv %s5666_s18  ;;  %v5676_v23 = vstv %s5669_s8  ;;  %s5729_s11 = sld [smem:[#allocation78_spill]] }
 0x2fc   :  { %v853_v45 = vadd.f32 %v852_v24, %v5672_v2  ;;  %v860_v58 = vmul.f32 %v5674_v50, %v465_v28  ;;  %v473_v53 = vsel %vm173_vm2, %v471_v26, 0.0  ;;  %v507_v40 = vmul.f32 %v5676_v23, %v472_v37  ;;  %s5730_s18 = sld [smem:[#allocation58_spill]] }
 0x2fd   :  { %v5677_v43 = vstv %s5608_s27  ;;  %v759_v29 = vadd.f32 %v758_v38, %v755_v48  ;;  %v810_v3 = vadd.f32 %v809_v39, %v806_v49  ;;  %v5679_v31 = vstv %s5611_s12  ;;  %s5690_s12 = sld [smem:[#allocation69_spill]] }
 0x2fe   :  { %v558_v25 = vmul.f32 %v5677_v43, %v472_v37  ;;  %v857_v42 = vadd.f32 %v3452_v55, %v853_v45  ;;  %v609_v35 = vmul.f32 %v5679_v31, %v472_v37  ;;  %v508_v27 = vadd.f32 %v507_v40, %v504_v47  ;;  %s5699_s27 = sld [smem:[#allocation73_spill]] }
 0x2ff   :  { %v5681_v15 = vstv %s5671_s19  ;;  %v5683_v7 = vstv %s5613_s6  ;;  %v5685_v41 = vstv %s5609_s4  ;;  %v5687_v38 = vstv %s5673_s0  ;;  %s5691_s6 = sld [smem:[#allocation70_spill]] }
 0x300   :  { %v515_v46 = vmul.f32 %v5681_v15, %v473_v53  ;;  %v559_v28 = vadd.f32 %v558_v25, %v555_v0  ;;  %v660_v56 = vmul.f32 %v5683_v7, %v472_v37  ;;  %v566_v24 = vmul.f32 %v5685_v41, %v473_v53  ;;  %s5696_s4 = sld [smem:[#allocation72_spill]] }
 0x301   :  { %v610_v44 = vadd.f32 %v609_v35, %v606_v51  ;;  %v617_v39 = vmul.f32 %v5687_v38, %v473_v53  ;;  %v5688_v48 = vstv %s5675_s25  ;;  %v861_v55 = vadd.f32 %v860_v58, %v857_v42  ;;  %s5731_s8 = sld [smem:[#allocation62_spill]] }
 0x302   :  { %v711_v49 = vmul.f32 %v5688_v48, %v472_v37  ;;  %v512_v2 = vadd.f32 %v3455_v52, %v508_v27  ;;  %v563_v47 = vadd.f32 %v3461_v54, %v559_v28  ;;  %v661_v45 = vadd.f32 %v660_v56, %v657_v30  ;;  %v477_v27 = vpop.permute.xlu1 %476  ;;  %v475_v28 = vpop.permute.xlu0 %474  ;;  %s5736_s19 = sld [smem:[#allocation60_spill]] }
 0x303   :  { %v614_v26 = vadd.f32 %v3464_v60, %v610_v44  ;;  %v5689_v0 = vstv %s5678_s28  ;;  %v5692_v40 = vstv %s5680_s23  ;;  %v5693_v25 = vstv %s5682_s24  ;;  %s5742_s0 = sld [smem:[#allocation30_spill]] }
 0x304   :  { %v668_v50 = vmul.f32 %v5689_v0, %v473_v53  ;;  %v712_v23 = vadd.f32 %v711_v49, %v708_v11  ;;  %v762_v43 = vmul.f32 %v5692_v40, %v472_v37  ;;  %v665_v51 = vadd.f32 %v3467_v61, %v661_v45  ;;  %s5745_s25 = sld [smem:[#allocation31_spill]] }
 0x305   :  { %v719_v31 = vmul.f32 %v5693_v25, %v473_v53  ;;  %v5694_v35 = vstv %s5684_s26  ;;  %v5695_v42 = vstv %s5686_s13  ;;  %v516_v54 = vadd.f32 %v515_v46, %v512_v2  ;;  %s3804_s28 = sld [smem:[#allocation6 + $0x47]] }
 0x306   :  { %v770_v58 = vmul.f32 %v5694_v35, %v473_v53  ;;  %v813_v52 = vmul.f32 %v5695_v42, %v472_v37  ;;  %v567_v30 = vadd.f32 %v566_v24, %v563_v47  ;;  %v716_v60 = vadd.f32 %v3473_v62, %v712_v23  ;;  %s2350_s23 = sld [smem:[#allocation6 + $0x3b]] }
 0x307   :  { %v763_v15 = vadd.f32 %v762_v43, %v759_v29  ;;  %v618_v11 = vadd.f32 %v617_v39, %v614_v26  ;;  %v5697_v56 = vstv %s5690_s12  ;;  %v5698_v41 = vstv %s5691_s6  ;;  %s2376_s24 = sld [smem:[#allocation6 + $0x53]] }
 0x308   :  { %v814_v7 = vadd.f32 %v813_v52, %v810_v3  ;;  %v821_v61 = vmul.f32 %v5697_v56, %v473_v53  ;;  %v864_v44 = vmul.f32 %v5698_v41, %v472_v37  ;;  %v669_v38 = vadd.f32 %v668_v50, %v665_v51  ;;  %s5752_s26 = sld [smem:[#allocation86_spill]] }
 0x309   :  { %v767_v48 = vadd.f32 %v3476_v63, %v763_v15  ;;  %v478_v46 = vsel %vm3040_vm3, %v475_v28, %v477_v27  ;;  %v479_v62 = vsel %vm3040_vm3, %v477_v27, %v475_v28  ;;  %v720_v63 = vadd.f32 %v719_v31, %v716_v60  ;;  %s5753_s6 = sld [smem:[#allocation87_spill]] }
 0x30a   :  { %v818_v29 = vadd.f32 %v3479_v1, %v814_v7  ;;  %v865_v3 = vadd.f32 %v864_v44, %v861_v55  ;;  %v480_v24 = vsel %vm172_vm1, %v478_v46, 0.0  ;;  %v481_v37 = vsel %vm173_vm2, %v479_v62, 0.0  ;;  %s3937_s13 = sld [smem:[#allocation9 + $0x13]] }
 0x30b   :  { %v5702_v39 = vstv %s5620_s29  ;;  %v5703_v2 = vstv %s5696_s4  ;;  %v5704_v45 = vstv %s5624_s17  ;;  %v771_v0 = vadd.f32 %v770_v58, %v767_v48  ;;  %s5710_s29 = sld [smem:[#allocation25_spill]] }
 0x30c   :  { %v872_v49 = vmul.f32 %v5702_v39, %v473_v53  ;;  %v519_v47 = vmul.f32 %v5703_v2, %v480_v24  ;;  %v570_v26 = vmul.f32 %v5704_v45, %v480_v24  ;;  %v869_v1 = vadd.f32 %v3485_v4, %v865_v3  ;;  %s5723_s17 = sld [smem:[#allocation77_spill]] }
 0x30d   :  { %v5705_v50 = vstv %s5699_s27  ;;  %v5706_v23 = vstv %s5626_s20  ;;  %v822_v43 = vadd.f32 %v821_v61, %v818_v29  ;;  %v5709_v31 = vstv %s5628_s30  ;;  %s5715_s20 = sld [smem:[#allocation26_spill]] }
 0x30e   :  { %v527_v55 = vmul.f32 %v5705_v50, %v481_v37  ;;  %v621_v40 = vmul.f32 %v5706_v23, %v480_v24  ;;  %v520_v51 = vadd.f32 %v519_v47, %v516_v54  ;;  %v571_v25 = vadd.f32 %v570_v26, %v567_v30  ;;  %s5716_s30 = sld [smem:[#allocation27_spill]]  ;;  %v483_v47 = vpop.permute.xlu0 %482 }
 0x30f   :  { %v672_v53 = vmul.f32 %v5709_v31, %v480_v24  ;;  %v5711_v35 = vstv %s5700_s10  ;;  %v5712_v58 = vstv %s5701_s3  ;;  %v5713_v4 = vstv %s3399_s7  ;;  %s5721_s7 = sld [smem:[#allocation28_spill]] }
 0x310   :  { %v578_v42 = vmul.f32 %v5711_v35, %v481_v37  ;;  %v622_v52 = vadd.f32 %v621_v40, %v618_v11  ;;  %v629_v27 = vmul.f32 %v5712_v58, %v481_v37  ;;  %v723_v60 = vmul.f32 %v5713_v4, %v480_v24  ;;  %s5754_s10 = sld [smem:[#allocation92_spill]] }
 0x311   :  { %v873_v15 = vadd.f32 %v872_v49, %v869_v1  ;;  %v524_v28 = vadd.f32 %v3488_v5, %v520_v51  ;;  %v575_v7 = vadd.f32 %v3491_v6, %v571_v25  ;;  %v673_v56 = vadd.f32 %v672_v53, %v669_v38  ;;  %v485_v49 = vpop.permute.xlu1 %484  ;;  %s3939_s12 = sld [smem:[#allocation9 + $0x1f]] }
 0x312   :  { %v626_v54 = vadd.f32 %v3497_v9, %v622_v52  ;;  %v5714_v30 = vstv %s3393_s15  ;;  %v724_v41 = vadd.f32 %v723_v60, %v720_v63  ;;  %v5717_v44 = vstv %s5707_s21  ;;  %s5722_s15 = sld [smem:[#allocation29_spill]] }
 0x313   :  { %v680_v61 = vmul.f32 %v5714_v30, %v481_v37  ;;  %v774_v48 = vmul.f32 %v5717_v44, %v480_v24  ;;  %v677_v11 = vadd.f32 %v3500_v10, %v673_v56  ;;  %v5718_v46 = vstv %s5708_s5  ;;  %s3943_s4 = sld [smem:[#allocation9 + $0x37]] }
 0x314   :  { %v731_v62 = vmul.f32 %v5718_v46, %v481_v37  ;;  %v5719_v29 = vstv %s5710_s29  ;;  %v5720_v39 = vstv %s3433_s2  ;;  %v528_v6 = vadd.f32 %v527_v55, %v524_v28  ;;  %s5728_s2 = sld [smem:[#allocation59_spill]] }
 0x315   :  { %v782_v3 = vmul.f32 %v5719_v29, %v481_v37  ;;  %v825_v5 = vmul.f32 %v5720_v39, %v480_v24  ;;  %v579_v38 = vadd.f32 %v578_v42, %v575_v7  ;;  %v728_v9 = vadd.f32 %v3503_v57, %v724_v41  ;;  %s3945_s27 = sld [smem:[#allocation9 + $0x43]] }
 0x316   :  { %v775_v2 = vadd.f32 %v774_v48, %v771_v0  ;;  %v630_v63 = vadd.f32 %v629_v27, %v626_v54  ;;  %v5724_v26 = vstv %s5715_s20  ;;  %v5725_v1 = vstv %s5716_s30  ;;  %s2853_s20 = smov 126   ;;  %s2854_s30 = smov 2  }
 0x317   :  { %v826_v45 = vadd.f32 %v825_v5, %v822_v43  ;;  %v833_v10 = vmul.f32 %v5724_v26, %v481_v37  ;;  %v876_v50 = vmul.f32 %v5725_v1, %v480_v24  ;;  %v681_v23 = vadd.f32 %v680_v61, %v677_v11  ;;  %s3949_s3 = sld [smem:[#allocation9 + $0x5b]] }
 0x318   :  { %v779_v40 = vadd.f32 %v3509_v12, %v775_v2  ;;  %v486_v55 = vsel %vm3040_vm3, %v483_v47, %v485_v49  ;;  %v487_v57 = vsel %vm3040_vm3, %v485_v49, %v483_v47  ;;  %v732_v12 = vadd.f32 %v731_v62, %v728_v9  ;;  %s3951_s21 = sld [smem:[#allocation9 + $0xa]] }
 0x319   :  { %v830_v0 = vadd.f32 %v3512_v13, %v826_v45  ;;  %v877_v43 = vadd.f32 %v876_v50, %v873_v15  ;;  %v488_v51 = vsel %vm172_vm1, %v486_v55, 0.0  ;;  %v3772_v24 = vsel %vm173_vm2, %v487_v57, 0.0  ;;  %5755 = sst [smem:[#allocation71_spill]] %s3943_s4 }
 0x31a   :  { %v5732_v25 = vstv %s5721_s7  ;;  %v5733_v53 = vstv %s5722_s15  ;;  %v5734_v42 = vstv %s5723_s17  ;;  %v783_v58 = vadd.f32 %v782_v3, %v779_v40  ;;  %s3901_s17 = sld [smem:[#allocation9 + $0x1]] }
 0x31b   :  { %v884_v31 = vmul.f32 %v5732_v25, %v481_v37  ;;  %v531_v35 = vmul.f32 %v5733_v53, %v488_v51  ;;  %v582_v52 = vmul.f32 %v5734_v42, %v488_v51  ;;  %v881_v13 = vadd.f32 %v3515_v14, %v877_v43  ;;  %5756 = sst [smem:[#allocation74_spill]] %s3945_s27 }
 0x31c   :  { %v5735_v27 = vstv %s5726_s22  ;;  %v5737_v60 = vstv %s5727_s16  ;;  %v834_v28 = vadd.f32 %v833_v10, %v830_v0  ;;  %v5738_v54 = vstv %s5728_s2  ;;  %s3903_s22 = sld [smem:[#allocation9 + $0xd]] }
 0x31d   :  { %v539_v4 = vmul.f32 %v5735_v27, %v3772_v24  ;;  %v633_v15 = vmul.f32 %v5737_v60, %v488_v51  ;;  %v532_v7 = vadd.f32 %v531_v35, %v528_v6  ;;  %v583_v56 = vadd.f32 %v582_v52, %v579_v38  ;;  %s3906_s16 = sld [smem:[#allocation9 + $0x19]] }
 0x31e   :  { %v684_v30 = vmul.f32 %v5738_v54, %v488_v51  ;;  %v5739_v37 = vstv %s5729_s11  ;;  %v5740_v44 = vstv %s5730_s18  ;;  %v5741_v48 = vstv %s5731_s8  ;;  %s3908_s2 = sld [smem:[#allocation9 + $0x25]] }
 0x31f   :  { %v590_v61 = vmul.f32 %v5739_v37, %v3772_v24  ;;  %v634_v41 = vadd.f32 %v633_v15, %v630_v63  ;;  %v641_v14 = vmul.f32 %v5740_v44, %v3772_v24  ;;  %v735_v11 = vmul.f32 %v5741_v48, %v488_v51  ;;  %s3910_s11 = sld [smem:[#allocation9 + $0x31]] }
 0x320   :  { %v885_v46 = vadd.f32 %v884_v31, %v881_v13  ;;  %v536_v62 = vadd.f32 %v3521_v16, %v532_v7  ;;  %v587_v29 = vadd.f32 %v3524_v17, %v583_v56  ;;  %v685_v3 = vadd.f32 %v684_v30, %v681_v23  ;;  %s3912_s18 = sld [smem:[#allocation9 + $0x3d]] }
 0x321   :  { %v638_v39 = vadd.f32 %v3529_v19, %v634_v41  ;;  %v5743_v5 = vstv %s5736_s19  ;;  %v736_v6 = vadd.f32 %v735_v11, %v732_v12  ;;  %v5744_v38 = vstv %s3567_s1  ;;  %s3915_s8 = sld [smem:[#allocation9 + $0x49]] }
 0x322   :  { %v692_v49 = vmul.f32 %v5743_v5, %v3772_v24  ;;  %v786_v9 = vmul.f32 %v5744_v38, %v488_v51  ;;  %v540_v2 = vadd.f32 %v539_v4, %v536_v62  ;;  %v591_v47 = vadd.f32 %v590_v61, %v587_v29  ;;  %s3917_s19 = sld [smem:[#allocation9 + $0x55]] }
 0x323   :  { %v689_v63 = vadd.f32 %v3537_v20, %v685_v3  ;;  %v5746_v16 = vstv %s3573_s14  ;;  %v642_v17 = vadd.f32 %v641_v14, %v638_v39  ;;  %v5747_v10 = vstv %s3579_s9  ;;  %s2389_s9 = sld [smem:[#allocation6 + $0x5f]] }
 0x324   :  { %v837_v45 = vmul.f32 %v5746_v16, %v488_v51  ;;  %v787_v26 = vadd.f32 %v786_v9, %v783_v58  ;;  %v888_v19 = vmul.f32 %v5747_v10, %v488_v51  ;;  %v5748_v1 = vstv %s5742_s0  ;;  %s3919_s0 = sld [smem:[#allocation9 + $0x4]] }
 0x325   :  { %v841_v50 = vmul.f32 %v5748_v1, %v3181_v59  ;;  %v693_v23 = vadd.f32 %v692_v49, %v689_v63  ;;  %v2390_v55 = vmul.f32 -1.442695, %v540_v2  ;;  %v5749_v57 = vstv %s5745_s25  ;;  %s3921_s25 = sld [smem:[#allocation9 + $0x10]] }
 0x326   :  { %v838_v40 = vadd.f32 %v837_v45, %v834_v28  ;;  %v892_v0 = vmul.f32 %v5749_v57, %v3181_v59  ;;  %v889_v43 = vadd.f32 %v888_v19, %v885_v46  ;;  %v2391_v20 = vmul.f32 -1.442695, %v591_v47  ;;  %s3931_s1 = sld [smem:[#allocation9 + $0x4c]] }
 0x327   :  { %v2392_v12 = vmul.f32 -1.442695, %v642_v17  ;;  %v791_v25 = vadd.f32 %v3540_v21, %v787_v26  ;;  %v740_v31 = vadd.f32 %v3543_v22, %v736_v6  ;;  %2658 = vpow2.f32 %v2390_v55  ;;  %s3933_s14 = sld [smem:[#allocation9 + $0x58]] }
 0x328   :  { %v842_v51 = vadd.f32 %v841_v50, %v838_v40  ;;  %2660 = vpow2.f32 %v2391_v20  ;;  %v893_v53 = vadd.f32 %v892_v0, %v889_v43  ;;  %v2393_v35 = vmul.f32 -1.442695, %v693_v23  ;;  %5758 = sst [smem:[#allocation22_spill]] %s3949_s3 }
 0x329   :  { %2662 = vpow2.f32 %v2392_v12  ;;  %v793_v42 = vstv %s3804_s28  ;;  %v742_v52 = vstv %s2350_s23  ;;  %v844_v58 = vstv %s2376_s24  ;;  %s3923_s28 = sld [smem:[#allocation9 + $0x1c]] }
 0x32a   :  { %2664 = vpow2.f32 %v2393_v35  ;;  %v794_v59 = vmul.f32 %v793_v42, %v3772_v24  ;;  %v743_v13 = vmul.f32 %v742_v52, %v3772_v24  ;;  %v845_v27 = vmul.f32 %v844_v58, %v3772_v24  ;;  %s3925_s23 = sld [smem:[#allocation9 + $0x28]] }
 0x32b   :  { %v895_v60 = vstv %s2389_s9  ;;  %v449_v14 = vand.u32 1, %v3018_v8  ;;  %s3927_s24 = sld [smem:[#allocation9 + $0x34]] }
 0x32c   :  { %v795_v21 = vadd.f32 %v794_v59, %v791_v25  ;;  %v744_v4 = vadd.f32 %v743_v13, %v740_v31  ;;  %v846_v22 = vadd.f32 %v845_v27, %v842_v51  ;;  %v896_v54 = vmul.f32 %v895_v60, %v3772_v24  ;;  %s3929_s9 = sld [smem:[#allocation9 + $0x40]] }
 0x32d   :  { %vm3825_vm5 = vcmp.eq.s32.totalorder %v449_v14, 0  ;;  %5759 = sst [smem:[#allocation33_spill]] %s3951_s21 }
 0x32e   :  { %2666 = vtanh.f32 %v795_v21  ;;  %v897_v61 = vadd.f32 %v896_v54, %v893_v53  ;;  %s3953_s5 = sld [smem:[#allocation9 + $0x16]] }
 0x32f   :  { %2668 = vtanh.f32 %v744_v4  ;;  %s3955_s29 = sld [smem:[#allocation9 + $0x22]] }
 0x330   :  { %2670 = vtanh.f32 %v846_v22  ;;  %s3961_s7 = sld [smem:[#allocation9 + $0x3a]] }
 0x331   :  { %s3963_s15 = sld [smem:[#allocation9 + $0x52]] }
 0x332   :  { %s3965_s4 = sld [smem:[#allocation9 + $0x5e]] }
 0x333   :  { %s3967_s27 = sld [smem:[#allocation10]] }
 0x334   :  { %v2659_v15 = vpop.eup %2658  ;;  %5760 = sst [smem:[#allocation36_spill]] %s3953_s5 }
 0x335   :  { %v2661_v28 = vpop.eup %2660  ;;  %v901_v7 = vadd.f32 1.0, %v2659_v15  ;;  %5761 = sst [smem:[#allocation34_spill]] %s3955_s29 }
 0x336   :  { %v2663_v56 = vpop.eup %2662  ;;  %v909_v30 = vadd.f32 1.0, %v2661_v28  ;;  %v979_v28 = vld [vmem:[%s5752_s26] sm:$0xf]  ;;  %s3935_s26 = sld [smem:[#allocation9 + $0x7]] }
 0x337   :  { %2672 = vrcp.f32 %v901_v7  ;;  %v917_v37 = vadd.f32 1.0, %v2663_v56  ;;  %v2665_v41 = vpop.eup %2664  ;;  %v980_v7 = vld [vmem:[%s5753_s6] sm:$0xf]  ;;  %v986_v56 = vrot.slane %v979_v28, %v3150_v32  ;;  %v999_v54 = vrot.slane %v979_v28, %v3152_v33  ;;  %s3941_s6 = sld [smem:[#allocation9 + $0x2b]] }
 0x338   :  { %2674 = vrcp.f32 %v909_v30  ;;  %v925_v44 = vadd.f32 1.0, %v2665_v41  ;;  %v1013_v30 = vrot.slane %v979_v28, %v3154_v34  ;;  %v1032_v29 = vrot.slane %v980_v7, %v3156_v36  ;;  %5764 = sst [smem:[#allocation42_spill]] %s3961_s7 }
 0x339   :  { %2676 = vrcp.f32 %v917_v37  ;;  %v1027_v37 = vrot.slane %v979_v28, %v3156_v36  ;;  %5765 = sst [smem:[#allocation32_spill]] %s3963_s15 }
 0x33a   :  { %2678 = vtanh.f32 %v897_v61  ;;  %5766 = sst [smem:[#allocation35_spill]] %s3965_s4 }
 0x33b   :  { %2680 = vrcp.f32 %v925_v44  ;;  %v2667_v48 = vpop.eup %2666  ;;  %5767 = sst [smem:[#allocation40_spill]] %s3967_s27 }
 0x33c   :  { %v2669_v11 = vpop.eup %2668  ;;  %s3971_s3 = sld [smem:[#allocation9 + $0x2]] }
 0x33d   :  { %v2671_v46 = vpop.eup %2670  ;;  %s3973_s21 = sld [smem:[#allocation10 + $0x1]] }
 0x33e   :  { %s3975_s5 = sld [smem:[#allocation9 + $0xc]] }
 0x33f   :  { %s3977_s29 = sld [smem:[#allocation9 + $0xe]] }
 0x340   :  { %s3983_s7 = sld [smem:[#allocation9 + $0x1a]] }
 0x341   :  { %s3985_s15 = sld [smem:[#allocation10 + $0x3]] }
 0x342   :  { %5769 = sst [smem:[#allocation38_spill]] %s3971_s3 }
 0x343   :  { %5770 = sst [smem:[#allocation41_spill]] %s3973_s21 }
 0x344   :  { %v2673_v62 = vpop.eup %2672  ;;  %5771 = sst [smem:[#allocation43_spill]] %s3975_s5 }
 0x345   :  { %v2675_v24 = vpop.eup %2674  ;;  %v3829_v3 = vmul.f32 %v2673_v62, %v2669_v11  ;;  %v991_v11 = vrot.slane %v980_v7, %v3150_v32  ;;  %v1018_v62 = vrot.slane %v980_v7, %v3154_v34  ;;  %5772 = sst [smem:[#allocation48_spill]] %s3977_s29 }
 0x346   :  { %v2677_v39 = vpop.eup %2676  ;;  %v3831_v5 = vmul.f32 %v2675_v24, %v2667_v48  ;;  %5775 = sst [smem:[#allocation46_spill]] %s3983_s7 }
 0x347   :  { %v932_v49 = vsel %vm3825_vm5, %v3829_v3, 0.0  ;;  %v3836_v6 = vmul.f32 %v2677_v39, %v2671_v46  ;;  %v2679_v47 = vpop.eup %2678  ;;  %v1004_v46 = vrot.slane %v980_v7, %v3152_v33  ;;  %5776 = sst [smem:[#allocation47_spill]] %s3985_s15 }
 0x348   :  { %v942_v38 = vsel %vm3825_vm5, %v3831_v5, 0.0  ;;  %v933_v9 = vsel %vm344_vm4, %v932_v49, 0.0  ;;  %v937_v2 = vmul.f32 %v932_v49, %v932_v49  ;;  %v2681_v16 = vpop.eup %2680  ;;  %s3987_s4 = sld [smem:[#allocation9 + $0x24]] }
 0x349   :  { %v943_v63 = vsel %vm344_vm4, %v942_v38, 0.0  ;;  %934 = vadd.xlane.f32.xlu0 %v933_v9  ;;  %v952_v45 = vsel %vm3825_vm5, %v3836_v6, 0.0  ;;  %v929_v17 = vmul.f32 %v2681_v16, %v2679_v47  ;;  %v947_v10 = vmul.f32 %v942_v38, %v942_v38  ;;  %s3989_s27 = sld [smem:[#allocation9 + $0x26]] }
 0x34a   :  { %944 = vadd.xlane.f32.xlu1 %v943_v63  ;;  %v938_v26 = vsel %vm344_vm4, %v937_v2, 0.0  ;;  %v953_v19 = vsel %vm344_vm4, %v952_v45, 0.0  ;;  %v957_v23 = vmul.f32 %v952_v45, %v952_v45  ;;  %s3993_s3 = sld [smem:[#allocation9 + $0x30]]  ;;  %v1095_v45 = vstv %s3901_s17 }
 0x34b   :  { %v962_v1 = vsel %vm3825_vm5, %v929_v17, 0.0  ;;  %v948_v50 = vsel %vm344_vm4, %v947_v10, 0.0  ;;  %s3995_s21 = sld [smem:[#allocation9 + $0x32]]  ;;  %v1248_v10 = vstv %s3908_s2 }
 0x34c   :  { %v963_v40 = vsel %vm344_vm4, %v962_v1, 0.0  ;;  %v958_v55 = vsel %vm344_vm4, %v957_v23, 0.0  ;;  %v967_v57 = vmul.f32 %v962_v1, %v962_v1  ;;  %s3997_s5 = sld [smem:[#allocation10 + $0x5]]  ;;  %v1350_v1 = vstv %s3912_s18 }
 0x34d   :  { %939 = vadd.xlane.f32.xlu0 %v938_v26  ;;  %s3999_s29 = sld [smem:[#allocation9 + $0x3c]]  ;;  %v1197_v26 = vstv %s3906_s16  ;;  %v1452_v23 = vstv %s3917_s19 }
 0x34e   :  { %954 = vadd.xlane.f32.xlu1 %v953_v19  ;;  %v968_v0 = vsel %vm344_vm4, %v967_v57, 0.0  ;;  %5777 = sst [smem:[#allocation49_spill]] %s3987_s4  ;;  %v1299_v19 = vstv %s3910_s11  ;;  %v1209_v57 = vstv %s3923_s28 }
 0x34f   :  { %5778 = sst [smem:[#allocation50_spill]] %s3989_s27 }
 0x350   :  { %5780 = sst [smem:[#allocation54_spill]] %s3993_s3 }
 0x351   :  { %949 = vadd.xlane.f32.xlu0 %v948_v50  ;;  %5781 = sst [smem:[#allocation53_spill]] %s3995_s21  ;;  %v1401_v50 = vstv %s3915_s8 }
 0x352   :  { %964 = vadd.xlane.f32.xlu1 %v963_v40  ;;  %5782 = sst [smem:[#allocation55_spill]] %s3997_s5  ;;  %v1107_v40 = vstv %s3919_s0 }
 0x353   :  { %5783 = sst [smem:[#allocation56_spill]] %s3999_s29 }
 0x354   :  { %s4005_s7 = sld [smem:[#allocation9 + $0x48]] }
 0x355   :  { %959 = vadd.xlane.f32.xlu0 %v958_v55  ;;  %s4007_s15 = sld [smem:[#allocation9 + $0x4a]]  ;;  %v1158_v55 = vstv %s3921_s25 }
 0x356   :  { %s4009_s4 = sld [smem:[#allocation10 + $0x7]] }
 0x357   :  { %s4011_s27 = sld [smem:[#allocation9 + $0x54]] }
 0x358   :  { %s4015_s3 = sld [smem:[#allocation9 + $0x3]] }
 0x359   :  { %969 = vadd.xlane.f32.xlu0 %v968_v0  ;;  %s4017_s21 = sld [smem:[#allocation9 + $0x5]]  ;;  %v1260_v0 = vstv %s3925_s23 }
 0x35a   :  { %5786 = sst [smem:[#allocation64_spill]] %s4005_s7 }
 0x35b   :  { %5787 = sst [smem:[#allocation63_spill]] %s4007_s15 }
 0x35c   :  { %5788 = sst [smem:[#allocation66_spill]] %s4009_s4 }
 0x35d   :  { %5789 = sst [smem:[#allocation65_spill]] %s4011_s27 }
 0x35e   :  { %5791 = sst [smem:[#allocation68_spill]] %s4015_s3 }
 0x35f   :  { %5792 = sst [smem:[#allocation69_spill]] %s4017_s21 }
 0x360   :  { %s4019_s5 = sld [smem:[#allocation9 + $0xf]] }
 0x361   :  { %s4025_s15 = sld [smem:[#allocation9 + $0x1d]] }
 0x362   :  { %s4027_s4 = sld [smem:[#allocation9 + $0x27]] }
 0x363   :  { %s4029_s27 = sld [smem:[#allocation9 + $0x29]] }
 0x364   :  { %s4031_s3 = sld [smem:[#allocation9 + $0x33]] }
 0x365   :  { %s4033_s21 = sld [smem:[#allocation9 + $0x35]] }
 0x366   :  { %5793 = sst [smem:[#allocation70_spill]] %s4019_s5 }
 0x367   :  { %5796 = sst [smem:[#allocation75_spill]] %s4025_s15 }
 0x368   :  { %5797 = sst [smem:[#allocation21_spill]] %s4027_s4 }
 0x369   :  { %5798 = sst [smem:[#allocation24_spill]] %s4029_s27 }
 0x36a   :  { %5799 = sst [smem:[#allocation23_spill]] %s4031_s3 }
 0x36b   :  { %5800 = sst [smem:[#allocation25_spill]] %s4033_s21 }
 0x36c   :  { %s4035_s5 = sld [smem:[#allocation9 + $0x3f]] }
 0x36d   :  { %s4041_s15 = sld [smem:[#allocation9 + $0x4d]] }
 0x36e   :  { %s4043_s4 = sld [smem:[#allocation9 + $0x57]] }
 0x36f   :  { %s4045_s27 = sld [smem:[#allocation9 + $0x59]] }
 0x370   :  { %s4047_s3 = sld [smem:[#allocation9 + $0x6]] }
 0x371   :  { %s4049_s21 = sld [smem:[#allocation9 + $0x8]] }
 0x372   :  { %5801 = sst [smem:[#allocation26_spill]] %s4035_s5 }
 0x373   :  { %5804 = sst [smem:[#allocation29_spill]] %s4041_s15 }
 0x374   :  { %5805 = sst [smem:[#allocation77_spill]] %s4043_s4 }
 0x375   :  { %5806 = sst [smem:[#allocation76_spill]] %s4045_s27 }
 0x376   :  { %5807 = sst [smem:[#allocation79_spill]] %s4047_s3 }
 0x377   :  { %5808 = sst [smem:[#allocation59_spill]] %s4049_s21 }
 0x378   :  { %s4055_s15 = sld [smem:[#allocation9 + $0x12]] }
 0x379   :  { %s4061_s3 = sld [smem:[#allocation9 + $0x14]] }
 0x37a   :  { %s5811_s17 = sld [smem:[#allocation71_spill]] }
 0x37b   :  { %s5814_s2 = sld [smem:[#allocation22_spill]] }
 0x37c   :  { %s4067_s21 = sld [smem:[#allocation9 + $0x1e]] }
 0x37d   :  { %s5816_s11 = sld [smem:[#allocation33_spill]] }
 0x37e   :  { %5809 = sst [smem:[#allocation78_spill]] %s4055_s15 }
 0x37f   :  { %5810 = sst [smem:[#allocation58_spill]] %s4061_s3 }
 0x380   :  { %s5817_s18 = sld [smem:[#allocation36_spill]] }
 0x381   :  { %s5818_s8 = sld [smem:[#allocation34_spill]] }
 0x382   :  { %5815 = sst [smem:[#allocation62_spill]] %s4067_s21 }
 0x383   :  { %s4073_s15 = sld [smem:[#allocation9 + $0x20]] }
 0x384   :  { %s5822_s25 = sld [smem:[#allocation42_spill]] }
 0x385   :  { %s4078_s23 = sld [smem:[#allocation9 + $0x2a]] }
 0x386   :  { %s4081_s21 = sld [smem:[#allocation9 + $0x2c]] }
 0x387   :  { %s4093_s27 = sld [smem:[#allocation9 + $0x38]] }
 0x388   :  { %s4145_s3 = sld [smem:[#allocation9 + $0x5a]] }
 0x389   :  { %5820 = sst [smem:[#allocation60_spill]] %s4073_s15 }
 0x38a   :  { %s4087_s15 = sld [smem:[#allocation9 + $0x36]] }
 0x38b   :  { %5824 = sst [smem:[#allocation30_spill]] %s4078_s23 }
 0x38c   :  { %s4245_s7 = sld [smem:[#allocation9 + $0x2f]] }
 0x38d   :  { %5835 = sst [smem:[#allocation31_spill]] %s4093_s27 }
 0x38e   :  { %5844 = sst [smem:[#allocation22_spill]] %s4145_s3 }
 0x38f   :  { %s5905_s28 = sld [smem:[#allocation64_spill]] }
 0x390   :  { %s5911_s3 = sld [smem:[#allocation65_spill]] }
 0x391   :  { %s5916_s4 = sld [smem:[#allocation66_spill]] }
 0x3d2   :  { %v935_v43 = vpop.xlane.xlu0 %934 }
 0x3d3   :  { %v945_v20 = vpop.xlane.xlu1 %944 }
 0x3d4   :  { %v946_v31 = vadd.f32 %v945_v20, %v935_v43  ;;  %v1311_v43 = vstv %s3927_s24  ;;  %v1362_v20 = vstv %s3929_s9  ;;  %s5826_s24 = sld [smem:[#allocation40_spill]] }
 0x3d6   :  { %v940_v12 = vpop.xlane.xlu0 %939 }
 0x3d7   :  { %v955_v25 = vpop.xlane.xlu1 %954 }
 0x3d8   :  { %v956_v53 = vadd.f32 %v955_v25, %v946_v31  ;;  %v1464_v25 = vstv %s3933_s14  ;;  %v1119_v31 = vstv %s3935_s26  ;;  %s5829_s14 = sld [smem:[#allocation41_spill]] }
 0x3d9   :  { %s5830_s26 = sld [smem:[#allocation43_spill]] }
 0x3da   :  { %v950_v51 = vpop.xlane.xlu0 %949  ;;  %v1088_v7 = vstv %s5826_s24  ;;  %s5872_s24 = sld [smem:[#allocation76_spill]] }
 0x3db   :  { %v965_v35 = vpop.xlane.xlu1 %964  ;;  %v951_v58 = vadd.f32 %v950_v51, %v940_v12  ;;  %v1413_v12 = vstv %s3931_s1  ;;  %v1170_v51 = vstv %s3937_s13  ;;  %s5828_s1 = sld [smem:[#allocation38_spill]] }
 0x3dc   :  { %v966_v42 = vadd.f32 %v965_v35, %v956_v53  ;;  %v1221_v53 = vstv %s3939_s12  ;;  %v1272_v35 = vstv %s3941_s6  ;;  %s5831_s13 = sld [smem:[#allocation48_spill]] }
 0x3dd   :  { %s5834_s6 = sld [smem:[#allocation46_spill]] }
 0x3de   :  { %v960_v52 = vpop.xlane.xlu0 %959  ;;  %v973_v59 = vmul.f32 0.00390625, %v966_v42  ;;  %v1323_v42 = vstv %s5811_s17  ;;  %s5836_s17 = sld [smem:[#allocation47_spill]] }
 0x3df   :  { %v961_v13 = vadd.f32 %v960_v52, %v951_v58 }
 0x3e0   :  { %v975_v4 = vmul.f32 %v973_v59, %v973_v59  ;;  %v981_v61 = vsub.f32 %v3829_v3, %v973_v59  ;;  %v994_v41 = vsub.f32 %v3831_v5, %v973_v59  ;;  %v1008_v44 = vsub.f32 %v3836_v6, %v973_v59 }
 0x3e1   :  { %v1022_v14 = vsub.f32 %v929_v17, %v973_v59  ;;  %v1146_v17 = vstv %s3903_s22  ;;  %s5812_s22 = sld [smem:[#allocation74_spill]]  ;;  %v1476_v59 = vstv %s5814_s2 }
 0x3e2   :  { %v970_v27 = vpop.xlane.xlu0 %969  ;;  %s4109_s2 = sld [smem:[#allocation9 + $0x44]] }
 0x3e3   :  { %v971_v21 = vadd.f32 %v970_v27, %v961_v13  ;;  %v1131_v13 = vstv %s5816_s11  ;;  %v1182_v27 = vstv %s5817_s18  ;;  %s5840_s11 = sld [smem:[#allocation50_spill]] }
 0x3e4   :  { %s4121_s18 = sld [smem:[#allocation9 + $0x4e]] }
 0x3e5   :  { %v974_v22 = vmul.f32 0.00390625, %v971_v21  ;;  %v1233_v21 = vstv %s5818_s8  ;;  %s4181_s8 = sld [smem:[#allocation9 + $0xb]] }
 0x3e7   :  { %v976_v60 = vsub.f32 %v974_v22, %v975_v4  ;;  %v1374_v52 = vstv %s5812_s22  ;;  %s4103_s22 = sld [smem:[#allocation9 + $0x42]] }
 0x3e8   :  { %5839 = sst [smem:[#allocation74_spill]] %s4109_s2 }
 0x3e9   :  { %v977_v15 = vadd.f32 1e-05, %v976_v60  ;;  %v1335_v60 = vstv %s5822_s25  ;;  %s5843_s25 = sld [smem:[#allocation54_spill]] }
 0x3ea   :  { %s5932_s2 = sld [smem:[#allocation26_spill]] }
 0x3eb   :  { %2682 = vrsqrt.f32 %v977_v15  ;;  %5849 = sst [smem:[#allocation34_spill]] %s4181_s8 }
 0x3ed   :  { %5837 = sst [smem:[#allocation71_spill]] %s4103_s22 }
 0x3ee   :  { %s5910_s22 = sld [smem:[#allocation63_spill]] }
 0x3f8   :  { %v2683_v48 = vpop.eup %2682 }
 0x3f9   :  { %v982_v24 = vmul.f32 %v2683_v48, %v981_v61  ;;  %v995_v39 = vmul.f32 %v2683_v48, %v994_v41  ;;  %v1009_v49 = vmul.f32 %v2683_v48, %v1008_v44  ;;  %v1023_v38 = vmul.f32 %v2683_v48, %v1022_v14 }
 0x3fa   :  { %v1150_v61 = vstv %s5831_s13  ;;  %v1201_v14 = vstv %s5834_s6  ;;  %s5930_s6 = sld [smem:[#allocation24_spill]] }
 0x3fb   :  { %v987_v9 = vmul.f32 %v986_v56, %v982_v24  ;;  %v1000_v3 = vmul.f32 %v999_v54, %v995_v39  ;;  %v1014_v2 = vmul.f32 %v1013_v30, %v1009_v49  ;;  %v1028_v5 = vmul.f32 %v1027_v37, %v1023_v38 }
 0x3fc   :  { %v1099_v54 = vstv %s5828_s1  ;;  %v1139_v30 = vstv %s5829_s14  ;;  %v1142_v37 = vstv %s5830_s26  ;;  %s4220_s26 = sld [smem:[#allocation9 + $0x23]] }
 0x3fd   :  { %v3871_v47 = vadd.f32 %v991_v11, %v987_v9  ;;  %v3873_v6 = vadd.f32 %v1004_v46, %v1000_v3  ;;  %v3875_v63 = vadd.f32 %v1018_v62, %v1014_v2  ;;  %v3877_v16 = vadd.f32 %v1032_v29, %v1028_v5  ;;  %s5880_s1 = sld [smem:[#allocation30_spill]] }
 0x3fe   :  { %v1241_v62 = vstv %s5836_s17  ;;  %v1252_v2 = vstv %s5840_s11  ;;  %s4157_s17 = sld [smem:[#allocation9 + $0x5c]] }
 0x3ff   :  { %993 = vst [vmem:[%s5754_s10] sm:$0x3] %v3871_v47  ;;  %2394 = vst [vmem:[%s5754_s10 + $0x2] sm:$0x3] %v3873_v6  ;;  %1053 = vrot.lane.b32.xlu0 %v3871_v47, %s2853_s20  ;;  %1051 = vrot.lane.b32.xlu1 %v3871_v47, %s2854_s30  ;;  %v4113_v48 = vmul.f32 %v1095_v45, %v3871_v47  ;;  %v4116_v11 = vmul.f32 %v1146_v17, %v3871_v47  ;;  %s4169_s11 = sld [smem:[#allocation9 + $0x9]] }
 0x400   :  { %2395 = vst [vmem:[%s5754_s10 + $0x4] sm:$0x3] %v3875_v63  ;;  %2396 = vst [vmem:[%s5754_s10 + $0x6] sm:$0x3] %v3877_v16  ;;  %s3947_s10 = sld [smem:[#allocation9 + $0x4f]]  ;;  %v4119_v46 = vmul.f32 %v1197_v26, %v3871_v47  ;;  %v4125_v29 = vmul.f32 %v1248_v10, %v3871_v47  ;;  %v4128_v24 = vmul.f32 %v1299_v19, %v3871_v47 }
 0x401   :  { %v4131_v39 = vmul.f32 %v1350_v1, %v3871_v47  ;;  %v4137_v38 = vmul.f32 %v1401_v50, %v3871_v47  ;;  %v4140_v9 = vmul.f32 %v1452_v23, %v3871_v47  ;;  %v4143_v3 = vmul.f32 %v1107_v40, %v3873_v6  ;;  %s5927_s14 = sld [smem:[#allocation23_spill]] }
 0x402   :  { %v4149_v5 = vmul.f32 %v1158_v55, %v3873_v6  ;;  %v4152_v45 = vmul.f32 %v1209_v57, %v3873_v6  ;;  %v4155_v17 = vmul.f32 %v1260_v0, %v3873_v6  ;;  %v4161_v26 = vmul.f32 %v1311_v43, %v3873_v6  ;;  %5860 = sst [smem:[#allocation80_spill]] %s4220_s26 }
 0x403   :  { %1071 = vrot.lane.b32.xlu0 %v3875_v63, %s2854_s30  ;;  %1063 = vrot.lane.b32.xlu1 %v3873_v6, %s2854_s30  ;;  %v4164_v10 = vmul.f32 %v1362_v20, %v3873_v6  ;;  %v4167_v19 = vmul.f32 %v1413_v12, %v3873_v6  ;;  %v1295_v1 = vstv %s5843_s25  ;;  %v4173_v50 = vmul.f32 %v1464_v25, %v3873_v6  ;;  %s4193_s25 = sld [smem:[#allocation9 + $0x15]] }
 0x404   :  { %5846 = sst [smem:[#allocation33_spill]] %s4157_s17  ;;  %v4176_v23 = vmul.f32 %v1119_v31, %v3875_v63  ;;  %v4179_v40 = vmul.f32 %v1170_v51, %v3875_v63  ;;  %v4185_v57 = vmul.f32 %v1221_v53, %v3875_v63  ;;  %v4188_v0 = vmul.f32 %v1272_v35, %v3875_v63 }
 0x405   :  { %5848 = sst [smem:[#allocation36_spill]] %s4169_s11  ;;  %v4197_v20 = vmul.f32 %v1374_v52, %v3875_v63  ;;  %v4203_v25 = vmul.f32 %v1476_v59, %v3875_v63  ;;  %v1346_v31 = vstv %s3999_s29  ;;  %v4209_v51 = vmul.f32 %v1131_v13, %v3877_v16 }
 0x406   :  { %5757 = sst [smem:[#allocation20_spill]] %s3947_s10  ;;  %v4212_v53 = vmul.f32 %v1182_v27, %v3877_v16  ;;  %v4217_v35 = vmul.f32 %v1233_v21, %v3877_v16 }
 0x407   :  { %1079 = vrot.lane.b32.xlu0 %v3877_v16, %s2854_s30  ;;  %1065 = vrot.lane.b32.xlu1 %v3873_v6, %s2853_s20  ;;  %s3959_s30 = sld [smem:[#allocation9 + $0x46]]  ;;  %v4191_v6 = vmul.f32 %v1323_v42, %v3875_v63 }
 0x408   :  { %s3969_s10 = sld [smem:[#allocation9]] }
 0x409   :  { %s5813_s16 = sld [smem:[#allocation20_spill]] }
 0x40a   :  { %s5861_s29 = sld [smem:[#allocation70_spill]] }
 0x40b   :  { %1073 = vrot.lane.b32.xlu1 %v3875_v63, %s2853_s20  ;;  %s4251_s11 = sld [smem:[#allocation9 + $0x39]] }
 0x40c   :  { %s5876_s17 = sld [smem:[#allocation78_spill]] }
 0x40d   :  { %5763 = sst [smem:[#allocation39_spill]] %s3959_s30 }
 0x40e   :  { %5768 = sst [smem:[#allocation45_spill]] %s3969_s10 }
 0x40f   :  { %1081 = vrot.lane.b32.xlu1 %v3877_v16, %s2853_s20  ;;  %s3957_s20 = sld [smem:[#allocation9 + $0x2e]]  ;;  %v1425_v58 = vstv %s5813_s16 }
 0x410   :  { %s3981_s30 = sld [smem:[#allocation9 + $0x18]]  ;;  %v4200_v12 = vmul.f32 %v1425_v58, %v3875_v63  ;;  %v4231_v58 = vmul.f32 %v1335_v60, %v3877_v16 }
 0x411   :  { %s3991_s10 = sld [smem:[#allocation10 + $0x4]] }
 0x412   :  { %s5821_s0 = sld [smem:[#allocation39_spill]] }
 0x413   :  { %s5827_s9 = sld [smem:[#allocation45_spill]] }
 0x414   :  { %s5838_s16 = sld [smem:[#allocation49_spill]] }
 0x415   :  { %5762 = sst [smem:[#allocation37_spill]] %s3957_s20 }
 0x416   :  { %s3979_s20 = sld [smem:[#allocation10 + $0x2]] }
 0x417   :  { %5774 = sst [smem:[#allocation51_spill]] %s3981_s30 }
 0x418   :  { %5779 = sst [smem:[#allocation52_spill]] %s3991_s10  ;;  %v1386_v22 = vstv %s5821_s0 }
 0x419   :  { %s4003_s30 = sld [smem:[#allocation10 + $0x6]]  ;;  %v1091_v56 = vstv %s5827_s9  ;;  %v4228_v52 = vmul.f32 %v1386_v22, %v3877_v16 }
 0x41a   :  { %s4013_s10 = sld [smem:[#allocation9 + $0x56]]  ;;  %v1244_v49 = vstv %s5838_s16 }
 0x41b   :  { %s5819_s19 = sld [smem:[#allocation37_spill]] }
 0x41c   :  { %5773 = sst [smem:[#allocation44_spill]] %s3979_s20 }
 0x41d   :  { %s4001_s20 = sld [smem:[#allocation9 + $0x3e]] }
 0x41e   :  { %s5832_s12 = sld [smem:[#allocation44_spill]] }
 0x41f   :  { %5785 = sst [smem:[#allocation61_spill]] %s4003_s30 }
 0x420   :  { %5790 = sst [smem:[#allocation67_spill]] %s4013_s10 }
 0x421   :  { %s4023_s30 = sld [smem:[#allocation9 + $0x1b]]  ;;  %v1284_v4 = vstv %s5819_s19 }
 0x422   :  { %s5833_s23 = sld [smem:[#allocation51_spill]]  ;;  %v4225_v42 = vmul.f32 %v1284_v4, %v3877_v16 }
 0x423   :  { %5784 = sst [smem:[#allocation57_spill]] %s4001_s20 }
 0x424   :  { %s4021_s20 = sld [smem:[#allocation9 + $0x11]]  ;;  %v1190_v41 = vstv %s5832_s12 }
 0x425   :  { %s4133_s0 = sld [smem:[#allocation9 + $0x50]] }
 0x426   :  { %5851 = sst [smem:[#allocation37_spill]] %s4193_s25 }
 0x427   :  { %5795 = sst [smem:[#allocation73_spill]] %s4023_s30 }
 0x428   :  { %s4039_s30 = sld [smem:[#allocation9 + $0x4b]]  ;;  %v1193_v44 = vstv %s5833_s23 }
 0x429   :  { %s4205_s16 = sld [smem:[#allocation9 + $0x17]] }
 0x42a   :  { %5794 = sst [smem:[#allocation72_spill]] %s4021_s20 }
 0x42b   :  { %s4037_s20 = sld [smem:[#allocation9 + $0x41]] }
 0x42c   :  { %5842 = sst [smem:[#allocation20_spill]] %s4133_s0 }
 0x42d   :  { %s4214_s23 = sld [smem:[#allocation9 + $0x21]] }
 0x42e   :  { %5803 = sst [smem:[#allocation28_spill]] %s4039_s30 }
 0x42f   :  { %5855 = sst [smem:[#allocation39_spill]] %s4205_s16 }
 0x430   :  { %s5862_s9 = sld [smem:[#allocation72_spill]] }
 0x431   :  { %5802 = sst [smem:[#allocation27_spill]] %s4037_s20 }
 0x432   :  { %s5863_s16 = sld [smem:[#allocation73_spill]] }
 0x433   :  { %5857 = sst [smem:[#allocation42_spill]] %s4214_s23 }
 0x434   :  { %s5865_s25 = sld [smem:[#allocation21_spill]] }
 0x435   :  { %s4237_s19 = sld [smem:[#allocation9 + $0x2d]] }
 0x436   :  { %5871 = sst [smem:[#allocation72_spill]] %s4245_s7 }
 0x437   :  { %5875 = sst [smem:[#allocation73_spill]] %s4251_s11 }
 0x438   :  { %s5878_s10 = sld [smem:[#allocation62_spill]] }
 0x439   :  { %s4257_s7 = sld [smem:[#allocation9 + $0x45]] }
 0x43a   :  { %s4263_s23 = sld [smem:[#allocation9 + $0x51]] }
 0x43b   :  { %5868 = sst [smem:[#allocation70_spill]] %s4237_s19 }
 0x43c   :  { %s4269_s26 = sld [smem:[#allocation9 + $0x5d]] }
 0x43d   :  { %s5904_s19 = sld [smem:[#allocation52_spill]] }
 0x43e   :  { %s5906_s11 = sld [smem:[#allocation53_spill]] }
 0x43f   :  { %s5907_s12 = sld [smem:[#allocation55_spill]] }
 0x440   :  { %s5908_s27 = sld [smem:[#allocation57_spill]] }
 0x441   :  { %s5909_s13 = sld [smem:[#allocation61_spill]] }
 0x442   :  { %s5918_s5 = sld [smem:[#allocation67_spill]] }
 0x443   :  { %s5921_s20 = sld [smem:[#allocation68_spill]] }
 0x444   :  { %s5923_s30 = sld [smem:[#allocation69_spill]] }
 0x445   :  { %s5936_s8 = sld [smem:[#allocation27_spill]] }
 0x446   :  { %s5938_s0 = sld [smem:[#allocation28_spill]] }
 0x471   :  { %v1054_v63 = vpop.permute.xlu0 %1053  ;;  %v1052_v43 = vpop.permute.xlu1 %1051 }
 0x472   :  { %v1055_v21 = vsel %vm3040_vm3, %v1052_v43, %v1054_v63  ;;  %v1056_v15 = vsel %vm3040_vm3, %v1054_v63, %v1052_v43 }
 0x473   :  { %v1059_v22 = vsel %vm1036_vm6, %v1055_v21, 0.0  ;;  %v1062_v60 = vsel %vm1037_vm7, %v1056_v15, 0.0 }
 0x474   :  { %v1092_v13 = vmul.f32 %v1091_v56, %v1059_v22  ;;  %v1143_v43 = vmul.f32 %v1142_v37, %v1059_v22  ;;  %v1100_v59 = vmul.f32 %v1099_v54, %v1062_v60  ;;  %v1151_v21 = vmul.f32 %v1150_v61, %v1062_v60 }
 0x475   :  { %v1194_v15 = vmul.f32 %v1193_v44, %v1059_v22  ;;  %v1245_v4 = vmul.f32 %v1244_v49, %v1059_v22  ;;  %v1064_v28 = vpop.permute.xlu1 %1063  ;;  %v1202_v37 = vmul.f32 %v1201_v14, %v1062_v60  ;;  %v1296_v47 = vmul.f32 %v1295_v1, %v1059_v22 }
 0x476   :  { %v1093_v56 = vadd.f32 %v1092_v13, %v1088_v7  ;;  %v1144_v55 = vadd.f32 %v1143_v43, %v1139_v30  ;;  %v1253_v44 = vmul.f32 %v1252_v2, %v1062_v60  ;;  %v1347_v49 = vmul.f32 %v1346_v31, %v1059_v22 }
 0x477   :  { %v1195_v54 = vadd.f32 %v1194_v15, %v1190_v41  ;;  %v1246_v61 = vadd.f32 %v1245_v4, %v1241_v62  ;;  %v5912_v30 = vstv %s5904_s19  ;;  %v5913_v13 = vstv %s5905_s28  ;;  %s5925_s28 = sld [smem:[#allocation75_spill]] }
 0x478   :  { %v1097_v63 = vadd.f32 %v4113_v48, %v1093_v56  ;;  %v1148_v7 = vadd.f32 %v4116_v11, %v1144_v55  ;;  %v1297_v14 = vadd.f32 %v1296_v47, %v5912_v30  ;;  %v1398_v43 = vmul.f32 %v5913_v13, %v1059_v22  ;;  %s5952_s19 = sld [smem:[#allocation58_spill]] }
 0x479   :  { %v1199_v1 = vadd.f32 %v4119_v46, %v1195_v54  ;;  %v1250_v41 = vadd.f32 %v4125_v29, %v1246_v61  ;;  %v5914_v15 = vstv %s5906_s11  ;;  %v5915_v62 = vstv %s5907_s12  ;;  %v1066_v4 = vpop.permute.xlu1 %1065  ;;  %s5934_s11 = sld [smem:[#allocation25_spill]] }
 0x47a   :  { %v1304_v27 = vmul.f32 %v5914_v15, %v1062_v60  ;;  %v1348_v2 = vadd.f32 %v1347_v49, %v5915_v62  ;;  %v1301_v31 = vadd.f32 %v4128_v24, %v1297_v14  ;;  %v5917_v48 = vstv %s5908_s27  ;;  %s5953_s12 = sld [smem:[#allocation60_spill]] }
 0x47b   :  { %v1355_v56 = vmul.f32 %v5917_v48, %v1062_v60  ;;  %v5919_v11 = vstv %s5909_s13  ;;  %v5920_v47 = vstv %s5910_s22  ;;  %v1101_v46 = vadd.f32 %v1100_v59, %v1097_v63  ;;  %s5959_s27 = sld [smem:[#allocation71_spill]] }
 0x47c   :  { %v1399_v55 = vadd.f32 %v1398_v43, %v5919_v11  ;;  %v1406_v30 = vmul.f32 %v5920_v47, %v1062_v60  ;;  %v1152_v54 = vadd.f32 %v1151_v21, %v1148_v7  ;;  %v1352_v29 = vadd.f32 %v4131_v39, %v1348_v2  ;;  %s5960_s13 = sld [smem:[#allocation31_spill]] }
 0x47d   :  { %v5922_v61 = vstv %s5911_s3  ;;  %v1203_v49 = vadd.f32 %v1202_v37, %v1199_v1  ;;  %v1254_v15 = vadd.f32 %v1253_v44, %v1250_v41  ;;  %v1067_v14 = vsel %vm3040_vm3, %v1064_v28, %v1066_v4  ;;  %s5978_s22 = sld [smem:[#allocation34_spill]] }
 0x47e   :  { %v1449_v13 = vmul.f32 %v5922_v61, %v1059_v22  ;;  %v1403_v24 = vadd.f32 %v4137_v38, %v1399_v55  ;;  %v1305_v43 = vadd.f32 %v1304_v27, %v1301_v31  ;;  %v5924_v62 = vstv %s5916_s4  ;;  %s5979_s3 = sld [smem:[#allocation42_spill]] }
 0x47f   :  { %v1068_v59 = vsel %vm3040_vm3, %v1066_v4, %v1064_v28  ;;  %v1069_v39 = vsel %vm1036_vm6, %v1067_v14, 0.0  ;;  %v5926_v22 = vstv %s5918_s5  ;;  %v5928_v21 = vstv %s5921_s20  ;;  %s5981_s4 = sld [smem:[#allocation39_spill]] }
 0x480   :  { %v1450_v48 = vadd.f32 %v1449_v13, %v5924_v62  ;;  %v1457_v63 = vmul.f32 %v5926_v22, %v1062_v60  ;;  %v1070_v38 = vsel %vm1037_vm7, %v1068_v59, 0.0  ;;  %v1104_v37 = vmul.f32 %v5928_v21, %v1069_v39  ;;  %s5982_s5 = sld [smem:[#allocation80_spill]] }
 0x481   :  { %v5929_v44 = vstv %s5861_s29  ;;  %v1356_v7 = vadd.f32 %v1355_v56, %v1352_v29  ;;  %v1407_v1 = vadd.f32 %v1406_v30, %v1403_v24  ;;  %v5931_v28 = vstv %s5863_s16  ;;  %s5942_s29 = sld [smem:[#allocation29_spill]] }
 0x482   :  { %v1155_v27 = vmul.f32 %v5929_v44, %v1069_v39  ;;  %v1454_v41 = vadd.f32 %v4140_v9, %v1450_v48  ;;  %v1206_v2 = vmul.f32 %v5931_v28, %v1069_v39  ;;  %v1105_v4 = vadd.f32 %v1104_v37, %v1101_v46  ;;  %s5943_s16 = sld [smem:[#allocation77_spill]] }
 0x483   :  { %v5933_v31 = vstv %s5923_s30  ;;  %v5935_v55 = vstv %s5865_s25  ;;  %v5937_v61 = vstv %s5862_s9  ;;  %v5939_v56 = vstv %s5925_s28  ;;  %s5948_s9 = sld [smem:[#allocation79_spill]] }
 0x484   :  { %v1112_v11 = vmul.f32 %v5933_v31, %v1070_v38  ;;  %v1156_v60 = vadd.f32 %v1155_v27, %v1152_v54  ;;  %v1257_v47 = vmul.f32 %v5935_v55, %v1069_v39  ;;  %v1163_v13 = vmul.f32 %v5937_v61, %v1070_v38  ;;  %s5951_s25 = sld [smem:[#allocation59_spill]] }
 0x485   :  { %v1207_v14 = vadd.f32 %v1206_v2, %v1203_v49  ;;  %v1214_v30 = vmul.f32 %v5939_v56, %v1070_v38  ;;  %v5940_v29 = vstv %s5927_s14  ;;  %v1458_v9 = vadd.f32 %v1457_v63, %v1454_v41  ;;  %s5983_s20 = sld [smem:[#allocation73_spill]] }
 0x486   :  { %v1308_v24 = vmul.f32 %v5940_v29, %v1069_v39  ;;  %v1109_v62 = vadd.f32 %v4143_v3, %v1105_v4  ;;  %v1160_v46 = vadd.f32 %v4149_v5, %v1156_v60  ;;  %v1258_v48 = vadd.f32 %v1257_v47, %v1254_v15  ;;  %v1074_v4 = vpop.permute.xlu1 %1073  ;;  %v1072_v60 = vpop.permute.xlu0 %1071  ;;  %s5988_s30 = sld [smem:[#allocation72_spill]] }
 0x487   :  { %v1211_v59 = vadd.f32 %v4152_v45, %v1207_v14  ;;  %v5941_v54 = vstv %s5930_s6  ;;  %v5944_v37 = vstv %s5932_s2  ;;  %v5945_v27 = vstv %s5934_s11  ;;  %s5994_s28 = sld [smem:[#allocation32_spill]] }
 0x488   :  { %v1265_v22 = vmul.f32 %v5941_v54, %v1070_v38  ;;  %v1309_v21 = vadd.f32 %v1308_v24, %v1305_v43  ;;  %v1359_v44 = vmul.f32 %v5944_v37, %v1069_v39  ;;  %v1262_v49 = vadd.f32 %v4155_v17, %v1258_v48  ;;  %s5997_s14 = sld [smem:[#allocation35_spill]] }
 0x489   :  { %v1316_v28 = vmul.f32 %v5945_v27, %v1070_v38  ;;  %v5946_v2 = vstv %s5936_s8  ;;  %v5947_v41 = vstv %s5938_s0  ;;  %v1113_v5 = vadd.f32 %v1112_v11, %v1109_v62  ;;  %s4494_s6 = sld [smem:[#allocation9 + $0x47]] }
 0x48a   :  { %v1367_v63 = vmul.f32 %v5946_v2, %v1070_v38  ;;  %v1410_v3 = vmul.f32 %v5947_v41, %v1069_v39  ;;  %v1164_v15 = vadd.f32 %v1163_v13, %v1160_v46  ;;  %v1313_v45 = vadd.f32 %v4161_v26, %v1309_v21  ;;  %s2459_s2 = sld [smem:[#allocation9 + $0x3b]] }
 0x48b   :  { %v1360_v31 = vadd.f32 %v1359_v44, %v1356_v7  ;;  %v1215_v43 = vadd.f32 %v1214_v30, %v1211_v59  ;;  %v5949_v47 = vstv %s5942_s29  ;;  %v5950_v61 = vstv %s5943_s16  ;;  %s2485_s11 = sld [smem:[#allocation9 + $0x53]] }
 0x48c   :  { %v1411_v55 = vadd.f32 %v1410_v3, %v1407_v1  ;;  %v1418_v17 = vmul.f32 %v5949_v47, %v1070_v38  ;;  %v1461_v14 = vmul.f32 %v5950_v61, %v1069_v39  ;;  %v1266_v56 = vadd.f32 %v1265_v22, %v1262_v49  ;;  %s6004_s8 = sld [smem:[#allocation88_spill]] }
 0x48d   :  { %v1364_v29 = vadd.f32 %v4164_v10, %v1360_v31  ;;  %v1075_v11 = vsel %vm3040_vm3, %v1072_v60, %v1074_v4  ;;  %v1076_v26 = vsel %vm3040_vm3, %v1074_v4, %v1072_v60  ;;  %v1317_v10 = vadd.f32 %v1316_v28, %v1313_v45  ;;  %s6005_s16 = sld [smem:[#allocation89_spill]] }
 0x48e   :  { %v1415_v7 = vadd.f32 %v4167_v19, %v1411_v55  ;;  %v1462_v1 = vadd.f32 %v1461_v14, %v1458_v9  ;;  %v1077_v13 = vsel %vm1036_vm6, %v1075_v11, 0.0  ;;  %v1078_v39 = vsel %vm1037_vm7, %v1076_v26, 0.0  ;;  %s4627_s0 = sld [smem:[#allocation12 + $0x13]] }
 0x48f   :  { %v5954_v30 = vstv %s5872_s24  ;;  %v5955_v62 = vstv %s5948_s9  ;;  %v5956_v48 = vstv %s5876_s17  ;;  %v1368_v54 = vadd.f32 %v1367_v63, %v1364_v29  ;;  %s5962_s24 = sld [smem:[#allocation74_spill]] }
 0x490   :  { %v1469_v24 = vmul.f32 %v5954_v30, %v1070_v38  ;;  %v1116_v46 = vmul.f32 %v5955_v62, %v1077_v13  ;;  %v1167_v59 = vmul.f32 %v5956_v48, %v1077_v13  ;;  %v1466_v19 = vadd.f32 %v4173_v50, %v1462_v1  ;;  %s5975_s17 = sld [smem:[#allocation37_spill]] }
 0x491   :  { %v5957_v22 = vstv %s5951_s25  ;;  %v5958_v21 = vstv %s5878_s10  ;;  %v1419_v44 = vadd.f32 %v1418_v17, %v1415_v7  ;;  %v5961_v28 = vstv %s5880_s1  ;;  %s5967_s10 = sld [smem:[#allocation20_spill]] }
 0x492   :  { %v1124_v9 = vmul.f32 %v5957_v22, %v1078_v39  ;;  %v1218_v37 = vmul.f32 %v5958_v21, %v1077_v13  ;;  %v1117_v49 = vadd.f32 %v1116_v46, %v1113_v5  ;;  %v1168_v27 = vadd.f32 %v1167_v59, %v1164_v15  ;;  %s5968_s1 = sld [smem:[#allocation22_spill]]  ;;  %v1080_v46 = vpop.permute.xlu0 %1079 }
 0x493   :  { %v1269_v38 = vmul.f32 %v5961_v28, %v1077_v13  ;;  %v5963_v2 = vstv %s5952_s19  ;;  %v5964_v63 = vstv %s5953_s12  ;;  %v5965_v50 = vstv %s4087_s15  ;;  %s5974_s15 = sld [smem:[#allocation36_spill]] }
 0x494   :  { %v1175_v41 = vmul.f32 %v5963_v2, %v1078_v39  ;;  %v1219_v3 = vadd.f32 %v1218_v37, %v1215_v43  ;;  %v1226_v4 = vmul.f32 %v5964_v63, %v1078_v39  ;;  %v1320_v45 = vmul.f32 %v5965_v50, %v1077_v13  ;;  %s6006_s19 = sld [smem:[#allocation93_spill]] }
 0x495   :  { %v1470_v31 = vadd.f32 %v1469_v24, %v1466_v19  ;;  %v1121_v60 = vadd.f32 %v4176_v23, %v1117_v49  ;;  %v1172_v55 = vadd.f32 %v4179_v40, %v1168_v27  ;;  %v1270_v47 = vadd.f32 %v1269_v38, %v1266_v56  ;;  %v1082_v24 = vpop.permute.xlu1 %1081  ;;  %s4629_s29 = sld [smem:[#allocation12 + $0x1f]] }
 0x496   :  { %v1223_v5 = vadd.f32 %v4185_v57, %v1219_v3  ;;  %v5966_v15 = vstv %s4081_s21  ;;  %v1321_v61 = vadd.f32 %v1320_v45, %v1317_v10  ;;  %v5969_v14 = vstv %s5959_s27  ;;  %s5973_s21 = sld [smem:[#allocation33_spill]] }
 0x497   :  { %v1277_v17 = vmul.f32 %v5966_v15, %v1078_v39  ;;  %v1371_v29 = vmul.f32 %v5969_v14, %v1077_v13  ;;  %v1274_v43 = vadd.f32 %v4188_v0, %v1270_v47  ;;  %v5970_v11 = vstv %s5960_s13  ;;  %s4633_s9 = sld [smem:[#allocation12 + $0x37]] }
 0x498   :  { %v1328_v26 = vmul.f32 %v5970_v11, %v1078_v39  ;;  %v5971_v7 = vstv %s5962_s24  ;;  %v5972_v30 = vstv %s4121_s18  ;;  %v1125_v40 = vadd.f32 %v1124_v9, %v1121_v60  ;;  %s5980_s18 = sld [smem:[#allocation70_spill]] }
 0x499   :  { %v1379_v1 = vmul.f32 %v5971_v7, %v1078_v39  ;;  %v1422_v23 = vmul.f32 %v5972_v30, %v1077_v13  ;;  %v1176_v56 = vadd.f32 %v1175_v41, %v1172_v55  ;;  %v1325_v57 = vadd.f32 %v4191_v6, %v1321_v61  ;;  %s4635_s25 = sld [smem:[#allocation12 + $0x43]] }
 0x49a   :  { %v1372_v62 = vadd.f32 %v1371_v29, %v1368_v54  ;;  %v1227_v10 = vadd.f32 %v1226_v4, %v1223_v5  ;;  %v5976_v59 = vstv %s5967_s10  ;;  %v5977_v19 = vstv %s5968_s1  ;;  %s2855_s10 = smov 124   ;;  %s2856_s1 = smov 4  }
 0x49b   :  { %v1423_v48 = vadd.f32 %v1422_v23, %v1419_v44  ;;  %v1430_v0 = vmul.f32 %v5976_v59, %v1078_v39  ;;  %v1473_v22 = vmul.f32 %v5977_v19, %v1077_v13  ;;  %v1278_v21 = vadd.f32 %v1277_v17, %v1274_v43  ;;  %s4639_s12 = sld [smem:[#allocation12 + $0x5b]] }
 0x49c   :  { %v1376_v37 = vadd.f32 %v4197_v20, %v1372_v62  ;;  %v1083_v9 = vsel %vm3040_vm3, %v1080_v46, %v1082_v24  ;;  %v1084_v6 = vsel %vm3040_vm3, %v1082_v24, %v1080_v46  ;;  %v1329_v20 = vadd.f32 %v1328_v26, %v1325_v57  ;;  %s4641_s27 = sld [smem:[#allocation12 + $0xa]] }
 0x49d   :  { %v1427_v54 = vadd.f32 %v4200_v12, %v1423_v48  ;;  %v1474_v44 = vadd.f32 %v1473_v22, %v1470_v31  ;;  %v1085_v49 = vsel %vm1036_vm6, %v1083_v9, 0.0  ;;  %v4462_v13 = vsel %vm1037_vm7, %v1084_v6, 0.0  ;;  %6007 = sst [smem:[#allocation21_spill]] %s4633_s9 }
 0x49e   :  { %v5984_v27 = vstv %s5973_s21  ;;  %v5985_v38 = vstv %s5974_s15  ;;  %v5986_v41 = vstv %s5975_s17  ;;  %v1380_v63 = vadd.f32 %v1379_v1, %v1376_v37  ;;  %s4591_s17 = sld [smem:[#allocation12 + $0x1]] }
 0x49f   :  { %v1481_v28 = vmul.f32 %v5984_v27, %v1078_v39  ;;  %v1128_v2 = vmul.f32 %v5985_v38, %v1085_v49  ;;  %v1179_v3 = vmul.f32 %v5986_v41, %v1085_v49  ;;  %v1478_v12 = vadd.f32 %v4203_v25, %v1474_v44  ;;  %6008 = sst [smem:[#allocation76_spill]] %s4635_s25 }
 0x4a0   :  { %v5987_v4 = vstv %s5978_s22  ;;  %v5989_v45 = vstv %s5979_s3  ;;  %v1431_v60 = vadd.f32 %v1430_v0, %v1427_v54  ;;  %v5990_v5 = vstv %s5980_s18  ;;  %s4593_s22 = sld [smem:[#allocation12 + $0xd]] }
 0x4a1   :  { %v1136_v50 = vmul.f32 %v5987_v4, %v4462_v13  ;;  %v1230_v31 = vmul.f32 %v5989_v45, %v1085_v49  ;;  %v1129_v55 = vadd.f32 %v1128_v2, %v1125_v40  ;;  %v1180_v47 = vadd.f32 %v1179_v3, %v1176_v56  ;;  %s4596_s3 = sld [smem:[#allocation12 + $0x19]] }
 0x4a2   :  { %v1281_v15 = vmul.f32 %v5990_v5, %v1085_v49  ;;  %v5991_v39 = vstv %s5981_s4  ;;  %v5992_v14 = vstv %s5982_s5  ;;  %v5993_v29 = vstv %s5983_s20  ;;  %s4598_s18 = sld [smem:[#allocation12 + $0x25]] }
 0x4a3   :  { %v1187_v17 = vmul.f32 %v5991_v39, %v4462_v13  ;;  %v1231_v61 = vadd.f32 %v1230_v31, %v1227_v10  ;;  %v1238_v25 = vmul.f32 %v5992_v14, %v4462_v13  ;;  %v1332_v43 = vmul.f32 %v5993_v29, %v1085_v49  ;;  %s4600_s4 = sld [smem:[#allocation12 + $0x31]] }
 0x4a4   :  { %v1482_v11 = vadd.f32 %v1481_v28, %v1478_v12  ;;  %v1133_v26 = vadd.f32 %v4209_v51, %v1129_v55  ;;  %v1184_v7 = vadd.f32 %v4212_v53, %v1180_v47  ;;  %v1282_v1 = vadd.f32 %v1281_v15, %v1278_v21  ;;  %s4602_s5 = sld [smem:[#allocation12 + $0x3d]] }
 0x4a5   :  { %v1235_v30 = vadd.f32 %v4217_v35, %v1231_v61  ;;  %v5995_v23 = vstv %s5988_s30  ;;  %v1333_v40 = vadd.f32 %v1332_v43, %v1329_v20  ;;  %v5996_v56 = vstv %s4257_s7  ;;  %s2498_s7 = sld [smem:[#allocation9 + $0x5f]] }
 0x4a6   :  { %v1289_v24 = vmul.f32 %v5995_v23, %v4462_v13  ;;  %v1383_v57 = vmul.f32 %v5996_v56, %v1085_v49  ;;  %v1137_v62 = vadd.f32 %v1136_v50, %v1133_v26  ;;  %v1188_v46 = vadd.f32 %v1187_v17, %v1184_v7  ;;  %s4605_s20 = sld [smem:[#allocation12 + $0x49]] }
 0x4a7   :  { %v1286_v10 = vadd.f32 %v4225_v42, %v1282_v1  ;;  %v5998_v51 = vstv %s4263_s23  ;;  %v1239_v53 = vadd.f32 %v1238_v25, %v1235_v30  ;;  %v5999_v0 = vstv %s4269_s26  ;;  %s4607_s30 = sld [smem:[#allocation12 + $0x55]] }
 0x4a8   :  { %v1434_v48 = vmul.f32 %v5998_v51, %v1085_v49  ;;  %v1384_v59 = vadd.f32 %v1383_v57, %v1380_v63  ;;  %v1485_v35 = vmul.f32 %v5999_v0, %v1085_v49  ;;  %v6000_v19 = vstv %s5994_s28  ;;  %s4609_s28 = sld [smem:[#allocation12 + $0x4]] }
 0x4a9   :  { %v1438_v22 = vmul.f32 %v6000_v19, %v3877_v16  ;;  %v1290_v21 = vadd.f32 %v1289_v24, %v1286_v10  ;;  %v2499_v9 = vmul.f32 -1.442695, %v1137_v62  ;;  %v6001_v6 = vstv %s5997_s14  ;;  %s4611_s14 = sld [smem:[#allocation12 + $0x10]] }
 0x4aa   :  { %v1435_v37 = vadd.f32 %v1434_v48, %v1431_v60  ;;  %v1489_v54 = vmul.f32 %v6001_v6, %v3877_v16  ;;  %v1486_v44 = vadd.f32 %v1485_v35, %v1482_v11  ;;  %v2500_v42 = vmul.f32 -1.442695, %v1188_v46  ;;  %s4621_s23 = sld [smem:[#allocation12 + $0x4c]] }
 0x4ab   :  { %v2501_v20 = vmul.f32 -1.442695, %v1239_v53  ;;  %v1388_v27 = vadd.f32 %v4228_v52, %v1384_v59  ;;  %v1337_v28 = vadd.f32 %v4231_v58, %v1333_v40  ;;  %2684 = vpow2.f32 %v2499_v9  ;;  %s4623_s26 = sld [smem:[#allocation12 + $0x58]] }
 0x4ac   :  { %v1439_v49 = vadd.f32 %v1438_v22, %v1435_v37  ;;  %2686 = vpow2.f32 %v2500_v42  ;;  %v1490_v38 = vadd.f32 %v1489_v54, %v1486_v44  ;;  %v2502_v2 = vmul.f32 -1.442695, %v1290_v21  ;;  %6010 = sst [smem:[#allocation62_spill]] %s4639_s12 }
 0x4ad   :  { %2688 = vpow2.f32 %v2501_v20  ;;  %v1390_v41 = vstv %s4494_s6  ;;  %v1339_v3 = vstv %s2459_s2  ;;  %v1441_v63 = vstv %s2485_s11  ;;  %s4613_s6 = sld [smem:[#allocation12 + $0x1c]] }
 0x4ae   :  { %2690 = vpow2.f32 %v2502_v2  ;;  %v1391_v16 = vmul.f32 %v1390_v41, %v4462_v13  ;;  %v1340_v12 = vmul.f32 %v1339_v3, %v4462_v13  ;;  %v1442_v4 = vmul.f32 %v1441_v63, %v4462_v13  ;;  %s4615_s2 = sld [smem:[#allocation12 + $0x28]] }
 0x4af   :  { %v1492_v45 = vstv %s2498_s7  ;;  %v1042_v25 = vand.u32 3, %v3018_v8  ;;  %s4617_s11 = sld [smem:[#allocation12 + $0x34]] }
 0x4b0   :  { %v1392_v52 = vadd.f32 %v1391_v16, %v1388_v27  ;;  %v1341_v50 = vadd.f32 %v1340_v12, %v1337_v28  ;;  %v1443_v58 = vadd.f32 %v1442_v4, %v1439_v49  ;;  %v1493_v5 = vmul.f32 %v1492_v45, %v4462_v13  ;;  %s4619_s7 = sld [smem:[#allocation12 + $0x40]] }
 0x4b1   :  { %vm4515_vm8 = vcmp.eq.s32.totalorder %v1042_v25, 0  ;;  %6011 = sst [smem:[#allocation30_spill]] %s4641_s27 }
 0x4b2   :  { %2692 = vtanh.f32 %v1392_v52  ;;  %v1494_v17 = vadd.f32 %v1493_v5, %v1490_v38  ;;  %s4643_s13 = sld [smem:[#allocation12 + $0x16]] }
 0x4b3   :  { %2694 = vtanh.f32 %v1341_v50  ;;  %s4645_s24 = sld [smem:[#allocation12 + $0x22]] }
 0x4b4   :  { %2696 = vtanh.f32 %v1443_v58  ;;  %s4651_s21 = sld [smem:[#allocation12 + $0x3a]] }
 0x4b5   :  { %s4653_s15 = sld [smem:[#allocation12 + $0x52]] }
 0x4b6   :  { %s4655_s9 = sld [smem:[#allocation12 + $0x5e]] }
 0x4b7   :  { %s4657_s25 = sld [smem:[#allocation13]] }
 0x4b8   :  { %v2685_v31 = vpop.eup %2684  ;;  %6012 = sst [smem:[#allocation45_spill]] %s4643_s13 }
 0x4b9   :  { %v2687_v60 = vpop.eup %2686  ;;  %v1498_v55 = vadd.f32 1.0, %v2685_v31  ;;  %6013 = sst [smem:[#allocation43_spill]] %s4645_s24 }
 0x4ba   :  { %v2689_v47 = vpop.eup %2688  ;;  %v1506_v15 = vadd.f32 1.0, %v2687_v60  ;;  %v1576_v60 = vld [vmem:[%s6004_s8] sm:$0xf]  ;;  %s4625_s8 = sld [smem:[#allocation12 + $0x7]] }
 0x4bb   :  { %2698 = vrcp.f32 %v1498_v55  ;;  %v1514_v39 = vadd.f32 1.0, %v2689_v47  ;;  %v2691_v61 = vpop.eup %2690  ;;  %v1577_v55 = vld [vmem:[%s6005_s16] sm:$0xf]  ;;  %v1583_v47 = vrot.slane %v1576_v60, %v3150_v32  ;;  %v1596_v5 = vrot.slane %v1576_v60, %v3152_v33  ;;  %s4631_s16 = sld [smem:[#allocation12 + $0x2b]] }
 0x4bc   :  { %2700 = vrcp.f32 %v1506_v15  ;;  %v1522_v14 = vadd.f32 1.0, %v2691_v61  ;;  %v1610_v15 = vrot.slane %v1576_v60, %v3154_v34  ;;  %v1629_v7 = vrot.slane %v1577_v55, %v3156_v36  ;;  %6016 = sst [smem:[#allocation51_spill]] %s4651_s21 }
 0x4bd   :  { %2702 = vrcp.f32 %v1514_v39  ;;  %v1624_v39 = vrot.slane %v1576_v60, %v3156_v36  ;;  %6017 = sst [smem:[#allocation49_spill]] %s4653_s15 }
 0x4be   :  { %2704 = vtanh.f32 %v1494_v17  ;;  %6018 = sst [smem:[#allocation40_spill]] %s4655_s9 }
 0x4bf   :  { %2706 = vrcp.f32 %v1522_v14  ;;  %v2693_v29 = vpop.eup %2692  ;;  %6019 = sst [smem:[#allocation41_spill]] %s4657_s25 }
 0x4c0   :  { %v2695_v43 = vpop.eup %2694  ;;  %s4661_s12 = sld [smem:[#allocation12 + $0x2]] }
 0x4c1   :  { %v2697_v11 = vpop.eup %2696  ;;  %s4663_s27 = sld [smem:[#allocation13 + $0x1]] }
 0x4c2   :  { %s4665_s13 = sld [smem:[#allocation12 + $0xc]] }
 0x4c3   :  { %s4667_s24 = sld [smem:[#allocation12 + $0xe]] }
 0x4c4   :  { %s4673_s21 = sld [smem:[#allocation12 + $0x1a]] }
 0x4c5   :  { %s4675_s15 = sld [smem:[#allocation13 + $0x3]] }
 0x4c6   :  { %6021 = sst [smem:[#allocation54_spill]] %s4661_s12 }
 0x4c7   :  { %6022 = sst [smem:[#allocation44_spill]] %s4663_s27 }
 0x4c8   :  { %v2699_v26 = vpop.eup %2698  ;;  %6023 = sst [smem:[#allocation47_spill]] %s4665_s13 }
 0x4c9   :  { %v2701_v13 = vpop.eup %2700  ;;  %v4519_v1 = vmul.f32 %v2699_v26, %v2695_v43  ;;  %v1588_v43 = vrot.slane %v1577_v55, %v3150_v32  ;;  %v1615_v26 = vrot.slane %v1577_v55, %v3154_v34  ;;  %6024 = sst [smem:[#allocation50_spill]] %s4667_s24 }
 0x4ca   :  { %v2703_v30 = vpop.eup %2702  ;;  %v4521_v23 = vmul.f32 %v2701_v13, %v2693_v29  ;;  %6027 = sst [smem:[#allocation64_spill]] %s4673_s21 }
 0x4cb   :  { %v1529_v24 = vsel %vm4515_vm8, %v4519_v1, 0.0  ;;  %v4526_v40 = vmul.f32 %v2703_v30, %v2697_v11  ;;  %v2705_v46 = vpop.eup %2704  ;;  %v1601_v11 = vrot.slane %v1577_v55, %v3152_v33  ;;  %6028 = sst [smem:[#allocation53_spill]] %s4675_s15 }
 0x4cc   :  { %v1539_v56 = vsel %vm4515_vm8, %v4521_v23, 0.0  ;;  %v1530_v57 = vsel %vm344_vm4, %v1529_v24, 0.0  ;;  %v1534_v62 = vmul.f32 %v1529_v24, %v1529_v24  ;;  %v2707_v51 = vpop.eup %2706  ;;  %s4677_s9 = sld [smem:[#allocation12 + $0x24]] }
 0x4cd   :  { %v1540_v10 = vsel %vm344_vm4, %v1539_v56, 0.0  ;;  %1531 = vadd.xlane.f32.xlu0 %v1530_v57  ;;  %v1549_v48 = vsel %vm4515_vm8, %v4526_v40, 0.0  ;;  %v1526_v53 = vmul.f32 %v2707_v51, %v2705_v46  ;;  %v1544_v0 = vmul.f32 %v1539_v56, %v1539_v56  ;;  %s4679_s25 = sld [smem:[#allocation12 + $0x26]] }
 0x4ce   :  { %1541 = vadd.xlane.f32.xlu1 %v1540_v10  ;;  %v1535_v59 = vsel %vm344_vm4, %v1534_v62, 0.0  ;;  %v1550_v35 = vsel %vm344_vm4, %v1549_v48, 0.0  ;;  %v1554_v21 = vmul.f32 %v1549_v48, %v1549_v48  ;;  %s4683_s12 = sld [smem:[#allocation12 + $0x30]]  ;;  %v1692_v48 = vstv %s4591_s17 }
 0x4cf   :  { %v1559_v19 = vsel %vm4515_vm8, %v1526_v53, 0.0  ;;  %v1545_v22 = vsel %vm344_vm4, %v1544_v0, 0.0  ;;  %s4685_s27 = sld [smem:[#allocation12 + $0x32]]  ;;  %v1845_v0 = vstv %s4598_s18 }
 0x4d0   :  { %v1560_v37 = vsel %vm344_vm4, %v1559_v19, 0.0  ;;  %v1555_v9 = vsel %vm344_vm4, %v1554_v21, 0.0  ;;  %v1564_v6 = vmul.f32 %v1559_v19, %v1559_v19  ;;  %s4687_s13 = sld [smem:[#allocation13 + $0x5]]  ;;  %v1947_v19 = vstv %s4602_s5 }
 0x4d1   :  { %1536 = vadd.xlane.f32.xlu0 %v1535_v59  ;;  %s4689_s24 = sld [smem:[#allocation12 + $0x3c]]  ;;  %v1794_v59 = vstv %s4596_s3  ;;  %v2049_v21 = vstv %s4607_s30 }
 0x4d2   :  { %1551 = vadd.xlane.f32.xlu1 %v1550_v35  ;;  %v1565_v54 = vsel %vm344_vm4, %v1564_v6, 0.0  ;;  %6029 = sst [smem:[#allocation55_spill]] %s4677_s9  ;;  %v1896_v35 = vstv %s4600_s4  ;;  %v1806_v6 = vstv %s4613_s6 }
 0x4d3   :  { %6030 = sst [smem:[#allocation57_spill]] %s4679_s25 }
 0x4d4   :  { %6032 = sst [smem:[#allocation63_spill]] %s4683_s12 }
 0x4d5   :  { %1546 = vadd.xlane.f32.xlu0 %v1545_v22  ;;  %6033 = sst [smem:[#allocation65_spill]] %s4685_s27  ;;  %v1998_v22 = vstv %s4605_s20 }
 0x4d6   :  { %1561 = vadd.xlane.f32.xlu1 %v1560_v37  ;;  %6034 = sst [smem:[#allocation66_spill]] %s4687_s13  ;;  %v1704_v37 = vstv %s4609_s28 }
 0x4d7   :  { %6035 = sst [smem:[#allocation67_spill]] %s4689_s24 }
 0x4d8   :  { %s4695_s21 = sld [smem:[#allocation12 + $0x48]] }
 0x4d9   :  { %1556 = vadd.xlane.f32.xlu0 %v1555_v9  ;;  %s4697_s15 = sld [smem:[#allocation12 + $0x4a]]  ;;  %v1755_v9 = vstv %s4611_s14 }
 0x4da   :  { %s4699_s9 = sld [smem:[#allocation13 + $0x7]] }
 0x4db   :  { %s4701_s25 = sld [smem:[#allocation12 + $0x54]] }
 0x4dc   :  { %s4705_s12 = sld [smem:[#allocation12 + $0x3]] }
 0x4dd   :  { %1566 = vadd.xlane.f32.xlu0 %v1565_v54  ;;  %s4707_s27 = sld [smem:[#allocation12 + $0x5]]  ;;  %v1857_v54 = vstv %s4615_s2 }
 0x4de   :  { %6038 = sst [smem:[#allocation75_spill]] %s4695_s21 }
 0x4df   :  { %6039 = sst [smem:[#allocation23_spill]] %s4697_s15 }
 0x4e0   :  { %6040 = sst [smem:[#allocation24_spill]] %s4699_s9 }
 0x4e1   :  { %6041 = sst [smem:[#allocation26_spill]] %s4701_s25 }
 0x4e2   :  { %6043 = sst [smem:[#allocation27_spill]] %s4705_s12 }
 0x4e3   :  { %6044 = sst [smem:[#allocation28_spill]] %s4707_s27 }
 0x4e4   :  { %s4709_s13 = sld [smem:[#allocation12 + $0xf]] }
 0x4e5   :  { %s4715_s15 = sld [smem:[#allocation12 + $0x1d]] }
 0x4e6   :  { %s4717_s9 = sld [smem:[#allocation12 + $0x27]] }
 0x4e7   :  { %s4719_s25 = sld [smem:[#allocation12 + $0x29]] }
 0x4e8   :  { %s4721_s12 = sld [smem:[#allocation12 + $0x33]] }
 0x4e9   :  { %s4723_s27 = sld [smem:[#allocation12 + $0x35]] }
 0x4ea   :  { %6045 = sst [smem:[#allocation29_spill]] %s4709_s13 }
 0x4eb   :  { %6048 = sst [smem:[#allocation59_spill]] %s4715_s15 }
 0x4ec   :  { %6049 = sst [smem:[#allocation58_spill]] %s4717_s9 }
 0x4ed   :  { %6050 = sst [smem:[#allocation60_spill]] %s4719_s25 }
 0x4ee   :  { %6051 = sst [smem:[#allocation71_spill]] %s4721_s12 }
 0x4ef   :  { %6052 = sst [smem:[#allocation31_spill]] %s4723_s27 }
 0x4f0   :  { %s4725_s13 = sld [smem:[#allocation12 + $0x3f]] }
 0x4f1   :  { %s4731_s15 = sld [smem:[#allocation12 + $0x4d]] }
 0x4f2   :  { %s4733_s9 = sld [smem:[#allocation12 + $0x57]] }
 0x4f3   :  { %s4735_s25 = sld [smem:[#allocation12 + $0x59]] }
 0x4f4   :  { %s4737_s12 = sld [smem:[#allocation12 + $0x6]] }
 0x4f5   :  { %s4739_s27 = sld [smem:[#allocation12 + $0x8]] }
 0x4f6   :  { %6053 = sst [smem:[#allocation74_spill]] %s4725_s13 }
 0x4f7   :  { %6056 = sst [smem:[#allocation33_spill]] %s4731_s15 }
 0x4f8   :  { %6057 = sst [smem:[#allocation36_spill]] %s4733_s9 }
 0x4f9   :  { %6058 = sst [smem:[#allocation37_spill]] %s4735_s25 }
 0x4fa   :  { %6059 = sst [smem:[#allocation34_spill]] %s4737_s12 }
 0x4fb   :  { %6060 = sst [smem:[#allocation42_spill]] %s4739_s27 }
 0x4fc   :  { %s4745_s15 = sld [smem:[#allocation12 + $0x12]] }
 0x4fd   :  { %s4751_s12 = sld [smem:[#allocation12 + $0x14]] }
 0x4fe   :  { %s6063_s17 = sld [smem:[#allocation21_spill]] }
 0x4ff   :  { %s6066_s18 = sld [smem:[#allocation62_spill]] }
 0x500   :  { %s4757_s27 = sld [smem:[#allocation12 + $0x1e]] }
 0x501   :  { %s6068_s4 = sld [smem:[#allocation30_spill]] }
 0x502   :  { %6061 = sst [smem:[#allocation70_spill]] %s4745_s15 }
 0x503   :  { %6062 = sst [smem:[#allocation39_spill]] %s4751_s12 }
 0x504   :  { %s6069_s5 = sld [smem:[#allocation45_spill]] }
 0x505   :  { %s6070_s20 = sld [smem:[#allocation43_spill]] }
 0x506   :  { %6067 = sst [smem:[#allocation80_spill]] %s4757_s27 }
 0x507   :  { %s4763_s15 = sld [smem:[#allocation12 + $0x20]] }
 0x508   :  { %s6074_s14 = sld [smem:[#allocation51_spill]] }
 0x509   :  { %s4768_s2 = sld [smem:[#allocation12 + $0x2a]] }
 0x50a   :  { %s4771_s27 = sld [smem:[#allocation12 + $0x2c]] }
 0x50b   :  { %s4783_s25 = sld [smem:[#allocation12 + $0x38]] }
 0x50c   :  { %s4835_s12 = sld [smem:[#allocation12 + $0x5a]] }
 0x50d   :  { %6072 = sst [smem:[#allocation73_spill]] %s4763_s15 }
 0x50e   :  { %s4777_s15 = sld [smem:[#allocation12 + $0x36]] }
 0x50f   :  { %6076 = sst [smem:[#allocation72_spill]] %s4768_s2 }
 0x510   :  { %s4935_s21 = sld [smem:[#allocation12 + $0x2f]] }
 0x511   :  { %6087 = sst [smem:[#allocation32_spill]] %s4783_s25 }
 0x512   :  { %s6157_s6 = sld [smem:[#allocation75_spill]] }
 0x513   :  { %s6168_s9 = sld [smem:[#allocation24_spill]] }
 0x556   :  { %v1532_v44 = vpop.xlane.xlu0 %1531 }
 0x557   :  { %v1542_v42 = vpop.xlane.xlu1 %1541 }
 0x558   :  { %v1543_v28 = vadd.f32 %v1542_v42, %v1532_v44  ;;  %v1908_v44 = vstv %s4617_s11  ;;  %v1959_v42 = vstv %s4619_s7  ;;  %s6078_s11 = sld [smem:[#allocation41_spill]] }
 0x55a   :  { %v1537_v20 = vpop.xlane.xlu0 %1536 }
 0x55b   :  { %v1552_v27 = vpop.xlane.xlu1 %1551 }
 0x55c   :  { %v1553_v38 = vadd.f32 %v1552_v27, %v1543_v28  ;;  %v2061_v27 = vstv %s4623_s26  ;;  %v1716_v28 = vstv %s4625_s8  ;;  %s6081_s26 = sld [smem:[#allocation44_spill]] }
 0x55d   :  { %s6082_s8 = sld [smem:[#allocation47_spill]] }
 0x55e   :  { %v1547_v49 = vpop.xlane.xlu0 %1546  ;;  %v1685_v55 = vstv %s6078_s11  ;;  %s6124_s11 = sld [smem:[#allocation37_spill]] }
 0x55f   :  { %v1562_v2 = vpop.xlane.xlu1 %1561  ;;  %v1548_v63 = vadd.f32 %v1547_v49, %v1537_v20  ;;  %v2010_v20 = vstv %s4621_s23  ;;  %v1767_v49 = vstv %s4627_s0  ;;  %s6080_s23 = sld [smem:[#allocation54_spill]] }
 0x560   :  { %v1563_v41 = vadd.f32 %v1562_v2, %v1553_v38  ;;  %v1818_v38 = vstv %s4629_s29  ;;  %v1869_v2 = vstv %s4631_s16  ;;  %s6083_s0 = sld [smem:[#allocation50_spill]] }
 0x561   :  { %s6086_s16 = sld [smem:[#allocation64_spill]] }
 0x562   :  { %v1557_v3 = vpop.xlane.xlu0 %1556  ;;  %v1570_v16 = vmul.f32 0.0078125, %v1563_v41  ;;  %v1920_v41 = vstv %s6063_s17  ;;  %s6088_s17 = sld [smem:[#allocation53_spill]] }
 0x563   :  { %v1558_v12 = vadd.f32 %v1557_v3, %v1548_v63 }
 0x564   :  { %v1572_v50 = vmul.f32 %v1570_v16, %v1570_v16  ;;  %v1578_v17 = vsub.f32 %v4519_v1, %v1570_v16  ;;  %v1591_v61 = vsub.f32 %v4521_v23, %v1570_v16  ;;  %v1605_v14 = vsub.f32 %v4526_v40, %v1570_v16 }
 0x565   :  { %v1619_v25 = vsub.f32 %v1526_v53, %v1570_v16  ;;  %v1743_v53 = vstv %s4593_s22  ;;  %s6064_s22 = sld [smem:[#allocation76_spill]]  ;;  %v2073_v16 = vstv %s6066_s18 }
 0x566   :  { %v1567_v4 = vpop.xlane.xlu0 %1566  ;;  %s4799_s18 = sld [smem:[#allocation12 + $0x44]] }
 0x567   :  { %v1568_v52 = vadd.f32 %v1567_v4, %v1558_v12  ;;  %v1728_v12 = vstv %s6068_s4  ;;  %v1779_v4 = vstv %s6069_s5  ;;  %s6092_s4 = sld [smem:[#allocation57_spill]] }
 0x568   :  { %s4811_s5 = sld [smem:[#allocation12 + $0x4e]] }
 0x569   :  { %v1571_v58 = vmul.f32 0.0078125, %v1568_v52  ;;  %v1830_v52 = vstv %s6070_s20  ;;  %s4871_s20 = sld [smem:[#allocation12 + $0xb]] }
 0x56b   :  { %v1573_v45 = vsub.f32 %v1571_v58, %v1572_v50  ;;  %v1971_v3 = vstv %s6064_s22  ;;  %s4793_s22 = sld [smem:[#allocation12 + $0x42]] }
 0x56c   :  { %6091 = sst [smem:[#allocation21_spill]] %s4799_s18 }
 0x56d   :  { %v1574_v31 = vadd.f32 1e-05, %v1573_v45  ;;  %v1932_v45 = vstv %s6074_s14  ;;  %s6095_s14 = sld [smem:[#allocation63_spill]] }
 0x56e   :  { %s6184_s18 = sld [smem:[#allocation74_spill]] }
 0x56f   :  { %2708 = vrsqrt.f32 %v1574_v31  ;;  %6101 = sst [smem:[#allocation45_spill]] %s4871_s20 }
 0x571   :  { %6089 = sst [smem:[#allocation35_spill]] %s4793_s22 }
 0x572   :  { %s6162_s22 = sld [smem:[#allocation23_spill]] }
 0x57c   :  { %v2709_v29 = vpop.eup %2708 }
 0x57d   :  { %v1579_v13 = vmul.f32 %v2709_v29, %v1578_v17  ;;  %v1592_v30 = vmul.f32 %v2709_v29, %v1591_v61  ;;  %v1606_v24 = vmul.f32 %v2709_v29, %v1605_v14  ;;  %v1620_v56 = vmul.f32 %v2709_v29, %v1619_v25 }
 0x57e   :  { %v1747_v17 = vstv %s6083_s0  ;;  %v1798_v25 = vstv %s6086_s16  ;;  %s6182_s16 = sld [smem:[#allocation60_spill]] }
 0x57f   :  { %v1584_v57 = vmul.f32 %v1583_v47, %v1579_v13  ;;  %v1597_v1 = vmul.f32 %v1596_v5, %v1592_v30  ;;  %v1611_v62 = vmul.f32 %v1610_v15, %v1606_v24  ;;  %v1625_v23 = vmul.f32 %v1624_v39, %v1620_v56 }
 0x580   :  { %v1696_v5 = vstv %s6080_s23  ;;  %v1736_v15 = vstv %s6081_s26  ;;  %v1739_v39 = vstv %s6082_s8  ;;  %s4910_s8 = sld [smem:[#allocation12 + $0x23]] }
 0x581   :  { %v4561_v46 = vadd.f32 %v1588_v43, %v1584_v57  ;;  %v4563_v40 = vadd.f32 %v1601_v11, %v1597_v1  ;;  %v4565_v10 = vadd.f32 %v1615_v26, %v1611_v62  ;;  %v4567_v51 = vadd.f32 %v1629_v7, %v1625_v23  ;;  %s6132_s23 = sld [smem:[#allocation72_spill]] }
 0x582   :  { %v1838_v26 = vstv %s6088_s17  ;;  %v1849_v62 = vstv %s6092_s4  ;;  %s4847_s17 = sld [smem:[#allocation12 + $0x5c]] }
 0x583   :  { %1590 = vst [vmem:[%s6006_s19] sm:$0x3] %v4561_v46  ;;  %2503 = vst [vmem:[%s6006_s19 + $0x2] sm:$0x3] %v4563_v40  ;;  %1650 = vrot.lane.b32.xlu0 %v4561_v46, %s2855_s10  ;;  %1648 = vrot.lane.b32.xlu1 %v4561_v46, %s2856_s1  ;;  %v4803_v29 = vmul.f32 %v1692_v48, %v4561_v46  ;;  %v4806_v43 = vmul.f32 %v1743_v53, %v4561_v46  ;;  %s4859_s4 = sld [smem:[#allocation12 + $0x9]] }
 0x584   :  { %2504 = vst [vmem:[%s6006_s19 + $0x4] sm:$0x3] %v4565_v10  ;;  %2505 = vst [vmem:[%s6006_s19 + $0x6] sm:$0x3] %v4567_v51  ;;  %s4637_s19 = sld [smem:[#allocation12 + $0x4f]]  ;;  %v4809_v11 = vmul.f32 %v1794_v59, %v4561_v46  ;;  %v4815_v7 = vmul.f32 %v1845_v0, %v4561_v46  ;;  %v4818_v13 = vmul.f32 %v1896_v35, %v4561_v46 }
 0x585   :  { %v4821_v30 = vmul.f32 %v1947_v19, %v4561_v46  ;;  %v4827_v56 = vmul.f32 %v1998_v22, %v4561_v46  ;;  %v4830_v57 = vmul.f32 %v2049_v21, %v4561_v46  ;;  %v4833_v1 = vmul.f32 %v1704_v37, %v4563_v40  ;;  %s6179_s26 = sld [smem:[#allocation71_spill]] }
 0x586   :  { %v4839_v23 = vmul.f32 %v1755_v9, %v4563_v40  ;;  %v4842_v48 = vmul.f32 %v1806_v6, %v4563_v40  ;;  %v4845_v53 = vmul.f32 %v1857_v54, %v4563_v40  ;;  %v4851_v59 = vmul.f32 %v1908_v44, %v4563_v40  ;;  %6112 = sst [smem:[#allocation51_spill]] %s4910_s8 }
 0x587   :  { %1668 = vrot.lane.b32.xlu0 %v4565_v10, %s2856_s1  ;;  %1660 = vrot.lane.b32.xlu1 %v4563_v40, %s2856_s1  ;;  %v4854_v0 = vmul.f32 %v1959_v42, %v4563_v40  ;;  %v4857_v35 = vmul.f32 %v2010_v20, %v4563_v40  ;;  %v1892_v19 = vstv %s6095_s14  ;;  %v4863_v22 = vmul.f32 %v2061_v27, %v4563_v40  ;;  %s4883_s14 = sld [smem:[#allocation12 + $0x15]] }
 0x588   :  { %6098 = sst [smem:[#allocation62_spill]] %s4847_s17  ;;  %v4866_v21 = vmul.f32 %v1716_v28, %v4565_v10  ;;  %v4869_v37 = vmul.f32 %v1767_v49, %v4565_v10  ;;  %v4875_v6 = vmul.f32 %v1818_v38, %v4565_v10  ;;  %v4878_v54 = vmul.f32 %v1869_v2, %v4565_v10 }
 0x589   :  { %6100 = sst [smem:[#allocation30_spill]] %s4859_s4  ;;  %v4887_v42 = vmul.f32 %v1971_v3, %v4565_v10  ;;  %v4893_v27 = vmul.f32 %v2073_v16, %v4565_v10  ;;  %v1943_v28 = vstv %s4689_s24  ;;  %v4899_v49 = vmul.f32 %v1728_v12, %v4567_v51 }
 0x58a   :  { %6009 = sst [smem:[#allocation78_spill]] %s4637_s19  ;;  %v4902_v38 = vmul.f32 %v1779_v4, %v4567_v51  ;;  %v4907_v2 = vmul.f32 %v1830_v52, %v4567_v51 }
 0x58b   :  { %1676 = vrot.lane.b32.xlu0 %v4567_v51, %s2856_s1  ;;  %1662 = vrot.lane.b32.xlu1 %v4563_v40, %s2855_s10  ;;  %s4649_s1 = sld [smem:[#allocation12 + $0x46]]  ;;  %v4881_v40 = vmul.f32 %v1920_v41, %v4565_v10 }
 0x58c   :  { %s4659_s19 = sld [smem:[#allocation12]] }
 0x58d   :  { %s6065_s3 = sld [smem:[#allocation78_spill]] }
 0x58e   :  { %6096 = sst [smem:[#allocation78_spill]] %s4835_s12 }
 0x58f   :  { %1670 = vrot.lane.b32.xlu1 %v4565_v10, %s2855_s10  ;;  %6103 = sst [smem:[#allocation43_spill]] %s4883_s14 }
 0x590   :  { %s6113_s24 = sld [smem:[#allocation29_spill]] }
 0x591   :  { %6015 = sst [smem:[#allocation48_spill]] %s4649_s1 }
 0x592   :  { %6020 = sst [smem:[#allocation46_spill]] %s4659_s19 }
 0x593   :  { %1678 = vrot.lane.b32.xlu1 %v4567_v51, %s2855_s10  ;;  %s4647_s10 = sld [smem:[#allocation12 + $0x2e]]  ;;  %v2022_v63 = vstv %s6065_s3 }
 0x594   :  { %s4671_s1 = sld [smem:[#allocation12 + $0x18]]  ;;  %v4890_v20 = vmul.f32 %v2022_v63, %v4565_v10  ;;  %v4921_v63 = vmul.f32 %v1932_v45, %v4567_v51 }
 0x595   :  { %s4681_s19 = sld [smem:[#allocation13 + $0x4]] }
 0x596   :  { %s6073_s28 = sld [smem:[#allocation48_spill]] }
 0x597   :  { %s6079_s7 = sld [smem:[#allocation46_spill]] }
 0x598   :  { %s6090_s3 = sld [smem:[#allocation55_spill]] }
 0x599   :  { %6014 = sst [smem:[#allocation38_spill]] %s4647_s10 }
 0x59a   :  { %s4669_s10 = sld [smem:[#allocation13 + $0x2]] }
 0x59b   :  { %6026 = sst [smem:[#allocation52_spill]] %s4671_s1 }
 0x59c   :  { %6031 = sst [smem:[#allocation61_spill]] %s4681_s19  ;;  %v1983_v58 = vstv %s6073_s28 }
 0x59d   :  { %s4693_s1 = sld [smem:[#allocation13 + $0x6]]  ;;  %v1688_v47 = vstv %s6079_s7  ;;  %v4918_v3 = vmul.f32 %v1983_v58, %v4567_v51 }
 0x59e   :  { %s4703_s19 = sld [smem:[#allocation12 + $0x56]]  ;;  %v1841_v24 = vstv %s6090_s3 }
 0x59f   :  { %s6071_s30 = sld [smem:[#allocation38_spill]] }
 0x5a0   :  { %6025 = sst [smem:[#allocation56_spill]] %s4669_s10 }
 0x5a1   :  { %s4691_s10 = sld [smem:[#allocation12 + $0x3e]] }
 0x5a2   :  { %s6084_s29 = sld [smem:[#allocation56_spill]] }
 0x5a3   :  { %6037 = sst [smem:[#allocation69_spill]] %s4693_s1 }
 0x5a4   :  { %6042 = sst [smem:[#allocation25_spill]] %s4703_s19 }
 0x5a5   :  { %s4713_s1 = sld [smem:[#allocation12 + $0x1b]]  ;;  %v1881_v50 = vstv %s6071_s30 }
 0x5a6   :  { %s6085_s2 = sld [smem:[#allocation52_spill]]  ;;  %v4915_v41 = vmul.f32 %v1881_v50, %v4567_v51 }
 0x5a7   :  { %6036 = sst [smem:[#allocation68_spill]] %s4691_s10 }
 0x5a8   :  { %s4711_s10 = sld [smem:[#allocation12 + $0x11]]  ;;  %v1787_v61 = vstv %s6084_s29 }
 0x5a9   :  { %s4823_s28 = sld [smem:[#allocation12 + $0x50]] }
 0x5aa   :  { %s4895_s3 = sld [smem:[#allocation12 + $0x17]] }
 0x5ab   :  { %6047 = sst [smem:[#allocation79_spill]] %s4713_s1 }
 0x5ac   :  { %s4729_s1 = sld [smem:[#allocation12 + $0x4b]]  ;;  %v1790_v14 = vstv %s6085_s2 }
 0x5ad   :  { %s4904_s2 = sld [smem:[#allocation12 + $0x21]] }
 0x5ae   :  { %6046 = sst [smem:[#allocation77_spill]] %s4711_s10 }
 0x5af   :  { %s4727_s10 = sld [smem:[#allocation12 + $0x41]] }
 0x5b0   :  { %6094 = sst [smem:[#allocation76_spill]] %s4823_s28 }
 0x5b1   :  { %6107 = sst [smem:[#allocation38_spill]] %s4895_s3 }
 0x5b2   :  { %6055 = sst [smem:[#allocation22_spill]] %s4729_s1 }
 0x5b3   :  { %6109 = sst [smem:[#allocation48_spill]] %s4904_s2 }
 0x5b4   :  { %s6114_s7 = sld [smem:[#allocation77_spill]] }
 0x5b5   :  { %6054 = sst [smem:[#allocation20_spill]] %s4727_s10 }
 0x5b6   :  { %s6115_s3 = sld [smem:[#allocation79_spill]] }
 0x5b7   :  { %s6117_s14 = sld [smem:[#allocation58_spill]] }
 0x5b8   :  { %s4927_s30 = sld [smem:[#allocation12 + $0x2d]] }
 0x5b9   :  { %6123 = sst [smem:[#allocation77_spill]] %s4935_s21 }
 0x5ba   :  { %s4941_s4 = sld [smem:[#allocation12 + $0x39]] }
 0x5bb   :  { %s6128_s17 = sld [smem:[#allocation70_spill]] }
 0x5bc   :  { %s6130_s19 = sld [smem:[#allocation80_spill]] }
 0x5bd   :  { %s4947_s21 = sld [smem:[#allocation12 + $0x45]] }
 0x5be   :  { %6120 = sst [smem:[#allocation29_spill]] %s4927_s30 }
 0x5bf   :  { %s4953_s2 = sld [smem:[#allocation12 + $0x51]] }
 0x5c0   :  { %6127 = sst [smem:[#allocation79_spill]] %s4941_s4 }
 0x5c1   :  { %s4959_s8 = sld [smem:[#allocation12 + $0x5d]] }
 0x5c2   :  { %s6156_s30 = sld [smem:[#allocation61_spill]] }
 0x5c3   :  { %s6158_s4 = sld [smem:[#allocation65_spill]] }
 0x5c4   :  { %s6159_s29 = sld [smem:[#allocation66_spill]] }
 0x5c5   :  { %s6160_s25 = sld [smem:[#allocation68_spill]] }
 0x5c6   :  { %s6161_s0 = sld [smem:[#allocation69_spill]] }
 0x5c7   :  { %s6163_s12 = sld [smem:[#allocation26_spill]] }
 0x5c8   :  { %s6170_s13 = sld [smem:[#allocation25_spill]] }
 0x5c9   :  { %s6173_s10 = sld [smem:[#allocation27_spill]] }
 0x5ca   :  { %s6175_s1 = sld [smem:[#allocation28_spill]] }
 0x5cb   :  { %s6188_s20 = sld [smem:[#allocation20_spill]] }
 0x5cc   :  { %s6190_s28 = sld [smem:[#allocation22_spill]] }
 0x5f5   :  { %v1651_v10 = vpop.permute.xlu0 %1650  ;;  %v1649_v44 = vpop.permute.xlu1 %1648 }
 0x5f6   :  { %v1652_v52 = vsel %vm3040_vm3, %v1649_v44, %v1651_v10  ;;  %v1653_v31 = vsel %vm3040_vm3, %v1651_v10, %v1649_v44 }
 0x5f7   :  { %v1656_v58 = vsel %vm1633_vm9, %v1652_v52, 0.0  ;;  %v1659_v45 = vsel %vm1634_vm10, %v1653_v31, 0.0 }
 0x5f8   :  { %v1689_v12 = vmul.f32 %v1688_v47, %v1656_v58  ;;  %v1740_v44 = vmul.f32 %v1739_v39, %v1656_v58  ;;  %v1697_v16 = vmul.f32 %v1696_v5, %v1659_v45  ;;  %v1748_v52 = vmul.f32 %v1747_v17, %v1659_v45 }
 0x5f9   :  { %v1791_v31 = vmul.f32 %v1790_v14, %v1656_v58  ;;  %v1842_v50 = vmul.f32 %v1841_v24, %v1656_v58  ;;  %v1661_v60 = vpop.permute.xlu1 %1660  ;;  %v1799_v39 = vmul.f32 %v1798_v25, %v1659_v45  ;;  %v1893_v46 = vmul.f32 %v1892_v19, %v1656_v58 }
 0x5fa   :  { %v1690_v47 = vadd.f32 %v1689_v12, %v1685_v55  ;;  %v1741_v9 = vadd.f32 %v1740_v44, %v1736_v15  ;;  %v1850_v14 = vmul.f32 %v1849_v62, %v1659_v45  ;;  %v1944_v24 = vmul.f32 %v1943_v28, %v1656_v58 }
 0x5fb   :  { %v1792_v5 = vadd.f32 %v1791_v31, %v1787_v61  ;;  %v1843_v17 = vadd.f32 %v1842_v50, %v1838_v26  ;;  %v6164_v15 = vstv %s6156_s30  ;;  %v6165_v12 = vstv %s6157_s6  ;;  %s6177_s6 = sld [smem:[#allocation59_spill]] }
 0x5fc   :  { %v1694_v10 = vadd.f32 %v4803_v29, %v1690_v47  ;;  %v1745_v55 = vadd.f32 %v4806_v43, %v1741_v9  ;;  %v1894_v25 = vadd.f32 %v1893_v46, %v6164_v15  ;;  %v1995_v44 = vmul.f32 %v6165_v12, %v1656_v58  ;;  %s6204_s30 = sld [smem:[#allocation39_spill]] }
 0x5fd   :  { %v1796_v19 = vadd.f32 %v4809_v11, %v1792_v5  ;;  %v1847_v61 = vadd.f32 %v4815_v7, %v1843_v17  ;;  %v6166_v31 = vstv %s6158_s4  ;;  %v6167_v26 = vstv %s6159_s29  ;;  %v1663_v50 = vpop.permute.xlu1 %1662  ;;  %s6186_s4 = sld [smem:[#allocation31_spill]] }
 0x5fe   :  { %v1901_v4 = vmul.f32 %v6166_v31, %v1659_v45  ;;  %v1945_v62 = vadd.f32 %v1944_v24, %v6167_v26  ;;  %v1898_v28 = vadd.f32 %v4818_v13, %v1894_v25  ;;  %v6169_v29 = vstv %s6160_s25  ;;  %s6205_s29 = sld [smem:[#allocation73_spill]] }
 0x5ff   :  { %v1952_v47 = vmul.f32 %v6169_v29, %v1659_v45  ;;  %v6171_v43 = vstv %s6161_s0  ;;  %v6172_v46 = vstv %s6162_s22  ;;  %v1698_v11 = vadd.f32 %v1697_v16, %v1694_v10  ;;  %s6211_s25 = sld [smem:[#allocation35_spill]] }
 0x600   :  { %v1996_v9 = vadd.f32 %v1995_v44, %v6171_v43  ;;  %v2003_v15 = vmul.f32 %v6172_v46, %v1659_v45  ;;  %v1749_v5 = vadd.f32 %v1748_v52, %v1745_v55  ;;  %v1949_v7 = vadd.f32 %v4821_v30, %v1945_v62  ;;  %s6212_s0 = sld [smem:[#allocation32_spill]] }
 0x601   :  { %v6174_v17 = vstv %s6163_s12  ;;  %v1800_v24 = vadd.f32 %v1799_v39, %v1796_v19  ;;  %v1851_v31 = vadd.f32 %v1850_v14, %v1847_v61  ;;  %v1664_v25 = vsel %vm3040_vm3, %v1661_v60, %v1663_v50  ;;  %s6230_s22 = sld [smem:[#allocation45_spill]] }
 0x602   :  { %v2046_v12 = vmul.f32 %v6174_v17, %v1656_v58  ;;  %v2000_v13 = vadd.f32 %v4827_v56, %v1996_v9  ;;  %v1902_v44 = vadd.f32 %v1901_v4, %v1898_v28  ;;  %v6176_v26 = vstv %s6168_s9  ;;  %s6231_s12 = sld [smem:[#allocation48_spill]] }
 0x603   :  { %v1665_v16 = vsel %vm3040_vm3, %v1663_v50, %v1661_v60  ;;  %v1666_v30 = vsel %vm1633_vm9, %v1664_v25, 0.0  ;;  %v6178_v58 = vstv %s6170_s13  ;;  %v6180_v52 = vstv %s6173_s10  ;;  %s6233_s9 = sld [smem:[#allocation38_spill]] }
 0x604   :  { %v2047_v29 = vadd.f32 %v2046_v12, %v6176_v26  ;;  %v2054_v10 = vmul.f32 %v6178_v58, %v1659_v45  ;;  %v1667_v56 = vsel %vm1634_vm10, %v1665_v16, 0.0  ;;  %v1701_v39 = vmul.f32 %v6180_v52, %v1666_v30  ;;  %s6234_s13 = sld [smem:[#allocation51_spill]] }
 0x605   :  { %v6181_v14 = vstv %s6113_s24  ;;  %v1953_v55 = vadd.f32 %v1952_v47, %v1949_v7  ;;  %v2004_v19 = vadd.f32 %v2003_v15, %v2000_v13  ;;  %v6183_v60 = vstv %s6115_s3  ;;  %s6194_s24 = sld [smem:[#allocation33_spill]] }
 0x606   :  { %v1752_v4 = vmul.f32 %v6181_v14, %v1666_v30  ;;  %v2051_v61 = vadd.f32 %v4830_v57, %v2047_v29  ;;  %v1803_v62 = vmul.f32 %v6183_v60, %v1666_v30  ;;  %v1702_v50 = vadd.f32 %v1701_v39, %v1698_v11  ;;  %s6195_s3 = sld [smem:[#allocation36_spill]] }
 0x607   :  { %v6185_v28 = vstv %s6175_s1  ;;  %v6187_v9 = vstv %s6117_s14  ;;  %v6189_v17 = vstv %s6114_s7  ;;  %v6191_v47 = vstv %s6177_s6  ;;  %s6200_s7 = sld [smem:[#allocation34_spill]] }
 0x608   :  { %v1709_v43 = vmul.f32 %v6185_v28, %v1667_v56  ;;  %v1753_v45 = vadd.f32 %v1752_v4, %v1749_v5  ;;  %v1854_v46 = vmul.f32 %v6187_v9, %v1666_v30  ;;  %v1760_v12 = vmul.f32 %v6189_v17, %v1667_v56  ;;  %s6203_s14 = sld [smem:[#allocation42_spill]] }
 0x609   :  { %v1804_v25 = vadd.f32 %v1803_v62, %v1800_v24  ;;  %v1811_v15 = vmul.f32 %v6191_v47, %v1667_v56  ;;  %v6192_v7 = vstv %s6179_s26  ;;  %v2055_v57 = vadd.f32 %v2054_v10, %v2051_v61  ;;  %s6235_s10 = sld [smem:[#allocation79_spill]] }
 0x60a   :  { %v1905_v13 = vmul.f32 %v6192_v7, %v1666_v30  ;;  %v1706_v26 = vadd.f32 %v4833_v1, %v1702_v50  ;;  %v1757_v11 = vadd.f32 %v4839_v23, %v1753_v45  ;;  %v1855_v29 = vadd.f32 %v1854_v46, %v1851_v31  ;;  %v1671_v50 = vpop.permute.xlu1 %1670  ;;  %v1669_v45 = vpop.permute.xlu0 %1668  ;;  %s6240_s1 = sld [smem:[#allocation77_spill]] }
 0x60b   :  { %v1808_v16 = vadd.f32 %v4842_v48, %v1804_v25  ;;  %v6193_v5 = vstv %s6182_s16  ;;  %v6196_v39 = vstv %s6184_s18  ;;  %v6197_v4 = vstv %s6186_s4  ;;  %s6246_s6 = sld [smem:[#allocation49_spill]] }
 0x60c   :  { %v1862_v58 = vmul.f32 %v6193_v5, %v1667_v56  ;;  %v1906_v52 = vadd.f32 %v1905_v13, %v1902_v44  ;;  %v1956_v14 = vmul.f32 %v6196_v39, %v1666_v30  ;;  %v1859_v24 = vadd.f32 %v4845_v53, %v1855_v29  ;;  %s6249_s26 = sld [smem:[#allocation40_spill]] }
 0x60d   :  { %v1913_v60 = vmul.f32 %v6197_v4, %v1667_v56  ;;  %v6198_v62 = vstv %s6188_s20  ;;  %v6199_v61 = vstv %s6190_s28  ;;  %v1710_v23 = vadd.f32 %v1709_v43, %v1706_v26  ;;  %s5184_s16 = sld [smem:[#allocation12 + $0x47]] }
 0x60e   :  { %v1964_v10 = vmul.f32 %v6198_v62, %v1667_v56  ;;  %v2007_v1 = vmul.f32 %v6199_v61, %v1666_v30  ;;  %v1761_v31 = vadd.f32 %v1760_v12, %v1757_v11  ;;  %v1910_v48 = vadd.f32 %v4851_v59, %v1906_v52  ;;  %s2568_s18 = sld [smem:[#allocation12 + $0x3b]] }
 0x60f   :  { %v1957_v28 = vadd.f32 %v1956_v14, %v1953_v55  ;;  %v1812_v44 = vadd.f32 %v1811_v15, %v1808_v16  ;;  %v6201_v46 = vstv %s6194_s24  ;;  %v6202_v17 = vstv %s6195_s3  ;;  %s2594_s4 = sld [smem:[#allocation12 + $0x53]] }
 0x610   :  { %v2008_v9 = vadd.f32 %v2007_v1, %v2004_v19  ;;  %v2015_v53 = vmul.f32 %v6201_v46, %v1667_v56  ;;  %v2058_v25 = vmul.f32 %v6202_v17, %v1666_v30  ;;  %v1863_v47 = vadd.f32 %v1862_v58, %v1859_v24  ;;  %s6256_s20 = sld [smem:[#allocation90_spill]] }
 0x611   :  { %v1961_v7 = vadd.f32 %v4854_v0, %v1957_v28  ;;  %v1672_v43 = vsel %vm3040_vm3, %v1669_v45, %v1671_v50  ;;  %v1673_v59 = vsel %vm3040_vm3, %v1671_v50, %v1669_v45  ;;  %v1914_v0 = vadd.f32 %v1913_v60, %v1910_v48  ;;  %s6257_s3 = sld [smem:[#allocation91_spill]] }
 0x612   :  { %v2012_v55 = vadd.f32 %v4857_v35, %v2008_v9  ;;  %v2059_v19 = vadd.f32 %v2058_v25, %v2055_v57  ;;  %v1674_v12 = vsel %vm1633_vm9, %v1672_v43, 0.0  ;;  %v1675_v30 = vsel %vm1634_vm10, %v1673_v59, 0.0 }
 0x613   :  { %v6206_v15 = vstv %s6124_s11  ;;  %v6207_v26 = vstv %s6200_s7  ;;  %v6208_v29 = vstv %s6128_s17  ;;  %v1965_v5 = vadd.f32 %v1964_v10, %v1961_v7  ;;  %s6214_s11 = sld [smem:[#allocation21_spill]] }
 0x614   :  { %v2066_v13 = vmul.f32 %v6206_v15, %v1667_v56  ;;  %v1713_v11 = vmul.f32 %v6207_v26, %v1674_v12  ;;  %v1764_v16 = vmul.f32 %v6208_v29, %v1674_v12  ;;  %v2063_v35 = vadd.f32 %v4863_v22, %v2059_v19  ;;  %s6227_s17 = sld [smem:[#allocation43_spill]] }
 0x615   :  { %v6209_v58 = vstv %s6203_s14  ;;  %v6210_v52 = vstv %s6130_s19  ;;  %v2016_v14 = vadd.f32 %v2015_v53, %v2012_v55  ;;  %v6213_v60 = vstv %s6132_s23  ;;  %s6219_s19 = sld [smem:[#allocation76_spill]] }
 0x616   :  { %v1721_v57 = vmul.f32 %v6209_v58, %v1675_v30  ;;  %v1815_v39 = vmul.f32 %v6210_v52, %v1674_v12  ;;  %v1714_v24 = vadd.f32 %v1713_v11, %v1710_v23  ;;  %v1765_v4 = vadd.f32 %v1764_v16, %v1761_v31  ;;  %s6220_s23 = sld [smem:[#allocation78_spill]]  ;;  %v1677_v11 = vpop.permute.xlu0 %1676 }
 0x617   :  { %v1866_v56 = vmul.f32 %v6213_v60, %v1674_v12  ;;  %v6215_v62 = vstv %s6204_s30  ;;  %v6216_v10 = vstv %s6205_s29  ;;  %v6217_v22 = vstv %s4777_s15  ;;  %s6226_s15 = sld [smem:[#allocation30_spill]] }
 0x618   :  { %v1772_v61 = vmul.f32 %v6215_v62, %v1675_v30  ;;  %v1816_v1 = vadd.f32 %v1815_v39, %v1812_v44  ;;  %v1823_v50 = vmul.f32 %v6216_v10, %v1675_v30  ;;  %v1917_v48 = vmul.f32 %v6217_v22, %v1674_v12  ;;  %s6258_s30 = sld [smem:[#allocation94_spill]] }
 0x619   :  { %v2067_v28 = vadd.f32 %v2066_v13, %v2063_v35  ;;  %v1718_v45 = vadd.f32 %v4866_v21, %v1714_v24  ;;  %v1769_v9 = vadd.f32 %v4869_v37, %v1765_v4  ;;  %v1867_v46 = vadd.f32 %v1866_v56, %v1863_v47  ;;  %v1679_v13 = vpop.permute.xlu1 %1678 }
 0x61a   :  { %v1820_v23 = vadd.f32 %v4875_v6, %v1816_v1  ;;  %v6218_v31 = vstv %s4771_s27  ;;  %v1918_v17 = vadd.f32 %v1917_v48, %v1914_v0  ;;  %v6221_v25 = vstv %s6211_s25  ;;  %s6225_s27 = sld [smem:[#allocation62_spill]] }
 0x61b   :  { %v1874_v53 = vmul.f32 %v6218_v31, %v1675_v30  ;;  %v1968_v7 = vmul.f32 %v6221_v25, %v1674_v12  ;;  %v1871_v44 = vadd.f32 %v4878_v54, %v1867_v46  ;;  %v6222_v43 = vstv %s6212_s0 }
 0x61c   :  { %v1925_v59 = vmul.f32 %v6222_v43, %v1675_v30  ;;  %v6223_v55 = vstv %s6214_s11  ;;  %v6224_v15 = vstv %s4811_s5  ;;  %v1722_v37 = vadd.f32 %v1721_v57, %v1718_v45  ;;  %s6232_s5 = sld [smem:[#allocation29_spill]] }
 0x61d   :  { %v1976_v19 = vmul.f32 %v6223_v55, %v1675_v30  ;;  %v2019_v21 = vmul.f32 %v6224_v15, %v1674_v12  ;;  %v1773_v47 = vadd.f32 %v1772_v61, %v1769_v9  ;;  %v1922_v6 = vadd.f32 %v4881_v40, %v1918_v17 }
 0x61e   :  { %v1969_v26 = vadd.f32 %v1968_v7, %v1965_v5  ;;  %v1824_v0 = vadd.f32 %v1823_v50, %v1820_v23  ;;  %v6228_v16 = vstv %s6219_s19  ;;  %v6229_v35 = vstv %s6220_s23 }
 0x61f   :  { %v2020_v29 = vadd.f32 %v2019_v21, %v2016_v14  ;;  %v2027_v54 = vmul.f32 %v6228_v16, %v1675_v30  ;;  %v2070_v58 = vmul.f32 %v6229_v35, %v1674_v12  ;;  %v1875_v52 = vadd.f32 %v1874_v53, %v1871_v44 }
 0x620   :  { %v1973_v39 = vadd.f32 %v4887_v42, %v1969_v26  ;;  %v1680_v57 = vsel %vm3040_vm3, %v1677_v11, %v1679_v13  ;;  %v1681_v40 = vsel %vm3040_vm3, %v1679_v13, %v1677_v11  ;;  %v1926_v42 = vadd.f32 %v1925_v59, %v1922_v6 }
 0x621   :  { %v2024_v5 = vadd.f32 %v4890_v20, %v2020_v29  ;;  %v2071_v14 = vadd.f32 %v2070_v58, %v2067_v28  ;;  %v1682_v24 = vsel %vm1633_vm9, %v1680_v57, 0.0  ;;  %v5152_v12 = vsel %vm1634_vm10, %v1681_v40, 0.0 }
 0x622   :  { %v6236_v4 = vstv %s6225_s27  ;;  %v6237_v56 = vstv %s6226_s15  ;;  %v6238_v62 = vstv %s6227_s17  ;;  %v1977_v1 = vadd.f32 %v1976_v19, %v1973_v39 }
 0x623   :  { %v2078_v60 = vmul.f32 %v6236_v4, %v1675_v30  ;;  %v1725_v18 = vmul.f32 %v6237_v56, %v1682_v24  ;;  %v1776_v61 = vmul.f32 %v6238_v62, %v1682_v24  ;;  %v2075_v20 = vadd.f32 %v4893_v27, %v2071_v14 }
 0x624   :  { %v6239_v10 = vstv %s6230_s22  ;;  %v6241_v22 = vstv %s6231_s12  ;;  %v2028_v28 = vadd.f32 %v2027_v54, %v2024_v5  ;;  %v6242_v46 = vstv %s6232_s5 }
 0x625   :  { %v1733_v50 = vmul.f32 %v6239_v10, %v5152_v12  ;;  %v1827_v48 = vmul.f32 %v6241_v22, %v1682_v24  ;;  %v1726_v45 = vadd.f32 %v1725_v18, %v1722_v37  ;;  %v1777_v9 = vadd.f32 %v1776_v61, %v1773_v47 }
 0x626   :  { %v1878_v23 = vmul.f32 %v6242_v46, %v1682_v24  ;;  %v6243_v30 = vstv %s6233_s9  ;;  %v6244_v17 = vstv %s6234_s13  ;;  %v6245_v25 = vstv %s6235_s10 }
 0x627   :  { %v1784_v31 = vmul.f32 %v6243_v30, %v5152_v12  ;;  %v1828_v53 = vadd.f32 %v1827_v48, %v1824_v0  ;;  %v1835_v27 = vmul.f32 %v6244_v17, %v5152_v12  ;;  %v1929_v7 = vmul.f32 %v6245_v25, %v1682_v24 }
 0x628   :  { %v2079_v44 = vadd.f32 %v2078_v60, %v2075_v20  ;;  %v1730_v43 = vadd.f32 %v4899_v49, %v1726_v45  ;;  %v1781_v59 = vadd.f32 %v4902_v38, %v1777_v9  ;;  %v1879_v55 = vadd.f32 %v1878_v23, %v1875_v52 }
 0x629   :  { %v1832_v19 = vadd.f32 %v4907_v2, %v1828_v53  ;;  %v6247_v15 = vstv %s6240_s1  ;;  %v1930_v13 = vadd.f32 %v1929_v7, %v1926_v42  ;;  %v6248_v37 = vstv %s4947_s21  ;;  %s2607_s21 = sld [smem:[#allocation12 + $0x5f]] }
 0x62a   :  { %v1886_v21 = vmul.f32 %v6247_v15, %v5152_v12  ;;  %v1980_v47 = vmul.f32 %v6248_v37, %v1682_v24  ;;  %v1734_v6 = vadd.f32 %v1733_v50, %v1730_v43  ;;  %v1785_v26 = vadd.f32 %v1784_v31, %v1781_v59 }
 0x62b   :  { %v1883_v11 = vadd.f32 %v4915_v41, %v1879_v55  ;;  %v6250_v49 = vstv %s4953_s2  ;;  %v1836_v38 = vadd.f32 %v1835_v27, %v1832_v19  ;;  %v6251_v16 = vstv %s4959_s8 }
 0x62c   :  { %v2031_v0 = vmul.f32 %v6250_v49, %v1682_v24  ;;  %v1981_v29 = vadd.f32 %v1980_v47, %v1977_v1  ;;  %v2082_v2 = vmul.f32 %v6251_v16, %v1682_v24  ;;  %v6252_v54 = vstv %s6246_s6 }
 0x62d   :  { %v2035_v35 = vmul.f32 %v6252_v54, %v4567_v51  ;;  %v1887_v58 = vadd.f32 %v1886_v21, %v1883_v11  ;;  %v2608_v39 = vmul.f32 -1.442695, %v1734_v6  ;;  %v6253_v57 = vstv %s6249_s26 }
 0x62e   :  { %v2032_v52 = vadd.f32 %v2031_v0, %v2028_v28  ;;  %v2086_v40 = vmul.f32 %v6253_v57, %v4567_v51  ;;  %v2083_v5 = vadd.f32 %v2082_v2, %v2079_v44  ;;  %v2609_v41 = vmul.f32 -1.442695, %v1785_v26 }
 0x62f   :  { %v2610_v14 = vmul.f32 -1.442695, %v1836_v38  ;;  %v1985_v42 = vadd.f32 %v4918_v3, %v1981_v29  ;;  %v1934_v4 = vadd.f32 %v4921_v63, %v1930_v13  ;;  %2710 = vpow2.f32 %v2608_v39 }
 0x630   :  { %v2036_v24 = vadd.f32 %v2035_v35, %v2032_v52  ;;  %2712 = vpow2.f32 %v2609_v41  ;;  %v2087_v60 = vadd.f32 %v2086_v40, %v2083_v5  ;;  %v2611_v56 = vmul.f32 -1.442695, %v1887_v58 }
 0x631   :  { %2714 = vpow2.f32 %v2610_v14  ;;  %v1987_v18 = vstv %s5184_s16  ;;  %v1936_v62 = vstv %s2568_s18  ;;  %v2038_v61 = vstv %s2594_s4 }
 0x632   :  { %2716 = vpow2.f32 %v2611_v56  ;;  %v1988_v51 = vmul.f32 %v1987_v18, %v5152_v12  ;;  %v1937_v1 = vmul.f32 %v1936_v62, %v5152_v12  ;;  %v2039_v20 = vmul.f32 %v2038_v61, %v5152_v12 }
 0x633   :  { %v2089_v50 = vstv %s2607_s21  ;;  %v1639_v17 = vand.u32 7, %v3018_v8 }
 0x634   :  { %v1989_v3 = vadd.f32 %v1988_v51, %v1985_v42  ;;  %v1938_v10 = vadd.f32 %v1937_v1, %v1934_v4  ;;  %v2040_v63 = vadd.f32 %v2039_v20, %v2036_v24  ;;  %v2090_v9 = vmul.f32 %v2089_v50, %v5152_v12  ;;  %v2173_v50 = vld [vmem:[%s6256_s20] sm:$0xf] }
 0x635   :  { %vm5205_vm11 = vcmp.eq.s32.totalorder %v1639_v17, 0 }
 0x636   :  { %2718 = vtanh.f32 %v1989_v3  ;;  %v2091_v30 = vadd.f32 %v2090_v9, %v2087_v60  ;;  %v2221_v9 = vrot.slane %v2173_v50, %v3156_v36 }
 0x637   :  { %2720 = vtanh.f32 %v1938_v10 }
 0x638   :  { %2722 = vtanh.f32 %v2040_v63 }
 0x63c   :  { %v2711_v22 = vpop.eup %2710 }
 0x63d   :  { %v2713_v48 = vpop.eup %2712  ;;  %v2095_v28 = vadd.f32 1.0, %v2711_v22  ;;  %v2174_v22 = vld [vmem:[%s6257_s3] sm:$0xf] }
 0x63e   :  { %v2715_v45 = vpop.eup %2714  ;;  %v2103_v46 = vadd.f32 1.0, %v2713_v48  ;;  %v2180_v48 = vrot.slane %v2173_v50, %v3150_v32  ;;  %v2185_v17 = vrot.slane %v2174_v22, %v3150_v32 }
 0x63f   :  { %2724 = vrcp.f32 %v2095_v28  ;;  %v2111_v23 = vadd.f32 1.0, %v2715_v45  ;;  %v2717_v31 = vpop.eup %2716  ;;  %v2193_v28 = vrot.slane %v2173_v50, %v3152_v33  ;;  %v2207_v45 = vrot.slane %v2173_v50, %v3154_v34 }
 0x640   :  { %2726 = vrcp.f32 %v2103_v46  ;;  %v2119_v53 = vadd.f32 1.0, %v2717_v31 }
 0x641   :  { %2728 = vrcp.f32 %v2111_v23 }
 0x642   :  { %2730 = vtanh.f32 %v2091_v30 }
 0x643   :  { %2732 = vrcp.f32 %v2119_v53  ;;  %v2719_v27 = vpop.eup %2718 }
 0x644   :  { %v2721_v25 = vpop.eup %2720 }
 0x645   :  { %v2723_v7 = vpop.eup %2722 }
 0x64c   :  { %v2725_v44 = vpop.eup %2724 }
 0x64d   :  { %v2727_v12 = vpop.eup %2726  ;;  %v5209_v59 = vmul.f32 %v2725_v44, %v2721_v25  ;;  %v2212_v25 = vrot.slane %v2174_v22, %v3154_v34 }
 0x64e   :  { %v2729_v55 = vpop.eup %2728  ;;  %v5211_v19 = vmul.f32 %v2727_v12, %v2719_v27  ;;  %v2198_v27 = vrot.slane %v2174_v22, %v3152_v33 }
 0x64f   :  { %v2126_v15 = vsel %vm5205_vm11, %v5209_v59, 0.0  ;;  %v5216_v21 = vmul.f32 %v2729_v55, %v2723_v7  ;;  %v2731_v47 = vpop.eup %2730  ;;  %v2226_v7 = vrot.slane %v2174_v22, %v3156_v36 }
 0x650   :  { %v2136_v8 = vsel %vm5205_vm11, %v5211_v19, 0.0  ;;  %v2127_v13 = vsel %vm344_vm4, %v2126_v15, 0.0  ;;  %v2131_v37 = vmul.f32 %v2126_v15, %v2126_v15  ;;  %v2733_v26 = vpop.eup %2732 }
 0x651   :  { %v2137_v6 = vsel %vm344_vm4, %v2136_v8, 0.0  ;;  %2128 = vadd.xlane.f32.xlu0 %v2127_v13  ;;  %v2146_v11 = vsel %vm5205_vm11, %v5216_v21, 0.0  ;;  %v2123_v49 = vmul.f32 %v2733_v26, %v2731_v47  ;;  %v2141_v38 = vmul.f32 %v2136_v8, %v2136_v8 }
 0x652   :  { %2138 = vadd.xlane.f32.xlu1 %v2137_v6  ;;  %v2132_v0 = vsel %vm344_vm4, %v2131_v37, 0.0  ;;  %v2147_v29 = vsel %vm344_vm4, %v2146_v11, 0.0  ;;  %v2151_v54 = vmul.f32 %v2146_v11, %v2146_v11 }
 0x653   :  { %v2156_v16 = vsel %vm5205_vm11, %v2123_v49, 0.0  ;;  %v2142_v2 = vsel %vm344_vm4, %v2141_v38, 0.0 }
 0x654   :  { %v2157_v35 = vsel %vm344_vm4, %v2156_v16, 0.0  ;;  %v2152_v58 = vsel %vm344_vm4, %v2151_v54, 0.0  ;;  %v2161_v52 = vmul.f32 %v2156_v16, %v2156_v16 }
 0x655   :  { %2133 = vadd.xlane.f32.xlu0 %v2132_v0 }
 0x656   :  { %2148 = vadd.xlane.f32.xlu1 %v2147_v29  ;;  %v2162_v39 = vsel %vm344_vm4, %v2161_v52, 0.0 }
 0x659   :  { %2143 = vadd.xlane.f32.xlu0 %v2142_v2 }
 0x65a   :  { %2158 = vadd.xlane.f32.xlu1 %v2157_v35 }
 0x65d   :  { %2153 = vadd.xlane.f32.xlu0 %v2152_v58 }
 0x661   :  { %2163 = vadd.xlane.f32.xlu0 %v2162_v39 }
 0x6da   :  { %v2129_v57 = vpop.xlane.xlu0 %2128 }
 0x6db   :  { %v2139_v40 = vpop.xlane.xlu1 %2138 }
 0x6dc   :  { %v2140_v14 = vadd.f32 %v2139_v40, %v2129_v57 }
 0x6de   :  { %v2134_v5 = vpop.xlane.xlu0 %2133 }
 0x6df   :  { %v2149_v41 = vpop.xlane.xlu1 %2148 }
 0x6e0   :  { %v2150_v4 = vadd.f32 %v2149_v41, %v2140_v14 }
 0x6e2   :  { %v2144_v42 = vpop.xlane.xlu0 %2143 }
 0x6e3   :  { %v2159_v24 = vpop.xlane.xlu1 %2158  ;;  %v2145_v18 = vadd.f32 %v2144_v42, %v2134_v5 }
 0x6e4   :  { %v2160_v60 = vadd.f32 %v2159_v24, %v2150_v4 }
 0x6e6   :  { %v2154_v56 = vpop.xlane.xlu0 %2153  ;;  %v2167_v62 = vmul.f32 0.015625, %v2160_v60 }
 0x6e7   :  { %v2155_v61 = vadd.f32 %v2154_v56, %v2145_v18 }
 0x6e8   :  { %v2169_v20 = vmul.f32 %v2167_v62, %v2167_v62  ;;  %v2175_v46 = vsub.f32 %v5209_v59, %v2167_v62  ;;  %v2188_v23 = vsub.f32 %v5211_v19, %v2167_v62  ;;  %v2202_v30 = vsub.f32 %v5216_v21, %v2167_v62 }
 0x6e9   :  { %v2216_v31 = vsub.f32 %v2123_v49, %v2167_v62 }
 0x6ea   :  { %v2164_v51 = vpop.xlane.xlu0 %2163 }
 0x6eb   :  { %v2165_v1 = vadd.f32 %v2164_v51, %v2155_v61 }
 0x6ed   :  { %v2168_v3 = vmul.f32 0.015625, %v2165_v1 }
 0x6ef   :  { %v2170_v10 = vsub.f32 %v2168_v3, %v2169_v20 }
 0x6f1   :  { %v2171_v63 = vadd.f32 1e-05, %v2170_v10 }
 0x6f3   :  { %2734 = vrsqrt.f32 %v2171_v63 }
 0x700   :  { %v2735_v53 = vpop.eup %2734 }
 0x701   :  { %v2176_v44 = vmul.f32 %v2735_v53, %v2175_v46  ;;  %v2189_v43 = vmul.f32 %v2735_v53, %v2188_v23  ;;  %v2203_v12 = vmul.f32 %v2735_v53, %v2202_v30  ;;  %v2217_v55 = vmul.f32 %v2735_v53, %v2216_v31 }
 0x703   :  { %v2181_v15 = vmul.f32 %v2180_v48, %v2176_v44  ;;  %v2194_v59 = vmul.f32 %v2193_v28, %v2189_v43  ;;  %v2208_v8 = vmul.f32 %v2207_v45, %v2203_v12  ;;  %v2222_v19 = vmul.f32 %v2221_v9, %v2217_v55 }
 0x705   :  { %v2186_v13 = vadd.f32 %v2185_v17, %v2181_v15  ;;  %v2199_v21 = vadd.f32 %v2198_v27, %v2194_v59  ;;  %v2213_v37 = vadd.f32 %v2212_v25, %v2208_v8  ;;  %v2227_v47 = vadd.f32 %v2226_v7, %v2222_v19 }
 0x707   :  { %2187 = vst [vmem:[%s6258_s30] sm:$0x3] %v2186_v13  ;;  %2612 = vst [vmem:[%s6258_s30 + $0x2] sm:$0x3] %v2199_v21 }
 0x708   :  { %2613 = vst [vmem:[%s6258_s30 + $0x4] sm:$0x3] %v2213_v37  ;;  %2614 = vst [vmem:[%s6258_s30 + $0x6] sm:$0x3] %v2227_v47 }
 0x709   :  { %2246 = vsyncpa [#allocation3], 1 }
 0x70a   :  { %2247 = vsyncpa [#allocation5], 1 }
 0x70b   :  { %2248 = vsyncpa [#allocation8], 1 }
 0x70c   :  { %2249 = vsyncpa [#allocation11], 1 }
 0x70d   :  { %2250 = vsyncpa [#allocation14], 1 }

</bundles_post_ra>
